<compile_context>
chip_gen: v7x
topology: tpu7x:2x2x1
jax: 0.10.0
libtpu: 0.0.40
codegen_flags: <defaults>
</compile_context>

<pallas_src>
import functools

import jax
import jax.numpy as jnp
from jax import lax
from jax.experimental import pallas as pl
from jax.experimental.pallas import tpu as pltpu

EPS = 1e-5
NUM_CLASS = 10
POOL = 4
CPAD = 128            # lane-padded channel count carried through the network
WROWS = 3 * CPAD      # stacked per-layer weight rows (>= 80 and >= 3*CPAD)


# --------------------------------------------------------------------------
# Pallas kernel: the full M5 forward for ONE batch element
# --------------------------------------------------------------------------
def _m5_kernel(xr_ref, w_ref, s_ref, t_ref, fcw_ref, fcb_ref, o_ref, *,
               g1, gw, layer_dims):
    """Fused conv1..conv4 + BN + ReLU + MaxPool(4) + avg-pool + fc.

    xr_ref : (R, gw)            bf16  input row-view (R = L // stride1)
    w_ref  : (4, WROWS, CPAD)   bf16  stacked, channel-padded conv weights
    s_ref  : (4, CPAD)          f32   folded BN scale  (gamma / sqrt(var+eps))
    t_ref  : (4, CPAD)          f32   folded BN shift  ((bias-mean)*scale+beta)
    fcw_ref: (CPAD, CPAD)       bf16  padded fc weight (in, out)
    fcb_ref: (1, CPAD)          f32   padded fc bias
    o_ref  : (1, CPAD)          f32   padded logits
    """

    def bn_relu_maxpool(acc, li, tp):
        scale = s_ref[li:li + 1, :]                      # (1, CPAD) f32
        shift = t_ref[li:li + 1, :]
        y = jnp.maximum(acc * scale + shift, 0.0)        # folded BN + ReLU
        y = y.reshape(tp, POOL, CPAD)
        return jnp.max(y, axis=1)                        # MaxPool1d(POOL)

    # ---- conv1: kernel=80, stride=16 as g1=5 shifted matmuls over the row view
    tu, tp = layer_dims[0]
    x = xr_ref[...]                                      # (R, gw) bf16
    w = w_ref[0]                                         # (WROWS, CPAD) bf16
    acc = jnp.dot(x[0:tu, :], w[0:gw, :], preferred_element_type=jnp.float32)
    for j in range(1, g1):
        acc += jnp.dot(x[j:j + tu, :], w[j * gw:(j + 1) * gw, :],
                       preferred_element_type=jnp.float32)
    h = bn_relu_maxpool(acc, 0, tp)                      # (tp, CPAD) f32

    # ---- conv2..conv4: kernel=3, stride=1 as 3 shifted matmuls over CPAD chans
    for li in range(1, len(layer_dims)):
        tu, tp = layer_dims[li]
        hb = h.astype(jnp.bfloat16)                      # cast once per layer
        w = w_ref[li]                                    # (3*CPAD, CPAD) bf16
        acc = jnp.dot(hb[0:tu, :], w[0:CPAD, :],
                      preferred_element_type=jnp.float32)
        for k in range(1, 3):
            acc += jnp.dot(hb[k:k + tu, :], w[k * CPAD:(k + 1) * CPAD, :],
                           preferred_element_type=jnp.float32)
        h = bn_relu_maxpool(acc, li, tp)

    # ---- head: global average pool over remaining time + fc1 (lane-dense out)
    feat = jnp.mean(h, axis=0, keepdims=True).astype(jnp.bfloat16)   # (1, CPAD)
    o_ref[...] = (jnp.dot(feat, fcw_ref[...], preferred_element_type=jnp.float32)
                  + fcb_ref[...])


# --------------------------------------------------------------------------
# Parameter packing (fold BN, pad channels to 128, stack conv weights)
# --------------------------------------------------------------------------
def _pad_to(a, shape):
    return jnp.pad(a, [(0, s - d) for d, s in zip(a.shape, shape)])


def _prep_params(params):
    convs = params["convs"]
    Ws, Ss, Ts = [], [], []

    # conv1: Cin == 1 -> plain k-major flatten (80, Cout), pad to (WROWS, CPAD)
    w1 = convs[0]["w"]                                   # (C1, 1, 80)
    w1m = jnp.transpose(w1[:, 0, :], (1, 0))             # (80, C1)
    Ws.append(_pad_to(w1m, (WROWS, CPAD)))

    # conv2..conv4: per-tap (Cin, Cout) slabs padded to (CPAD, CPAD), stacked
    for layer in convs[1:]:
        w = layer["w"]                                   # (Cout, Cin, 3)
        taps = [_pad_to(jnp.transpose(w[:, :, k], (1, 0)), (CPAD, CPAD))
                for k in range(w.shape[2])]
        Ws.append(jnp.concatenate(taps, axis=0))         # (3*CPAD, CPAD)

    for layer in convs:
        scale = layer["gamma"] / jnp.sqrt(layer["var"] + EPS)
        shift = (layer["b"] - layer["mean"]) * scale + layer["beta"]
        Ss.append(_pad_to(scale, (CPAD,)))
        Ts.append(_pad_to(shift, (CPAD,)))

    W = jnp.stack(Ws).astype(jnp.bfloat16)               # (4, WROWS, CPAD)
    S = jnp.stack(Ss).astype(jnp.float32)                # (4, CPAD)
    T = jnp.stack(Ts).astype(jnp.float32)                # (4, CPAD)
    fcw = _pad_to(params["fc_w"].T, (CPAD, CPAD)).astype(jnp.bfloat16)
    fcb = _pad_to(params["fc_b"].reshape(1, -1), (1, CPAD)).astype(jnp.float32)
    return W, S, T, fcw, fcb


# --------------------------------------------------------------------------
# Forward wrapper
# --------------------------------------------------------------------------
def m5_forward(x, params):
    """x: (B, n_input, L) (PyTorch NCW) -> (B, n_output)."""
    B, Cin, L = x.shape
    if Cin != 1:
        raise NotImplementedError("fused conv1 path requires n_input == 1")
    conv1 = params["convs"][0]
    K1 = conv1["w"].shape[2]
    stride1 = conv1["stride"]
    assert K1 % stride1 == 0 and L % stride1 == 0
    g1 = K1 // stride1
    R = L // stride1
    assert K1 <= WROWS and g1 * stride1 == K1

    # per-layer (used_length, pooled_length); rows lost to maxpool floor are
    # never computed.
    dims = []
    T = (L - K1) // stride1 + 1
    tp = T // POOL
    assert tp >= 1
    dims.append((tp * POOL, tp))
    for layer in params["convs"][1:]:
        K = layer["w"].shape[2]
        assert K == 3, "later conv layers are expected to have kernel_size=3"
        T = tp - K + 1
        tp = T // POOL
        assert tp >= 1, "input too short for the M5 architecture"
        dims.append((tp * POOL, tp))

    W, S, Tsh, fcw, fcb = _prep_params(params)
    xr = x.reshape(B, R, stride1).astype(jnp.bfloat16)   # free strided row view

    out = pl.pallas_call(
        functools.partial(_m5_kernel, g1=g1, gw=stride1, layer_dims=tuple(dims)),
        out_shape=jax.ShapeDtypeStruct((B, 1, CPAD), jnp.float32),
        grid=(B,),
        in_specs=[
            pl.BlockSpec((None, R, stride1), lambda b: (b, 0, 0)),
            pl.BlockSpec((4, WROWS, CPAD), lambda b: (0, 0, 0)),   # resident
            pl.BlockSpec((4, CPAD), lambda b: (0, 0)),
            pl.BlockSpec((4, CPAD), lambda b: (0, 0)),
            pl.BlockSpec((CPAD, CPAD), lambda b: (0, 0)),
            pl.BlockSpec((1, CPAD), lambda b: (0, 0)),
        ],
        out_specs=pl.BlockSpec((None, 1, CPAD), lambda b: (b, 0, 0)),
        compiler_params=pltpu.CompilerParams(dimension_semantics=("parallel",)),
    )(xr, W, S, Tsh, fcw, fcb)

    n_out = params["fc_w"].shape[0]
    return out.reshape(B, CPAD)[:, :n_out]


# --------------------------------------------------------------------------
# Deterministic parameter init (same shapes as the PyTorch module)
# --------------------------------------------------------------------------
def init_params(key, n_input=1, n_output=NUM_CLASS, n_channel=32):
    layer_defs = [
        (n_input, n_channel, 80, 16),          # conv1 / bn1
        (n_channel, n_channel, 3, 1),          # conv2 / bn2
        (n_channel, 2 * n_channel, 3, 1),      # conv3 / bn3
        (2 * n_channel, 2 * n_channel, 3, 1),  # conv4 / bn4
    ]
    keys = jax.random.split(key, len(layer_defs) * 6 + 2)
    ki = 0
    convs = []
    for cin, cout, ksize, stride in layer_defs:
        fan_in = cin * ksize
        w = jax.random.normal(keys[ki], (cout, cin, ksize), jnp.float32) / jnp.sqrt(fan_in); ki += 1
        b = 0.1 * jax.random.normal(keys[ki], (cout,), jnp.float32); ki += 1
        gamma = 1.0 + 0.1 * jax.random.normal(keys[ki], (cout,), jnp.float32); ki += 1
        beta = 0.1 * jax.random.normal(keys[ki], (cout,), jnp.float32); ki += 1
        mean = 0.1 * jax.random.normal(keys[ki], (cout,), jnp.float32); ki += 1
        var = 1.0 + 0.1 * jnp.abs(jax.random.normal(keys[ki], (cout,), jnp.float32)); ki += 1
        convs.append(dict(w=w, b=b, gamma=gamma, beta=beta, mean=mean, var=var,
                          stride=stride))
    c2 = 2 * n_channel
    fc_w = jax.random.normal(keys[ki], (n_output, c2), jnp.float32) / jnp.sqrt(c2); ki += 1
    fc_b = 0.1 * jax.random.normal(keys[ki], (n_output,), jnp.float32)
    return dict(convs=convs, fc_w=fc_w, fc_b=fc_b)


# --------------------------------------------------------------------------
# Independent pure-JAX (f32) reference for a sanity check
# --------------------------------------------------------------------------
def m5_reference(x, params):
    h = x                                               # (B, Cin, L)
    for layer in params["convs"]:
        h = lax.conv_general_dilated(
            h, layer["w"], (layer["stride"],), "VALID",
            dimension_numbers=("NCH", "OIH", "NCH"))
        h = h + layer["b"][None, :, None]
        h = (h - layer["mean"][None, :, None]) / jnp.sqrt(layer["var"][None, :, None] + EPS)
        h = h * layer["gamma"][None, :, None] + layer["beta"][None, :, None]
        h = jnp.maximum(h, 0.0)
        B, C, T = h.shape
        Tp = T // POOL
        h = h[:, :, : Tp * POOL].reshape(B, C, Tp, POOL).max(axis=-1)
    h = h.mean(axis=-1)                                 # avg_pool1d over full length
    return h @ params["fc_w"].T + params["fc_b"][None, :]


if __name__ == "__main__":
    key = jax.random.PRNGKey(0)
    kx, kp = jax.random.split(key)

    B, Cin, L = 2, 1, 8000                              # smallest length compatible
    x = jax.random.normal(kx, (B, Cin, L), jnp.float32) # with k=80/s=16 + 4x pool(4)
    params = init_params(kp)

    fwd = jax.jit(functools.partial(m5_forward, params=params))
    out = jax.block_until_ready(fwd(x))
    assert out.shape == (B, NUM_CLASS), out.shape

    ref = jax.block_until_ready(m5_reference(x, params))
    max_err = float(jnp.max(jnp.abs(out - ref)))
    # matmul operands are bf16 (f32 accumulation); reference is pure f32
    assert max_err < 1e-1, f"mismatch vs reference: {max_err}"

    print("KERNEL_OK")
</pallas_src>

<mosaic_0001>
module attributes {stable_mosaic.version = 11 : i64} {
  func.func @_m5_kernel(%arg0: i32, %arg1: memref<1x500x16xbf16, #tpu.memory_space<vmem>>, %arg2: memref<4x384x128xbf16, #tpu.memory_space<vmem>>, %arg3: memref<4x128xf32, #tpu.memory_space<vmem>>, %arg4: memref<4x128xf32, #tpu.memory_space<vmem>>, %arg5: memref<128x128xbf16, #tpu.memory_space<vmem>>, %arg6: memref<1x128xf32, #tpu.memory_space<vmem>>, %arg7: memref<1x1x128xf32, #tpu.memory_space<vmem>>) attributes {dimension_semantics = [#tpu.dimension_semantics<parallel>], iteration_bounds = array<i64: 2>, scalar_prefetch = 0 : i64, scratch_operands = 0 : i64, tpu.core_type = #tpu.core_type<tc>, window_params = [{transform_indices = @transform_0, window_bounds = array<i64: 1, 500, 16>}, {pipeline_mode = #tpu.pipeline_mode<synchronous>, transform_indices = @transform_1, window_bounds = array<i64: 4, 384, 128>}, {pipeline_mode = #tpu.pipeline_mode<synchronous>, transform_indices = @transform_2, window_bounds = array<i64: 4, 128>}, {pipeline_mode = #tpu.pipeline_mode<synchronous>, transform_indices = @transform_3, window_bounds = array<i64: 4, 128>}, {pipeline_mode = #tpu.pipeline_mode<synchronous>, transform_indices = @transform_4, window_bounds = array<i64: 128, 128>}, {pipeline_mode = #tpu.pipeline_mode<synchronous>, transform_indices = @transform_5, window_bounds = array<i64: 1, 128>}, {transform_indices = @transform_6, window_bounds = array<i64: 1, 1, 128>}]} {
    %c0 = arith.constant 0 : index
    %c0_0 = arith.constant 0 : index
    %c0_1 = arith.constant 0 : index
    %0 = vector.load %arg1[%c0, %c0_0, %c0_1] : memref<1x500x16xbf16, #tpu.memory_space<vmem>>, vector<1x500x16xbf16>
    %1 = vector.shape_cast %0 : vector<1x500x16xbf16> to vector<500x16xbf16>
    %c0_2 = arith.constant 0 : index
    %c0_3 = arith.constant 0 : index
    %c0_4 = arith.constant 0 : index
    %2 = vector.load %arg2[%c0_2, %c0_3, %c0_4] : memref<4x384x128xbf16, #tpu.memory_space<vmem>>, vector<1x384x128xbf16>
    %3 = vector.shape_cast %2 : vector<1x384x128xbf16> to vector<384x128xbf16>
    %4 = vector.extract_strided_slice %1 {offsets = [0, 0], sizes = [496, 16], strides = [1, 1]} : vector<500x16xbf16> to vector<496x16xbf16>
    %5 = vector.extract_strided_slice %3 {offsets = [0, 0], sizes = [16, 128], strides = [1, 1]} : vector<384x128xbf16> to vector<16x128xbf16>
    %cst = arith.constant dense<0.000000e+00> : vector<496x128xf32>
    %6 = tpu.matmul %4, %5, %cst {dimension_numbers = #tpu.dot_dimension_numbers<[1], [0], [0], [1], [0, 0, 1, 1], [], []>} : vector<496x16xbf16>, vector<16x128xbf16>, vector<496x128xf32> -> vector<496x128xf32>
    %7 = vector.extract_strided_slice %1 {offsets = [1, 0], sizes = [496, 16], strides = [1, 1]} : vector<500x16xbf16> to vector<496x16xbf16>
    %8 = vector.extract_strided_slice %3 {offsets = [16, 0], sizes = [16, 128], strides = [1, 1]} : vector<384x128xbf16> to vector<16x128xbf16>
    %cst_5 = arith.constant dense<0.000000e+00> : vector<496x128xf32>
    %9 = tpu.matmul %7, %8, %cst_5 {dimension_numbers = #tpu.dot_dimension_numbers<[1], [0], [0], [1], [0, 0, 1, 1], [], []>} : vector<496x16xbf16>, vector<16x128xbf16>, vector<496x128xf32> -> vector<496x128xf32>
    %10 = arith.addf %6, %9 : vector<496x128xf32>
    %11 = vector.extract_strided_slice %1 {offsets = [2, 0], sizes = [496, 16], strides = [1, 1]} : vector<500x16xbf16> to vector<496x16xbf16>
    %12 = vector.extract_strided_slice %3 {offsets = [32, 0], sizes = [16, 128], strides = [1, 1]} : vector<384x128xbf16> to vector<16x128xbf16>
    %cst_6 = arith.constant dense<0.000000e+00> : vector<496x128xf32>
    %13 = tpu.matmul %11, %12, %cst_6 {dimension_numbers = #tpu.dot_dimension_numbers<[1], [0], [0], [1], [0, 0, 1, 1], [], []>} : vector<496x16xbf16>, vector<16x128xbf16>, vector<496x128xf32> -> vector<496x128xf32>
    %14 = arith.addf %10, %13 : vector<496x128xf32>
    %15 = vector.extract_strided_slice %1 {offsets = [3, 0], sizes = [496, 16], strides = [1, 1]} : vector<500x16xbf16> to vector<496x16xbf16>
    %16 = vector.extract_strided_slice %3 {offsets = [48, 0], sizes = [16, 128], strides = [1, 1]} : vector<384x128xbf16> to vector<16x128xbf16>
    %cst_7 = arith.constant dense<0.000000e+00> : vector<496x128xf32>
    %17 = tpu.matmul %15, %16, %cst_7 {dimension_numbers = #tpu.dot_dimension_numbers<[1], [0], [0], [1], [0, 0, 1, 1], [], []>} : vector<496x16xbf16>, vector<16x128xbf16>, vector<496x128xf32> -> vector<496x128xf32>
    %18 = arith.addf %14, %17 : vector<496x128xf32>
    %19 = vector.extract_strided_slice %1 {offsets = [4, 0], sizes = [496, 16], strides = [1, 1]} : vector<500x16xbf16> to vector<496x16xbf16>
    %20 = vector.extract_strided_slice %3 {offsets = [64, 0], sizes = [16, 128], strides = [1, 1]} : vector<384x128xbf16> to vector<16x128xbf16>
    %cst_8 = arith.constant dense<0.000000e+00> : vector<496x128xf32>
    %21 = tpu.matmul %19, %20, %cst_8 {dimension_numbers = #tpu.dot_dimension_numbers<[1], [0], [0], [1], [0, 0, 1, 1], [], []>} : vector<496x16xbf16>, vector<16x128xbf16>, vector<496x128xf32> -> vector<496x128xf32>
    %22 = arith.addf %18, %21 : vector<496x128xf32>
    %c0_9 = arith.constant 0 : index
    %c0_10 = arith.constant 0 : index
    %23 = vector.load %arg3[%c0_9, %c0_10] : memref<4x128xf32, #tpu.memory_space<vmem>>, vector<1x128xf32>
    %c0_11 = arith.constant 0 : index
    %c0_12 = arith.constant 0 : index
    %24 = vector.load %arg4[%c0_11, %c0_12] : memref<4x128xf32, #tpu.memory_space<vmem>>, vector<1x128xf32>
    %25 = vector.broadcast %23 : vector<1x128xf32> to vector<496x128xf32>
    %26 = arith.mulf %22, %25 : vector<496x128xf32>
    %27 = vector.broadcast %24 : vector<1x128xf32> to vector<496x128xf32>
    %28 = arith.addf %26, %27 : vector<496x128xf32>
    %cst_13 = arith.constant 0.000000e+00 : f32
    %29 = vector.broadcast %cst_13 : f32 to vector<496x128xf32>
    %30 = arith.maximumf %28, %29 : vector<496x128xf32>
    %31 = vector.shape_cast %30 : vector<496x128xf32> to vector<124x4x128xf32>
    %cst_14 = arith.constant dense<0xFF800000> : vector<124x128xf32>
    %32 = vector.multi_reduction <maximumf>, %31, %cst_14 [1] : vector<124x4x128xf32> to vector<124x128xf32>
    %33 = arith.truncf %32 : vector<124x128xf32> to vector<124x128xbf16>
    %c1 = arith.constant 1 : index
    %c0_15 = arith.constant 0 : index
    %c0_16 = arith.constant 0 : index
    %34 = vector.load %arg2[%c1, %c0_15, %c0_16] : memref<4x384x128xbf16, #tpu.memory_space<vmem>>, vector<1x384x128xbf16>
    %35 = vector.shape_cast %34 : vector<1x384x128xbf16> to vector<384x128xbf16>
    %36 = vector.extract_strided_slice %33 {offsets = [0, 0], sizes = [120, 128], strides = [1, 1]} : vector<124x128xbf16> to vector<120x128xbf16>
    %37 = vector.extract_strided_slice %35 {offsets = [0, 0], sizes = [128, 128], strides = [1, 1]} : vector<384x128xbf16> to vector<128x128xbf16>
    %cst_17 = arith.constant dense<0.000000e+00> : vector<120x128xf32>
    %38 = tpu.matmul %36, %37, %cst_17 {dimension_numbers = #tpu.dot_dimension_numbers<[1], [0], [0], [1], [0, 0, 1, 1], [], []>} : vector<120x128xbf16>, vector<128x128xbf16>, vector<120x128xf32> -> vector<120x128xf32>
    %39 = vector.extract_strided_slice %33 {offsets = [1, 0], sizes = [120, 128], strides = [1, 1]} : vector<124x128xbf16> to vector<120x128xbf16>
    %40 = vector.extract_strided_slice %35 {offsets = [128, 0], sizes = [128, 128], strides = [1, 1]} : vector<384x128xbf16> to vector<128x128xbf16>
    %cst_18 = arith.constant dense<0.000000e+00> : vector<120x128xf32>
    %41 = tpu.matmul %39, %40, %cst_18 {dimension_numbers = #tpu.dot_dimension_numbers<[1], [0], [0], [1], [0, 0, 1, 1], [], []>} : vector<120x128xbf16>, vector<128x128xbf16>, vector<120x128xf32> -> vector<120x128xf32>
    %42 = arith.addf %38, %41 : vector<120x128xf32>
    %43 = vector.extract_strided_slice %33 {offsets = [2, 0], sizes = [120, 128], strides = [1, 1]} : vector<124x128xbf16> to vector<120x128xbf16>
    %44 = vector.extract_strided_slice %35 {offsets = [256, 0], sizes = [128, 128], strides = [1, 1]} : vector<384x128xbf16> to vector<128x128xbf16>
    %cst_19 = arith.constant dense<0.000000e+00> : vector<120x128xf32>
    %45 = tpu.matmul %43, %44, %cst_19 {dimension_numbers = #tpu.dot_dimension_numbers<[1], [0], [0], [1], [0, 0, 1, 1], [], []>} : vector<120x128xbf16>, vector<128x128xbf16>, vector<120x128xf32> -> vector<120x128xf32>
    %46 = arith.addf %42, %45 : vector<120x128xf32>
    %c1_20 = arith.constant 1 : index
    %c0_21 = arith.constant 0 : index
    %47 = vector.load %arg3[%c1_20, %c0_21] : memref<4x128xf32, #tpu.memory_space<vmem>>, vector<1x128xf32>
    %c1_22 = arith.constant 1 : index
    %c0_23 = arith.constant 0 : index
    %48 = vector.load %arg4[%c1_22, %c0_23] : memref<4x128xf32, #tpu.memory_space<vmem>>, vector<1x128xf32>
    %49 = vector.broadcast %47 : vector<1x128xf32> to vector<120x128xf32>
    %50 = arith.mulf %46, %49 : vector<120x128xf32>
    %51 = vector.broadcast %48 : vector<1x128xf32> to vector<120x128xf32>
    %52 = arith.addf %50, %51 : vector<120x128xf32>
    %cst_24 = arith.constant 0.000000e+00 : f32
    %53 = vector.broadcast %cst_24 : f32 to vector<120x128xf32>
    %54 = arith.maximumf %52, %53 : vector<120x128xf32>
    %55 = vector.shape_cast %54 : vector<120x128xf32> to vector<30x4x128xf32>
    %cst_25 = arith.constant dense<0xFF800000> : vector<30x128xf32>
    %56 = vector.multi_reduction <maximumf>, %55, %cst_25 [1] : vector<30x4x128xf32> to vector<30x128xf32>
    %57 = arith.truncf %56 : vector<30x128xf32> to vector<30x128xbf16>
    %c2 = arith.constant 2 : index
    %c0_26 = arith.constant 0 : index
    %c0_27 = arith.constant 0 : index
    %58 = vector.load %arg2[%c2, %c0_26, %c0_27] : memref<4x384x128xbf16, #tpu.memory_space<vmem>>, vector<1x384x128xbf16>
    %59 = vector.shape_cast %58 : vector<1x384x128xbf16> to vector<384x128xbf16>
    %60 = vector.extract_strided_slice %57 {offsets = [0, 0], sizes = [28, 128], strides = [1, 1]} : vector<30x128xbf16> to vector<28x128xbf16>
    %61 = vector.extract_strided_slice %59 {offsets = [0, 0], sizes = [128, 128], strides = [1, 1]} : vector<384x128xbf16> to vector<128x128xbf16>
    %cst_28 = arith.constant dense<0.000000e+00> : vector<28x128xf32>
    %62 = tpu.matmul %60, %61, %cst_28 {dimension_numbers = #tpu.dot_dimension_numbers<[1], [0], [0], [1], [0, 0, 1, 1], [], []>} : vector<28x128xbf16>, vector<128x128xbf16>, vector<28x128xf32> -> vector<28x128xf32>
    %63 = vector.extract_strided_slice %57 {offsets = [1, 0], sizes = [28, 128], strides = [1, 1]} : vector<30x128xbf16> to vector<28x128xbf16>
    %64 = vector.extract_strided_slice %59 {offsets = [128, 0], sizes = [128, 128], strides = [1, 1]} : vector<384x128xbf16> to vector<128x128xbf16>
    %cst_29 = arith.constant dense<0.000000e+00> : vector<28x128xf32>
    %65 = tpu.matmul %63, %64, %cst_29 {dimension_numbers = #tpu.dot_dimension_numbers<[1], [0], [0], [1], [0, 0, 1, 1], [], []>} : vector<28x128xbf16>, vector<128x128xbf16>, vector<28x128xf32> -> vector<28x128xf32>
    %66 = arith.addf %62, %65 : vector<28x128xf32>
    %67 = vector.extract_strided_slice %57 {offsets = [2, 0], sizes = [28, 128], strides = [1, 1]} : vector<30x128xbf16> to vector<28x128xbf16>
    %68 = vector.extract_strided_slice %59 {offsets = [256, 0], sizes = [128, 128], strides = [1, 1]} : vector<384x128xbf16> to vector<128x128xbf16>
    %cst_30 = arith.constant dense<0.000000e+00> : vector<28x128xf32>
    %69 = tpu.matmul %67, %68, %cst_30 {dimension_numbers = #tpu.dot_dimension_numbers<[1], [0], [0], [1], [0, 0, 1, 1], [], []>} : vector<28x128xbf16>, vector<128x128xbf16>, vector<28x128xf32> -> vector<28x128xf32>
    %70 = arith.addf %66, %69 : vector<28x128xf32>
    %c2_31 = arith.constant 2 : index
    %c0_32 = arith.constant 0 : index
    %71 = vector.load %arg3[%c2_31, %c0_32] : memref<4x128xf32, #tpu.memory_space<vmem>>, vector<1x128xf32>
    %c2_33 = arith.constant 2 : index
    %c0_34 = arith.constant 0 : index
    %72 = vector.load %arg4[%c2_33, %c0_34] : memref<4x128xf32, #tpu.memory_space<vmem>>, vector<1x128xf32>
    %73 = vector.broadcast %71 : vector<1x128xf32> to vector<28x128xf32>
    %74 = arith.mulf %70, %73 : vector<28x128xf32>
    %75 = vector.broadcast %72 : vector<1x128xf32> to vector<28x128xf32>
    %76 = arith.addf %74, %75 : vector<28x128xf32>
    %cst_35 = arith.constant 0.000000e+00 : f32
    %77 = vector.broadcast %cst_35 : f32 to vector<28x128xf32>
    %78 = arith.maximumf %76, %77 : vector<28x128xf32>
    %79 = vector.shape_cast %78 : vector<28x128xf32> to vector<7x4x128xf32>
    %cst_36 = arith.constant dense<0xFF800000> : vector<7x128xf32>
    %80 = vector.multi_reduction <maximumf>, %79, %cst_36 [1] : vector<7x4x128xf32> to vector<7x128xf32>
    %81 = arith.truncf %80 : vector<7x128xf32> to vector<7x128xbf16>
    %c3 = arith.constant 3 : index
    %c0_37 = arith.constant 0 : index
    %c0_38 = arith.constant 0 : index
    %82 = vector.load %arg2[%c3, %c0_37, %c0_38] : memref<4x384x128xbf16, #tpu.memory_space<vmem>>, vector<1x384x128xbf16>
    %83 = vector.shape_cast %82 : vector<1x384x128xbf16> to vector<384x128xbf16>
    %84 = vector.extract_strided_slice %81 {offsets = [0, 0], sizes = [4, 128], strides = [1, 1]} : vector<7x128xbf16> to vector<4x128xbf16>
    %85 = vector.extract_strided_slice %83 {offsets = [0, 0], sizes = [128, 128], strides = [1, 1]} : vector<384x128xbf16> to vector<128x128xbf16>
    %cst_39 = arith.constant dense<0.000000e+00> : vector<4x128xf32>
    %86 = tpu.matmul %84, %85, %cst_39 {dimension_numbers = #tpu.dot_dimension_numbers<[1], [0], [0], [1], [0, 0, 1, 1], [], []>} : vector<4x128xbf16>, vector<128x128xbf16>, vector<4x128xf32> -> vector<4x128xf32>
    %87 = vector.extract_strided_slice %81 {offsets = [1, 0], sizes = [4, 128], strides = [1, 1]} : vector<7x128xbf16> to vector<4x128xbf16>
    %88 = vector.extract_strided_slice %83 {offsets = [128, 0], sizes = [128, 128], strides = [1, 1]} : vector<384x128xbf16> to vector<128x128xbf16>
    %cst_40 = arith.constant dense<0.000000e+00> : vector<4x128xf32>
    %89 = tpu.matmul %87, %88, %cst_40 {dimension_numbers = #tpu.dot_dimension_numbers<[1], [0], [0], [1], [0, 0, 1, 1], [], []>} : vector<4x128xbf16>, vector<128x128xbf16>, vector<4x128xf32> -> vector<4x128xf32>
    %90 = arith.addf %86, %89 : vector<4x128xf32>
    %91 = vector.extract_strided_slice %81 {offsets = [2, 0], sizes = [4, 128], strides = [1, 1]} : vector<7x128xbf16> to vector<4x128xbf16>
    %92 = vector.extract_strided_slice %83 {offsets = [256, 0], sizes = [128, 128], strides = [1, 1]} : vector<384x128xbf16> to vector<128x128xbf16>
    %cst_41 = arith.constant dense<0.000000e+00> : vector<4x128xf32>
    %93 = tpu.matmul %91, %92, %cst_41 {dimension_numbers = #tpu.dot_dimension_numbers<[1], [0], [0], [1], [0, 0, 1, 1], [], []>} : vector<4x128xbf16>, vector<128x128xbf16>, vector<4x128xf32> -> vector<4x128xf32>
    %94 = arith.addf %90, %93 : vector<4x128xf32>
    %c3_42 = arith.constant 3 : index
    %c0_43 = arith.constant 0 : index
    %95 = vector.load %arg3[%c3_42, %c0_43] : memref<4x128xf32, #tpu.memory_space<vmem>>, vector<1x128xf32>
    %c3_44 = arith.constant 3 : index
    %c0_45 = arith.constant 0 : index
    %96 = vector.load %arg4[%c3_44, %c0_45] : memref<4x128xf32, #tpu.memory_space<vmem>>, vector<1x128xf32>
    %97 = vector.broadcast %95 : vector<1x128xf32> to vector<4x128xf32>
    %98 = arith.mulf %94, %97 : vector<4x128xf32>
    %99 = vector.broadcast %96 : vector<1x128xf32> to vector<4x128xf32>
    %100 = arith.addf %98, %99 : vector<4x128xf32>
    %cst_46 = arith.constant 0.000000e+00 : f32
    %101 = vector.broadcast %cst_46 : f32 to vector<4x128xf32>
    %102 = arith.maximumf %100, %101 : vector<4x128xf32>
    %103 = vector.shape_cast %102 : vector<4x128xf32> to vector<1x4x128xf32>
    %cst_47 = arith.constant dense<0xFF800000> : vector<1x128xf32>
    %104 = vector.multi_reduction <maximumf>, %103, %cst_47 [1] : vector<1x4x128xf32> to vector<1x128xf32>
    %cst_48 = arith.constant dense<0.000000e+00> : vector<128xf32>
    %105 = vector.multi_reduction <add>, %104, %cst_48 [0] : vector<1x128xf32> to vector<128xf32>
    %106 = vector.shape_cast %105 : vector<128xf32> to vector<1x128xf32>
    %cst_49 = arith.constant 1.000000e+00 : f32
    %107 = vector.broadcast %cst_49 : f32 to vector<1x128xf32>
    %108 = arith.divf %106, %107 : vector<1x128xf32>
    %109 = arith.truncf %108 : vector<1x128xf32> to vector<1x128xbf16>
    %c0_50 = arith.constant 0 : index
    %c0_51 = arith.constant 0 : index
    %110 = vector.load %arg5[%c0_50, %c0_51] : memref<128x128xbf16, #tpu.memory_space<vmem>>, vector<128x128xbf16>
    %cst_52 = arith.constant dense<0.000000e+00> : vector<1x128xf32>
    %111 = tpu.matmul %109, %110, %cst_52 {dimension_numbers = #tpu.dot_dimension_numbers<[1], [0], [0], [1], [0, 0, 1, 1], [], []>} : vector<1x128xbf16>, vector<128x128xbf16>, vector<1x128xf32> -> vector<1x128xf32>
    %c0_53 = arith.constant 0 : index
    %c0_54 = arith.constant 0 : index
    %112 = vector.load %arg6[%c0_53, %c0_54] : memref<1x128xf32, #tpu.memory_space<vmem>>, vector<1x128xf32>
    %113 = arith.addf %111, %112 : vector<1x128xf32>
    %c0_55 = arith.constant 0 : index
    %c0_56 = arith.constant 0 : index
    %c0_57 = arith.constant 0 : index
    %114 = vector.load %arg7[%c0_55, %c0_56, %c0_57] : memref<1x1x128xf32, #tpu.memory_space<vmem>>, vector<1x1x128xf32>
    %115 = vector.shape_cast %114 : vector<1x1x128xf32> to vector<1x128xf32>
    %116 = vector.shape_cast %113 : vector<1x128xf32> to vector<1x1x128xf32>
    tpu.vector_store %arg7[%c0_55, %c0_56, %c0_57], %116 {strides = array<i32>} : memref<1x1x128xf32, #tpu.memory_space<vmem>>, vector<1x1x128xf32>,
    return
  }
  func.func @transform_0(%arg0: i32) -> (i32, i32, i32) {
    %c0_i32 = arith.constant 0 : i32
    %c0_i32_0 = arith.constant 0 : i32
    %c0_i32_1 = arith.constant 0 : i32
    return %arg0, %c0_i32, %c0_i32_0 : i32, i32, i32
  }
  func.func @transform_1(%arg0: i32) -> (i32, i32, i32) {
    %c0_i32 = arith.constant 0 : i32
    %c0_i32_0 = arith.constant 0 : i32
    %c0_i32_1 = arith.constant 0 : i32
    %c0_i32_2 = arith.constant 0 : i32
    return %c0_i32, %c0_i32_0, %c0_i32_1 : i32, i32, i32
  }
  func.func @transform_2(%arg0: i32) -> (i32, i32) {
    %c0_i32 = arith.constant 0 : i32
    %c0_i32_0 = arith.constant 0 : i32
    %c0_i32_1 = arith.constant 0 : i32
    return %c0_i32, %c0_i32_0 : i32, i32
  }
  func.func @transform_3(%arg0: i32) -> (i32, i32) {
    %c0_i32 = arith.constant 0 : i32
    %c0_i32_0 = arith.constant 0 : i32
    %c0_i32_1 = arith.constant 0 : i32
    return %c0_i32, %c0_i32_0 : i32, i32
  }
  func.func @transform_4(%arg0: i32) -> (i32, i32) {
    %c0_i32 = arith.constant 0 : i32
    %c0_i32_0 = arith.constant 0 : i32
    %c0_i32_1 = arith.constant 0 : i32
    return %c0_i32, %c0_i32_0 : i32, i32
  }
  func.func @transform_5(%arg0: i32) -> (i32, i32) {
    %c0_i32 = arith.constant 0 : i32
    %c0_i32_0 = arith.constant 0 : i32
    %c0_i32_1 = arith.constant 0 : i32
    return %c0_i32, %c0_i32_0 : i32, i32
  }
  func.func @transform_6(%arg0: i32) -> (i32, i32, i32) {
    %c0_i32 = arith.constant 0 : i32
    %c0_i32_0 = arith.constant 0 : i32
    %c0_i32_1 = arith.constant 0 : i32
    return %arg0, %c0_i32, %c0_i32_0 : i32, i32, i32
  }
}

</mosaic_0001>

<bundles_post_ra>
// kernel: m5_forward.1
= control target key start
LH: loop header
LB: loop body
LE: loop exit
PB: predicated region body
PF: predicated region fallthrough
CT: control target
= control target key end

     0   :  { %11 = vsyncpa [#allocation3], 0  ;;  %s13299_s0 = inlined_call_operand.vmem [shape: bf16[2,500,16], index: 0, kind: input, shape index: {}]   ;;  %s13300_s1 = inlined_call_operand.vmem [shape: bf16[4,384,128], index: 1, kind: input, shape index: {}]   ;;  %s13301_s2 = inlined_call_operand.vmem [shape: f32[4,128], index: 2, kind: input, shape index: {}]   ;;  %s13302_s3 = inlined_call_operand.vmem [shape: f32[4,128], index: 3, kind: input, shape index: {}]   ;;  %s13303_s4 = inlined_call_operand.hbm [shape: bf16[128,128], index: 4, kind: input, shape index: {}]   ;;  %s13304_s5 = inlined_call_operand.vmem [shape: f32[1,128], index: 5, kind: input, shape index: {}]   ;;  %s13305_s6 = inlined_call_operand.hbm [shape: f32[2,1,128], index: 6, kind: output, shape index: {}]  }
   0x1   :  { %12 = vsyncpa [#allocation4], 0 }
   0x2   :  { %14 = vsyncpa [#allocation4 + $0x1], 0  ;;  %s9369_s21 = smov 0   ;;  %s9371_s22 = smov 0  }
   0x3   :  { %s9373_s23 = smov 0   ;;  %s9375_s24 = smov 0  }
   0x4 LB: > { %s9390_s25 = sadd.s32 4294967295, %s9326_s24   ;;  %s6967_s26 = sadd.s32 4294967294, %s9326_s24   ;;  %s9326_s24 = sphi %s9375_s24, %s13912_s24   ;;  %s9322_s23 = sphi %s9373_s23, %s13911_s23   ;;  %s9318_s22 = sphi %s9371_s22, %s13910_s22   ;;  %s9314_s21 = sphi %s9369_s21, %s13909_s21  }
   0x5   : > { %s9394_s27 = sadd.s32 1, %s9326_s24   ;;  %s158_s28 = sadd.s32 1, %s9322_s23 }
   0x6   : > { %s155_s29 = ssub.s32 %s9326_s24, %s9394_s27  ;;  %p168_p0 = scmp.ne.s32.totalorder %s9322_s23, %s9318_s22 }
   0x7   : > { %p156_p1 = scmp.eq.s32.totalorder %s155_s29, 0  ;;  %p169_p2 = scmp.eq.s32.totalorder %s9390_s25, 1 }
   0x8   : > { %p174_p3 = scmp.ne.s32.totalorder %s9318_s22, %s9314_s21  ;;  %p175_p4 = scmp.eq.s32.totalorder %s6967_s26, 1 }
   0x9   : > { %s9405_s30 = scalar_select %p156_p1, %s9322_s23, %s158_s28  }
   0xa   : > { %p9407_p5 = por %p169_p2, %p168_p0  ;;  %p9411_p6 = por %p175_p4, %p174_p3 }
   0xb   : > { %p6968_p7 = scmp.ge.s32.totalorder %s9326_s24, 1  ;;  %p182_p8 = scmp.lt.s32.totalorder %s9326_s24, 3 }
   0xc   : > { %s13489_s7 = scalar_select %p9407_p5, 1, 0 }
   0xd   : > { %s13490_s8 = scalar_select %p9411_p6, 1, 0 }
   0xe   : > { %p13306_p9 = scmp.eq.s32.totalorder %s9390_s25, 0  ;;  %p9418_p10 = pnand %p6968_p7, %p182_p8 }
   0xf   : > { %s9328_s10 = smov [#allocation2]   ;;  %s9232_s15 = scalar_lea.hbm %s13303_s4, 1024 }
  0x10   : > { %s13491_s9 = scalar_select %p9418_p10, 1, 0 }
  0x11   : > { %s203_s11 = sshll.u32 %s9328_s10, 4  ;;  %p9031_p11 = pneg %p9418_p10  ;;  %s204_s11 = int_to_ptr.vmem [resolvable:$true] %s203_s11 }
  0x12   : > { %p9233_p13 = scmp.ne.s32.totalorder %s13303_s4, %s9232_s15  ;;  %p9239_p3 = scmp.lt.u32.totalorder %s9232_s15, %s13303_s4 }
  0x13   : > { %p9426_p12 = pnand %p13306_p9, %p9031_p11 }
  0x15   : > { %p9234_p0 = pneg %p9426_p12 }
  0x17   : > { %p9235_p1 = pnand %p9234_p0, %p9233_p13 }
  0x19   : > { %p9236_p2 = pneg %p9235_p1 }
  0x1b   : > { %p9241_p4 = pnand %p9239_p3, %p9236_p2 }
  0x1d   : > { %9244 = shalt.err (!%p9241_p4)
}
  0x1e   : > { %s9245_s20 = scalar_lea.vmem %s204_s11, 1024  ;;  %p9253_p9 = scmp.lt.s32.totalorder %s204_s11, %s204_s11 }
  0x1f   : > { %p9246_p7 = scmp.ne.s32.totalorder %s204_s11, %s9245_s20  ;;  %p9254_p6 = scmp.lt.s32.totalorder %s9245_s20, %s9245_s20 }
  0x21   : > { %p9248_p8 = pnand %p9246_p7, %p9234_p0  ;;  %p9255_p5 = por %p9254_p6, %p9253_p9 }
  0x23   : > { %p9249_p11 = pneg %p9248_p8 }
  0x25   : > { %p9256_p10 = pnand %p9255_p5, %p9249_p11 }
  0x27   : > { %9259 = shalt.err (!%p9256_p10)
}
  0x28   : > { %s9329_s26 = smov 64   ;;  %s9330_s28 = smov 4  }
  0x29   : > { %9034 = dma.hbm_to_vmem [thread:$0]  (!%p9426_p12), %s13303_s4, 1024, %s204_s11, [#allocation3], %s9329_s26, %s9329_s26, %s9330_s28  }
  0x2a   : > { %p13493_p13 = scmp.ne.s32.totalorder %s13491_s9, 0 }
  0x2c   : > { %230 = sbr.rel (%p13493_p13) target bundleno = 2381 (0x94d), region = 44 }
  0x33   : > { %p13494_p1 = scmp.eq.s32.totalorder %s9390_s25, 0 }
  0x35   : > { %9305 = dma.done.wait (%p13494_p1), [#allocation3], 1024   ;;  %p13495_p0 = pmov %p13494_p1 }
  0x36   : > { %p259_p5 = scmp.lt.s32.totalorder %s9390_s25, 1  ;;  %v13345_v0 = vmov 0.0   ;;  %vm9332_vm0 = vmmov 0   ;;  %v9079_v1 = vld [vmem:[%s13300_s1] sm:$0xff]   ;;  %vm755_vm1 = vcmask 130048   ;;  %v9081_v3 = vld [vmem:[%s13300_s1 + $0x10] sm:$0xff]  }
  0x37   : > { %9307 = vsyncadd (%p13495_p0), [#allocation3], 4294966272  ;;  %7801 = vmatprep.subr.bf16.mxu0 %v13345_v0  ;;  %7803 = vmatprep.mubr.msk.bf16.mxu0 %vm9332_vm0, %v13345_v0  ;;  %v9089_v7 = vld [vmem:[%s13300_s1 + $0x8] sm:$0xff]   ;;  %vm496_vm2 = vsmask.f32 7424  ;;  %vm1477_vm3 = vcmask 1046528  }
  0x38   : > { %s260_s11 = scalar_select %p259_p5, %s9390_s25, 1  ;;  %7675 = vmatprep.subr.bf16.mxu1 %v13345_v0  ;;  %7677 = vmatprep.mubr.msk.bf16.mxu1 %vm9332_vm0, %v13345_v0  ;;  %v9084_v27 = vld [vmem:[%s13300_s1 + $0x18] sm:$0xff]   ;;  %vm1981_vm4 = vsmask.f32 6400  ;;  %vm2551_vm5 = vcmask 1045504   ;;  %vm3431_vm6 = vcmask 1043456  }
  0x39   : > { %7802 = vmatpush3.bf16.msra.mxu0 %v9079_v1  ;;  %7676 = vmatpush3.bf16.msra.mxu1 %v9089_v7  ;;  %vm4697_vm7 = vcmask 1041409   ;;  %vm4699_vm8 = vcmask 1042434   ;;  %vm4701_vm9 = vcmask 1043459   ;;  %vm4703_vm10 = vcmask 1044484   ;;  %s257_s13 = sand.u32 1, %s9318_s22   ;;  %s7398_s17 = sshll.u32 %s9390_s25, 4 }
  0x3a   : > { %s9024_s9 = smul.u32 252, %s260_s11  ;;  %7927 = vmatprep.subr.bf16.mxu0 %v13345_v0  ;;  %8541 = vmatprep.subr.bf16.mxu1 %v13345_v0  ;;  %vm4705_vm11 = vcmask 1045509   ;;  %vm4707_vm12 = vcmask 1046534   ;;  %vm4709_vm13 = vcmask 1047559   ;;  %s258_s18 = scalar_lea.vmem [#allocation5], %s257_s13 }
  0x3b   : > { %s6900_s19 = sshll.u32 %s258_s18, 4  ;;  %s13257_s28 = scalar_lea.hbm %s13305_s6, %s7398_s17  ;;  %s13259_s19 = int_to_ptr.vmem [resolvable:$true] %s6900_s19 }
  0x3c   : > { %s9463_s14 = scalar_lea.vmem %s13299_s0, %s9024_s9  ;;  %s6888_s29 = scalar_lea.sflag [#allocation4], %s257_s13 }
  0x3d   : > { %v9469_v2 = vld [vmem:[%s9463_s14] sm:$0xff]   ;;  %v9482_v5 = vld [vmem:[%s9463_s14 + $0x8] sm:$0xff]   ;;  %v9492_v10 = vld [vmem:[%s9463_s14 + $0x10] sm:$0xff]   ;;  %s9260_s25 = scalar_lea.vmem %s13259_s19, 16  ;;  %p13907_p9 = scmp.ne.s32.totalorder %s13489_s7, 0 }
  0x3e   : > { %7804 = vmatmul.mubr.msk.bf16.vlgmr.msra.gmra.mrb[0].mxu0 %vm755_vm1, %v9469_v2  ;;  %v500_v4 = vshll.u32 %v9469_v2, 16  ;;  %v498_v6 = vshrl.u32 %v9469_v2, 16  ;;  %v505_v9 = vshll.u32 %v9482_v5, 16  ;;  %v509_v13 = vshrl.u32 %v9482_v5, 16  ;;  %v9514_v18 = vld [vmem:[%s9463_s14 + $0x18] sm:$0xff]   ;;  %v9537_v28 = vld [vmem:[%s9463_s14 + $0x20] sm:$0xff]   ;;  %p9261_p6 = scmp.ne.s32.totalorder %s13259_s19, %s9260_s25 }
  0x3f   : > { %7928 = vmatpush3.bf16.msra.mxu0 %v9081_v3  ;;  %7807 = vmatprep.mubr.msk.bf16.mxu0 %vm9332_vm0, %v13345_v0  ;;  %v513_v14 = vshll.u32 %v9492_v10, 16  ;;  %v517_v20 = vshrl.u32 %v9492_v10, 16  ;;  %v521_v21 = vshll.u32 %v9514_v18, 16  ;;  %v1478_v22 = vrot.slane %v9469_v2, 1  ;;  %v9547_v33 = vld [vmem:[%s9463_s14 + $0x28] sm:$0xff]   ;;  %v9566_v41 = vld [vmem:[%s9463_s14 + $0x30] sm:$0xff]  }
  0x40   : > { %8053 = vmatprep.subr.bf16.mxu0 %v13345_v0  ;;  %v502_v8 = vrot.slane %v500_v4, 1  ;;  %v507_v12 = vrot.slane %v505_v9, 1  ;;  %v1479_v23 = vrot.slane %v9482_v5, 1  ;;  %v525_v30 = vshrl.u32 %v9514_v18, 16  ;;  %v9584_v49 = vld [vmem:[%s9463_s14 + $0x38] sm:$0xff]   ;;  %v9602_v57 = vld [vmem:[%s9463_s14 + $0x40] sm:$0xff]   ;;  %p9262_p10 = pnand %p9261_p6, %p13907_p9 }
  0x41   : > { %v515_v17 = vrot.slane %v513_v14, 1  ;;  %v523_v25 = vrot.slane %v521_v21, 1  ;;  %v529_v31 = vshll.u32 %v9537_v28, 16  ;;  %v1481_v32 = vrot.slane %v9492_v10, 1  ;;  %v9620_v3 = vld [vmem:[%s9463_s14 + $0x48] sm:$0xff]   ;;  %s9333_s10 = smov [#allocation5]  }
  0x42   : > { %v503_v11 = vor.u32 %v502_v8, %v498_v6  ;;  %v511_v16 = vor.u32 %v509_v13, %v507_v12  ;;  %v1480_v26 = vsel %vm1477_vm3, %v1478_v22, %v1479_v23  ;;  %v537_v36 = vshll.u32 %v9547_v33, 16  ;;  %p9263_p12 = pneg %p9262_p10  ;;  %s9264_s11 = sshll.u32 %s9333_s10, 4  ;;  %s9265_s11 = int_to_ptr.vmem [resolvable:$false] %s9264_s11 }
  0x43   : > { %v519_v24 = vor.u32 %v517_v20, %v515_v17  ;;  %v527_v34 = vor.u32 %v525_v30, %v523_v25  ;;  %v531_v35 = vrot.slane %v529_v31, 1  ;;  %v1482_v37 = vsel %vm1477_vm3, %v1479_v23, %v1481_v32  ;;  %s9266_s9 = scalar_lea.vmem %s9265_s11, 32  ;;  %p9267_p2 = scmp.lt.s32.totalorder %s13259_s19, %s9265_s11 }
  0x44   : > { %v508_v15 = vsel %vm496_vm2, %v503_v11, %v507_v12  ;;  %v516_v19 = vsel %vm496_vm2, %v511_v16, %v515_v17  ;;  %v533_v39 = vshrl.u32 %v9537_v28, 16  ;;  %v1483_v40 = vrot.slane %v9514_v18, 1  ;;  %p9268_p3 = scmp.lt.s32.totalorder %s9266_s9, %s9260_s25 }
  0x45   : > { %7678 = vmatmul.mubr.msk.bf16.vlgmr.msra.gmra.mrb[0].mxu1 %vm755_vm1, %v508_v15  ;;  %v524_v29 = vsel %vm496_vm2, %v519_v24, %v523_v25  ;;  %v532_v38 = vsel %vm496_vm2, %v527_v34, %v531_v35  ;;  %v539_v42 = vrot.slane %v537_v36, 1  ;;  %v545_v43 = vshll.u32 %v9566_v41, 16 }
  0x46   : > { %7808 = vmatmul.mubr.msk.bf16.gmra.mrb[4].mxu0 %vm755_vm1, %v9482_v5  ;;  %7681 = vmatprep.mubr.msk.bf16.mxu1 %vm9332_vm0, %v13345_v0  ;;  %v535_v44 = vor.u32 %v533_v39, %v531_v35  ;;  %v1484_v45 = vsel %vm1477_vm3, %v1481_v32, %v1483_v40  ;;  %v541_v47 = vshrl.u32 %v9547_v33, 16  ;;  %v1485_v48 = vrot.slane %v9537_v28, 1  ;;  %v9656_v32 = vld [vmem:[%s9463_s14 + $0x58] sm:$0xff]   ;;  %p9269_p4 = por %p9268_p3, %p9267_p2 }
  0x47   : > { %7811 = vmatprep.mubr.msk.bf16.mxu0 %vm9332_vm0, %v13345_v0  ;;  %8542 = vmatpush3.bf16.msra.mxu1 %v9079_v1  ;;  %v547_v50 = vrot.slane %v545_v43, 1  ;;  %v553_v51 = vshll.u32 %v9584_v49, 16  ;;  %v549_v55 = vshrl.u32 %v9566_v41, 16  ;;  %v1487_v56 = vrot.slane %v9547_v33, 1 }
  0x48   : > { %v540_v46 = vsel %vm496_vm2, %v535_v44, %v539_v42  ;;  %v543_v52 = vor.u32 %v541_v47, %v539_v42  ;;  %v1486_v53 = vsel %vm1477_vm3, %v1483_v40, %v1485_v48  ;;  %v561_v59 = vshll.u32 %v9602_v57, 16  ;;  %p9270_p7 = pnand %p9269_p4, %p9263_p12 }
  0x49   : > { %v555_v58 = vrot.slane %v553_v51, 1  ;;  %v551_v60 = vor.u32 %v549_v55, %v547_v50  ;;  %v1488_v61 = vsel %vm1477_vm3, %v1485_v48, %v1487_v56  ;;  %v557_v63 = vshrl.u32 %v9584_v49, 16 }
  0x4a   : > { %v548_v54 = vsel %vm496_vm2, %v543_v52, %v547_v50  ;;  %v1489_v1 = vrot.slane %v9566_v41, 1  ;;  %v563_v7 = vrot.slane %v561_v59, 1  ;;  %v569_v8 = vshll.u32 %v9620_v3, 16 }
  0x4b   : > { %v556_v62 = vsel %vm496_vm2, %v551_v60, %v555_v58  ;;  %v559_v11 = vor.u32 %v557_v63, %v555_v58  ;;  %v565_v16 = vshrl.u32 %v9602_v57, 16  ;;  %v1491_v17 = vrot.slane %v9584_v49, 1  ;;  %v9695_v60 = vld [vmem:[%s9463_s14 + $0x68] sm:$0xff]  }
  0x4c   : > { %v1490_v12 = vsel %vm1477_vm3, %v1487_v56, %v1489_v1  ;;  %v571_v22 = vrot.slane %v569_v8, 1  ;;  %v585_v35 = vshll.u32 %v9656_v32, 16  ;;  %v1495_v44 = vrot.slane %v9620_v3, 1 }
  0x4d   : > { %7682 = vmatmul.mubr.msk.bf16.gmra.mrb[4].mxu1 %vm755_vm1, %v516_v19  ;;  %v564_v15 = vsel %vm496_vm2, %v559_v11, %v563_v7  ;;  %v9638_v19 = vld [vmem:[%s9463_s14 + $0x50] sm:$0xff]   ;;  %v567_v24 = vor.u32 %v565_v16, %v563_v7  ;;  %v1492_v25 = vsel %vm1477_vm3, %v1489_v1, %v1491_v17  ;;  %v13334_v11 = vshll.u32 %v9695_v60, 16 }
  0x4e   : > { %7812 = vmatmul.mubr.msk.bf16.gmra.mrb[8].mxu0 %vm755_vm1, %v9492_v10  ;;  %7685 = vmatprep.mubr.msk.bf16.mxu1 %vm9332_vm0, %v13345_v0  ;;  %v577_v23 = vshll.u32 %v9638_v19, 16  ;;  %v581_v42 = vshrl.u32 %v9638_v19, 16  ;;  %v1497_v56 = vrot.slane %v9638_v19, 1  ;;  %v1997_v18 = vrot.slane %v533_v39, 1 }
  0x4f   : > { %7929 = vmatprep.mubr.msk.bf16.mxu0 %vm9332_vm0, %v13345_v0  ;;  %v2001_v39 = vrot.slane %v541_v47, 1  ;;  %v2002_v28 = vrot.slane %v537_v36, 2  ;;  %v2005_v47 = vrot.slane %v549_v55, 1  ;;  %v2006_v33 = vrot.slane %v545_v43, 2 }
  0x50   : > { %v579_v34 = vrot.slane %v577_v23, 1  ;;  %v2009_v55 = vrot.slane %v557_v63, 1  ;;  %v2010_v41 = vrot.slane %v553_v51, 2  ;;  %v2013_v63 = vrot.slane %v565_v16, 1 }
  0x51   : > { %v2007_v36 = vor.u32 %v2006_v33, %v2005_v47 }
  0x52   : > { %v583_v50 = vor.u32 %v581_v42, %v579_v34  ;;  %v2011_v43 = vor.u32 %v2010_v41, %v2009_v55 }
  0x55   : > { %7686 = vmatmul.mubr.msk.bf16.gmra.mrb[8].mxu1 %vm755_vm1, %v524_v29  ;;  %v1493_v29 = vrot.slane %v9602_v57, 1 }
  0x56   : > { %7930 = vmatmul.mubr.msk.bf16.vlgmr.msra.gmra.mrb[0].mxu0 %vm755_vm1, %v1480_v26  ;;  %7689 = vmatprep.mubr.msk.bf16.mxu1 %vm9332_vm0, %v13345_v0  ;;  %v572_v26 = vsel %vm496_vm2, %v567_v24, %v571_v22  ;;  %v9718_v24 = vld [vmem:[%s9463_s14 + $0x70] sm:$0xff]  }
  0x57   : > { %8054 = vmatpush3.bf16.msra.mxu0 %v9084_v27  ;;  %7933 = vmatprep.mubr.msk.bf16.mxu0 %vm9332_vm0, %v13345_v0  ;;  %v573_v27 = vshrl.u32 %v9620_v3, 16  ;;  %v1496_v52 = vsel %vm1477_vm3, %v1493_v29, %v1495_v44 }
  0x58   : > { %8179 = vmatprep.subr.bf16.mxu0 %v13345_v0 }
  0x59   : > { %v2017_v16 = vrot.slane %v573_v27, 1 }
  0x5d   : > { %7690 = vmatmul.mubr.msk.bf16.gmra.mrb[12].mxu1 %vm755_vm1, %v532_v38  ;;  %v1494_v38 = vsel %vm1477_vm3, %v1491_v17, %v1493_v29  ;;  %v603_v17 = vrot.slane %v13334_v11, 1  ;;  %v13328_v29 = vshll.u32 %v9718_v24, 16 }
  0x5e   : > { %7934 = vmatmul.mubr.msk.bf16.gmra.mrb[4].mxu0 %vm755_vm1, %v1482_v37  ;;  %7693 = vmatprep.mubr.msk.bf16.mxu1 %vm9332_vm0, %v13345_v0  ;;  %v575_v37 = vor.u32 %v573_v27, %v571_v22  ;;  %v2021_v27 = vrot.slane %v581_v42, 1 }
  0x5f   : > { %7937 = vmatprep.mubr.msk.bf16.mxu0 %vm9332_vm0, %v13345_v0 }
  0x60   : > { %v580_v40 = vsel %vm496_vm2, %v575_v37, %v579_v34 }
  0x65   : > { %7694 = vmatmul.mubr.msk.bf16.gmra.mrb[16].mxu1 %vm755_vm1, %v540_v46  ;;  %v587_v46 = vrot.slane %v585_v35, 1 }
  0x66   : > { %7938 = vmatmul.mubr.msk.bf16.gmra.mrb[8].mxu0 %vm755_vm1, %v1484_v45  ;;  %7697 = vmatprep.mubr.msk.bf16.mxu1 %vm9332_vm0, %v13345_v0  ;;  %v9674_v45 = vld [vmem:[%s9463_s14 + $0x60] sm:$0xff]  }
  0x67   : > { %7941 = vmatprep.mubr.msk.bf16.mxu0 %vm9332_vm0, %v13345_v0  ;;  %v13340_v48 = vshll.u32 %v9674_v45, 16  ;;  %v13343_v7 = vshrl.u32 %v9674_v45, 16  ;;  %v1501_v34 = vrot.slane %v9674_v45, 1 }
  0x69   : > { %v595_v58 = vrot.slane %v13340_v48, 1 }
  0x6d   : > { %7698 = vmatmul.mubr.msk.bf16.gmra.mrb[20].mxu1 %vm755_vm1, %v548_v54  ;;  %v589_v54 = vshrl.u32 %v9656_v32, 16 }
  0x6e   : > { %7942 = vmatmul.mubr.msk.bf16.gmra.mrb[12].mxu0 %vm755_vm1, %v1486_v53  ;;  %7701 = vmatprep.mubr.msk.bf16.mxu1 %vm9332_vm0, %v13345_v0  ;;  %v588_v53 = vsel %vm496_vm2, %v583_v50, %v587_v46  ;;  %v13331_v50 = vshrl.u32 %v9718_v24, 16 }
  0x6f   : > { %7945 = vmatprep.mubr.msk.bf16.mxu0 %vm9332_vm0, %v13345_v0  ;;  %v2025_v42 = vrot.slane %v589_v54, 1 }
  0x75   : > { %7702 = vmatmul.mubr.msk.bf16.gmra.mrb[24].mxu1 %vm755_vm1, %v556_v62  ;;  %v1498_v62 = vsel %vm1477_vm3, %v1495_v44, %v1497_v56  ;;  %v9736_v44 = vld [vmem:[%s9463_s14 + $0x78] sm:$0xff]  }
  0x76   : > { %7946 = vmatmul.mubr.msk.bf16.gmra.mrb[16].mxu0 %vm755_vm1, %v1488_v61  ;;  %7705 = vmatprep.mubr.msk.bf16.mxu1 %vm9332_vm0, %v13345_v0  ;;  %v591_v61 = vor.u32 %v589_v54, %v587_v46  ;;  %v13502_v55 = vshrl.u32 %v9736_v44, 16 }
  0x77   : > { %7949 = vmatprep.mubr.msk.bf16.mxu0 %vm9332_vm0, %v13345_v0 }
  0x78   : > { %v596_v1 = vsel %vm496_vm2, %v591_v61, %v595_v58  ;;  %v2041_v41 = vrot.slane %v13502_v55, 1 }
  0x7d   : > { %7706 = vmatmul.mubr.msk.bf16.gmra.mrb[28].mxu1 %vm755_vm1, %v564_v15  ;;  %v599_v15 = vor.u32 %v13343_v7, %v595_v58 }
  0x7e   : > { %7950 = vmatmul.mubr.msk.bf16.gmra.mrb[20].mxu0 %vm755_vm1, %v1490_v12  ;;  %7709 = vmatprep.mubr.msk.bf16.mxu1 %vm9332_vm0, %v13345_v0  ;;  %v1499_v12 = vrot.slane %v9656_v32, 1 }
  0x7f   : > { %7953 = vmatprep.mubr.msk.bf16.mxu0 %vm9332_vm0, %v13345_v0 }
  0x80   : > { %v1500_v22 = vsel %vm1477_vm3, %v1497_v56, %v1499_v12 }
  0x85   : > { %7710 = vmatmul.mubr.msk.bf16.gmra.mrb[32].mxu1 %vm755_vm1, %v572_v26  ;;  %v13337_v26 = vshrl.u32 %v9695_v60, 16 }
  0x86   : > { %7954 = vmatmul.mubr.msk.bf16.gmra.mrb[24].mxu0 %vm755_vm1, %v1492_v25  ;;  %7713 = vmatprep.mubr.msk.bf16.mxu1 %vm9332_vm0, %v13345_v0  ;;  %v604_v25 = vsel %vm496_vm2, %v599_v15, %v603_v17 }
  0x87   : > { %7957 = vmatprep.mubr.msk.bf16.mxu0 %vm9332_vm0, %v13345_v0  ;;  %v607_v37 = vor.u32 %v13337_v26, %v603_v17  ;;  %v1505_v17 = vrot.slane %v9718_v24, 1 }
  0x8d   : > { %7714 = vmatmul.mubr.msk.bf16.gmra.mrb[36].mxu1 %vm755_vm1, %v580_v40  ;;  %v1502_v40 = vsel %vm1477_vm3, %v1499_v12, %v1501_v34  ;;  %v13325_v12 = vshrl.u32 %v9736_v44, 16 }
  0x8e   : > { %7958 = vmatmul.mubr.msk.bf16.gmra.mrb[28].mxu0 %vm755_vm1, %v1494_v38  ;;  %7717 = vmatprep.mubr.msk.bf16.mxu1 %vm9332_vm0, %v13345_v0  ;;  %v611_v38 = vrot.slane %v13328_v29, 1 }
  0x8f   : > { %7961 = vmatprep.mubr.msk.bf16.mxu0 %vm9332_vm0, %v13345_v0 }
  0x90   : > { %v612_v46 = vsel %vm496_vm2, %v607_v37, %v611_v38  ;;  %v615_v56 = vor.u32 %v13331_v50, %v611_v38  ;;  %v9772_v37 = vld [vmem:[%s9463_s14 + $0x88] sm:$0xff]  }
  0x95   : > { %7718 = vmatmul.mubr.msk.bf16.gmra.mrb[40].mxu1 %vm755_vm1, %v588_v53  ;;  %v1503_v53 = vrot.slane %v9695_v60, 1 }
  0x96   : > { %7962 = vmatmul.mubr.msk.bf16.gmra.mrb[32].mxu0 %vm755_vm1, %v1496_v52  ;;  %7721 = vmatprep.mubr.msk.bf16.mxu1 %vm9332_vm0, %v13345_v0  ;;  %v13322_v52 = vshll.u32 %v9736_v44, 16 }
  0x97   : > { %7965 = vmatprep.mubr.msk.bf16.mxu0 %vm9332_vm0, %v13345_v0  ;;  %v1504_v61 = vsel %vm1477_vm3, %v1501_v34, %v1503_v53  ;;  %v1506_v34 = vsel %vm1477_vm3, %v1503_v53, %v1505_v17  ;;  %v1982_v53 = vrot.slane %v498_v6, 1 }
  0x98   : > { %v619_v58 = vrot.slane %v13322_v52, 1 }
  0x9d   : > { %7722 = vmatmul.mubr.msk.bf16.gmra.mrb[44].mxu1 %vm755_vm1, %v596_v1  ;;  %v620_v1 = vsel %vm496_vm2, %v615_v56, %v619_v58  ;;  %v1507_v56 = vrot.slane %v9736_v44, 1 }
  0x9e   : > { %7966 = vmatmul.mubr.msk.bf16.gmra.mrb[36].mxu0 %vm755_vm1, %v1498_v62  ;;  %7725 = vmatprep.mubr.msk.bf16.mxu1 %vm9332_vm0, %v13345_v0  ;;  %v9754_v62 = vld [vmem:[%s9463_s14 + $0x80] sm:$0xff]  }
  0x9f   : > { %7969 = vmatprep.mubr.msk.bf16.mxu0 %vm9332_vm0, %v13345_v0  ;;  %v13316_v15 = vshll.u32 %v9754_v62, 16  ;;  %v1508_v6 = vsel %vm1477_vm3, %v1505_v17, %v1507_v56 }
  0xa5   : > { %7726 = vmatmul.mubr.msk.bf16.gmra.mrb[48].mxu1 %vm755_vm1, %v604_v25  ;;  %v627_v25 = vrot.slane %v13316_v15, 1 }
  0xa6   : > { %7970 = vmatmul.mubr.msk.bf16.gmra.mrb[40].mxu0 %vm755_vm1, %v1500_v22  ;;  %7729 = vmatprep.mubr.msk.bf16.mxu1 %vm9332_vm0, %v13345_v0  ;;  %v623_v22 = vor.u32 %v13325_v12, %v619_v58 }
  0xa7   : > { %7973 = vmatprep.mubr.msk.bf16.mxu0 %vm9332_vm0, %v13345_v0 }
  0xa8   : > { %v628_v38 = vsel %vm496_vm2, %v623_v22, %v627_v25  ;;  %v1986_v22 = vrot.slane %v505_v9, 2 }
  0xad   : > { %7730 = vmatmul.mubr.msk.bf16.gmra.mrb[52].mxu1 %vm755_vm1, %v612_v46  ;;  %v13309_v46 = vshll.u32 %v9772_v37, 16 }
  0xae   : > { %7974 = vmatmul.mubr.msk.bf16.gmra.mrb[44].mxu0 %vm755_vm1, %v1502_v40  ;;  %7733 = vmatprep.mubr.msk.bf16.mxu1 %vm9332_vm0, %v13345_v0  ;;  %v13319_v40 = vshrl.u32 %v9754_v62, 16 }
  0xaf   : > { %7977 = vmatprep.mubr.msk.bf16.mxu0 %vm9332_vm0, %v13345_v0 }
  0xb0   : > { %v631_v58 = vor.u32 %v13319_v40, %v627_v25 }
  0xb5   : > { %7734 = vmatmul.mubr.msk.bf16.gmra.mrb[56].mxu1 %vm755_vm1, %v620_v1  ;;  %v1983_v1 = vrot.slane %v500_v4, 2  ;;  %v1509_v4 = vrot.slane %v9754_v62, 1 }
  0xb6   : > { %7978 = vmatmul.mubr.msk.bf16.gmra.mrb[48].mxu0 %vm755_vm1, %v1504_v61  ;;  %7737 = vmatprep.mubr.msk.bf16.mxu1 %vm9332_vm0, %v13345_v0  ;;  %v635_v61 = vrot.slane %v13309_v46, 1  ;;  %v13313_v46 = vshrl.u32 %v9772_v37, 16 }
  0xb7   : > { %7981 = vmatprep.mubr.msk.bf16.mxu0 %vm9332_vm0, %v13345_v0  ;;  %v1984_v5 = vor.u32 %v1983_v1, %v1982_v53  ;;  %v1510_v53 = vsel %vm1477_vm3, %v1507_v56, %v1509_v4  ;;  %v9822_v1 = vld [vmem:[%s9463_s14 + $0x98] sm:$0xff]  }
  0xb8   : > { %v636_v25 = vsel %vm496_vm2, %v631_v58, %v635_v61  ;;  %v639_v17 = vor.u32 %v13313_v46, %v635_v61  ;;  %v1511_v61 = vrot.slane %v9772_v37, 1 }
  0xbd   : > { %7738 = vmatmul.mubr.msk.bf16.gmra.mrb[60].mxu1 %vm755_vm1, %v628_v38  ;;  %v9798_v38 = vld [vmem:[%s9463_s14 + $0x90] sm:$0xff]  }
  0xbe   : > { %7982 = vmatmul.mubr.msk.bf16.gmra.mrb[52].mxu0 %vm755_vm1, %v1506_v34  ;;  %7741 = vmatprep.mubr.msk.bf16.mxu1 %vm9332_vm0, %v13345_v0  ;;  %v1985_v34 = vrot.slane %v509_v13, 1  ;;  %v13310_v2 = vshll.u32 %v9798_v38, 16 }
  0xbf   : > { %7985 = vmatprep.mubr.msk.bf16.mxu0 %vm9332_vm0, %v13345_v0 }
  0xc0   : > { %v9807_v9 = vor.u32 %v1986_v22, %v1985_v34  ;;  %v643_v58 = vrot.slane %v13310_v2, 1  ;;  %v13312_v34 = vshrl.u32 %v9798_v38, 16 }
  0xc2   : > { %v9812_v13 = vsel %vm1981_vm4, %v1984_v5, %v9807_v9  ;;  %v644_v22 = vsel %vm496_vm2, %v639_v17, %v643_v58  ;;  %v647_v56 = vor.u32 %v13312_v34, %v643_v58  ;;  %v1512_v5 = vsel %vm1477_vm3, %v1509_v4, %v1511_v61  ;;  %v9840_v17 = vld [vmem:[%s9463_s14 + $0xa0] sm:$0xff]  }
  0xc3   : > { %v13314_v2 = vshll.u32 %v9840_v17, 16  ;;  %v1513_v58 = vrot.slane %v9798_v38, 1 }
  0xc5   : > { %7742 = vmatmul.mubr.msk.bf16.gmra.mrb[64].mxu1 %vm755_vm1, %v636_v25 }
  0xc6   : > { %7986 = vmatmul.mubr.msk.bf16.gmra.mrb[56].mxu0 %vm755_vm1, %v1508_v6  ;;  %7745 = vmatprep.mubr.msk.bf16.mxu1 %vm9332_vm0, %v13345_v0  ;;  %v13311_v6 = vshll.u32 %v9822_v1, 16 }
  0xc7   : > { %7989 = vmatprep.mubr.msk.bf16.mxu0 %vm9332_vm0, %v13345_v0 }
  0xc8   : > { %v651_v25 = vrot.slane %v13311_v6, 1  ;;  %v9858_v6 = vld [vmem:[%s9463_s14 + $0xa8] sm:$0xff]  }
  0xc9   : > { %v13317_v46 = vshll.u32 %v9858_v6, 16 }
  0xcd   : > { %7746 = vmatmul.mubr.msk.bf16.gmra.mrb[68].mxu1 %vm755_vm1, %v644_v22  ;;  %v13315_v22 = vshrl.u32 %v9822_v1, 16 }
  0xce   : > { %7990 = vmatmul.mubr.msk.bf16.gmra.mrb[60].mxu0 %vm755_vm1, %v1510_v53  ;;  %7749 = vmatprep.mubr.msk.bf16.mxu1 %vm9332_vm0, %v13345_v0  ;;  %v652_v53 = vsel %vm496_vm2, %v647_v56, %v651_v25  ;;  %v659_v56 = vrot.slane %v13314_v2, 1  ;;  %v9876_v2 = vld [vmem:[%s9463_s14 + $0xb0] sm:$0xff]  }
  0xcf   : > { %7993 = vmatprep.mubr.msk.bf16.mxu0 %vm9332_vm0, %v13345_v0  ;;  %v655_v4 = vor.u32 %v13315_v22, %v651_v25  ;;  %v1515_v25 = vrot.slane %v9822_v1, 1  ;;  %v13320_v15 = vshll.u32 %v9876_v2, 16 }
  0xd1   : > { %v660_v34 = vsel %vm496_vm2, %v655_v4, %v659_v56  ;;  %v667_v4 = vrot.slane %v13317_v46, 1  ;;  %v9894_v46 = vld [vmem:[%s9463_s14 + $0xb8] sm:$0xff]  }
  0xd2   : > { %v13323_v40 = vshll.u32 %v9894_v46, 16 }
  0xd5   : > { %7750 = vmatmul.mubr.msk.bf16.gmra.mrb[72].mxu1 %vm755_vm1, %v652_v53  ;;  %v13318_v53 = vshrl.u32 %v9840_v17, 16 }
  0xd6   : > { %7994 = vmatmul.mubr.msk.bf16.gmra.mrb[64].mxu0 %vm755_vm1, %v1512_v5  ;;  %7753 = vmatprep.mubr.msk.bf16.mxu1 %vm9332_vm0, %v13345_v0  ;;  %v1514_v5 = vsel %vm1477_vm3, %v1511_v61, %v1513_v58 }
  0xd7   : > { %7997 = vmatprep.mubr.msk.bf16.mxu0 %vm9332_vm0, %v13345_v0  ;;  %v663_v61 = vor.u32 %v13318_v53, %v659_v56  ;;  %v1517_v56 = vrot.slane %v9840_v17, 1 }
  0xd9   : > { %v668_v22 = vsel %vm496_vm2, %v663_v61, %v667_v4  ;;  %v675_v61 = vrot.slane %v13320_v15, 1  ;;  %v9912_v15 = vld [vmem:[%s9463_s14 + $0xc0] sm:$0xff]  }
  0xda   : > { %v13326_v52 = vshll.u32 %v9912_v15, 16 }
  0xdd   : > { %7754 = vmatmul.mubr.msk.bf16.gmra.mrb[76].mxu1 %vm755_vm1, %v660_v34  ;;  %v13321_v34 = vshrl.u32 %v9858_v6, 16 }
  0xde   : > { %7998 = vmatmul.mubr.msk.bf16.gmra.mrb[68].mxu0 %vm755_vm1, %v1514_v5  ;;  %7757 = vmatprep.mubr.msk.bf16.mxu1 %vm9332_vm0, %v13345_v0  ;;  %v1516_v5 = vsel %vm1477_vm3, %v1513_v58, %v1515_v25 }
  0xdf   : > { %8001 = vmatprep.mubr.msk.bf16.mxu0 %vm9332_vm0, %v13345_v0  ;;  %v671_v58 = vor.u32 %v13321_v34, %v667_v4  ;;  %v1519_v4 = vrot.slane %v9858_v6, 1 }
  0xe1   : > { %v676_v53 = vsel %vm496_vm2, %v671_v58, %v675_v61  ;;  %v683_v58 = vrot.slane %v13323_v40, 1  ;;  %v9930_v40 = vld [vmem:[%s9463_s14 + $0xc8] sm:$0xff]  }
  0xe2   : > { %v13329_v12 = vshll.u32 %v9930_v40, 16 }
  0xe5   : > { %7758 = vmatmul.mubr.msk.bf16.gmra.mrb[80].mxu1 %vm755_vm1, %v668_v22  ;;  %v13324_v22 = vshrl.u32 %v9876_v2, 16 }
  0xe6   : > { %8002 = vmatmul.mubr.msk.bf16.gmra.mrb[72].mxu0 %vm755_vm1, %v1516_v5  ;;  %7761 = vmatprep.mubr.msk.bf16.mxu1 %vm9332_vm0, %v13345_v0  ;;  %v1518_v5 = vsel %vm1477_vm3, %v1515_v25, %v1517_v56 }
  0xe7   : > { %8005 = vmatprep.mubr.msk.bf16.mxu0 %vm9332_vm0, %v13345_v0  ;;  %v679_v25 = vor.u32 %v13324_v22, %v675_v61  ;;  %v1521_v61 = vrot.slane %v9876_v2, 1 }
  0xe9   : > { %v684_v34 = vsel %vm496_vm2, %v679_v25, %v683_v58  ;;  %v691_v25 = vrot.slane %v13326_v52, 1  ;;  %v9948_v52 = vld [vmem:[%s9463_s14 + $0xd0] sm:$0xff]  }
  0xea   : > { %v13332_v29 = vshll.u32 %v9948_v52, 16 }
  0xed   : > { %7762 = vmatmul.mubr.msk.bf16.gmra.mrb[84].mxu1 %vm755_vm1, %v676_v53  ;;  %v13327_v53 = vshrl.u32 %v9894_v46, 16 }
  0xee   : > { %8006 = vmatmul.mubr.msk.bf16.gmra.mrb[76].mxu0 %vm755_vm1, %v1518_v5  ;;  %7765 = vmatprep.mubr.msk.bf16.mxu1 %vm9332_vm0, %v13345_v0  ;;  %v1520_v5 = vsel %vm1477_vm3, %v1517_v56, %v1519_v4 }
  0xef   : > { %8009 = vmatprep.mubr.msk.bf16.mxu0 %vm9332_vm0, %v13345_v0  ;;  %v687_v56 = vor.u32 %v13327_v53, %v683_v58  ;;  %v1523_v58 = vrot.slane %v9894_v46, 1 }
  0xf1   : > { %v692_v22 = vsel %vm496_vm2, %v687_v56, %v691_v25  ;;  %v699_v56 = vrot.slane %v13329_v12, 1  ;;  %v9966_v12 = vld [vmem:[%s9463_s14 + $0xd8] sm:$0xff]  }
  0xf2   : > { %v13335_v50 = vshll.u32 %v9966_v12, 16 }
  0xf5   : > { %7766 = vmatmul.mubr.msk.bf16.gmra.mrb[88].mxu1 %vm755_vm1, %v684_v34  ;;  %v13330_v34 = vshrl.u32 %v9912_v15, 16 }
  0xf6   : > { %8010 = vmatmul.mubr.msk.bf16.gmra.mrb[80].mxu0 %vm755_vm1, %v1520_v5  ;;  %7769 = vmatprep.mubr.msk.bf16.mxu1 %vm9332_vm0, %v13345_v0  ;;  %v1522_v5 = vsel %vm1477_vm3, %v1519_v4, %v1521_v61 }
  0xf7   : > { %8013 = vmatprep.mubr.msk.bf16.mxu0 %vm9332_vm0, %v13345_v0  ;;  %v695_v4 = vor.u32 %v13330_v34, %v691_v25  ;;  %v1525_v25 = vrot.slane %v9912_v15, 1 }
  0xf9   : > { %v700_v53 = vsel %vm496_vm2, %v695_v4, %v699_v56  ;;  %v707_v4 = vrot.slane %v13332_v29, 1  ;;  %v9984_v29 = vld [vmem:[%s9463_s14 + $0xe0] sm:$0xff]  }
  0xfa   : > { %v13338_v11 = vshll.u32 %v9984_v29, 16 }
  0xfd   : > { %7770 = vmatmul.mubr.msk.bf16.gmra.mrb[92].mxu1 %vm755_vm1, %v692_v22  ;;  %v13333_v22 = vshrl.u32 %v9930_v40, 16 }
  0xfe   : > { %8014 = vmatmul.mubr.msk.bf16.gmra.mrb[84].mxu0 %vm755_vm1, %v1522_v5  ;;  %7773 = vmatprep.mubr.msk.bf16.mxu1 %vm9332_vm0, %v13345_v0  ;;  %v1524_v5 = vsel %vm1477_vm3, %v1521_v61, %v1523_v58 }
  0xff   : > { %8017 = vmatprep.mubr.msk.bf16.mxu0 %vm9332_vm0, %v13345_v0  ;;  %v703_v61 = vor.u32 %v13333_v22, %v699_v56  ;;  %v1527_v56 = vrot.slane %v9930_v40, 1 }
 0x101   : > { %v708_v34 = vsel %vm496_vm2, %v703_v61, %v707_v4  ;;  %v715_v61 = vrot.slane %v13335_v50, 1  ;;  %v10002_v50 = vld [vmem:[%s9463_s14 + $0xe8] sm:$0xff]  }
 0x102   : > { %v13341_v26 = vshll.u32 %v10002_v50, 16 }
 0x105   : > { %7774 = vmatmul.mubr.msk.bf16.gmra.mrb[96].mxu1 %vm755_vm1, %v700_v53  ;;  %v13336_v53 = vshrl.u32 %v9948_v52, 16 }
 0x106   : > { %8018 = vmatmul.mubr.msk.bf16.gmra.mrb[88].mxu0 %vm755_vm1, %v1524_v5  ;;  %7777 = vmatprep.mubr.msk.bf16.mxu1 %vm9332_vm0, %v13345_v0  ;;  %v1526_v5 = vsel %vm1477_vm3, %v1523_v58, %v1525_v25 }
 0x107   : > { %8021 = vmatprep.mubr.msk.bf16.mxu0 %vm9332_vm0, %v13345_v0  ;;  %v711_v58 = vor.u32 %v13336_v53, %v707_v4  ;;  %v1529_v4 = vrot.slane %v9948_v52, 1 }
 0x109   : > { %v716_v22 = vsel %vm496_vm2, %v711_v58, %v715_v61  ;;  %v723_v58 = vrot.slane %v13338_v11, 1  ;;  %v10020_v11 = vld [vmem:[%s9463_s14 + $0xf0] sm:$0xff]  }
 0x10a   : > { %v13344_v48 = vshll.u32 %v10020_v11, 16  ;;  %v741_v7 = vshrl.u32 %v10020_v11, 16 }
 0x10d   : > { %7778 = vmatmul.mubr.msk.bf16.gmra.mrb[100].mxu1 %vm755_vm1, %v708_v34  ;;  %v13339_v34 = vshrl.u32 %v9966_v12, 16 }
 0x10e   : > { %8022 = vmatmul.mubr.msk.bf16.gmra.mrb[92].mxu0 %vm755_vm1, %v1526_v5  ;;  %7781 = vmatprep.mubr.msk.bf16.mxu1 %vm9332_vm0, %v13345_v0  ;;  %v1528_v5 = vsel %vm1477_vm3, %v1525_v25, %v1527_v56 }
 0x10f   : > { %8025 = vmatprep.mubr.msk.bf16.mxu0 %vm9332_vm0, %v13345_v0  ;;  %v719_v25 = vor.u32 %v13339_v34, %v715_v61  ;;  %v1531_v61 = vrot.slane %v9966_v12, 1 }
 0x111   : > { %v724_v53 = vsel %vm496_vm2, %v719_v25, %v723_v58  ;;  %v731_v25 = vrot.slane %v13341_v26, 1  ;;  %v10038_v26 = vld [vmem:[%s9463_s14 + $0xf8] ss:$0 sps:$4 sm:$0x33]  }
 0x115   : > { %7782 = vmatmul.mubr.msk.bf16.gmra.mrb[104].mxu1 %vm755_vm1, %v716_v22  ;;  %v13342_v22 = vshrl.u32 %v9984_v29, 16 }
 0x116   : > { %8026 = vmatmul.mubr.msk.bf16.gmra.mrb[96].mxu0 %vm755_vm1, %v1528_v5  ;;  %7785 = vmatprep.mubr.msk.bf16.mxu1 %vm9332_vm0, %v13345_v0  ;;  %v1530_v5 = vsel %vm1477_vm3, %v1527_v56, %v1529_v4 }
 0x117   : > { %8029 = vmatprep.mubr.msk.bf16.mxu0 %vm9332_vm0, %v13345_v0  ;;  %v727_v56 = vor.u32 %v13342_v22, %v723_v58  ;;  %v1533_v58 = vrot.slane %v9984_v29, 1 }
 0x119   : > { %v732_v34 = vsel %vm496_vm2, %v727_v56, %v731_v25  ;;  %v739_v56 = vrot.slane %v13344_v48, 1 }
 0x11d   : > { %7786 = vmatmul.mubr.msk.bf16.gmra.mrb[108].mxu1 %vm755_vm1, %v724_v53  ;;  %v733_v53 = vshrl.u32 %v10002_v50, 16 }
 0x11e   : > { %8030 = vmatmul.mubr.msk.bf16.gmra.mrb[100].mxu0 %vm755_vm1, %v1530_v5  ;;  %7789 = vmatprep.mubr.msk.bf16.mxu1 %vm9332_vm0, %v13345_v0  ;;  %v1532_v5 = vsel %vm1477_vm3, %v1529_v4, %v1531_v61 }
 0x11f   : > { %8033 = vmatprep.mubr.msk.bf16.mxu0 %vm9332_vm0, %v13345_v0  ;;  %v735_v4 = vor.u32 %v733_v53, %v731_v25  ;;  %v1535_v25 = vrot.slane %v10002_v50, 1 }
 0x121   : > { %v740_v22 = vsel %vm496_vm2, %v735_v4, %v739_v56 }
 0x125   : > { %7790 = vmatmul.mubr.msk.bf16.gmra.mrb[112].mxu1 %vm755_vm1, %v732_v34  ;;  %v745_v34 = vshll.u32 %v10038_v26, 16 }
 0x126   : > { %8034 = vmatmul.mubr.msk.bf16.gmra.mrb[104].mxu0 %vm755_vm1, %v1532_v5  ;;  %7793 = vmatprep.mubr.msk.bf16.mxu1 %vm9332_vm0, %v13345_v0  ;;  %v1534_v5 = vsel %vm1477_vm3, %v1531_v61, %v1533_v58  ;;  %v743_v61 = vor.u32 %v741_v7, %v739_v56 }
 0x127   : > { %8037 = vmatprep.mubr.msk.bf16.mxu0 %vm9332_vm0, %v13345_v0  ;;  %v747_v4 = vrot.slane %v745_v34, 1 }
 0x129   : > { %v748_v48 = vsel %vm496_vm2, %v743_v61, %v747_v4  ;;  %v10069_v61 = vld [vmem:[%s9463_s14 + $0x18] sm:$0xff]   ;;  %v9115_v4 = vld [vmem:[%s13300_s1 + $0x20] sm:$0xff]  }
 0x12d   : > { %7794 = vmatmul.mubr.msk.bf16.gmra.mrb[116].mxu1 %vm755_vm1, %v740_v22  ;;  %v1537_v22 = vrot.slane %v10020_v11, 1 }
 0x12e   : > { %8038 = vmatmul.mubr.msk.bf16.gmra.mrb[108].mxu0 %vm755_vm1, %v1534_v5  ;;  %7797 = vmatprep.mubr.msk.bf16.mxu1 %vm9332_vm0, %v13345_v0  ;;  %v1536_v5 = vsel %vm1477_vm3, %v1533_v58, %v1535_v25  ;;  %v1539_v58 = vrot.slane %v10038_v26, 1 }
 0x12f   : > { %8041 = vmatprep.mubr.msk.bf16.mxu0 %vm9332_vm0, %v13345_v0  ;;  %v1538_v56 = vsel %vm1477_vm3, %v1535_v25, %v1537_v22  ;;  %v10080_v25 = vld [vmem:[%s9463_s14 + $0x20] sm:$0xff]  }
 0x135   : > { %7798 = vmatmul.mubr.msk.bf16.gmra.mrb[120].mxu1 %vm755_vm1, %v748_v48  ;;  %v1540_v48 = vsel %vm1477_vm3, %v1537_v22, %v1539_v58  ;;  %v1990_v22 = vrot.slane %v513_v14, 2  ;;  %v10098_v58 = vld [vmem:[%s9463_s14 + $0x28] sm:$0xff]   ;;  %v1993_v14 = vrot.slane %v525_v30, 1 }
 0x136   : > { %8042 = vmatmul.mubr.msk.bf16.gmra.mrb[112].mxu0 %vm755_vm1, %v1536_v5  ;;  %7815 = vmatprep.mubr.msk.bf16.mxu1 %vm9332_vm0, %v13345_v0  ;;  %v1989_v5 = vrot.slane %v517_v20, 1  ;;  %v1994_v20 = vrot.slane %v521_v21, 2  ;;  %v1998_v21 = vrot.slane %v529_v31, 2  ;;  %v2003_v31 = vor.u32 %v2002_v28, %v2001_v39 }
 0x137   : > { %8045 = vmatprep.mubr.msk.bf16.mxu0 %vm9332_vm0, %v13345_v0 }
 0x138   : > { %v1999_v30 = vor.u32 %v1998_v21, %v1997_v18 }
 0x13d   : > { %7816 = vmatmul.mubr.msk.bf16.vlgmr.msra.gmra.mrb[12].mxu1 %vm755_vm1, %v10069_v61 }
 0x13e   : > { %8046 = vmatmul.mubr.msk.bf16.gmra.mrb[116].mxu0 %vm755_vm1, %v1538_v56  ;;  %7819 = vmatprep.mubr.msk.bf16.mxu1 %vm9332_vm0, %v13345_v0  ;;  %v1991_v56 = vor.u32 %v1990_v22, %v1989_v5  ;;  %v2004_v5 = vsel %vm1981_vm4, %v1999_v30, %v2003_v31  ;;  %v2008_v22 = vsel %vm1981_vm4, %v2003_v31, %v2007_v36 }
 0x13f   : > { %8049 = vmatprep.mubr.msk.bf16.mxu0 %vm9332_vm0, %v13345_v0 }
 0x140   : > { %v1992_v10 = vsel %vm1981_vm4, %v9807_v9, %v1991_v56 }
 0x145   : > { %7820 = vmatmul.mubr.msk.bf16.gmra.mrb[16].mxu1 %vm755_vm1, %v10080_v25 }
 0x146   : > { %8050 = vmatmul.mubr.msk.bf16.gmra.mrb[120].mxu0 %vm755_vm1, %v1540_v48  ;;  %7823 = vmatprep.mubr.msk.bf16.mxu1 %vm9332_vm0, %v13345_v0  ;;  %v10114_v48 = vld [vmem:[%s9463_s14 + $0x30] sm:$0xff]  }
 0x147   : > { %8055 = vmatprep.mubr.msk.bf16.mxu0 %vm9332_vm0, %v13345_v0 }
 0x14d   : > { %7824 = vmatmul.mubr.msk.bf16.gmra.mrb[20].mxu1 %vm755_vm1, %v10098_v58 }
 0x14e   : > { %8056 = vmatmul.mubr.msk.bf16.vlgmr.msra.gmra.mrb[0].mxu0 %vm755_vm1, %v9812_v13  ;;  %7827 = vmatprep.mubr.msk.bf16.mxu1 %vm9332_vm0, %v13345_v0  ;;  %v1995_v13 = vor.u32 %v1994_v20, %v1993_v14 }
 0x14f   : > { %8180 = vmatpush3.bf16.msra.mxu0 %v9115_v4  ;;  %8059 = vmatprep.mubr.msk.bf16.mxu0 %vm9332_vm0, %v13345_v0 }
 0x150   : > { %v1996_v9 = vsel %vm1981_vm4, %v1991_v56, %v1995_v13  ;;  %v2000_v4 = vsel %vm1981_vm4, %v1995_v13, %v1999_v30  ;;  %v2012_v56 = vsel %vm1981_vm4, %v2007_v36, %v2011_v43  ;;  %v13498_v30 = vshrl.u32 %v9695_v60, 16 }
 0x155   : > { %7828 = vmatmul.mubr.msk.bf16.gmra.mrb[24].mxu1 %vm755_vm1, %v10114_v48 }
 0x156   : > { %8060 = vmatmul.mubr.msk.bf16.gmra.mrb[4].mxu0 %vm755_vm1, %v1992_v10  ;;  %7831 = vmatprep.mubr.msk.bf16.mxu1 %vm9332_vm0, %v13345_v0 }
 0x157   : > { %8063 = vmatprep.mubr.msk.bf16.mxu0 %vm9332_vm0, %v13345_v0 }
 0x15d   : > { %7832 = vmatmul.mubr.msk.bf16.gmra.mrb[28].mxu1 %vm755_vm1, %v9584_v49  ;;  %v2014_v49 = vrot.slane %v561_v59, 2 }
 0x15e   : > { %8064 = vmatmul.mubr.msk.bf16.gmra.mrb[8].mxu0 %vm755_vm1, %v1996_v9  ;;  %7835 = vmatprep.mubr.msk.bf16.mxu1 %vm9332_vm0, %v13345_v0  ;;  %v13496_v9 = vshrl.u32 %v9674_v45, 16 }
 0x15f   : > { %8067 = vmatprep.mubr.msk.bf16.mxu0 %vm9332_vm0, %v13345_v0  ;;  %v2015_v51 = vor.u32 %v2014_v49, %v2013_v63 }
 0x160   : > { %v2029_v54 = vrot.slane %v13496_v9, 1 }
 0x161   : > { %v2016_v10 = vsel %vm1981_vm4, %v2011_v43, %v2015_v51 }
 0x165   : > { %7836 = vmatmul.mubr.msk.bf16.gmra.mrb[32].mxu1 %vm755_vm1, %v9602_v57  ;;  %v2018_v57 = vrot.slane %v569_v8, 2 }
 0x166   : > { %8068 = vmatmul.mubr.msk.bf16.gmra.mrb[12].mxu0 %vm755_vm1, %v2000_v4  ;;  %7839 = vmatprep.mubr.msk.bf16.mxu1 %vm9332_vm0, %v13345_v0  ;;  %v2033_v4 = vrot.slane %v13498_v30, 1  ;;  %v13508_v30 = vshrl.u32 %v9798_v38, 16 }
 0x167   : > { %8071 = vmatprep.mubr.msk.bf16.mxu0 %vm9332_vm0, %v13345_v0  ;;  %v2019_v59 = vor.u32 %v2018_v57, %v2017_v16  ;;  %v13504_v16 = vshrl.u32 %v9754_v62, 16 }
 0x169   : > { %v2020_v14 = vsel %vm1981_vm4, %v2015_v51, %v2019_v59  ;;  %v2045_v57 = vrot.slane %v13504_v16, 1 }
 0x16d   : > { %7840 = vmatmul.mubr.msk.bf16.gmra.mrb[36].mxu1 %vm755_vm1, %v9620_v3  ;;  %v2022_v3 = vrot.slane %v577_v23, 2 }
 0x16e   : > { %8072 = vmatmul.mubr.msk.bf16.gmra.mrb[16].mxu0 %vm755_vm1, %v2004_v5  ;;  %7843 = vmatprep.mubr.msk.bf16.mxu1 %vm9332_vm0, %v13345_v0  ;;  %v13500_v5 = vshrl.u32 %v9718_v24, 16 }
 0x16f   : > { %8075 = vmatprep.mubr.msk.bf16.mxu0 %vm9332_vm0, %v13345_v0  ;;  %v2023_v8 = vor.u32 %v2022_v3, %v2021_v27 }
 0x170   : > { %v2037_v47 = vrot.slane %v13500_v5, 1  ;;  %v13510_v5 = vshrl.u32 %v9822_v1, 16 }
 0x171   : > { %v2024_v20 = vsel %vm1981_vm4, %v2019_v59, %v2023_v8  ;;  %v13505_v59 = vshll.u32 %v9754_v62, 16 }
 0x175   : > { %7844 = vmatmul.mubr.msk.bf16.gmra.mrb[40].mxu1 %vm755_vm1, %v9638_v19  ;;  %v2026_v19 = vrot.slane %v585_v35, 2 }
 0x176   : > { %8076 = vmatmul.mubr.msk.bf16.gmra.mrb[20].mxu0 %vm755_vm1, %v2008_v22  ;;  %7847 = vmatprep.mubr.msk.bf16.mxu1 %vm9332_vm0, %v13345_v0 }
 0x177   : > { %8079 = vmatprep.mubr.msk.bf16.mxu0 %vm9332_vm0, %v13345_v0  ;;  %v2027_v23 = vor.u32 %v2026_v19, %v2025_v42  ;;  %v13506_v19 = vshrl.u32 %v9772_v37, 16 }
 0x179   : > { %v2028_v13 = vsel %vm1981_vm4, %v2023_v8, %v2027_v23 }
 0x17d   : > { %7848 = vmatmul.mubr.msk.bf16.gmra.mrb[44].mxu1 %vm755_vm1, %v9656_v32  ;;  %v13497_v32 = vshll.u32 %v9674_v45, 16 }
 0x17e   : > { %8080 = vmatmul.mubr.msk.bf16.gmra.mrb[24].mxu0 %vm755_vm1, %v2012_v56  ;;  %7851 = vmatprep.mubr.msk.bf16.mxu1 %vm9332_vm0, %v13345_v0  ;;  %v10258_v56 = vpop.f32.mrb[0].mxu1 }
 0x17f   : > { %8083 = vmatprep.mubr.msk.bf16.mxu0 %vm9332_vm0, %v13345_v0  ;;  %v2030_v35 = vrot.slane %v13497_v32, 2  ;;  %v7679_v49 = vpop.f32.mrb[1].mxu1 }
 0x180   : > { %v10262_v51 = vpop.f32.mrb[2].mxu1 }
 0x181   : > { %v2031_v18 = vor.u32 %v2030_v35, %v2029_v54 }
 0x183   : > { %v2032_v21 = vsel %vm1981_vm4, %v2027_v23, %v2031_v18  ;;  %v2049_v23 = vrot.slane %v13506_v19, 1 }
 0x185   : > { %7852 = vmatmul.mubr.msk.bf16.gmra.mrb[48].mxu1 %vm755_vm1, %v9674_v45  ;;  %v13499_v45 = vshll.u32 %v9695_v60, 16 }
 0x186   : > { %8084 = vmatmul.mubr.msk.bf16.gmra.mrb[28].mxu0 %vm755_vm1, %v2016_v10  ;;  %7855 = vmatprep.mubr.msk.bf16.mxu1 %vm9332_vm0, %v13345_v0  ;;  %v7680_v10 = vpop.f32.mrb[3].mxu1 }
 0x187   : > { %8087 = vmatprep.mubr.msk.bf16.mxu0 %vm9332_vm0, %v13345_v0  ;;  %v2034_v39 = vrot.slane %v13499_v45, 2  ;;  %v10274_v27 = vpop.f32.mrb[4].mxu1  ;;  %v13509_v45 = vshll.u32 %v9798_v38, 16 }
 0x188   : > { %v7683_v8 = vpop.f32.mrb[5].mxu1 }
 0x189   : > { %v2035_v28 = vor.u32 %v2034_v39, %v2033_v4  ;;  %v2053_v4 = vrot.slane %v13508_v30, 1  ;;  %v2054_v39 = vrot.slane %v13509_v45, 2  ;;  %v13522_v30 = vshrl.u32 %v9930_v40, 16 }
 0x18b   : > { %v2036_v31 = vsel %vm1981_vm4, %v2031_v18, %v2035_v28 }
 0x18d   : > { %7856 = vmatmul.mubr.msk.bf16.gmra.mrb[52].mxu1 %vm755_vm1, %v9695_v60  ;;  %v13501_v60 = vshll.u32 %v9718_v24, 16 }
 0x18e   : > { %8088 = vmatmul.mubr.msk.bf16.gmra.mrb[32].mxu0 %vm755_vm1, %v2020_v14  ;;  %7859 = vmatprep.mubr.msk.bf16.mxu1 %vm9332_vm0, %v13345_v0  ;;  %v2046_v14 = vrot.slane %v13505_v59, 2 }
 0x18f   : > { %8091 = vmatprep.mubr.msk.bf16.mxu0 %vm9332_vm0, %v13345_v0  ;;  %v2038_v33 = vrot.slane %v13501_v60, 2 }
 0x190   : > { %v2047_v3 = vor.u32 %v2046_v14, %v2045_v57  ;;  %v13516_v57 = vshrl.u32 %v9876_v2, 16 }
 0x191   : > { %v2039_v36 = vor.u32 %v2038_v33, %v2037_v47  ;;  %v2057_v47 = vrot.slane %v13510_v5, 1 }
 0x192   : > { %v2069_v59 = vrot.slane %v13516_v57, 1 }
 0x193   : > { %v2040_v22 = vsel %vm1981_vm4, %v2035_v28, %v2039_v36  ;;  %v2055_v28 = vor.u32 %v2054_v39, %v2053_v4  ;;  %v2081_v4 = vrot.slane %v13522_v30, 1 }
 0x195   : > { %7860 = vmatmul.mubr.msk.bf16.gmra.mrb[56].mxu1 %vm755_vm1, %v9718_v24  ;;  %v13503_v24 = vshll.u32 %v9736_v44, 16 }
 0x196   : > { %8092 = vmatmul.mubr.msk.bf16.gmra.mrb[36].mxu0 %vm755_vm1, %v2024_v20  ;;  %7863 = vmatprep.mubr.msk.bf16.mxu1 %vm9332_vm0, %v13345_v0  ;;  %v10278_v20 = vpop.f32.mrb[6].mxu1 }
 0x197   : > { %8095 = vmatprep.mubr.msk.bf16.mxu0 %vm9332_vm0, %v13345_v0  ;;  %v2042_v43 = vrot.slane %v13503_v24, 2  ;;  %v7684_v42 = vpop.f32.mrb[7].mxu1 }
 0x198   : > { %v10290_v54 = vpop.f32.mrb[8].mxu1  ;;  %v13518_v42 = vshrl.u32 %v9894_v46, 16 }
 0x199   : > { %v2043_v63 = vor.u32 %v2042_v43, %v2041_v41  ;;  %v7687_v35 = vpop.f32.mrb[9].mxu1 }
 0x19a   : > { %v10294_v18 = vpop.f32.mrb[10].mxu1 }
 0x19d   : > { %7864 = vmatmul.mubr.msk.bf16.gmra.mrb[60].mxu1 %vm755_vm1, %v9736_v44  ;;  %v2044_v44 = vsel %vm1981_vm4, %v2039_v36, %v2043_v63 }
 0x19e   : > { %8096 = vmatmul.mubr.msk.bf16.gmra.mrb[40].mxu0 %vm755_vm1, %v2028_v13  ;;  %7867 = vmatprep.mubr.msk.bf16.mxu1 %vm9332_vm0, %v13345_v0  ;;  %v13507_v13 = vshll.u32 %v9772_v37, 16 }
 0x19f   : > { %8099 = vmatprep.mubr.msk.bf16.mxu0 %vm9332_vm0, %v13345_v0 }
 0x1a0   : > { %v2050_v9 = vrot.slane %v13507_v13, 2 }
 0x1a2   : > { %v2051_v32 = vor.u32 %v2050_v9, %v2049_v23  ;;  %v13520_v9 = vshrl.u32 %v9912_v15, 16 }
 0x1a5   : > { %7868 = vmatmul.mubr.msk.bf16.gmra.mrb[64].mxu1 %vm755_vm1, %v9754_v62  ;;  %v2048_v62 = vsel %vm1981_vm4, %v2043_v63, %v2047_v3  ;;  %v13514_v63 = vshrl.u32 %v9858_v6, 16 }
 0x1a6   : > { %8100 = vmatmul.mubr.msk.bf16.gmra.mrb[44].mxu0 %vm755_vm1, %v2032_v21  ;;  %7871 = vmatprep.mubr.msk.bf16.mxu1 %vm9332_vm0, %v13345_v0  ;;  %v7688_v21 = vpop.f32.mrb[11].mxu1 }
 0x1a7   : > { %8103 = vmatprep.mubr.msk.bf16.mxu0 %vm9332_vm0, %v13345_v0  ;;  %v2065_v49 = vrot.slane %v13514_v63, 1 }
 0x1ad   : > { %7872 = vmatmul.mubr.msk.bf16.gmra.mrb[68].mxu1 %vm755_vm1, %v9772_v37  ;;  %v2052_v37 = vsel %vm1981_vm4, %v2047_v3, %v2051_v32 }
 0x1ae   : > { %8104 = vmatmul.mubr.msk.bf16.gmra.mrb[48].mxu0 %vm755_vm1, %v2036_v31  ;;  %7875 = vmatprep.mubr.msk.bf16.mxu1 %vm9332_vm0, %v13345_v0  ;;  %v2056_v31 = vsel %vm1981_vm4, %v2051_v32, %v2055_v28  ;;  %v2077_v32 = vrot.slane %v13520_v9, 1 }
 0x1af   : > { %8107 = vmatprep.mubr.msk.bf16.mxu0 %vm9332_vm0, %v13345_v0 }
 0x1b5   : > { %7876 = vmatmul.mubr.msk.bf16.gmra.mrb[72].mxu1 %vm755_vm1, %v9798_v38  ;;  %v13511_v38 = vshll.u32 %v9822_v1, 16 }
 0x1b6   : > { %8108 = vmatmul.mubr.msk.bf16.gmra.mrb[52].mxu0 %vm755_vm1, %v2040_v22  ;;  %7879 = vmatprep.mubr.msk.bf16.mxu1 %vm9332_vm0, %v13345_v0  ;;  %v13512_v22 = vshrl.u32 %v9840_v17, 16 }
 0x1b7   : > { %8111 = vmatprep.mubr.msk.bf16.mxu0 %vm9332_vm0, %v13345_v0  ;;  %v2058_v60 = vrot.slane %v13511_v38, 2 }
 0x1b8   : > { %v2061_v55 = vrot.slane %v13512_v22, 1 }
 0x1b9   : > { %v2059_v33 = vor.u32 %v2058_v60, %v2057_v47 }
 0x1bb   : > { %v2060_v36 = vsel %vm1981_vm4, %v2055_v28, %v2059_v33 }
 0x1bd   : > { %7880 = vmatmul.mubr.msk.bf16.gmra.mrb[76].mxu1 %vm755_vm1, %v9822_v1  ;;  %v13513_v1 = vshll.u32 %v9840_v17, 16 }
 0x1be   : > { %8112 = vmatmul.mubr.msk.bf16.gmra.mrb[56].mxu0 %vm755_vm1, %v2044_v44  ;;  %7883 = vmatprep.mubr.msk.bf16.mxu1 %vm9332_vm0, %v13345_v0 }
 0x1bf   : > { %8115 = vmatprep.mubr.msk.bf16.mxu0 %vm9332_vm0, %v13345_v0  ;;  %v2062_v41 = vrot.slane %v13513_v1, 2 }
 0x1c1   : > { %v2063_v24 = vor.u32 %v2062_v41, %v2061_v55 }
 0x1c3   : > { %v2064_v43 = vsel %vm1981_vm4, %v2059_v33, %v2063_v24  ;;  %v13526_v33 = vshrl.u32 %v9966_v12, 16 }
 0x1c5   : > { %7884 = vmatmul.mubr.msk.bf16.gmra.mrb[80].mxu1 %vm755_vm1, %v9840_v17  ;;  %v13515_v17 = vshll.u32 %v9858_v6, 16 }
 0x1c6   : > { %8116 = vmatmul.mubr.msk.bf16.gmra.mrb[60].mxu0 %vm755_vm1, %v2048_v62  ;;  %7887 = vmatprep.mubr.msk.bf16.mxu1 %vm9332_vm0, %v13345_v0  ;;  %v2073_v62 = vrot.slane %v13518_v42, 1 }
 0x1c7   : > { %8119 = vmatprep.mubr.msk.bf16.mxu0 %vm9332_vm0, %v13345_v0  ;;  %v2066_v10 = vrot.slane %v13515_v17, 2  ;;  %v13529_v17 = vshll.u32 %v9984_v29, 16 }
 0x1c9   : > { %v2067_v44 = vor.u32 %v2066_v10, %v2065_v49  ;;  %v2094_v10 = vrot.slane %v13529_v17, 2 }
 0x1cb   : > { %v2068_v16 = vsel %vm1981_vm4, %v2063_v24, %v2067_v44 }
 0x1cd   : > { %7888 = vmatmul.mubr.msk.bf16.gmra.mrb[84].mxu1 %vm755_vm1, %v9858_v6  ;;  %v13517_v6 = vshll.u32 %v9876_v2, 16 }
 0x1ce   : > { %8120 = vmatmul.mubr.msk.bf16.gmra.mrb[64].mxu0 %vm755_vm1, %v2052_v37  ;;  %7891 = vmatprep.mubr.msk.bf16.mxu1 %vm9332_vm0, %v13345_v0 }
 0x1cf   : > { %8123 = vmatprep.mubr.msk.bf16.mxu0 %vm9332_vm0, %v13345_v0  ;;  %v2070_v14 = vrot.slane %v13517_v6, 2 }
 0x1d1   : > { %v2071_v3 = vor.u32 %v2070_v14, %v2069_v59 }
 0x1d3   : > { %v2072_v8 = vsel %vm1981_vm4, %v2067_v44, %v2071_v3 }
 0x1d5   : > { %7892 = vmatmul.mubr.msk.bf16.gmra.mrb[88].mxu1 %vm755_vm1, %v9876_v2  ;;  %v13519_v2 = vshll.u32 %v9894_v46, 16 }
 0x1d6   : > { %8124 = vmatmul.mubr.msk.bf16.gmra.mrb[68].mxu0 %vm755_vm1, %v2056_v31  ;;  %7895 = vmatprep.mubr.msk.bf16.mxu1 %vm9332_vm0, %v13345_v0  ;;  %v13524_v31 = vshrl.u32 %v9948_v52, 16 }
 0x1d7   : > { %8127 = vmatprep.mubr.msk.bf16.mxu0 %vm9332_vm0, %v13345_v0  ;;  %v2074_v19 = vrot.slane %v13519_v2, 2 }
 0x1d8   : > { %v2085_v5 = vrot.slane %v13524_v31, 1 }
 0x1d9   : > { %v2075_v23 = vor.u32 %v2074_v19, %v2073_v62 }
 0x1db   : > { %v2076_v13 = vsel %vm1981_vm4, %v2071_v3, %v2075_v23  ;;  %v2097_v3 = vrot.slane %v733_v53, 1  ;;  %v2101_v53 = vrot.slane %v741_v7, 1 }
 0x1dd   : > { %7896 = vmatmul.mubr.msk.bf16.gmra.mrb[92].mxu1 %vm755_vm1, %v9894_v46  ;;  %v13521_v46 = vshll.u32 %v9912_v15, 16 }
 0x1de   : > { %8128 = vmatmul.mubr.msk.bf16.gmra.mrb[72].mxu0 %vm755_vm1, %v2060_v36  ;;  %7899 = vmatprep.mubr.msk.bf16.mxu1 %vm9332_vm0, %v13345_v0  ;;  %v2089_v36 = vrot.slane %v13526_v33, 1 }
 0x1df   : > { %8131 = vmatprep.mubr.msk.bf16.mxu0 %vm9332_vm0, %v13345_v0  ;;  %v2078_v35 = vrot.slane %v13521_v46, 2 }
 0x1e1   : > { %v2079_v21 = vor.u32 %v2078_v35, %v2077_v32 }
 0x1e3   : > { %v2080_v37 = vsel %vm1981_vm4, %v2075_v23, %v2079_v21 }
 0x1e5   : > { %7900 = vmatmul.mubr.msk.bf16.gmra.mrb[96].mxu1 %vm755_vm1, %v9912_v15  ;;  %v13523_v15 = vshll.u32 %v9930_v40, 16 }
 0x1e6   : > { %8132 = vmatmul.mubr.msk.bf16.gmra.mrb[76].mxu0 %vm755_vm1, %v2064_v43  ;;  %7903 = vmatprep.mubr.msk.bf16.mxu1 %vm9332_vm0, %v13345_v0 }
 0x1e7   : > { %8135 = vmatprep.mubr.msk.bf16.mxu0 %vm9332_vm0, %v13345_v0  ;;  %v2082_v45 = vrot.slane %v13523_v15, 2 }
 0x1e9   : > { %v2083_v39 = vor.u32 %v2082_v45, %v2081_v4 }
 0x1eb   : > { %v2084_v28 = vsel %vm1981_vm4, %v2079_v21, %v2083_v39 }
 0x1ed   : > { %7904 = vmatmul.mubr.msk.bf16.gmra.mrb[100].mxu1 %vm755_vm1, %v9930_v40  ;;  %v13525_v40 = vshll.u32 %v9948_v52, 16 }
 0x1ee   : > { %8136 = vmatmul.mubr.msk.bf16.gmra.mrb[80].mxu0 %vm755_vm1, %v2068_v16  ;;  %7907 = vmatprep.mubr.msk.bf16.mxu1 %vm9332_vm0, %v13345_v0 }
 0x1ef   : > { %8139 = vmatprep.mubr.msk.bf16.mxu0 %vm9332_vm0, %v13345_v0  ;;  %v2086_v47 = vrot.slane %v13525_v40, 2 }
 0x1f1   : > { %v2087_v38 = vor.u32 %v2086_v47, %v2085_v5 }
 0x1f3   : > { %v2088_v60 = vsel %vm1981_vm4, %v2083_v39, %v2087_v38 }
 0x1f5   : > { %7908 = vmatmul.mubr.msk.bf16.gmra.mrb[104].mxu1 %vm755_vm1, %v9948_v52  ;;  %v13527_v52 = vshll.u32 %v9966_v12, 16 }
 0x1f6   : > { %8140 = vmatmul.mubr.msk.bf16.gmra.mrb[84].mxu0 %vm755_vm1, %v2072_v8  ;;  %7911 = vmatprep.mubr.msk.bf16.mxu1 %vm9332_vm0, %v13345_v0 }
 0x1f7   : > { %8143 = vmatprep.mubr.msk.bf16.mxu0 %vm9332_vm0, %v13345_v0  ;;  %v2090_v22 = vrot.slane %v13527_v52, 2 }
 0x1f9   : > { %v2091_v24 = vor.u32 %v2090_v22, %v2089_v36 }
 0x1fb   : > { %v2092_v63 = vsel %vm1981_vm4, %v2087_v38, %v2091_v24 }
 0x1fd   : > { %7912 = vmatmul.mubr.msk.bf16.gmra.mrb[108].mxu1 %vm755_vm1, %v9966_v12  ;;  %v13528_v12 = vshrl.u32 %v9984_v29, 16 }
 0x1fe   : > { %8144 = vmatmul.mubr.msk.bf16.gmra.mrb[88].mxu0 %vm755_vm1, %v2076_v13  ;;  %7915 = vmatprep.mubr.msk.bf16.mxu1 %vm9332_vm0, %v13345_v0 }
 0x1ff   : > { %8147 = vmatprep.mubr.msk.bf16.mxu0 %vm9332_vm0, %v13345_v0  ;;  %v2093_v49 = vrot.slane %v13528_v12, 1 }
 0x201   : > { %v2095_v59 = vor.u32 %v2094_v10, %v2093_v49 }
 0x203   : > { %v2096_v14 = vsel %vm1981_vm4, %v2091_v24, %v2095_v59 }
 0x205   : > { %7916 = vmatmul.mubr.msk.bf16.gmra.mrb[112].mxu1 %vm755_vm1, %v9984_v29  ;;  %v13530_v29 = vshll.u32 %v10002_v50, 16 }
 0x206   : > { %8148 = vmatmul.mubr.msk.bf16.gmra.mrb[92].mxu0 %vm755_vm1, %v2080_v37  ;;  %7919 = vmatprep.mubr.msk.bf16.mxu1 %vm9332_vm0, %v13345_v0  ;;  %v2105_v37 = vshrl.u32 %v10038_v26, 16 }
 0x207   : > { %8151 = vmatprep.mubr.msk.bf16.mxu0 %vm9332_vm0, %v13345_v0  ;;  %v2098_v8 = vrot.slane %v13530_v29, 2 }
 0x208   : > { %v2107_v7 = vrot.slane %v2105_v37, 1 }
 0x209   : > { %v2099_v19 = vor.u32 %v2098_v8, %v2097_v3 }
 0x20b   : > { %v2100_v13 = vsel %vm1981_vm4, %v2095_v59, %v2099_v19  ;;  %v2557_v59 = vrot.slane %v10069_v61, 2 }
 0x20d   : > { %7920 = vmatmul.mubr.msk.bf16.gmra.mrb[116].mxu1 %vm755_vm1, %v10002_v50  ;;  %v13531_v50 = vshll.u32 %v10020_v11, 16 }
 0x20e   : > { %8152 = vmatmul.mubr.msk.bf16.gmra.mrb[96].mxu0 %vm755_vm1, %v2084_v28  ;;  %7923 = vmatprep.mubr.msk.bf16.mxu1 %vm9332_vm0, %v13345_v0 }
 0x20f   : > { %8155 = vmatprep.mubr.msk.bf16.mxu0 %vm9332_vm0, %v13345_v0  ;;  %v2102_v9 = vrot.slane %v13531_v50, 2  ;;  %v2561_v50 = vrot.slane %v10098_v58, 2 }
 0x210   : > { %v10413_v55 = vpop.f32.mrb[12].mxu1 }
 0x211   : > { %v7817_v1 = vpop.f32.mrb[13].mxu1  ;;  %v2103_v21 = vor.u32 %v2102_v9, %v2101_v53 }
 0x212   : > { %v10416_v41 = vpop.f32.mrb[14].mxu1 }
 0x213   : > { %v7818_v43 = vpop.f32.mrb[15].mxu1  ;;  %v2104_v4 = vsel %vm1981_vm4, %v2099_v19, %v2103_v21 }
 0x214   : > { %v9202_v43 = vld [vmem:[%s9463_s14 + $0x10] sm:$0xff]  }
 0x215   : > { %7924 = vmatmul.mubr.msk.bf16.gmra.mrb[120].mxu1 %vm755_vm1, %v10020_v11  ;;  %v2108_v11 = vrot.slane %v745_v34, 2  ;;  %v9200_v34 = vld [vmem:[%s9463_s14] sm:$0xff]  }
 0x216   : > { %8156 = vmatmul.mubr.msk.bf16.gmra.mrb[100].mxu0 %vm755_vm1, %v2088_v60  ;;  %v2552_v38 = vrot.slane %v9200_v34, 2  ;;  %v9201_v60 = vld [vmem:[%s9463_s14 + $0x8] sm:$0xff]  }
 0x217   : > { %8159 = vmatprep.mubr.msk.bf16.mxu0 %vm9332_vm0, %v13345_v0  ;;  %v2109_v28 = vor.u32 %v2108_v11, %v2107_v7  ;;  %v2553_v33 = vrot.slane %v9201_v60, 2  ;;  %v9204_v60 = vld [vmem:[%s9463_s14 + $0x40] sm:$0xff]  }
 0x218   : > { %v10427_v44 = vpop.f32.mrb[16].mxu1 }
 0x219   : > { %v7821_v16 = vpop.f32.mrb[17].mxu1  ;;  %v2110_v5 = vsel %vm1981_vm4, %v2103_v21, %v2109_v28  ;;  %v2554_v52 = vsel %vm2551_vm5, %v2552_v38, %v2553_v33  ;;  %v9203_v28 = vld [vmem:[%s9463_s14 + $0x38] sm:$0xff]  }
 0x21a   : > { %v10430_v57 = vpop.f32.mrb[18].mxu1 }
 0x21b   : > { %v7822_v6 = vpop.f32.mrb[19].mxu1 }
 0x21e   : > { %8160 = vmatmul.mubr.msk.bf16.gmra.mrb[104].mxu0 %vm755_vm1, %v2092_v63  ;;  %v2555_v63 = vrot.slane %v9202_v43, 2 }
 0x21f   : > { %8163 = vmatprep.mubr.msk.bf16.mxu0 %vm9332_vm0, %v13345_v0 }
 0x220   : > { %v10439_v42 = vpop.f32.mrb[20].mxu1  ;;  %v2556_v49 = vsel %vm2551_vm5, %v2553_v33, %v2555_v63  ;;  %v2567_v33 = vrot.slane %v9204_v60, 2 }
 0x221   : > { %v7825_v62 = vpop.f32.mrb[21].mxu1 }
 0x222   : > { %v10442_v2 = vpop.f32.mrb[22].mxu1  ;;  %v2559_v62 = vrot.slane %v10080_v25, 2 }
 0x223   : > { %v7826_v23 = vpop.f32.mrb[23].mxu1 }
 0x224   : > { %v2560_v23 = vsel %vm2551_vm5, %v2557_v59, %v2559_v62 }
 0x226   : > { %8164 = vmatmul.mubr.msk.bf16.gmra.mrb[108].mxu0 %vm755_vm1, %v2096_v14  ;;  %v2558_v14 = vsel %vm2551_vm5, %v2555_v63, %v2557_v59 }
 0x227   : > { %8167 = vmatprep.mubr.msk.bf16.mxu0 %vm9332_vm0, %v13345_v0 }
 0x228   : > { %v10451_v32 = vpop.f32.mrb[24].mxu1 }
 0x229   : > { %v7829_v46 = vpop.f32.mrb[25].mxu1 }
 0x22a   : > { %v10454_v35 = vpop.f32.mrb[26].mxu1  ;;  %v2562_v46 = vsel %vm2551_vm5, %v2559_v62, %v2561_v50  ;;  %v9206_v62 = vld [vmem:[%s9463_s14 + $0x50] sm:$0xff]  }
 0x22b   : > { %v7830_v30 = vpop.f32.mrb[27].mxu1 }
 0x22c   : > { %v2563_v30 = vrot.slane %v10114_v48, 2 }
 0x22e   : > { %8168 = vmatmul.mubr.msk.bf16.gmra.mrb[112].mxu0 %vm755_vm1, %v2100_v13  ;;  %v2564_v58 = vsel %vm2551_vm5, %v2561_v50, %v2563_v30 }
 0x22f   : > { %8171 = vmatprep.mubr.msk.bf16.mxu0 %vm9332_vm0, %v13345_v0 }
 0x230   : > { %v10462_v15 = vpop.f32.mrb[28].mxu1 }
 0x231   : > { %v7833_v45 = vpop.f32.mrb[29].mxu1 }
 0x232   : > { %v10465_v39 = vpop.f32.mrb[30].mxu1 }
 0x233   : > { %v7834_v31 = vpop.f32.mrb[31].mxu1 }
 0x234   : > { %v2565_v31 = vrot.slane %v9203_v28, 2 }
 0x236   : > { %8172 = vmatmul.mubr.msk.bf16.gmra.mrb[116].mxu0 %vm755_vm1, %v2104_v4  ;;  %v2566_v48 = vsel %vm2551_vm5, %v2563_v30, %v2565_v31 }
 0x237   : > { %8175 = vmatprep.mubr.msk.bf16.mxu0 %vm9332_vm0, %v13345_v0 }
 0x238   : > { %v10470_v40 = vpop.f32.mrb[32].mxu1 }
 0x239   : > { %v7837_v47 = vpop.f32.mrb[33].mxu1 }
 0x23a   : > { %v10473_v26 = vpop.f32.mrb[34].mxu1 }
 0x23b   : > { %v7838_v36 = vpop.f32.mrb[35].mxu1 }
 0x23e   : > { %8176 = vmatmul.mubr.msk.bf16.gmra.mrb[120].mxu0 %vm755_vm1, %v2110_v5 }
 0x23f   : > { %8181 = vmatprep.mubr.msk.bf16.mxu0 %vm9332_vm0, %v13345_v0 }
 0x240   : > { %v10480_v22 = vpop.f32.mrb[36].mxu1 }
 0x241   : > { %v7841_v1 = vpop.f32.mrb[37].mxu1 }
 0x242   : > { %v10483_v24 = vpop.f32.mrb[38].mxu1 }
 0x243   : > { %v7842_v12 = vpop.f32.mrb[39].mxu1 }
 0x244   : > { %v9205_v12 = vld [vmem:[%s9463_s14 + $0x48] sm:$0xff]  }
 0x246   : > { %8182 = vmatmul.mubr.msk.bf16.vlgmr.msra.gmra.mrb[0].mxu0 %vm755_vm1, %v2554_v52  ;;  %v2568_v52 = vsel %vm2551_vm5, %v2565_v31, %v2567_v33 }
 0x247   : > { %8185 = vmatprep.mubr.msk.bf16.mxu0 %vm9332_vm0, %v13345_v0 }
 0x248   : > { %v10489_v17 = vpop.f32.mrb[40].mxu1 }
 0x249   : > { %v7845_v10 = vpop.f32.mrb[41].mxu1 }
 0x24a   : > { %v10492_v16 = vpop.f32.mrb[42].mxu1 }
 0x24b   : > { %v7846_v6 = vpop.f32.mrb[43].mxu1 }
 0x24e   : > { %8186 = vmatmul.mubr.msk.bf16.gmra.mrb[4].mxu0 %vm755_vm1, %v2556_v49  ;;  %v2569_v49 = vrot.slane %v9205_v12, 2 }
 0x24f   : > { %8189 = vmatprep.mubr.msk.bf16.mxu0 %vm9332_vm0, %v13345_v0 }
 0x250   : > { %v10498_v3 = vpop.f32.mrb[44].mxu1  ;;  %v2570_v59 = vsel %vm2551_vm5, %v2567_v33, %v2569_v49 }
 0x251   : > { %13532 = vst [vmem:[#allocation8_spill] sm:$0xff] %v10498_v3  ;;  %v7849_v29 = vpop.f32.mrb[45].mxu1 }
 0x252   : > { %v10501_v8 = vpop.f32.mrb[46].mxu1 }
 0x253   : > { %13533 = vst [vmem:[#allocation9_spill] sm:$0xff] %v10501_v8  ;;  %v7850_v19 = vpop.f32.mrb[47].mxu1 }
 0x254   : > { %v2571_v19 = vrot.slane %v9206_v62, 2 }
 0x256   : > { %8190 = vmatmul.mubr.msk.bf16.gmra.mrb[8].mxu0 %vm755_vm1, %v2558_v14 }
 0x257   : > { %8193 = vmatprep.mubr.msk.bf16.mxu0 %vm9332_vm0, %v13345_v0 }
 0x258   : > { %v10507_v13 = vpop.f32.mrb[48].mxu1 }
 0x259   : > { %13534 = vst [vmem:[#allocation10_spill] sm:$0xff] %v10507_v13  ;;  %v7853_v61 = vpop.f32.mrb[49].mxu1 }
 0x25a   : > { %v10510_v53 = vpop.f32.mrb[50].mxu1  ;;  %v2572_v61 = vsel %vm2551_vm5, %v2569_v49, %v2571_v19 }
 0x25b   : > { %13535 = vst [vmem:[#allocation11_spill] sm:$0xff] %v10510_v53  ;;  %v7854_v9 = vpop.f32.mrb[51].mxu1 }
 0x25e   : > { %8194 = vmatmul.mubr.msk.bf16.gmra.mrb[12].mxu0 %vm755_vm1, %v2560_v23 }
 0x25f   : > { %8197 = vmatprep.mubr.msk.bf16.mxu0 %vm9332_vm0, %v13345_v0 }
 0x260   : > { %v10516_v25 = vpop.f32.mrb[52].mxu1 }
 0x261   : > { %13536 = vst [vmem:[#allocation12_spill] sm:$0xff] %v10516_v25  ;;  %v7857_v21 = vpop.f32.mrb[53].mxu1 }
 0x262   : > { %v10519_v37 = vpop.f32.mrb[54].mxu1  ;;  %v9207_v21 = vld [vmem:[%s9463_s14 + $0x58] sm:$0xff]  }
 0x263   : > { %13537 = vst [vmem:[#allocation13_spill] sm:$0xff] %v10519_v37  ;;  %v7858_v4 = vpop.f32.mrb[55].mxu1  ;;  %v2573_v30 = vrot.slane %v9207_v21, 2 }
 0x266   : > { %8198 = vmatmul.mubr.msk.bf16.gmra.mrb[16].mxu0 %vm755_vm1, %v2562_v46 }
 0x267   : > { %8201 = vmatprep.mubr.msk.bf16.mxu0 %vm9332_vm0, %v13345_v0 }
 0x268   : > { %v10525_v7 = vpop.f32.mrb[56].mxu1 }
 0x269   : > { %13538 = vst [vmem:[#allocation14_spill] sm:$0xff] %v10525_v7  ;;  %v7861_v11 = vpop.f32.mrb[57].mxu1 }
 0x26a   : > { %v10528_v45 = vpop.f32.mrb[58].mxu1 }
 0x26b   : > { %13539 = vst [vmem:[#allocation15_spill] sm:$0xff] %v10528_v45  ;;  %v7862_v5 = vpop.f32.mrb[59].mxu1 }
 0x26c   : > { %v9208_v5 = vld [vmem:[%s9463_s14 + $0x60] sm:$0xff]  }
 0x26e   : > { %8202 = vmatmul.mubr.msk.bf16.gmra.mrb[20].mxu0 %vm755_vm1, %v2564_v58  ;;  %v2574_v58 = vsel %vm2551_vm5, %v2571_v19, %v2573_v30  ;;  %v9210_v19 = vld [vmem:[%s9463_s14 + $0x70] sm:$0xff]  }
 0x26f   : > { %8205 = vmatprep.mubr.msk.bf16.mxu0 %vm9332_vm0, %v13345_v0 }
 0x270   : > { %v10534_v47 = vpop.f32.mrb[60].mxu1 }
 0x271   : > { %13540 = vst [vmem:[#allocation16_spill] sm:$0xff] %v10534_v47  ;;  %v7865_v34 = vpop.f32.mrb[61].mxu1 }
 0x272   : > { %v10537_v38 = vpop.f32.mrb[62].mxu1 }
 0x273   : > { %13541 = vst [vmem:[#allocation17_spill] sm:$0xff] %v10537_v38  ;;  %v7866_v36 = vpop.f32.mrb[63].mxu1 }
 0x276   : > { %8206 = vmatmul.mubr.msk.bf16.gmra.mrb[24].mxu0 %vm755_vm1, %v2566_v48  ;;  %v2575_v48 = vrot.slane %v9208_v5, 2 }
 0x277   : > { %8209 = vmatprep.mubr.msk.bf16.mxu0 %vm9332_vm0, %v13345_v0 }
 0x278   : > { %v10543_v1 = vpop.f32.mrb[64].mxu1  ;;  %v2576_v60 = vsel %vm2551_vm5, %v2573_v30, %v2575_v48 }
 0x279   : > { %13542 = vst [vmem:[#allocation18_spill] sm:$0xff] %v10543_v1  ;;  %v7869_v43 = vpop.f32.mrb[65].mxu1 }
 0x27a   : > { %v10546_v63 = vpop.f32.mrb[66].mxu1  ;;  %v9209_v43 = vld [vmem:[%s9463_s14 + $0x68] sm:$0xff]  }
 0x27b   : > { %13543 = vst [vmem:[#allocation19_spill] sm:$0xff] %v10546_v63  ;;  %v7870_v10 = vpop.f32.mrb[67].mxu1  ;;  %v2577_v12 = vrot.slane %v9209_v43, 2  ;;  %v9212_v43 = vld [vmem:[%s9463_s14 + $0x80] sm:$0xff]  }
 0x27d   : > { %v2578_v10 = vsel %vm2551_vm5, %v2575_v48, %v2577_v12 }
 0x27e   : > { %8210 = vmatmul.mubr.msk.bf16.gmra.mrb[28].mxu0 %vm755_vm1, %v2568_v52 }
 0x27f   : > { %8213 = vmatprep.mubr.msk.bf16.mxu0 %vm9332_vm0, %v13345_v0 }
 0x280   : > { %v10552_v6 = vpop.f32.mrb[68].mxu1 }
 0x281   : > { %13544 = vst [vmem:[#allocation20_spill] sm:$0xff] %v10552_v6  ;;  %v7873_v14 = vpop.f32.mrb[69].mxu1 }
 0x282   : > { %v10555_v29 = vpop.f32.mrb[70].mxu1 }
 0x283   : > { %13545 = vst [vmem:[#allocation21_spill] sm:$0xff] %v10555_v29  ;;  %v7874_v23 = vpop.f32.mrb[71].mxu1 }
 0x284   : > { %v2579_v23 = vrot.slane %v9210_v19, 2 }
 0x286   : > { %8214 = vmatmul.mubr.msk.bf16.gmra.mrb[32].mxu0 %vm755_vm1, %v2570_v59 }
 0x287   : > { %8217 = vmatprep.mubr.msk.bf16.mxu0 %vm9332_vm0, %v13345_v0 }
 0x288   : > { %v10561_v50 = vpop.f32.mrb[72].mxu1 }
 0x289   : > { %13546 = vst [vmem:[#allocation22_spill] sm:$0xff] %v10561_v50  ;;  %v7877_v9 = vpop.f32.mrb[73].mxu1 }
 0x28a   : > { %v10564_v46 = vpop.f32.mrb[74].mxu1  ;;  %v2580_v9 = vsel %vm2551_vm5, %v2577_v12, %v2579_v23  ;;  %v2583_v12 = vrot.slane %v9212_v43, 2 }
 0x28b   : > { %13547 = vst [vmem:[#allocation23_spill] sm:$0xff] %v10564_v46  ;;  %v7878_v4 = vpop.f32.mrb[75].mxu1 }
 0x28e   : > { %8218 = vmatmul.mubr.msk.bf16.gmra.mrb[36].mxu0 %vm755_vm1, %v2572_v61 }
 0x28f   : > { %8221 = vmatprep.mubr.msk.bf16.mxu0 %vm9332_vm0, %v13345_v0 }
 0x290   : > { %v10570_v11 = vpop.f32.mrb[76].mxu1 }
 0x291   : > { %13548 = vst [vmem:[#allocation24_spill] sm:$0xff] %v10570_v11  ;;  %v7881_v28 = vpop.f32.mrb[77].mxu1 }
 0x292   : > { %v10573_v31 = vpop.f32.mrb[78].mxu1 }
 0x293   : > { %13549 = vst [vmem:[#allocation25_spill] sm:$0xff] %v10573_v31  ;;  %v7882_v34 = vpop.f32.mrb[79].mxu1 }
 0x296   : > { %8222 = vmatmul.mubr.msk.bf16.gmra.mrb[40].mxu0 %vm755_vm1, %v2574_v58  ;;  %v9211_v58 = vld [vmem:[%s9463_s14 + $0x78] sm:$0xff]  }
 0x297   : > { %8225 = vmatprep.mubr.msk.bf16.mxu0 %vm9332_vm0, %v13345_v0  ;;  %v2581_v28 = vrot.slane %v9211_v58, 2 }
 0x298   : > { %v10579_v33 = vpop.f32.mrb[80].mxu1 }
 0x299   : > { %13550 = vst [vmem:[#allocation26_spill] sm:$0xff] %v10579_v33  ;;  %v7885_v36 = vpop.f32.mrb[81].mxu1  ;;  %v2582_v48 = vsel %vm2551_vm5, %v2579_v23, %v2581_v28 }
 0x29a   : > { %v10582_v52 = vpop.f32.mrb[82].mxu1 }
 0x29b   : > { %13551 = vst [vmem:[#allocation27_spill] sm:$0xff] %v10582_v52  ;;  %v7886_v49 = vpop.f32.mrb[83].mxu1 }
 0x29e   : > { %8226 = vmatmul.mubr.msk.bf16.gmra.mrb[44].mxu0 %vm755_vm1, %v2576_v60 }
 0x29f   : > { %8229 = vmatprep.mubr.msk.bf16.mxu0 %vm9332_vm0, %v13345_v0 }
 0x2a0   : > { %v10588_v59 = vpop.f32.mrb[84].mxu1 }
 0x2a1   : > { %13552 = vst [vmem:[#allocation28_spill] sm:$0xff] %v10588_v59  ;;  %v7889_v14 = vpop.f32.mrb[85].mxu1 }
 0x2a2   : > { %v10591_v62 = vpop.f32.mrb[86].mxu1 }
 0x2a3   : > { %13553 = vst [vmem:[#allocation29_spill] sm:$0xff] %v10591_v62  ;;  %v7890_v61 = vpop.f32.mrb[87].mxu1 }
 0x2a4   : > { %v9213_v61 = vld [vmem:[%s9463_s14 + $0x88] sm:$0xff]  }
 0x2a6   : > { %8230 = vmatmul.mubr.msk.bf16.gmra.mrb[48].mxu0 %vm755_vm1, %v2578_v10  ;;  %v2584_v10 = vsel %vm2551_vm5, %v2581_v28, %v2583_v12 }
 0x2a7   : > { %8233 = vmatprep.mubr.msk.bf16.mxu0 %vm9332_vm0, %v13345_v0 }
 0x2a8   : > { %v10597_v21 = vpop.f32.mrb[88].mxu1 }
 0x2a9   : > { %13554 = vst [vmem:[#allocation30_spill] sm:$0xff] %v10597_v21  ;;  %v7893_v30 = vpop.f32.mrb[89].mxu1 }
 0x2aa   : > { %v10600_v4 = vpop.f32.mrb[90].mxu1 }
 0x2ab   : > { %13555 = vst [vmem:[#allocation31_spill] sm:$0xff] %v10600_v4  ;;  %v7894_v5 = vpop.f32.mrb[91].mxu1 }
 0x2ae   : > { %8234 = vmatmul.mubr.msk.bf16.gmra.mrb[52].mxu0 %vm755_vm1, %v2580_v9  ;;  %v2585_v9 = vrot.slane %v9213_v61, 2 }
 0x2af   : > { %8237 = vmatprep.mubr.msk.bf16.mxu0 %vm9332_vm0, %v13345_v0 }
 0x2b0   : > { %v10606_v34 = vpop.f32.mrb[92].mxu1  ;;  %v2586_v58 = vsel %vm2551_vm5, %v2583_v12, %v2585_v9 }
 0x2b1   : > { %13556 = vst [vmem:[#allocation32_spill] sm:$0xff] %v10606_v34  ;;  %v7897_v60 = vpop.f32.mrb[93].mxu1 }
 0x2b2   : > { %v10609_v36 = vpop.f32.mrb[94].mxu1  ;;  %v9214_v60 = vld [vmem:[%s9463_s14 + $0x90] sm:$0xff]  }
 0x2b3   : > { %13557 = vst [vmem:[#allocation33_spill] sm:$0xff] %v10609_v36  ;;  %v7898_v49 = vpop.f32.mrb[95].mxu1  ;;  %v2587_v43 = vrot.slane %v9214_v60, 2  ;;  %v9116_v60 = vld [vmem:[%s13300_s1 + $0x100] sm:$0xff]   ;;  %v10737_v36 = vld [vmem:[%s9463_s14 + $0xf0] sm:$0xff]  }
 0x2b4   : > { %8305 = vmatprep.subr.bf16.mxu1 %v9116_v60 }
 0x2b5   : > { %8306 = vmatpush3.bf16.msra.mxu1 %v9116_v60  ;;  %v9217_v60 = vld [vmem:[%s9463_s14 + $0xa8] sm:$0xff]  }
 0x2b6   : > { %8238 = vmatmul.mubr.msk.bf16.gmra.mrb[56].mxu0 %vm755_vm1, %v2582_v48 }
 0x2b7   : > { %8241 = vmatprep.mubr.msk.bf16.mxu0 %vm9332_vm0, %v13345_v0 }
 0x2b8   : > { %v10615_v14 = vpop.f32.mrb[96].mxu1 }
 0x2b9   : > { %13558 = vst [vmem:[#allocation34_spill] sm:$0xff] %v10615_v14  ;;  %v7901_v19 = vpop.f32.mrb[97].mxu1 }
 0x2ba   : > { %v10618_v23 = vpop.f32.mrb[98].mxu1 }
 0x2bb   : > { %13559 = vst [vmem:[#allocation35_spill] sm:$0xff] %v10618_v23  ;;  %v7902_v30 = vpop.f32.mrb[99].mxu1 }
 0x2bc   : > { %v9215_v30 = vld [vmem:[%s9463_s14 + $0x98] sm:$0xff]  }
 0x2be   : > { %8242 = vmatmul.mubr.msk.bf16.gmra.mrb[60].mxu0 %vm755_vm1, %v2584_v10  ;;  %v2588_v10 = vsel %vm2551_vm5, %v2585_v9, %v2587_v43 }
 0x2bf   : > { %8245 = vmatprep.mubr.msk.bf16.mxu0 %vm9332_vm0, %v13345_v0 }
 0x2c0   : > { %v10624_v5 = vpop.f32.mrb[100].mxu1 }
 0x2c1   : > { %13560 = vst [vmem:[#allocation36_spill] sm:$0xff] %v10624_v5  ;;  %v7905_v48 = vpop.f32.mrb[101].mxu1 }
 0x2c2   : > { %v10627_v28 = vpop.f32.mrb[102].mxu1 }
 0x2c3   : > { %13561 = vst [vmem:[#allocation37_spill] sm:$0xff] %v10627_v28  ;;  %v7906_v49 = vpop.f32.mrb[103].mxu1 }
 0x2c6   : > { %8246 = vmatmul.mubr.msk.bf16.gmra.mrb[64].mxu0 %vm755_vm1, %v2586_v58  ;;  %v2589_v58 = vrot.slane %v9215_v30, 2  ;;  %v9216_v30 = vld [vmem:[%s9463_s14 + $0xa0] sm:$0xff]  }
 0x2c7   : > { %8249 = vmatprep.mubr.msk.bf16.mxu0 %vm9332_vm0, %v13345_v0 }
 0x2c8   : > { %v10633_v19 = vpop.f32.mrb[104].mxu1  ;;  %v2590_v9 = vsel %vm2551_vm5, %v2587_v43, %v2589_v58 }
 0x2c9   : > { %13562 = vst [vmem:[#allocation38_spill] sm:$0xff] %v10633_v19  ;;  %v7909_v61 = vpop.f32.mrb[105].mxu1 }
 0x2ca   : > { %v10636_v12 = vpop.f32.mrb[106].mxu1 }
 0x2cb   : > { %13563 = vst [vmem:[#allocation39_spill] sm:$0xff] %v10636_v12  ;;  %v7910_v48 = vpop.f32.mrb[107].mxu1 }
 0x2cc   : > { %v2591_v48 = vrot.slane %v9216_v30, 2 }
 0x2ce   : > { %8250 = vmatmul.mubr.msk.bf16.gmra.mrb[68].mxu0 %vm755_vm1, %v2588_v10  ;;  %v2592_v19 = vsel %vm2551_vm5, %v2589_v58, %v2591_v48 }
 0x2cf   : > { %8253 = vmatprep.mubr.msk.bf16.mxu0 %vm9332_vm0, %v13345_v0 }
 0x2d0   : > { %v10645_v49 = vpop.f32.mrb[108].mxu1 }
 0x2d1   : > { %13564 = vst [vmem:[#allocation40_spill] sm:$0xff] %v10645_v49  ;;  %v7913_v61 = vpop.f32.mrb[109].mxu1 }
 0x2d2   : > { %v10648_v10 = vpop.f32.mrb[110].mxu1 }
 0x2d3   : > { %13565 = vst [vmem:[#allocation41_spill] sm:$0xff] %v10648_v10  ;;  %v7914_v12 = vpop.f32.mrb[111].mxu1 }
 0x2d6   : > { %8254 = vmatmul.mubr.msk.bf16.gmra.mrb[72].mxu0 %vm755_vm1, %v2590_v9  ;;  %v2593_v9 = vrot.slane %v9217_v60, 2 }
 0x2d7   : > { %8257 = vmatprep.mubr.msk.bf16.mxu0 %vm9332_vm0, %v13345_v0 }
 0x2d8   : > { %v10654_v43 = vpop.f32.mrb[112].mxu1  ;;  %v2594_v28 = vsel %vm2551_vm5, %v2591_v48, %v2593_v9 }
 0x2d9   : > { %13566 = vst [vmem:[#allocation42_spill] sm:$0xff] %v10654_v43  ;;  %v7917_v49 = vpop.f32.mrb[113].mxu1 }
 0x2da   : > { %v10657_v61 = vpop.f32.mrb[114].mxu1 }
 0x2db   : > { %13567 = vst [vmem:[#allocation43_spill] sm:$0xff] %v10657_v61  ;;  %v7918_v10 = vpop.f32.mrb[115].mxu1 }
 0x2dc   : > { %v9117_v10 = vld [vmem:[%s13300_s1 + $0x108] sm:$0xff]  }
 0x2dd   : > { %8307 = vmatprep.subr.bf16.mxu1 %v9117_v10 }
 0x2de   : > { %8258 = vmatmul.mubr.msk.bf16.gmra.mrb[76].mxu0 %vm755_vm1, %v2592_v19  ;;  %v9218_v19 = vld [vmem:[%s9463_s14 + $0xb0] sm:$0xff]   ;;  %8308 = vmatpush3.bf16.msra.mxu1 %v9117_v10 }
 0x2df   : > { %8261 = vmatprep.mubr.msk.bf16.mxu0 %vm9332_vm0, %v13345_v0  ;;  %v2595_v49 = vrot.slane %v9218_v19, 2 }
 0x2e0   : > { %v10663_v30 = vpop.f32.mrb[116].mxu1 }
 0x2e1   : > { %13568 = vst [vmem:[#allocation44_spill] sm:$0xff] %v10663_v30  ;;  %v7921_v12 = vpop.f32.mrb[117].mxu1  ;;  %v2596_v48 = vsel %vm2551_vm5, %v2593_v9, %v2595_v49  ;;  %v9220_v9 = vld [vmem:[%s9463_s14 + $0xc0] sm:$0xff]  }
 0x2e2   : > { %v10666_v58 = vpop.f32.mrb[118].mxu1  ;;  %v2599_v10 = vrot.slane %v9220_v9, 2 }
 0x2e3   : > { %13569 = vst [vmem:[#allocation45_spill] sm:$0xff] %v10666_v58  ;;  %v7922_v61 = vpop.f32.mrb[119].mxu1 }
 0x2e4   : > { %v9219_v61 = vld [vmem:[%s9463_s14 + $0xb8] sm:$0xff]  }
 0x2e5   : > { %v2597_v19 = vrot.slane %v9219_v61, 2 }
 0x2e6   : > { %8262 = vmatmul.mubr.msk.bf16.gmra.mrb[80].mxu0 %vm755_vm1, %v2594_v28 }
 0x2e7   : > { %8265 = vmatprep.mubr.msk.bf16.mxu0 %vm9332_vm0, %v13345_v0  ;;  %v2598_v30 = vsel %vm2551_vm5, %v2595_v49, %v2597_v19 }
 0x2e8   : > { %v10675_v60 = vpop.f32.mrb[120].mxu1 }
 0x2e9   : > { %13570 = vst [vmem:[#allocation46_spill] sm:$0xff] %v10675_v60  ;;  %v7925_v12 = vpop.f32.mrb[121].mxu1 }
 0x2ea   : > { %v1474_v28 = vpop.f32.mrb[122].mxu1  ;;  %v9221_v12 = vld [vmem:[%s9463_s14 + $0xc8] sm:$0xff]  }
 0x2eb   : > { %v7926_v58 = vpop.f32.mrb[123].mxu1 }
 0x2ec   : > { %v2601_v58 = vrot.slane %v9221_v12, 2 }
 0x2ee   : > { %8266 = vmatmul.mubr.msk.bf16.gmra.mrb[84].mxu0 %vm755_vm1, %v2596_v48  ;;  %v2600_v48 = vsel %vm2551_vm5, %v2597_v19, %v2599_v10  ;;  %v2602_v49 = vsel %vm2551_vm5, %v2599_v10, %v2601_v58  ;;  %v9223_v19 = vld [vmem:[%s9463_s14 + $0xd8] sm:$0xff]   ;;  %v9224_v10 = vld [vmem:[%s9463_s14 + $0xe0] sm:$0xff]  }
 0x2ef   : > { %8269 = vmatprep.mubr.msk.bf16.mxu0 %vm9332_vm0, %v13345_v0  ;;  %v2605_v9 = vrot.slane %v9223_v19, 2  ;;  %v2607_v12 = vrot.slane %v9224_v10, 2 }
 0x2f6   : > { %8270 = vmatmul.mubr.msk.bf16.gmra.mrb[88].mxu0 %vm755_vm1, %v2598_v30  ;;  %v9222_v30 = vld [vmem:[%s9463_s14 + $0xd0] sm:$0xff]  }
 0x2f7   : > { %8273 = vmatprep.mubr.msk.bf16.mxu0 %vm9332_vm0, %v13345_v0  ;;  %v2603_v28 = vrot.slane %v9222_v30, 2 }
 0x2f9   : > { %v2604_v61 = vsel %vm2551_vm5, %v2601_v58, %v2603_v28  ;;  %v10709_v58 = vld [vmem:[%s13301_s2] ss:$0 sm:$0xff] }
 0x2fe   : > { %8274 = vmatmul.mubr.msk.bf16.gmra.mrb[92].mxu0 %vm755_vm1, %v2600_v48  ;;  %v2606_v48 = vsel %vm2551_vm5, %v2603_v28, %v2605_v9  ;;  %v10715_v28 = vld [vmem:[%s13302_s3] ss:$0 sm:$0xff] }
 0x2ff   : > { %8277 = vmatprep.mubr.msk.bf16.mxu0 %vm9332_vm0, %v13345_v0 }
 0x306   : > { %8278 = vmatmul.mubr.msk.bf16.gmra.mrb[96].mxu0 %vm755_vm1, %v2602_v49 }
 0x307   : > { %8281 = vmatprep.mubr.msk.bf16.mxu0 %vm9332_vm0, %v13345_v0 }
 0x30e   : > { %8282 = vmatmul.mubr.msk.bf16.gmra.mrb[100].mxu0 %vm755_vm1, %v2604_v61 }
 0x30f   : > { %8285 = vmatprep.mubr.msk.bf16.mxu0 %vm9332_vm0, %v13345_v0 }
 0x316   : > { %8286 = vmatmul.mubr.msk.bf16.gmra.mrb[104].mxu0 %vm755_vm1, %v2606_v48  ;;  %v2608_v48 = vsel %vm2551_vm5, %v2605_v9, %v2607_v12 }
 0x317   : > { %8289 = vmatprep.mubr.msk.bf16.mxu0 %vm9332_vm0, %v13345_v0 }
 0x319   : > { %v2748_v49 = vpop.f32.mrb[0].mxu0 }
 0x31a   : > { %v8543_v30 = vadd.f32 %v2748_v49, %v10258_v56  ;;  %v8183_v61 = vpop.f32.mrb[1].mxu0  ;;  %v13571_v56 = vmov 0.0   ;;  %v9225_v49 = vld [vmem:[%s9463_s14 + $0xe8] sm:$0xff]  }
 0x31b   : > { %v2751_v19 = vpop.f32.mrb[2].mxu0  ;;  %v2609_v61 = vrot.slane %v9225_v49, 2 }
 0x31c   : > { %v3061_v10 = vmul.f32 %v8543_v30, %v10709_v58  ;;  %v8544_v0 = vadd.f32 %v2751_v19, %v10262_v51  ;;  %v8184_v60 = vpop.f32.mrb[3].mxu0  ;;  %v9118_v51 = vld [vmem:[%s13300_s1 + $0x110] sm:$0xff]  }
 0x31d   : > { %8309 = vmatprep.subr.bf16.mxu1 %v9118_v51 }
 0x31e   : > { %v3126_v43 = vadd.f32 %v10715_v28, %v3061_v10  ;;  %v3062_v5 = vmul.f32 %v8544_v0, %v10709_v58  ;;  %8290 = vmatmul.mubr.msk.bf16.gmra.mrb[108].mxu0 %vm755_vm1, %v2608_v48  ;;  %v9119_v0 = vld [vmem:[%s13300_s1 + $0x118] sm:$0xff]   ;;  %8310 = vmatpush3.bf16.msra.mxu1 %v9118_v51 }
 0x31f   : > { %8293 = vmatprep.mubr.msk.bf16.mxu0 %vm9332_vm0, %v13571_v56  ;;  %8311 = vmatprep.subr.bf16.mxu1 %v9119_v0 }
 0x320   : > { %v3187_v23 = vmax.f32 %v3126_v43, 0.0  ;;  %v3127_v9 = vadd.f32 %v10715_v28, %v3062_v5  ;;  %v2610_v5 = vsel %vm2551_vm5, %v2607_v12, %v2609_v61 }
 0x321   : > { %v2756_v60 = vpop.f32.mrb[4].mxu0 }
 0x322   : > { %v3309_v30 = vcombine.high %v3187_v23, %v3187_v23  ;;  %v3432_v19 = vsel %vm3431_vm6, %v3187_v23, -inf  ;;  %v3188_v48 = vmax.f32 %v3127_v9, 0.0  ;;  %v8545_v10 = vadd.f32 %v2756_v60, %v10274_v27  ;;  %v8187_v14 = vpop.f32.mrb[5].mxu0  ;;  %v9120_v27 = vld [vmem:[%s13300_s1 + $0x120] sm:$0xff]   ;;  %8312 = vmatpush3.bf16.msra.mxu1 %v9119_v0 }
 0x323   : > { %v3433_v43 = vrot.slane %v3432_v19, 4  ;;  %v2759_v49 = vpop.f32.mrb[6].mxu0  ;;  %8313 = vmatprep.subr.bf16.mxu1 %v9120_v27 }
 0x324   : > { %v3439_v4 = vsel %vm3431_vm6, %v3309_v30, -inf  ;;  %v3310_v21 = vcombine.high %v3188_v48, %v3188_v48  ;;  %v3446_v62 = vsel %vm3431_vm6, %v3188_v48, -inf  ;;  %v3063_v23 = vmul.f32 %v8545_v10, %v10709_v58  ;;  %v8188_v9 = vpop.f32.mrb[7].mxu0 }
 0x325   : > { %v3434_v14 = vmax.f32 %v3432_v19, %v3433_v43  ;;  %v3440_v12 = vrot.slane %v3439_v4, 4  ;;  %v3447_v60 = vrot.slane %v3446_v62, 4  ;;  %v8546_v59 = vadd.f32 %v2759_v49, %v10278_v20 }
 0x326   : > { %v3453_v51 = vsel %vm3431_vm6, %v3310_v21, -inf  ;;  %v3128_v30 = vadd.f32 %v10715_v28, %v3063_v23  ;;  %8294 = vmatmul.mubr.msk.bf16.gmra.mrb[112].mxu0 %vm755_vm1, %v2610_v5  ;;  %v13572_v43 = vrot.slane %v10737_v36, 2  ;;  %8314 = vmatpush3.bf16.msra.mxu1 %v9120_v27 }
 0x327   : > { %v3435_v48 = vrot.slane %v3434_v14, 2  ;;  %v3441_v34 = vmax.f32 %v3439_v4, %v3440_v12  ;;  %v3448_v10 = vmax.f32 %v3446_v62, %v3447_v60  ;;  %v3454_v9 = vrot.slane %v3453_v51, 4  ;;  %8297 = vmatprep.mubr.msk.bf16.mxu0 %vm9332_vm0, %v13571_v56 }
 0x328   : > { %v3189_v52 = vmax.f32 %v3128_v30, 0.0  ;;  %v3064_v19 = vmul.f32 %v8546_v59, %v10709_v58  ;;  %v2612_v20 = vsel %vm2551_vm5, %v2609_v61, %v13572_v43  ;;  %v9227_v43 = vld [vmem:[%s9463_s14 + $0xf8] ss:$0 sps:$4 sm:$0x33]  }
 0x329   : > { %v3436_v21 = vmax.f32 %v3434_v14, %v3435_v48  ;;  %v3442_v49 = vrot.slane %v3441_v34, 2  ;;  %v3449_v23 = vrot.slane %v3448_v10, 2  ;;  %v3455_v5 = vmax.f32 %v3453_v51, %v3454_v9  ;;  %v2764_v33 = vpop.f32.mrb[8].mxu0 }
 0x32a   : > { %v3311_v62 = vcombine.high %v3189_v52, %v3189_v52  ;;  %v3460_v4 = vsel %vm3431_vm6, %v3189_v52, -inf  ;;  %v3129_v12 = vadd.f32 %v10715_v28, %v3064_v19  ;;  %v8547_v0 = vadd.f32 %v2764_v33, %v10290_v54  ;;  %v8191_v60 = vpop.f32.mrb[9].mxu0  ;;  %v9121_v52 = vld [vmem:[%s13300_s1 + $0x128] sm:$0xff]  }
 0x32b   : > { %v3437_v59 = vrot.slane %v3436_v21, 1  ;;  %v3443_v30 = vmax.f32 %v3441_v34, %v3442_v49  ;;  %v3450_v31 = vmax.f32 %v3448_v10, %v3449_v23  ;;  %v3456_v11 = vrot.slane %v3455_v5, 2  ;;  %v2767_v61 = vpop.f32.mrb[10].mxu0  ;;  %8315 = vmatprep.subr.bf16.mxu1 %v9121_v52 }
 0x32c   : > { %v3461_v14 = vrot.slane %v3460_v4, 4  ;;  %v3467_v48 = vsel %vm3431_vm6, %v3311_v62, -inf  ;;  %v3190_v51 = vmax.f32 %v3129_v12, 0.0  ;;  %v8192_v9 = vpop.f32.mrb[11].mxu0  ;;  %v2613_v46 = vrot.slane %v9227_v43, 2  ;;  %8316 = vmatpush3.bf16.msra.mxu1 %v9121_v52 }
 0x32d   : > { %v3438_v19 = vmax.f32 %v3436_v21, %v3437_v59  ;;  %v3444_v54 = vrot.slane %v3443_v30, 1  ;;  %v3451_v33 = vrot.slane %v3450_v31, 1  ;;  %v3457_v60 = vmax.f32 %v3455_v5, %v3456_v11  ;;  %v9122_v11 = vld [vmem:[%s13300_s1 + $0x130] sm:$0xff]  }
 0x32e   : > { %v3462_v34 = vmax.f32 %v3460_v4, %v3461_v14  ;;  %v3468_v10 = vrot.slane %v3467_v48, 4  ;;  %v3312_v49 = vcombine.high %v3190_v51, %v3190_v51  ;;  %v3065_v27 = vmul.f32 %v8547_v0, %v10709_v58  ;;  %8298 = vmatmul.mubr.msk.bf16.gmra.mrb[116].mxu0 %vm755_vm1, %v2612_v20  ;;  %8317 = vmatprep.subr.bf16.mxu1 %v9122_v11 }
 0x32f   : > { %v3445_v23 = vmax.f32 %v3443_v30, %v3444_v54  ;;  %v4286_v62 = vpack.c.bf16 %v3438_v19, %v3438_v19  ;;  %v3458_v12 = vrot.slane %v3457_v60, 1  ;;  %v3474_v9 = vsel %vm3431_vm6, %v3190_v51, -inf  ;;  %8301 = vmatprep.mubr.msk.bf16.mxu0 %vm9332_vm0, %v13571_v56 }
 0x330   : > { %v3452_v21 = vmax.f32 %v3450_v31, %v3451_v33  ;;  %v3463_v4 = vrot.slane %v3462_v34, 2  ;;  %v3469_v20 = vmax.f32 %v3467_v48, %v3468_v10  ;;  %v3475_v59 = vrot.slane %v3474_v9, 4  ;;  %8318 = vmatpush3.bf16.msra.mxu1 %v9122_v11  ;;  %v9123_v48 = vld [vmem:[%s13300_s1 + $0x138] sm:$0xff]  }
 0x331   : > { %v4287_v5 = vpack.c.bf16 %v3445_v23, %v3445_v23  ;;  %v2772_v0 = vpop.f32.mrb[12].mxu0  ;;  %v3481_v30 = vsel %vm3431_vm6, %v3312_v49, -inf  ;;  %v13573_v51 = vrot.slane %v10737_v36, 2  ;;  %v4970_v31 = vunpack.c.l.b16 %v4286_v62  ;;  %8319 = vmatprep.subr.bf16.mxu1 %v9123_v48 }
 0x332   : > { %v8195_v14 = vpop.f32.mrb[13].mxu0  ;;  %v3459_v19 = vmax.f32 %v3457_v60, %v3458_v12  ;;  %v3130_v54 = vadd.f32 %v10715_v28, %v3065_v27  ;;  %v4288_v23 = vpack.c.bf16 %v3452_v21, %v3452_v21  ;;  %v3464_v36 = vmax.f32 %v3462_v34, %v3463_v4 }
 0x333   : > { %v2614_v43 = vsel %vm2551_vm5, %v13573_v51, %v2613_v46  ;;  %v4577_v52 = vunpack.c.l.b16 %v4287_v5  ;;  %v2775_v33 = vpop.f32.mrb[14].mxu0  ;;  %v3470_v46 = vrot.slane %v3469_v20, 2  ;;  %v3476_v14 = vmax.f32 %v3474_v9, %v3475_v59 }
 0x334   : > { %v8196_v56 = vpop.f32.mrb[15].mxu0  ;;  %v3191_v49 = vmax.f32 %v3130_v54, 0.0  ;;  %v3482_v5 = vrot.slane %v3481_v30, 4  ;;  %v4289_v60 = vpack.c.bf16 %v3459_v19, %v3459_v19  ;;  %v8548_v62 = vadd.f32 %v2767_v61, %v10294_v18  ;;  %8320 = vmatpush3.bf16.msra.mxu1 %v9123_v48 }
 0x335   : > { %v10781_v10 = vsel %vm4697_vm7, %v4577_v52, %v4970_v31  ;;  %v10785_v56 = vunpack.c.l.b16 %v4288_v23  ;;  %v3465_v12 = vrot.slane %v3464_v36, 1  ;;  %v8549_v34 = vadd.f32 %v2772_v0, %v10413_v55 }
 0x336   : > { %13574 = vst [vmem:[#allocation47_spill] sm:$0xff] %v10781_v10  ;;  %8302 = vmatmul.mubr.msk.bf16.gmra.mrb[120].mxu0 %vm755_vm1, %v2614_v43  ;;  %v3313_v27 = vcombine.high %v3191_v49, %v3191_v49  ;;  %v3066_v11 = vmul.f32 %v8548_v62, %v10709_v58  ;;  %v3471_v9 = vmax.f32 %v3469_v20, %v3470_v46  ;;  %v3477_v59 = vrot.slane %v3476_v14, 2 }
 0x337   : > { %13575 = vst [vmem:[#allocation48_spill] sm:$0xff] %v10785_v56  ;;  %v10790_v51 = vmax.f32 %v3481_v30, %v3482_v5  ;;  %v10792_v31 = vunpack.c.l.b16 %v4289_v60  ;;  %v3067_v61 = vmul.f32 %v8549_v34, %v10709_v58  ;;  %v10798_v23 = vsel %vm4697_vm7, %v10785_v56, %v4577_v52 }
 0x338   : > { %v3495_v21 = vsel %vm3431_vm6, %v3313_v27, -inf  ;;  %v3131_v18 = vadd.f32 %v10715_v28, %v3066_v11  ;;  %v3488_v55 = vsel %vm3431_vm6, %v3191_v49, -inf  ;;  %v8550_v0 = vadd.f32 %v2775_v33, %v10416_v41 }
 0x339   : > { %v2780_v4 = vpop.f32.mrb[16].mxu0  ;;  %13576 = vst [vmem:[#allocation49_spill] sm:$0xff] %v10792_v31  ;;  %v3496_v19 = vrot.slane %v3495_v21, 4  ;;  %v10803_v48 = vmax.f32 %v3464_v36, %v3465_v12  ;;  %v3132_v60 = vadd.f32 %v10715_v28, %v3067_v61  ;;  %v3478_v27 = vmax.f32 %v3476_v14, %v3477_v59 }
 0x33a   : > { %v8199_v43 = vpop.f32.mrb[17].mxu0  ;;  %v8551_v20 = vadd.f32 %v2780_v4, %v10427_v44  ;;  %v3192_v5 = vmax.f32 %v3131_v18, 0.0  ;;  %v3068_v62 = vmul.f32 %v8550_v0, %v10709_v58  ;;  %v3489_v34 = vrot.slane %v3488_v55, 4 }
 0x33b   : > { %v2783_v54 = vpop.f32.mrb[18].mxu0  ;;  %v3497_v46 = vmax.f32 %v3495_v21, %v3496_v19  ;;  %v3193_v33 = vmax.f32 %v3132_v60, 0.0  ;;  %v3472_v21 = vrot.slane %v3471_v9, 1  ;;  %v3484_v14 = vrot.slane %v10790_v51, 2 }
 0x33c   : > { %v8200_v30 = vpop.f32.mrb[19].mxu0  ;;  %v3069_v11 = vmul.f32 %v8551_v20, %v10709_v58  ;;  %v8552_v52 = vadd.f32 %v2783_v54, %v10430_v57  ;;  %v3314_v43 = vcombine.high %v3192_v5, %v3192_v5  ;;  %v3502_v41 = vsel %vm3431_vm6, %v3192_v5, -inf }
 0x33d   : > { %v3498_v49 = vrot.slane %v3497_v46, 2  ;;  %v3503_v44 = vrot.slane %v3502_v41, 4  ;;  %v3133_v36 = vadd.f32 %v10715_v28, %v3068_v62  ;;  %v3315_v61 = vcombine.high %v3193_v33, %v3193_v33 }
 0x33e   : > { %v3134_v12 = vadd.f32 %v10715_v28, %v3069_v11  ;;  %v3509_v59 = vsel %vm3431_vm6, %v3314_v43, -inf  ;;  %v3516_v54 = vsel %vm3431_vm6, %v3193_v33, -inf  ;;  %v3479_v20 = vrot.slane %v3478_v27, 1 }
 0x33f   : > { %v3499_v4 = vmax.f32 %v3497_v46, %v3498_v49  ;;  %v3504_v57 = vmax.f32 %v3502_v41, %v3503_v44  ;;  %v3510_v18 = vrot.slane %v3509_v59, 4  ;;  %v3517_v30 = vrot.slane %v3516_v54, 4 }
 0x340   : > { %v3194_v5 = vmax.f32 %v3133_v36, 0.0  ;;  %v3195_v60 = vmax.f32 %v3134_v12, 0.0  ;;  %v3490_v11 = vmax.f32 %v3488_v55, %v3489_v34  ;;  %v3523_v46 = vsel %vm3431_vm6, %v3315_v61, -inf }
 0x341   : > { %v10814_v19 = vpop.f32.mrb[20].mxu0  ;;  %v3505_v10 = vrot.slane %v3504_v57, 2  ;;  %v3511_v50 = vmax.f32 %v3509_v59, %v3510_v18  ;;  %v3500_v43 = vrot.slane %v3499_v4, 1  ;;  %v3518_v29 = vmax.f32 %v3516_v54, %v3517_v30 }
 0x342   : > { %v8203_v0 = vpop.f32.mrb[21].mxu0  ;;  %v3524_v41 = vrot.slane %v3523_v46, 4  ;;  %v3316_v44 = vcombine.high %v3194_v5, %v3194_v5  ;;  %v3473_v6 = vmax.f32 %v3471_v9, %v3472_v21  ;;  %v3317_v38 = vcombine.high %v3195_v60, %v3195_v60 }
 0x343   : > { %v10817_v62 = vpop.f32.mrb[22].mxu0  ;;  %v3506_v63 = vmax.f32 %v3504_v57, %v3505_v10  ;;  %v3512_v33 = vrot.slane %v3511_v50, 2  ;;  %v3530_v0 = vsel %vm3431_vm6, %v3194_v5, -inf  ;;  %v3519_v1 = vrot.slane %v3518_v29, 2 }
 0x344   : > { %v8204_v49 = vpop.f32.mrb[23].mxu0  ;;  %v3525_v36 = vmax.f32 %v3523_v46, %v3524_v41  ;;  %v3531_v12 = vrot.slane %v3530_v0, 4  ;;  %v3480_v47 = vmax.f32 %v3478_v27, %v3479_v20  ;;  %v3491_v55 = vrot.slane %v3490_v11, 2 }
 0x345   : > { %v3507_v34 = vrot.slane %v3506_v63, 1  ;;  %v3513_v59 = vmax.f32 %v3511_v50, %v3512_v33  ;;  %v10824_v18 = vsel %vm4697_vm7, %v10792_v31, %v10785_v56  ;;  %v3501_v61 = vmax.f32 %v3499_v4, %v3500_v43 }
 0x346   : > { %13577 = vst [vmem:[#allocation50_spill] sm:$0xff] %v10824_v18  ;;  %v3537_v9 = vsel %vm3431_vm6, %v3316_v44, -inf  ;;  %v3070_v10 = vmul.f32 %v8552_v52, %v10709_v58  ;;  %v3520_v57 = vmax.f32 %v3518_v29, %v3519_v1  ;;  %v3526_v54 = vrot.slane %v3525_v36, 2 }
 0x347   : > { %v3532_v30 = vmax.f32 %v3530_v0, %v3531_v12  ;;  %v3544_v5 = vsel %vm3431_vm6, %v3195_v60, -inf  ;;  %v4290_v50 = vpack.c.bf16 %v10803_v48, %v10803_v48  ;;  %v3508_v20 = vmax.f32 %v3506_v63, %v3507_v34 }
 0x348   : > { %v3514_v46 = vrot.slane %v3513_v59, 1  ;;  %v3551_v49 = vsel %vm3431_vm6, %v3317_v38, -inf  ;;  %v4291_v4 = vpack.c.bf16 %v3473_v6, %v3473_v6  ;;  %v10833_v43 = vmax.f32 %v10790_v51, %v3484_v14 }
 0x349   : > { %v2796_v21 = vpop.f32.mrb[24].mxu0  ;;  %v4292_v52 = vpack.c.bf16 %v3480_v47, %v3480_v47  ;;  %v10835_v44 = vmax.f32 %v3490_v11, %v3491_v55  ;;  %v4295_v29 = vpack.c.bf16 %v3501_v61, %v3501_v61  ;;  %v3538_v33 = vrot.slane %v3537_v9, 4 }
 0x34a   : > { %v8207_v27 = vpop.f32.mrb[25].mxu0  ;;  %v3545_v60 = vrot.slane %v3544_v5, 4  ;;  %v3552_v0 = vrot.slane %v3551_v49, 4  ;;  %v3521_v12 = vrot.slane %v3520_v57, 1  ;;  %v3533_v48 = vrot.slane %v3532_v30, 2 }
 0x34b   : > { %v2799_v41 = vpop.f32.mrb[26].mxu0  ;;  %v3527_v27 = vmax.f32 %v3525_v36, %v3526_v54  ;;  %v3135_v63 = vadd.f32 %v10715_v28, %v3070_v10  ;;  %v10838_v34 = vunpack.c.l.b16 %v4290_v50  ;;  %v3515_v38 = vmax.f32 %v3513_v59, %v3514_v46 }
 0x34c   : > { %v8208_v1 = vpop.f32.mrb[27].mxu0  ;;  %v4296_v6 = vpack.c.bf16 %v3508_v20, %v3508_v20  ;;  %v3553_v18 = vmax.f32 %v3551_v49, %v3552_v0  ;;  %v10840_v51 = vunpack.c.l.b16 %v4291_v4  ;;  %v10843_v14 = vunpack.c.l.b16 %v4292_v52 }
 0x34d   : > { %13578 = vst [vmem:[#allocation51_spill] sm:$0xff] %v10838_v34  ;;  %v10846_v55 = vunpack.c.l.b16 %v4295_v29  ;;  %v10848_v61 = vmax.f32 %v3537_v9, %v3538_v33  ;;  %v10850_v36 = vmax.f32 %v3544_v5, %v3545_v60  ;;  %v10852_v50 = vmax.f32 %v3520_v57, %v3521_v12 }
 0x34e   : > { %13579 = vst [vmem:[#allocation52_spill] sm:$0xff] %v10840_v51  ;;  %13580 = vst [vmem:[#allocation53_spill] sm:$0xff] %v10843_v14  ;;  %v3554_v10 = vrot.slane %v3553_v18, 2  ;;  %v3528_v59 = vrot.slane %v3527_v27, 1  ;;  %v10854_v20 = vmax.f32 %v3532_v30, %v3533_v48  ;;  %v3196_v46 = vmax.f32 %v3135_v63, 0.0 }
 0x34f   : > { %13581 = vst [vmem:[#allocation54_spill] sm:$0xff] %v10846_v55  ;;  %v4297_v4 = vpack.c.bf16 %v3515_v38, %v3515_v38  ;;  %v10856_v52 = vunpack.c.l.b16 %v4296_v6  ;;  %v8553_v29 = vadd.f32 %v10814_v19, %v10439_v42  ;;  %v8554_v57 = vadd.f32 %v10817_v62, %v10442_v2 }
 0x350   : > { %v3555_v1 = vmax.f32 %v3553_v18, %v3554_v10  ;;  %v3318_v5 = vcombine.high %v3196_v46, %v3196_v46  ;;  %v3558_v33 = vsel %vm3431_vm6, %v3196_v46, -inf  ;;  %v8555_v30 = vadd.f32 %v2796_v21, %v10451_v32 }
 0x351   : > { %v2804_v54 = vpop.f32.mrb[28].mxu0  ;;  %13582 = vst [vmem:[#allocation55_spill] sm:$0xff] %v10856_v52  ;;  %v3559_v48 = vrot.slane %v3558_v33, 4  ;;  %v3071_v18 = vmul.f32 %v8553_v29, %v10709_v58  ;;  %v3072_v19 = vmul.f32 %v8554_v57, %v10709_v58  ;;  %v8556_v38 = vadd.f32 %v2799_v41, %v10454_v35 }
 0x352   : > { %v8211_v49 = vpop.f32.mrb[29].mxu0  ;;  %v3565_v42 = vsel %vm3431_vm6, %v3318_v5, -inf  ;;  %v3073_v63 = vmul.f32 %v8555_v30, %v10709_v58  ;;  %v3556_v6 = vrot.slane %v3555_v1, 1  ;;  %v10874_v21 = vmax.f32 %v3527_v27, %v3528_v59 }
 0x353   : > { %v10860_v9 = vpop.f32.mrb[30].mxu0  ;;  %v3560_v2 = vmax.f32 %v3558_v33, %v3559_v48  ;;  %v3566_v62 = vrot.slane %v3565_v42, 4  ;;  %v3136_v32 = vadd.f32 %v10715_v28, %v3071_v18  ;;  %v3137_v10 = vadd.f32 %v10715_v28, %v3072_v19 }
 0x354   : > { %v8212_v60 = vpop.f32.mrb[31].mxu0  ;;  %v3138_v46 = vadd.f32 %v10715_v28, %v3073_v63  ;;  %v10879_v49 = vadd.f32 %v2804_v54, %v10462_v15  ;;  %v10885_v33 = vunpack.c.l.b16 %v4297_v4  ;;  %v3535_v27 = vrot.slane %v10854_v20, 1 }
 0x355   : > { %v3561_v5 = vrot.slane %v3560_v2, 2  ;;  %v3567_v57 = vmax.f32 %v3565_v42, %v3566_v62  ;;  %v3197_v35 = vmax.f32 %v3136_v32, 0.0  ;;  %v3198_v59 = vmax.f32 %v3137_v10, 0.0 }
 0x356   : > { %13583 = vst [vmem:[#allocation56_spill] sm:$0xff] %v10885_v33  ;;  %v3199_v30 = vmax.f32 %v3138_v46, 0.0  ;;  %v3557_v48 = vmax.f32 %v3555_v1, %v3556_v6 }
 0x357   : > { %v3562_v18 = vmax.f32 %v3560_v2, %v3561_v5  ;;  %v3568_v19 = vrot.slane %v3567_v57, 2  ;;  %v3319_v15 = vcombine.high %v3197_v35, %v3197_v35  ;;  %v3572_v63 = vsel %vm3431_vm6, %v3197_v35, -inf }
 0x358   : > { %v3320_v11 = vcombine.high %v3198_v59, %v3198_v59  ;;  %v3586_v42 = vsel %vm3431_vm6, %v3198_v59, -inf  ;;  %v3321_v62 = vcombine.high %v3199_v30, %v3199_v30  ;;  %v3573_v29 = vrot.slane %v3572_v63, 4 }
 0x359   : > { %v10883_v41 = vpop.f32.mrb[32].mxu0  ;;  %v3563_v4 = vrot.slane %v3562_v18, 1  ;;  %v3569_v47 = vmax.f32 %v3567_v57, %v3568_v19  ;;  %v3579_v10 = vsel %vm3431_vm6, %v3319_v15, -inf  ;;  %v3600_v6 = vsel %vm3431_vm6, %v3199_v30, -inf }
 0x35a   : > { %v8215_v60 = vpop.f32.mrb[33].mxu0  ;;  %v3580_v46 = vrot.slane %v3579_v10, 4  ;;  %v3593_v1 = vsel %vm3431_vm6, %v3320_v11, -inf  ;;  %v3574_v12 = vmax.f32 %v3572_v63, %v3573_v29  ;;  %v3601_v59 = vrot.slane %v3600_v6, 4 }
 0x35b   : > { %v10888_v54 = vpop.f32.mrb[34].mxu0  ;;  %v3587_v60 = vrot.slane %v3586_v42, 4  ;;  %v3564_v2 = vmax.f32 %v3562_v18, %v3563_v4  ;;  %v3570_v5 = vrot.slane %v3569_v47, 1  ;;  %v3594_v35 = vrot.slane %v3593_v1, 4 }
 0x35c   : > { %v8216_v32 = vpop.f32.mrb[35].mxu0  ;;  %v3581_v0 = vmax.f32 %v3579_v10, %v3580_v46  ;;  %v3575_v19 = vrot.slane %v3574_v12, 2  ;;  %v3074_v15 = vmul.f32 %v8556_v38, %v10709_v58  ;;  %v3602_v25 = vmax.f32 %v3600_v6, %v3601_v59 }
 0x35d   : > { %v3588_v56 = vmax.f32 %v3586_v42, %v3587_v60  ;;  %v3607_v32 = vsel %vm3431_vm6, %v3321_v62, -inf  ;;  %v3571_v45 = vmax.f32 %v3569_v47, %v3570_v5  ;;  %v4304_v57 = vpack.c.bf16 %v3564_v2, %v3564_v2 }
 0x35e   : > { %v3582_v37 = vrot.slane %v3581_v0, 2  ;;  %v3595_v11 = vmax.f32 %v3593_v1, %v3594_v35  ;;  %v3608_v30 = vrot.slane %v3607_v32, 4  ;;  %v10902_v29 = vsel %vm4697_vm7, %v10856_v52, %v10846_v55 }
 0x35f   : > { %v13584_v63 = vrot.slane %v10848_v61, 2  ;;  %v4303_v42 = vpack.c.bf16 %v3557_v48, %v3557_v48  ;;  %v4305_v62 = vpack.c.bf16 %v3571_v45, %v3571_v45  ;;  %v3576_v4 = vmax.f32 %v3574_v12, %v3575_v19 }
 0x360   : > { %v3589_v10 = vrot.slane %v3588_v56, 2  ;;  %v3603_v46 = vrot.slane %v3602_v25, 2  ;;  %v3609_v60 = vmax.f32 %v3607_v32, %v3608_v30  ;;  %v3536_v6 = vmax.f32 %v10854_v20, %v3535_v27 }
 0x361   : > { %v10897_v7 = vpop.f32.mrb[36].mxu0  ;;  %v10907_v47 = vmax.f32 %v10848_v61, %v13584_v63  ;;  %v10912_v2 = vunpack.c.l.b16 %v4304_v57  ;;  %v10914_v5 = vunpack.c.l.b16 %v4305_v62  ;;  %v3139_v35 = vadd.f32 %v10715_v28, %v3074_v15 }
 0x362   : > { %v8219_v18 = vpop.f32.mrb[37].mxu0  ;;  %v3583_v61 = vmax.f32 %v3581_v0, %v3582_v37  ;;  %v3596_v59 = vrot.slane %v3595_v11, 2  ;;  %v3604_v48 = vmax.f32 %v3602_v25, %v3603_v46  ;;  %v3610_v45 = vrot.slane %v3609_v60, 2 }
 0x363   : > { %v10909_v38 = vpop.f32.mrb[38].mxu0  ;;  %v13585_v18 = vrot.slane %v10850_v36, 2  ;;  %v10922_v32 = vunpack.c.l.b16 %v4303_v42  ;;  %v10927_v20 = vsel %vm4697_vm7, %v10914_v5, %v10912_v2  ;;  %v3075_v27 = vmul.f32 %v10879_v49, %v10709_v58 }
 0x364   : > { %v8220_v1 = vpop.f32.mrb[39].mxu0  ;;  %v4299_v37 = vpack.c.bf16 %v10874_v21, %v10874_v21  ;;  %v3577_v25 = vrot.slane %v3576_v4, 1  ;;  %v3590_v0 = vmax.f32 %v3588_v56, %v3589_v10  ;;  %v3611_v57 = vmax.f32 %v3609_v60, %v3610_v45 }
 0x365   : > { %v10920_v12 = vmax.f32 %v10850_v36, %v13585_v18  ;;  %13586 = vst [vmem:[#allocation57_spill] sm:$0xff] %v10922_v32  ;;  %v10936_v36 = vsel %vm4697_vm7, %v10885_v33, %v10856_v52  ;;  %v13588_v19 = vpack.c.bf16 %v10852_v50, %v10852_v50  ;;  %v3605_v30 = vrot.slane %v3604_v48, 1 }
 0x366   : > { %13587 = vst [vmem:[#allocation58_spill] sm:$0xff] %v10936_v36  ;;  %v3200_v63 = vmax.f32 %v3139_v35, 0.0  ;;  %v4300_v49 = vpack.c.bf16 %v3536_v6, %v3536_v6  ;;  %v3584_v62 = vrot.slane %v3583_v61, 1  ;;  %v3597_v21 = vmax.f32 %v3595_v11, %v3596_v59 }
 0x367   : > { %v10941_v15 = vunpack.c.l.b16 %v13588_v19  ;;  %v3612_v46 = vrot.slane %v3611_v57, 1  ;;  %v4718_v10 = vsel %vm4697_vm7, %v10912_v2, %v10922_v32  ;;  %v3140_v50 = vadd.f32 %v10715_v28, %v3075_v27 }
 0x368   : > { %v3322_v60 = vcombine.high %v3200_v63, %v3200_v63  ;;  %v3614_v1 = vsel %vm3431_vm6, %v3200_v63, -inf  ;;  %v3542_v35 = vrot.slane %v10907_v47, 1  ;;  %v10953_v18 = vmax.f32 %v3576_v4, %v3577_v25 }
 0x369   : > { %13589 = vst [vmem:[#allocation59_spill] sm:$0xff] %v10941_v15  ;;  %v10943_v42 = vpop.f32.mrb[40].mxu0  ;;  %v3591_v6 = vrot.slane %v3590_v0, 1  ;;  %v3613_v19 = vmax.f32 %v3611_v57, %v3612_v46  ;;  %v10955_v59 = vunpack.c.l.b16 %v4299_v37  ;;  %v3606_v36 = vmax.f32 %v3604_v48, %v3605_v30 }
 0x36a   : > { %v8223_v56 = vpop.f32.mrb[41].mxu0  ;;  %v3615_v52 = vrot.slane %v3614_v1, 4  ;;  %v10958_v53 = vunpack.c.l.b16 %v4300_v49  ;;  %v10962_v27 = vsel %vm4699_vm8, %v10914_v5, %v4718_v10  ;;  %v10964_v63 = vmax.f32 %v3583_v61, %v3584_v62 }
 0x36b   : > { %v10950_v45 = vpop.f32.mrb[42].mxu0  ;;  %13590 = vst [vmem:[#allocation60_spill] sm:$0xff] %v10955_v59  ;;  %v3549_v56 = vrot.slane %v10920_v12, 1  ;;  %v3598_v13 = vrot.slane %v3597_v21, 1  ;;  %v4311_v4 = vpack.c.bf16 %v3613_v19, %v3613_v19  ;;  %v3621_v57 = vsel %vm3431_vm6, %v3322_v60, -inf }
 0x36c   : > { %v8224_v11 = vpop.f32.mrb[43].mxu0  ;;  %13591 = vst [vmem:[#allocation61_spill] sm:$0xff] %v10958_v53  ;;  %v3616_v25 = vmax.f32 %v3614_v1, %v3615_v52  ;;  %v3201_v46 = vmax.f32 %v3140_v50, 0.0  ;;  %v3622_v48 = vrot.slane %v3621_v57, 4  ;;  %v8558_v30 = vadd.f32 %v10860_v9, %v10465_v39 }
 0x36d   : > { %v10969_v11 = vmax.f32 %v3590_v0, %v3591_v6  ;;  %v4310_v49 = vpack.c.bf16 %v3606_v36, %v3606_v36  ;;  %v10976_v52 = vmax.f32 %v3597_v21, %v3598_v13  ;;  %v10981_v6 = vunpack.c.l.b16 %v4311_v4 }
 0x36e   : > { %v3617_v10 = vrot.slane %v3616_v25, 2  ;;  %v3323_v8 = vcombine.high %v3201_v46, %v3201_v46  ;;  %v3628_v61 = vsel %vm3431_vm6, %v3201_v46, -inf  ;;  %v3623_v60 = vmax.f32 %v3621_v57, %v3622_v48 }
 0x36f   : > { %v3629_v1 = vrot.slane %v3628_v61, 4  ;;  %v3076_v50 = vmul.f32 %v8558_v30, %v10709_v58  ;;  %13593 = vst [vmem:[#allocation63_spill] sm:$0xff] %v10981_v6  ;;  %v10987_v48 = vunpack.c.l.b16 %v4310_v49 }
 0x370   : > { %v3618_v39 = vmax.f32 %v3616_v25, %v3617_v10  ;;  %v3635_v9 = vsel %vm3431_vm6, %v3323_v8, -inf  ;;  %v3624_v46 = vrot.slane %v3623_v60, 2  ;;  %v13597_v25 = vrot.slane %v10835_v44, 1 }
 0x371   : > { %v10974_v62 = vpop.f32.mrb[44].mxu0  ;;  %v3630_v37 = vmax.f32 %v3628_v61, %v3629_v1  ;;  %v3636_v13 = vrot.slane %v3635_v9, 4  ;;  %v3141_v21 = vadd.f32 %v10715_v28, %v3076_v50  ;;  %13595 = vst [vmem:[#allocation65_spill] sm:$0xff] %v10987_v48  ;;  %v4992_v49 = vsel %vm4697_vm7, %v10981_v6, %v10987_v48 }
 0x372   : > { %13592 = vst [vmem:[#allocation62_spill] sm:$0xff] %v10974_v62  ;;  %v8227_v19 = vpop.f32.mrb[45].mxu0  ;;  %v3619_v30 = vrot.slane %v3618_v39, 1  ;;  %v3494_v8 = vmax.f32 %v10835_v44, %v13597_v25  ;;  %v3625_v10 = vmax.f32 %v3623_v60, %v3624_v46  ;;  %v3550_v50 = vmax.f32 %v10920_v12, %v3549_v56 }
 0x373   : > { %v10984_v36 = vpop.f32.mrb[46].mxu0  ;;  %v13596_v19 = vrot.slane %v10833_v43, 1  ;;  %v3631_v0 = vrot.slane %v3630_v37, 2  ;;  %v3202_v62 = vmax.f32 %v3141_v21, 0.0 }
 0x374   : > { %13594 = vst [vmem:[#allocation64_spill] sm:$0xff] %v10984_v36  ;;  %v8228_v57 = vpop.f32.mrb[47].mxu0  ;;  %v3637_v36 = vmax.f32 %v3635_v9, %v3636_v13  ;;  %v3620_v1 = vmax.f32 %v3618_v39, %v3619_v30  ;;  %v3543_v9 = vmax.f32 %v10907_v47, %v3542_v35  ;;  %v4294_v48 = vpack.c.bf16 %v3494_v8, %v3494_v8 }
 0x375   : > { %v3487_v4 = vmax.f32 %v10833_v43, %v13596_v19  ;;  %v3626_v43 = vrot.slane %v3625_v10, 1  ;;  %v3632_v57 = vmax.f32 %v3630_v37, %v3631_v0  ;;  %v3324_v3 = vcombine.high %v3202_v62, %v3202_v62 }
 0x376   : > { %v3638_v19 = vrot.slane %v3637_v36, 2  ;;  %v4312_v44 = vpack.c.bf16 %v3620_v1, %v3620_v1  ;;  %v3642_v60 = vsel %vm3431_vm6, %v3202_v62, -inf  ;;  %v4302_v37 = vpack.c.bf16 %v3550_v50, %v3550_v50 }
 0x377   : > { %v4293_v46 = vpack.c.bf16 %v3487_v4, %v3487_v4  ;;  %v3627_v21 = vmax.f32 %v3625_v10, %v3626_v43  ;;  %v3633_v25 = vrot.slane %v3632_v57, 1  ;;  %v3643_v61 = vrot.slane %v3642_v60, 4 }
 0x378   : > { %v4602_v30 = vunpack.c.l.b16 %v4312_v44  ;;  %v3639_v12 = vmax.f32 %v3637_v36, %v3638_v19  ;;  %v3649_v56 = vsel %vm3431_vm6, %v3324_v3, -inf  ;;  %v4700_v47 = vsel %vm4699_vm8, %v10792_v31, %v10798_v23 }
 0x379   : > { %v11003_v13 = vpop.f32.mrb[48].mxu0  ;;  %v4313_v1 = vpack.c.bf16 %v3627_v21, %v3627_v21  ;;  %v3634_v62 = vmax.f32 %v3632_v57, %v3633_v25  ;;  %v3644_v55 = vmax.f32 %v3642_v60, %v3643_v61  ;;  %v3650_v8 = vrot.slane %v3649_v56, 4 }
 0x37a   : > { %v8231_v39 = vpop.f32.mrb[49].mxu0  ;;  %v4993_v4 = vsel %vm4699_vm8, %v4602_v30, %v4992_v49  ;;  %v4301_v10 = vpack.c.bf16 %v3543_v9, %v3543_v9  ;;  %v4702_v36 = vsel %vm4701_vm9, %v10838_v34, %v4700_v47  ;;  %v4712_v61 = vsel %vm4699_vm8, %v10885_v33, %v10902_v29 }
 0x37b   : > { %v11006_v0 = vpop.f32.mrb[50].mxu0  ;;  %v4603_v3 = vunpack.c.l.b16 %v4313_v1  ;;  %v4314_v50 = vpack.c.bf16 %v3634_v62, %v3634_v62  ;;  %v3645_v43 = vrot.slane %v3644_v55, 2  ;;  %v4725_v57 = vsel %vm4697_vm7, %v4602_v30, %v10981_v6 }
 0x37c   : > { %v8232_v35 = vpop.f32.mrb[51].mxu0  ;;  %v3640_v23 = vrot.slane %v3639_v12, 1  ;;  %v11019_v19 = vunpack.c.l.b16 %v4302_v37  ;;  %v4713_v49 = vsel %vm4701_vm9, %v10941_v15, %v4712_v61  ;;  %v3651_v9 = vmax.f32 %v3649_v56, %v3650_v8 }
 0x37d   : > { %v4994_v44 = vsel %vm4701_vm9, %v4603_v3, %v4993_v4  ;;  %v5259_v60 = vsel %vm4697_vm7, %v4603_v3, %v4602_v30  ;;  %v4704_v21 = vsel %vm4703_vm10, %v10840_v51, %v4702_v36  ;;  %v4604_v25 = vunpack.c.l.b16 %v4314_v50 }
 0x37e   : > { %13598 = vst [vmem:[#allocation66_spill] sm:$0xff] %v11019_v19  ;;  %v3646_v39 = vmax.f32 %v3644_v55, %v3645_v43  ;;  %v11027_v29 = vunpack.c.l.b16 %v4293_v46  ;;  %v11029_v1 = vunpack.c.l.b16 %v4294_v48  ;;  %v4726_v37 = vsel %vm4699_vm8, %v4603_v3, %v4725_v57 }
 0x37f   : > { %v11034_v47 = vunpack.c.l.b16 %v4301_v10  ;;  %v4714_v35 = vsel %vm4703_vm10, %v10955_v59, %v4713_v49  ;;  %v4985_v30 = vsel %vm4697_vm7, %v10922_v32, %v11019_v19  ;;  %v11042_v55 = vsel %vm4701_vm9, %v4604_v25, %v4726_v37 }
 0x380   : > { %13599 = vst [vmem:[#allocation67_spill] sm:$0xff] %v11027_v29  ;;  %13600 = vst [vmem:[#allocation68_spill] sm:$0xff] %v11029_v1  ;;  %v11045_v48 = vsel %vm4703_vm10, %v4604_v25, %v4994_v44  ;;  %v11048_v46 = vsel %vm4699_vm8, %v4604_v25, %v5259_v60  ;;  %v4706_v4 = vsel %vm4705_vm11, %v10843_v14, %v4704_v21  ;;  %v3652_v43 = vrot.slane %v3651_v9, 2 }
 0x381   : > { %v11031_v62 = vpop.f32.mrb[52].mxu0  ;;  %13601 = vst [vmem:[#allocation69_spill] sm:$0xff] %v11034_v47  ;;  %13602 = vst [vmem:[#allocation70_spill] sm:$0xff] %v11045_v48  ;;  %v13603_v10 = vpack.c.bf16 %v10953_v18, %v10953_v18  ;;  %v11061_v50 = vmax.f32 %v3639_v12, %v3640_v23  ;;  %v3647_v57 = vrot.slane %v3646_v39, 1  ;;  %v4715_v49 = vsel %vm4705_vm11, %v10958_v53, %v4714_v35 }
 0x382   : > { %v8235_v56 = vpop.f32.mrb[53].mxu0  ;;  %v4986_v44 = vsel %vm4699_vm8, %v10912_v2, %v4985_v30  ;;  %v8559_v60 = vadd.f32 %v10883_v41, %v10470_v40  ;;  %v4708_v18 = vsel %vm4707_vm12, %v11027_v29, %v4706_v4  ;;  %v4716_v21 = vsel %vm4707_vm12, %v11034_v47, %v4715_v49 }
 0x383   : > { %v11052_v8 = vpop.f32.mrb[54].mxu0  ;;  %v11057_v36 = vunpack.c.l.b16 %v13603_v10  ;;  %v11075_v12 = vsel %vm4701_vm9, %v10914_v5, %v4986_v44  ;;  %v8560_v23 = vadd.f32 %v10888_v54, %v10473_v26  ;;  %v4710_v25 = vsel %vm4709_vm13, %v11029_v1, %v4708_v18 }
 0x384   : > { %v8236_v61 = vpop.f32.mrb[55].mxu0  ;;  %13605 = vst [vmem:[#allocation72_spill] sm:$0xff] %v11075_v12  ;;  %v4717_v2 = vsel %vm4709_vm13, %v11019_v19, %v4716_v21  ;;  %v3077_v40 = vmul.f32 %v8559_v60, %v10709_v58  ;;  %v8561_v41 = vadd.f32 %v10897_v7, %v10480_v22  ;;  %v11086_v37 = vmax.f32 %v3651_v9, %v3652_v43 }
 0x385   : > { %13604 = vst [vmem:[#allocation71_spill] sm:$0xff] %v11057_v36  ;;  %v4809_v35 = vpack.c.b16 %v4717_v2, %v4710_v25  ;;  %v3078_v5 = vmul.f32 %v8560_v23, %v10709_v58  ;;  %v8562_v30 = vadd.f32 %v10909_v38, %v10483_v24  ;;  %v11091_v26 = vmax.f32 %v3646_v39, %v3647_v57 }
 0x386   : > { %v3142_v54 = vadd.f32 %v10715_v28, %v3077_v40  ;;  %v3079_v56 = vmul.f32 %v8561_v41, %v10709_v58  ;;  %v8563_v4 = vadd.f32 %v10943_v42, %v10489_v17  ;;  %v13606_v22 = vpack.c.bf16 %v10964_v63, %v10964_v63 }
 0x387   : > { %8321 = vmatprep.mubr.bf16.mxu1 %v4809_v35  ;;  %v3143_v9 = vadd.f32 %v10715_v28, %v3078_v5  ;;  %v3080_v24 = vmul.f32 %v8562_v30, %v10709_v58  ;;  %v11108_v38 = vadd.f32 %v10950_v45, %v10492_v16  ;;  %v11113_v17 = vsel %vm4699_vm8, %v11057_v36, %v10927_v20 }
 0x388   : > { %v11102_v7 = vunpack.c.l.b16 %v13606_v22  ;;  %v13608_v42 = vpack.c.bf16 %v10969_v11, %v10969_v11  ;;  %v3203_v43 = vmax.f32 %v3142_v54, 0.0  ;;  %v3144_v61 = vadd.f32 %v10715_v28, %v3079_v56 }
 0x389   : > { %v11097_v10 = vpop.f32.mrb[56].mxu0  ;;  %v4315_v16 = vpack.c.bf16 %v11061_v50, %v11061_v50  ;;  %v3654_v58 = vrot.slane %v11086_v37, 1  ;;  %v3204_v45 = vmax.f32 %v3143_v9, 0.0  ;;  %v3145_v49 = vadd.f32 %v10715_v28, %v3080_v24 }
 0x38a   : > { %13607 = vst [vmem:[#allocation73_spill] sm:$0xff] %v11102_v7  ;;  %v8239_v39 = vpop.f32.mrb[57].mxu0  ;;  %v11118_v63 = vunpack.c.l.b16 %v13608_v42  ;;  %v4316_v44 = vpack.c.bf16 %v11091_v26, %v11091_v26  ;;  %v3325_v11 = vcombine.high %v3203_v43, %v3203_v43  ;;  %v3656_v60 = vsel %vm3431_vm6, %v3203_v43, -inf }
 0x38b   : > { %v11121_v57 = vpop.f32.mrb[58].mxu0  ;;  %v3205_v18 = vmax.f32 %v3144_v61, 0.0  ;;  %v3657_v21 = vrot.slane %v3656_v60, 4  ;;  %v3326_v23 = vcombine.high %v3204_v45, %v3204_v45  ;;  %v3670_v25 = vsel %vm3431_vm6, %v3204_v45, -inf }
 0x38c   : > { %13609 = vst [vmem:[#allocation74_spill] sm:$0xff] %v11118_v63  ;;  %v8240_v20 = vpop.f32.mrb[59].mxu0  ;;  %v3206_v2 = vmax.f32 %v3145_v49, 0.0  ;;  %v3663_v50 = vsel %vm3431_vm6, %v3325_v11, -inf  ;;  %v3671_v40 = vrot.slane %v3670_v25, 4 }
 0x38d   : > { %v3327_v41 = vcombine.high %v3205_v18, %v3205_v18  ;;  %v3684_v35 = vsel %vm3431_vm6, %v3205_v18, -inf  ;;  %v3658_v28 = vmax.f32 %v3656_v60, %v3657_v21  ;;  %v3664_v5 = vrot.slane %v3663_v50, 4 }
 0x38e   : > { %v3677_v30 = vsel %vm3431_vm6, %v3326_v23, -inf  ;;  %v3685_v26 = vrot.slane %v3684_v35, 4  ;;  %v3672_v54 = vmax.f32 %v3670_v25, %v3671_v40  ;;  %v3328_v9 = vcombine.high %v3206_v2, %v3206_v2 }
 0x38f   : > { %v3678_v56 = vrot.slane %v3677_v30, 4  ;;  %v3691_v22 = vsel %vm3431_vm6, %v3327_v41, -inf  ;;  %v3659_v39 = vrot.slane %v3658_v28, 2  ;;  %v3665_v42 = vmax.f32 %v3663_v50, %v3664_v5 }
 0x390   : > { %v3686_v43 = vmax.f32 %v3684_v35, %v3685_v26  ;;  %v3692_v61 = vrot.slane %v3691_v22, 4  ;;  %v3673_v49 = vrot.slane %v3672_v54, 2  ;;  %v3698_v11 = vsel %vm3431_vm6, %v3206_v2, -inf  ;;  %v11144_v2 = vld [vmem:[%s13301_s2] ss:$0 sm:$0xff] }
 0x391   : > { %v11135_v24 = vpop.f32.mrb[60].mxu0  ;;  %v3679_v20 = vmax.f32 %v3677_v30, %v3678_v56  ;;  %v3705_v60 = vsel %vm3431_vm6, %v3328_v9, -inf  ;;  %v3660_v21 = vmax.f32 %v3658_v28, %v3659_v39  ;;  %v3666_v23 = vrot.slane %v3665_v42, 2 }
 0x392   : > { %v8243_v45 = vpop.f32.mrb[61].mxu0  ;;  %v3687_v25 = vrot.slane %v3686_v43, 2  ;;  %v3693_v40 = vmax.f32 %v3691_v22, %v3692_v61  ;;  %v3674_v3 = vmax.f32 %v3672_v54, %v3673_v49  ;;  %v3699_v19 = vrot.slane %v3698_v11, 4 }
 0x393   : > { %v11139_v18 = vpop.f32.mrb[62].mxu0  ;;  %v3680_v32 = vrot.slane %v3679_v20, 2  ;;  %v3706_v50 = vrot.slane %v3705_v60, 4  ;;  %v3661_v35 = vrot.slane %v3660_v21, 1  ;;  %v3667_v5 = vmax.f32 %v3665_v42, %v3666_v23 }
 0x394   : > { %v8244_v41 = vpop.f32.mrb[63].mxu0  ;;  %v3694_v26 = vrot.slane %v3693_v40, 2  ;;  %v3081_v30 = vmul.f32 %v11144_v2, %v8563_v4  ;;  %v4720_v28 = vsel %vm4701_vm9, %v11057_v36, %v10962_v27  ;;  %v11150_v56 = vunpack.c.l.b16 %v4315_v16 }
 0x395   : > { %v3655_v54 = vmax.f32 %v11086_v37, %v3654_v58  ;;  %v3688_v22 = vmax.f32 %v3686_v43, %v3687_v25  ;;  %v13611_v9 = vpack.c.bf16 %v10976_v52, %v10976_v52  ;;  %v3675_v42 = vrot.slane %v3674_v3, 1 }
 0x396   : > { %13610 = vst [vmem:[#allocation75_spill] sm:$0xff] %v11150_v56  ;;  %v3681_v61 = vmax.f32 %v3679_v20, %v3680_v32  ;;  %v3700_v45 = vmax.f32 %v3698_v11, %v3699_v19  ;;  %v5254_v4 = vsel %vm4701_vm9, %v11102_v7, %v11113_v17  ;;  %v3662_v49 = vmax.f32 %v3660_v21, %v3661_v35  ;;  %v11172_v32 = vld [vmem:[%s13302_s3] ss:$0 sm:$0xff]  ;;  %v13615_v35 = vld [vmem:[#allocation54_spill] sm:$0xff] }
 0x397   : > { %v11156_v39 = vunpack.c.l.b16 %v13611_v9  ;;  %v3668_v23 = vrot.slane %v3667_v5, 1  ;;  %v3707_v27 = vmax.f32 %v3705_v60, %v3706_v50  ;;  %v11165_v37 = vsel %vm4703_vm10, %v11102_v7, %v4720_v28 }
 0x398   : > { %v11167_v58 = vunpack.c.l.b16 %v4316_v44  ;;  %v3695_v52 = vmax.f32 %v3693_v40, %v3694_v26  ;;  %v3146_v19 = vadd.f32 %v11172_v32, %v3081_v30  ;;  %v5261_v43 = vsel %vm4701_vm9, %v11150_v56, %v11048_v46 }
 0x399   : > { %13612 = vst [vmem:[#allocation76_spill] sm:$0xff] %v11156_v39  ;;  %v11161_v16 = vpop.f32.mrb[64].mxu0  ;;  %v4317_v20 = vpack.c.bf16 %v3655_v54, %v3655_v54  ;;  %v3689_v11 = vrot.slane %v3688_v22, 1  ;;  %v3082_v60 = vmul.f32 %v11144_v2, %v11108_v38  ;;  %v11184_v21 = vsel %vm4703_vm10, %v11118_v63, %v5254_v4 }
 0x39a   : > { %13613 = vst [vmem:[#allocation77_spill] sm:$0xff] %v11167_v58  ;;  %v8247_v17 = vpop.f32.mrb[65].mxu0  ;;  %13614 = vst [vmem:[#allocation78_spill] sm:$0xff] %v11184_v21  ;;  %v3676_v25 = vmax.f32 %v3674_v3, %v3675_v42  ;;  %v3682_v40 = vrot.slane %v3681_v61, 1  ;;  %v3701_v41 = vrot.slane %v3700_v45, 2  ;;  %v11189_v26 = vsel %vm4697_vm7, %v13615_v35, %v11029_v1 }
 0x39b   : > { %v11180_v44 = vpop.f32.mrb[66].mxu0  ;;  %13616 = vst [vmem:[#allocation79_spill] sm:$0xff] %v11189_v26  ;;  %v3669_v46 = vmax.f32 %v3667_v5, %v3668_v23  ;;  %v4318_v30 = vpack.c.bf16 %v3662_v49, %v3662_v49  ;;  %v3708_v28 = vrot.slane %v3707_v27, 2  ;;  %v4728_v38 = vsel %vm4703_vm10, %v11150_v56, %v11042_v55  ;;  %v13620_v5 = vld [vmem:[#allocation62_spill] sm:$0xff] }
 0x39c   : > { %v8248_v50 = vpop.f32.mrb[67].mxu0  ;;  %v11196_v54 = vsel %vm4703_vm10, %v11167_v58, %v5261_v43  ;;  %v3696_v3 = vrot.slane %v3695_v52, 1  ;;  %v3207_v9 = vmax.f32 %v3146_v19, 0.0  ;;  %v11198_v42 = vunpack.c.l.b16 %v4317_v20 }
 0x39d   : > { %13617 = vst [vmem:[#allocation80_spill] sm:$0xff] %v11196_v54  ;;  %v11200_v4 = vmax.f32 %v3688_v22, %v3689_v11  ;;  %v3147_v17 = vadd.f32 %v11172_v32, %v3082_v60  ;;  %v13619_v50 = vld [vmem:[#allocation8_spill] sm:$0xff]  ;;  %v11205_v23 = vmax.f32 %v3681_v61, %v3682_v40  ;;  %v4320_v35 = vpack.c.bf16 %v3676_v25, %v3676_v25 }
 0x39e   : > { %13618 = vst [vmem:[#allocation81_spill] sm:$0xff] %v11198_v42  ;;  %v8565_v49 = vadd.f32 %v13620_v5, %v13619_v50  ;;  %v3702_v1 = vmax.f32 %v3700_v45, %v3701_v41  ;;  %v3329_v55 = vcombine.high %v3207_v9, %v3207_v9  ;;  %v4319_v6 = vpack.c.bf16 %v3669_v46, %v3669_v46  ;;  %v13622_v50 = vld [vmem:[#allocation9_spill] sm:$0xff]  ;;  %v13623_v61 = vld [vmem:[#allocation64_spill] sm:$0xff] }
 0x39f   : > { %v11207_v21 = vunpack.c.l.b16 %v4318_v30  ;;  %v11209_v43 = vmax.f32 %v3707_v27, %v3708_v28  ;;  %v3208_v19 = vmax.f32 %v3147_v17, 0.0  ;;  %v11213_v22 = vmax.f32 %v3695_v52, %v3696_v3 }
 0x3a0   : > { %v3719_v11 = vsel %vm3431_vm6, %v3329_v55, -inf  ;;  %v3083_v60 = vmul.f32 %v11144_v2, %v8565_v49  ;;  %v8566_v40 = vadd.f32 %v13623_v61, %v13622_v50  ;;  %v4322_v45 = vpack.c.bf16 %v11200_v4, %v11200_v4 }
 0x3a1   : > { %13621 = vst [vmem:[#allocation8_spill] sm:$0xff] %v11207_v21  ;;  %v11211_v20 = vpop.f32.mrb[68].mxu0  ;;  %v3720_v41 = vrot.slane %v3719_v11, 4  ;;  %v3330_v46 = vcombine.high %v3208_v19, %v3208_v19  ;;  %v3726_v27 = vsel %vm3431_vm6, %v3208_v19, -inf  ;;  %v3703_v28 = vrot.slane %v3702_v1, 1 }
 0x3a2   : > { %v8251_v25 = vpop.f32.mrb[69].mxu0  ;;  %v3727_v52 = vrot.slane %v3726_v27, 4  ;;  %v3148_v3 = vadd.f32 %v11172_v32, %v3083_v60  ;;  %v3084_v17 = vmul.f32 %v11144_v2, %v8566_v40  ;;  %v4321_v49 = vpack.c.bf16 %v11205_v23, %v11205_v23 }
 0x3a3   : > { %v11222_v30 = vpop.f32.mrb[70].mxu0  ;;  %v11228_v55 = vunpack.c.l.b16 %v4320_v35  ;;  %v3721_v50 = vmax.f32 %v3719_v11, %v3720_v41  ;;  %v3733_v4 = vsel %vm3431_vm6, %v3330_v46, -inf  ;;  %v11232_v47 = vunpack.c.l.b16 %v4319_v6 }
 0x3a4   : > { %v8252_v5 = vpop.f32.mrb[71].mxu0  ;;  %v3728_v19 = vmax.f32 %v3726_v27, %v3727_v52  ;;  %v3734_v25 = vrot.slane %v3733_v4, 4  ;;  %v3209_v54 = vmax.f32 %v3148_v3, 0.0  ;;  %v3712_v60 = vsel %vm3431_vm6, %v3207_v9, -inf }
 0x3a5   : > { %13624 = vst [vmem:[#allocation62_spill] sm:$0xff] %v11228_v55  ;;  %13625 = vst [vmem:[#allocation9_spill] sm:$0xff] %v11232_v47  ;;  %v3722_v56 = vrot.slane %v3721_v50, 2  ;;  %v3149_v40 = vadd.f32 %v11172_v32, %v3084_v17  ;;  %v11236_v5 = vmax.f32 %v3702_v1, %v3703_v28  ;;  %v4729_v27 = vsel %vm4705_vm11, %v11167_v58, %v4728_v38 }
 0x3a6   : > { %v3729_v23 = vrot.slane %v3728_v19, 2  ;;  %v3735_v35 = vmax.f32 %v3733_v4, %v3734_v25  ;;  %v3331_v48 = vcombine.high %v3209_v54, %v3209_v54  ;;  %v3740_v41 = vsel %vm3431_vm6, %v3209_v54, -inf }
 0x3a7   : > { %v3723_v11 = vmax.f32 %v3721_v50, %v3722_v56  ;;  %v3210_v46 = vmax.f32 %v3149_v40, 0.0  ;;  %v3713_v6 = vrot.slane %v3712_v60, 4  ;;  %v3741_v9 = vrot.slane %v3740_v41, 4 }
 0x3a8   : > { %v3736_v3 = vrot.slane %v3735_v35, 2  ;;  %v4722_v1 = vsel %vm4705_vm11, %v11118_v63, %v11165_v37  ;;  %v3730_v17 = vmax.f32 %v3728_v19, %v3729_v23  ;;  %v3747_v4 = vsel %vm3431_vm6, %v3331_v48, -inf }
 0x3a9   : > { %v11241_v52 = vpop.f32.mrb[72].mxu0  ;;  %v3332_v56 = vcombine.high %v3210_v46, %v3210_v46  ;;  %v3754_v54 = vsel %vm3431_vm6, %v3210_v46, -inf  ;;  %v3724_v25 = vrot.slane %v3723_v11, 1  ;;  %v3742_v38 = vmax.f32 %v3740_v41, %v3741_v9 }
 0x3aa   : > { %v8255_v28 = vpop.f32.mrb[73].mxu0  ;;  %v3748_v40 = vrot.slane %v3747_v4, 4  ;;  %v4730_v61 = vsel %vm4707_vm12, %v11198_v42, %v4729_v27  ;;  %v3737_v53 = vmax.f32 %v3735_v35, %v3736_v3  ;;  %v3755_v59 = vrot.slane %v3754_v54, 4 }
 0x3ab   : > { %v11248_v50 = vpop.f32.mrb[74].mxu0  ;;  %v4723_v37 = vsel %vm4707_vm12, %v11156_v39, %v4722_v1  ;;  %v4731_v48 = vsel %vm4709_vm13, %v11207_v21, %v4730_v61  ;;  %v3743_v19 = vrot.slane %v3742_v38, 2  ;;  %v3761_v46 = vsel %vm3431_vm6, %v3332_v56, -inf  ;;  %v13626_v28 = vld [vmem:[#allocation65_spill] sm:$0xff] }
 0x3ac   : > { %v8256_v58 = vpop.f32.mrb[75].mxu0  ;;  %v3749_v23 = vmax.f32 %v3747_v4, %v3748_v40  ;;  %v4724_v41 = vsel %vm4709_vm13, %v13626_v28, %v4723_v37  ;;  %v4323_v9 = vpack.c.bf16 %v11213_v22, %v11213_v22  ;;  %v3714_v27 = vmax.f32 %v3712_v60, %v3713_v6  ;;  %v13630_v40 = vld [vmem:[#allocation10_spill] sm:$0xff]  ;;  %v13639_v28 = vld [vmem:[#allocation15_spill] sm:$0xff] }
 0x3ad   : > { %v3731_v58 = vrot.slane %v3730_v17, 1  ;;  %v4810_v35 = vpack.c.b16 %v4731_v48, %v4724_v41  ;;  %v11261_v3 = vunpack.c.l.b16 %v4321_v49  ;;  %v11263_v42 = vunpack.c.l.b16 %v4322_v45  ;;  %v13631_v48 = vld [vmem:[#allocation11_spill] sm:$0xff] }
 0x3ae   : > { %v3725_v1 = vmax.f32 %v3723_v11, %v3724_v25  ;;  %v3756_v39 = vmax.f32 %v3754_v54, %v3755_v59  ;;  %v11268_v61 = vsel %vm4697_vm7, %v11232_v47, %v11207_v21  ;;  %v3738_v4 = vrot.slane %v3737_v53, 1  ;;  %v13635_v21 = vld [vmem:[#allocation12_spill] sm:$0xff] }
 0x3af   : > { %13627 = vst [vmem:[#allocation64_spill] sm:$0xff] %v11261_v3  ;;  %13628 = vst [vmem:[#allocation82_spill] sm:$0xff] %v11263_v42  ;;  %v3762_v56 = vrot.slane %v3761_v46, 4  ;;  %8322 = vmatmul.mubr.bf16.vlgmr.msra.gmra.mrb[124].mxu1 %v4810_v35  ;;  %v8567_v22 = vadd.f32 %v11003_v13, %v13630_v40  ;;  %v11277_v45 = vsel %vm4697_vm7, %v11228_v55, %v11232_v47  ;;  %v3750_v11 = vrot.slane %v3749_v23, 2 }
 0x3b0   : > { %13629 = vst [vmem:[#allocation83_spill] sm:$0xff] %v11268_v61  ;;  %v4324_v59 = vpack.c.bf16 %v11236_v5, %v11236_v5  ;;  %v3744_v49 = vmax.f32 %v3742_v38, %v3743_v19  ;;  %v3715_v54 = vrot.slane %v3714_v27, 2  ;;  %v11281_v25 = vmax.f32 %v3730_v17, %v3731_v58 }
 0x3b1   : > { %v11272_v60 = vpop.f32.mrb[76].mxu0  ;;  %v3085_v37 = vmul.f32 %v11144_v2, %v8567_v22  ;;  %v8568_v13 = vadd.f32 %v11006_v0, %v13631_v48  ;;  %v11291_v35 = vsel %vm4697_vm7, %v11261_v3, %v11228_v55  ;;  %v11293_v40 = vunpack.c.l.b16 %v4323_v9 }
 0x3b2   : > { %v8259_v6 = vpop.f32.mrb[77].mxu0  ;;  %13632 = vst [vmem:[#allocation10_spill] sm:$0xff] %v11291_v35  ;;  %v4327_v5 = vpack.c.bf16 %v3725_v1, %v3725_v1  ;;  %v3757_v38 = vrot.slane %v3756_v39, 2  ;;  %v11297_v17 = vmax.f32 %v3761_v46, %v3762_v56  ;;  %v11301_v22 = vunpack.c.l.b16 %v4324_v59 }
 0x3b3   : > { %v11286_v41 = vpop.f32.mrb[78].mxu0  ;;  %13633 = vst [vmem:[#allocation11_spill] sm:$0xff] %v11293_v40  ;;  %v11295_v6 = vmax.f32 %v3737_v53, %v3738_v4  ;;  %v3150_v58 = vadd.f32 %v11172_v32, %v3085_v37  ;;  %v3086_v0 = vmul.f32 %v11144_v2, %v8568_v13  ;;  %v3745_v48 = vrot.slane %v3744_v49, 1  ;;  %v13637_v37 = vld [vmem:[#allocation13_spill] sm:$0xff] }
 0x3b4   : > { %v8260_v19 = vpop.f32.mrb[79].mxu0  ;;  %13634 = vst [vmem:[#allocation84_spill] sm:$0xff] %v11301_v22  ;;  %v3751_v47 = vmax.f32 %v3749_v23, %v3750_v11  ;;  %v8569_v35 = vadd.f32 %v11031_v62, %v13635_v21  ;;  %v11305_v9 = vmax.f32 %v3714_v27, %v3715_v54  ;;  %v11310_v4 = vunpack.c.l.b16 %v4327_v5 }
 0x3b5   : > { %v3211_v53 = vmax.f32 %v3150_v58, 0.0  ;;  %v3151_v46 = vadd.f32 %v11172_v32, %v3086_v0  ;;  %v11312_v56 = vmax.f32 %v3756_v39, %v3757_v38  ;;  %v8570_v23 = vadd.f32 %v11052_v8, %v13637_v37 }
 0x3b6   : > { %13636 = vst [vmem:[#allocation12_spill] sm:$0xff] %v11310_v4  ;;  %v3087_v59 = vmul.f32 %v11144_v2, %v8569_v35  ;;  %v3764_v21 = vrot.slane %v11297_v17, 2  ;;  %v11322_v13 = vmax.f32 %v3744_v49, %v3745_v48  ;;  %v3752_v5 = vrot.slane %v3751_v47, 1 }
 0x3b7   : > { %v3333_v27 = vcombine.high %v3211_v53, %v3211_v53  ;;  %v3212_v11 = vmax.f32 %v3151_v46, 0.0  ;;  %v3088_v38 = vmul.f32 %v11144_v2, %v8570_v23  ;;  %v3768_v19 = vsel %vm3431_vm6, %v3211_v53, -inf }
 0x3b8   : > { %v3152_v39 = vadd.f32 %v11172_v32, %v3087_v59  ;;  %v3759_v46 = vrot.slane %v11312_v56, 1  ;;  %v3753_v29 = vmax.f32 %v3751_v47, %v3752_v5 }
 0x3b9   : > { %v11320_v54 = vpop.f32.mrb[80].mxu0  ;;  %v3775_v8 = vsel %vm3431_vm6, %v3333_v27, -inf  ;;  %v3334_v58 = vcombine.high %v3212_v11, %v3212_v11  ;;  %v3782_v0 = vsel %vm3431_vm6, %v3212_v11, -inf  ;;  %v3153_v23 = vadd.f32 %v11172_v32, %v3088_v38 }
 0x3ba   : > { %v8263_v35 = vpop.f32.mrb[81].mxu0  ;;  %v3776_v62 = vrot.slane %v3775_v8, 4  ;;  %v3783_v49 = vrot.slane %v3782_v0, 4  ;;  %v3213_v48 = vmax.f32 %v3152_v39, 0.0  ;;  %v11338_v27 = vadd.f32 %v11121_v57, %v13639_v28 }
 0x3bb   : > { %v11329_v37 = vpop.f32.mrb[82].mxu0  ;;  %v3789_v59 = vsel %vm3431_vm6, %v3334_v58, -inf  ;;  %v13638_v35 = vld [vmem:[#allocation14_spill] sm:$0xff]  ;;  %v3769_v11 = vrot.slane %v3768_v19, 4 }
 0x3bc   : > { %v8264_v1 = vpop.f32.mrb[83].mxu0  ;;  %v8571_v53 = vadd.f32 %v11097_v10, %v13638_v35  ;;  %v3777_v55 = vmax.f32 %v3775_v8, %v3776_v62  ;;  %v3784_v61 = vmax.f32 %v3782_v0, %v3783_v49  ;;  %v3790_v63 = vrot.slane %v3789_v59, 4 }
 0x3bd   : > { %v3335_v7 = vcombine.high %v3213_v48, %v3213_v48  ;;  %v3796_v39 = vsel %vm3431_vm6, %v3213_v48, -inf  ;;  %v3214_v1 = vmax.f32 %v3153_v23, 0.0  ;;  %v3770_v62 = vmax.f32 %v3768_v19, %v3769_v11 }
 0x3be   : > { %v3778_v15 = vrot.slane %v3777_v55, 2  ;;  %v3785_v58 = vrot.slane %v3784_v61, 2  ;;  %v3791_v14 = vmax.f32 %v3789_v59, %v3790_v63  ;;  %v3089_v38 = vmul.f32 %v11144_v2, %v8571_v53 }
 0x3bf   : > { %v3797_v36 = vrot.slane %v3796_v39, 4  ;;  %v3803_v10 = vsel %vm3431_vm6, %v3335_v7, -inf  ;;  %v3336_v35 = vcombine.high %v3214_v1, %v3214_v1  ;;  %v3810_v57 = vsel %vm3431_vm6, %v3214_v1, -inf }
 0x3c0   : > { %v3779_v8 = vmax.f32 %v3777_v55, %v3778_v15  ;;  %v3786_v47 = vmax.f32 %v3784_v61, %v3785_v58  ;;  %v3792_v5 = vrot.slane %v3791_v14, 2  ;;  %v3804_v48 = vrot.slane %v3803_v10, 4 }
 0x3c1   : > { %v11344_v28 = vpop.f32.mrb[84].mxu0  ;;  %v3798_v49 = vmax.f32 %v3796_v39, %v3797_v36  ;;  %v3811_v23 = vrot.slane %v3810_v57, 4  ;;  %v3817_v63 = vsel %vm3431_vm6, %v3336_v35, -inf  ;;  %v3154_v15 = vadd.f32 %v11172_v32, %v3089_v38 }
 0x3c2   : > { %v8267_v0 = vpop.f32.mrb[85].mxu0  ;;  %v3780_v53 = vrot.slane %v3779_v8, 1  ;;  %v3787_v12 = vrot.slane %v3786_v47, 1  ;;  %v3793_v7 = vmax.f32 %v3791_v14, %v3792_v5  ;;  %v3818_v33 = vrot.slane %v3817_v63, 4 }
 0x3c3   : > { %v11347_v59 = vpop.f32.mrb[86].mxu0  ;;  %v3799_v1 = vrot.slane %v3798_v49, 2  ;;  %v3805_v26 = vmax.f32 %v3803_v10, %v3804_v48  ;;  %v3812_v34 = vmax.f32 %v3810_v57, %v3811_v23  ;;  %v13641_v55 = vpack.c.bf16 %v11281_v25, %v11281_v25 }
 0x3c4   : > { %13640 = vst [vmem:[#allocation13_spill] sm:$0xff] %v11347_v59  ;;  %v8268_v51 = vpop.f32.mrb[87].mxu0  ;;  %v11356_v61 = vmax.f32 %v11297_v17, %v3764_v21  ;;  %v3781_v19 = vmax.f32 %v3779_v8, %v3780_v53  ;;  %v3788_v11 = vmax.f32 %v3786_v47, %v3787_v12  ;;  %v3794_v39 = vrot.slane %v3793_v7, 1 }
 0x3c5   : > { %v11353_v36 = vunpack.c.l.b16 %v13641_v55  ;;  %v3806_v58 = vrot.slane %v3805_v26, 2  ;;  %v3819_v14 = vmax.f32 %v3817_v63, %v3818_v33  ;;  %v3215_v35 = vmax.f32 %v3154_v15, 0.0 }
 0x3c6   : > { %v4330_v51 = vpack.c.bf16 %v11322_v13, %v11322_v13  ;;  %v4331_v10 = vpack.c.bf16 %v3753_v29, %v3753_v29  ;;  %v3760_v38 = vmax.f32 %v11312_v56, %v3759_v46  ;;  %v3800_v57 = vmax.f32 %v3798_v49, %v3799_v1 }
 0x3c7   : > { %13642 = vst [vmem:[#allocation14_spill] sm:$0xff] %v11353_v36  ;;  %v3771_v5 = vrot.slane %v3770_v62, 2  ;;  %v4335_v25 = vpack.c.bf16 %v3781_v19, %v3781_v19  ;;  %v3813_v0 = vrot.slane %v3812_v34, 2  ;;  %v3337_v48 = vcombine.high %v3215_v35, %v3215_v35 }
 0x3c8   : > { %v13644_v12 = vpack.c.bf16 %v11295_v6, %v11295_v6  ;;  %v11372_v29 = vsel %vm4697_vm7, %v11353_v36, %v11310_v4  ;;  %v3807_v56 = vmax.f32 %v3805_v26, %v3806_v58  ;;  %v3795_v46 = vmax.f32 %v3793_v7, %v3794_v39 }
 0x3c9   : > { %v11361_v23 = vpop.f32.mrb[88].mxu0  ;;  %v4336_v8 = vpack.c.bf16 %v3788_v11, %v3788_v11  ;;  %v3820_v47 = vrot.slane %v3819_v14, 2  ;;  %v11377_v63 = vunpack.c.l.b16 %v4330_v51  ;;  %v11379_v53 = vunpack.c.l.b16 %v4331_v10 }
 0x3ca   : > { %13643 = vst [vmem:[#allocation15_spill] sm:$0xff] %v11361_v23  ;;  %v11367_v33 = vunpack.c.l.b16 %v13644_v12  ;;  %v8271_v21 = vpop.f32.mrb[89].mxu0  ;;  %v4332_v6 = vpack.c.bf16 %v3760_v38, %v3760_v38  ;;  %v3801_v1 = vrot.slane %v3800_v57, 1  ;;  %v11381_v55 = vmax.f32 %v3770_v62, %v3771_v5 }
 0x3cb   : > { %v11375_v49 = vpop.f32.mrb[90].mxu0  ;;  %13647 = vst [vmem:[#allocation87_spill] sm:$0xff] %v11377_v63  ;;  %13648 = vst [vmem:[#allocation88_spill] sm:$0xff] %v11379_v53  ;;  %v11383_v19 = vunpack.c.l.b16 %v4335_v25  ;;  %v3814_v26 = vmax.f32 %v3812_v34, %v3813_v0  ;;  %v3831_v58 = vsel %vm3431_vm6, %v3337_v48, -inf  ;;  %v3808_v12 = vrot.slane %v3807_v56, 1  ;;  %v13651_v21 = vld [vmem:[#allocation16_spill] sm:$0xff] }
 0x3cc   : > { %13645 = vst [vmem:[#allocation85_spill] sm:$0xff] %v11367_v33  ;;  %13646 = vst [vmem:[#allocation86_spill] sm:$0xff] %v11375_v49  ;;  %v8272_v15 = vpop.f32.mrb[91].mxu0  ;;  %v3824_v7 = vsel %vm3431_vm6, %v3215_v35, -inf  ;;  %v3832_v11 = vrot.slane %v3831_v58, 4  ;;  %v3090_v39 = vmul.f32 %v11144_v2, %v11338_v27  ;;  %v4337_v51 = vpack.c.bf16 %v3795_v46, %v3795_v46  ;;  %v13652_v0 = vld [vmem:[#allocation17_spill] sm:$0xff] }
 0x3cd   : > { %13649 = vst [vmem:[#allocation89_spill] sm:$0xff] %v11383_v19  ;;  %v11389_v10 = vunpack.c.l.b16 %v4336_v8  ;;  %v11391_v38 = vmax.f32 %v3819_v14, %v3820_v47  ;;  %v8573_v62 = vadd.f32 %v11135_v24, %v13651_v21  ;;  %v3802_v5 = vmax.f32 %v3800_v57, %v3801_v1 }
 0x3ce   : > { %v3833_v25 = vmax.f32 %v3831_v58, %v3832_v11  ;;  %v3155_v34 = vadd.f32 %v11172_v32, %v3090_v39  ;;  %v8574_v48 = vadd.f32 %v11139_v18, %v13652_v0  ;;  %v11398_v35 = vunpack.c.l.b16 %v4332_v6 }
 0x3cf   : > { %13650 = vst [vmem:[#allocation90_spill] sm:$0xff] %v11389_v10  ;;  %v3815_v15 = vrot.slane %v3814_v26, 1  ;;  %v3825_v13 = vrot.slane %v3824_v7, 4  ;;  %v3091_v27 = vmul.f32 %v11144_v2, %v8573_v62  ;;  %v11403_v14 = vmax.f32 %v3807_v56, %v3808_v12 }
 0x3d0   : > { %13653 = vst [vmem:[#allocation16_spill] sm:$0xff] %v11398_v35  ;;  %v3834_v8 = vrot.slane %v3833_v25, 2  ;;  %v3216_v47 = vmax.f32 %v3155_v34, 0.0  ;;  %v3092_v24 = vmul.f32 %v11144_v2, %v8574_v48  ;;  %v3773_v1 = vrot.slane %v11381_v55, 1 }
 0x3d1   : > { %v11401_v46 = vpop.f32.mrb[92].mxu0  ;;  %v11407_v58 = vunpack.c.l.b16 %v4337_v51  ;;  %v11412_v18 = vsel %vm4697_vm7, %v11389_v10, %v11383_v19  ;;  %v3156_v6 = vadd.f32 %v11172_v32, %v3091_v27  ;;  %v4338_v56 = vpack.c.bf16 %v3802_v5, %v3802_v5 }
 0x3d2   : > { %13654 = vst [vmem:[#allocation17_spill] sm:$0xff] %v11401_v46  ;;  %v8275_v57 = vpop.f32.mrb[93].mxu0  ;;  %v3338_v39 = vcombine.high %v3216_v47, %v3216_v47  ;;  %v3838_v21 = vsel %vm3431_vm6, %v3216_v47, -inf  ;;  %v3835_v34 = vmax.f32 %v3833_v25, %v3834_v8  ;;  %v3157_v48 = vadd.f32 %v11172_v32, %v3092_v24 }
 0x3d3   : > { %13655 = vst [vmem:[#allocation91_spill] sm:$0xff] %v11407_v58  ;;  %v11415_v11 = vpop.f32.mrb[94].mxu0  ;;  %v3839_v0 = vrot.slane %v3838_v21, 4  ;;  %v3217_v51 = vmax.f32 %v3156_v6, 0.0  ;;  %v11422_v17 = vmax.f32 %v3814_v26, %v3815_v15  ;;  %v11424_v27 = vmax.f32 %v3824_v7, %v3825_v13 }
 0x3d4   : > { %13656 = vst [vmem:[#allocation92_spill] sm:$0xff] %v11415_v11  ;;  %v8276_v62 = vpop.f32.mrb[95].mxu0  ;;  %v3845_v5 = vsel %vm3431_vm6, %v3338_v39, -inf  ;;  %v3218_v8 = vmax.f32 %v3157_v48, 0.0  ;;  %v13658_v24 = vrot.slane %v11209_v43, 1  ;;  %v3836_v57 = vrot.slane %v3835_v34, 1 }
 0x3d5   : > { %v3840_v10 = vmax.f32 %v3838_v21, %v3839_v0  ;;  %v3846_v12 = vrot.slane %v3845_v5, 4  ;;  %v3339_v36 = vcombine.high %v3217_v51, %v3217_v51  ;;  %v3852_v47 = vsel %vm3431_vm6, %v3217_v51, -inf }
 0x3d6   : > { %v11428_v62 = vunpack.c.l.b16 %v4338_v56  ;;  %v3853_v25 = vrot.slane %v3852_v47, 4  ;;  %v3711_v6 = vmax.f32 %v11209_v43, %v13658_v24  ;;  %v3340_v0 = vcombine.high %v3218_v8, %v3218_v8 }
 0x3d7   : > { %v3841_v26 = vrot.slane %v3840_v10, 2  ;;  %v3847_v15 = vmax.f32 %v3845_v5, %v3846_v12  ;;  %v3859_v13 = vsel %vm3431_vm6, %v3339_v36, -inf  ;;  %v13660_v51 = vrot.slane %v11305_v9, 1 }
 0x3d8   : > { %13657 = vst [vmem:[#allocation93_spill] sm:$0xff] %v11428_v62  ;;  %v3854_v39 = vmax.f32 %v3852_v47, %v3853_v25  ;;  %v3860_v21 = vrot.slane %v3859_v13, 4  ;;  %v3866_v46 = vsel %vm3431_vm6, %v3218_v8, -inf  ;;  %v13661_v43 = vrot.slane %v11356_v61, 1 }
 0x3d9   : > { %v11434_v7 = vpop.f32.mrb[96].mxu0  ;;  %v3718_v56 = vmax.f32 %v11305_v9, %v13660_v51  ;;  %v3842_v48 = vmax.f32 %v3840_v10, %v3841_v26  ;;  %v3848_v11 = vrot.slane %v3847_v15, 2  ;;  %v3867_v24 = vrot.slane %v3866_v46, 4 }
 0x3da   : > { %13659 = vst [vmem:[#allocation94_spill] sm:$0xff] %v11434_v7  ;;  %v8279_v31 = vpop.f32.mrb[97].mxu0  ;;  %v3767_v12 = vmax.f32 %v11356_v61, %v13661_v43  ;;  %v3855_v5 = vrot.slane %v3854_v39, 2  ;;  %v3861_v36 = vmax.f32 %v3859_v13, %v3860_v21  ;;  %v3774_v47 = vmax.f32 %v11381_v55, %v3773_v1 }
 0x3db   : > { %v3837_v25 = vmax.f32 %v3835_v34, %v3836_v57  ;;  %v3843_v7 = vrot.slane %v3842_v48, 1  ;;  %v3849_v49 = vmax.f32 %v3847_v15, %v3848_v11  ;;  %v3873_v23 = vsel %vm3431_vm6, %v3340_v0, -inf }
 0x3dc   : > { %v3856_v9 = vmax.f32 %v3854_v39, %v3855_v5  ;;  %v3862_v31 = vrot.slane %v3861_v36, 2  ;;  %v3868_v10 = vmax.f32 %v3866_v46, %v3867_v24  ;;  %v3874_v26 = vrot.slane %v3873_v23, 4 }
 0x3dd   : > { %v4340_v8 = vpack.c.bf16 %v11422_v17, %v11422_v17  ;;  %v3844_v51 = vmax.f32 %v3842_v48, %v3843_v7  ;;  %v3850_v59 = vrot.slane %v3849_v49, 1  ;;  %v4325_v61 = vpack.c.bf16 %v3711_v6, %v3711_v6 }
 0x3de   : > { %v3857_v43 = vrot.slane %v3856_v9, 1  ;;  %v3863_v13 = vmax.f32 %v3861_v36, %v3862_v31  ;;  %v4333_v21 = vpack.c.bf16 %v3767_v12, %v3767_v12  ;;  %v4733_v55 = vsel %vm4699_vm8, %v11261_v3, %v11277_v45  ;;  %v11482_v31 = vpop.f32.mrb[98].mxu0 }
 0x3df   : > { %v3827_v1 = vrot.slane %v11424_v27, 2  ;;  %v4326_v11 = vpack.c.bf16 %v3718_v56, %v3718_v56  ;;  %v4334_v34 = vpack.c.bf16 %v3774_v47, %v3774_v47  ;;  %v4734_v46 = vsel %vm4701_vm9, %v11263_v42, %v4733_v55 }
 0x3e0   : > { %v4343_v57 = vpack.c.bf16 %v3837_v25, %v3837_v25  ;;  %v3869_v15 = vrot.slane %v3868_v10, 2  ;;  %v3875_v17 = vmax.f32 %v3873_v23, %v3874_v26  ;;  %v4740_v6 = vsel %vm4699_vm8, %v11367_v33, %v11372_v29 }
 0x3e1   : > { %v3851_v7 = vmax.f32 %v3849_v49, %v3850_v59  ;;  %v4344_v39 = vpack.c.bf16 %v3844_v51, %v3844_v51  ;;  %v4735_v0 = vsel %vm4703_vm10, %v11293_v40, %v4734_v46  ;;  %v4741_v45 = vsel %vm4701_vm9, %v11377_v63, %v4740_v6 }
 0x3e2   : > { %v3858_v56 = vmax.f32 %v3856_v9, %v3857_v43  ;;  %v3864_v48 = vrot.slane %v3863_v13, 1  ;;  %v11460_v12 = vunpack.c.l.b16 %v4325_v61  ;;  %v11462_v5 = vunpack.c.l.b16 %v4333_v21  ;;  %v8280_v21 = vpop.f32.mrb[99].mxu0 }
 0x3e3   : > { %v11464_v36 = vunpack.c.l.b16 %v4326_v11  ;;  %v11466_v23 = vunpack.c.l.b16 %v4334_v34  ;;  %v4736_v59 = vsel %vm4705_vm11, %v11301_v22, %v4735_v0  ;;  %v4742_v29 = vsel %vm4703_vm10, %v11379_v53, %v4741_v45  ;;  %v13670_v34 = vld [vmem:[#allocation18_spill] sm:$0xff]  ;;  %v13673_v45 = vld [vmem:[#allocation21_spill] sm:$0xff] }
 0x3e4   : > { %13662 = vst [vmem:[#allocation95_spill] sm:$0xff] %v11460_v12  ;;  %13663 = vst [vmem:[#allocation96_spill] sm:$0xff] %v11462_v5  ;;  %v13666_v49 = vpack.c.bf16 %v11403_v14, %v11403_v14  ;;  %v11478_v47 = vmax.f32 %v11424_v27, %v3827_v1  ;;  %v11480_v25 = vunpack.c.l.b16 %v4343_v57  ;;  %v3870_v9 = vmax.f32 %v3868_v10, %v3869_v15  ;;  %v13671_v57 = vld [vmem:[#allocation19_spill] sm:$0xff]  ;;  %v11502_v15 = vpop.f32.mrb[100].mxu0 }
 0x3e5   : > { %13664 = vst [vmem:[#allocation97_spill] sm:$0xff] %v11464_v36  ;;  %13665 = vst [vmem:[#allocation98_spill] sm:$0xff] %v11466_v23  ;;  %v4345_v26 = vpack.c.bf16 %v3851_v7, %v3851_v7  ;;  %v11484_v51 = vunpack.c.l.b16 %v4344_v39  ;;  %v3876_v61 = vrot.slane %v3875_v17, 2  ;;  %v4743_v43 = vsel %vm4705_vm11, %v11398_v35, %v4742_v29  ;;  %v13672_v39 = vld [vmem:[#allocation20_spill] sm:$0xff] }
 0x3e6   : > { %v11475_v24 = vunpack.c.l.b16 %v13666_v49  ;;  %13668 = vst [vmem:[#allocation100_spill] sm:$0xff] %v11480_v25  ;;  %v11488_v55 = vmax.f32 %v3863_v13, %v3864_v48  ;;  %v4346_v14 = vpack.c.bf16 %v3858_v56, %v3858_v56  ;;  %v4737_v27 = vsel %vm4707_vm12, %v11460_v12, %v4736_v59  ;;  %v8283_v48 = vpop.f32.mrb[101].mxu0  ;;  %v13674_v49 = vld [vmem:[#allocation22_spill] sm:$0xff] }
 0x3e7   : > { %13669 = vst [vmem:[#allocation101_spill] sm:$0xff] %v11484_v51  ;;  %v4744_v1 = vsel %vm4707_vm12, %v11462_v5, %v4743_v43  ;;  %v4738_v10 = vsel %vm4709_vm13, %v11464_v36, %v4737_v27  ;;  %v8575_v46 = vadd.f32 %v11161_v16, %v13670_v34  ;;  %v8576_v13 = vadd.f32 %v11180_v44, %v13671_v57  ;;  %v13675_v43 = vld [vmem:[#allocation23_spill] sm:$0xff]  ;;  %v11516_v21 = vpop.f32.mrb[102].mxu0 }
 0x3e8   : > { %13667 = vst [vmem:[#allocation99_spill] sm:$0xff] %v11475_v24  ;;  %v4745_v11 = vsel %vm4709_vm13, %v11466_v23, %v4744_v1  ;;  %v3871_v6 = vrot.slane %v3870_v9, 1  ;;  %v8577_v0 = vadd.f32 %v11211_v20, %v13672_v39  ;;  %v8578_v56 = vadd.f32 %v11222_v30, %v13673_v45  ;;  %v13676_v30 = vld [vmem:[#allocation24_spill] sm:$0xff] }
 0x3e9   : > { %v4811_v7 = vpack.c.b16 %v4745_v11, %v4738_v10  ;;  %v3093_v59 = vmul.f32 %v11144_v2, %v8575_v46  ;;  %v3094_v29 = vmul.f32 %v11144_v2, %v8576_v13  ;;  %v8579_v16 = vadd.f32 %v11241_v52, %v13674_v49  ;;  %v13677_v10 = vld [vmem:[#allocation25_spill] sm:$0xff]  ;;  %v8284_v52 = vpop.f32.mrb[103].mxu0 }
 0x3ea   : > { %v11514_v44 = vadd.f32 %v11248_v50, %v13675_v43  ;;  %v3095_v20 = vmul.f32 %v11144_v2, %v8577_v0  ;;  %v3096_v27 = vmul.f32 %v11144_v2, %v8578_v56  ;;  %v11522_v1 = vadd.f32 %v11272_v60, %v13676_v30  ;;  %v11533_v13 = vpop.f32.mrb[104].mxu0 }
 0x3eb   : > { %8325 = vmatprep.mubr.bf16.mxu1 %v4811_v7  ;;  %v11526_v11 = vadd.f32 %v11286_v41, %v13677_v10  ;;  %v11528_v34 = vunpack.c.l.b16 %v4340_v8  ;;  %v3158_v46 = vadd.f32 %v11172_v32, %v3093_v59  ;;  %v3159_v57 = vadd.f32 %v11172_v32, %v3094_v29  ;;  %v8287_v0 = vpop.f32.mrb[105].mxu0 }
 0x3ec   : > { %v11535_v7 = vunpack.c.l.b16 %v4345_v26  ;;  %v11537_v39 = vmax.f32 %v3875_v17, %v3876_v61  ;;  %v3160_v60 = vadd.f32 %v11172_v32, %v3095_v20  ;;  %v3161_v41 = vadd.f32 %v11172_v32, %v3096_v27  ;;  %v11561_v35 = vpop.f32.mrb[106].mxu0 }
 0x3ed   : > { %13678 = vst [vmem:[#allocation18_spill] sm:$0xff] %v11528_v34  ;;  %v11544_v8 = vsel %vm4697_vm7, %v11484_v51, %v11480_v25  ;;  %v3219_v56 = vmax.f32 %v3158_v46, 0.0  ;;  %v3220_v48 = vmax.f32 %v3159_v57, 0.0  ;;  %v11548_v59 = vunpack.c.l.b16 %v4346_v14 }
 0x3ee   : > { %13679 = vst [vmem:[#allocation19_spill] sm:$0xff] %v11535_v7  ;;  %v11550_v26 = vmax.f32 %v3870_v9, %v3871_v6  ;;  %v3221_v17 = vmax.f32 %v3160_v60, 0.0  ;;  %v3222_v61 = vmax.f32 %v3161_v41, 0.0  ;;  %v3097_v0 = vmul.f32 %v11144_v2, %v8579_v16 }
 0x3ef   : > { %13680 = vst [vmem:[#allocation20_spill] sm:$0xff] %v11548_v59  ;;  %v3341_v29 = vcombine.high %v3219_v56, %v3219_v56  ;;  %v3880_v49 = vsel %vm3431_vm6, %v3219_v56, -inf  ;;  %v3342_v43 = vcombine.high %v3220_v48, %v3220_v48  ;;  %v3894_v20 = vsel %vm3431_vm6, %v3220_v48, -inf }
 0x3f0   : > { %v3881_v27 = vrot.slane %v3880_v49, 4  ;;  %v3895_v30 = vrot.slane %v3894_v20, 4  ;;  %v3343_v10 = vcombine.high %v3221_v17, %v3221_v17  ;;  %v3908_v52 = vsel %vm3431_vm6, %v3221_v17, -inf }
 0x3f1   : > { %v3887_v46 = vsel %vm3431_vm6, %v3341_v29, -inf  ;;  %v3901_v14 = vsel %vm3431_vm6, %v3342_v43, -inf  ;;  %v3909_v57 = vrot.slane %v3908_v52, 4  ;;  %v3344_v9 = vcombine.high %v3222_v61, %v3222_v61 }
 0x3f2   : > { %v3888_v6 = vrot.slane %v3887_v46, 4  ;;  %v3896_v60 = vmax.f32 %v3894_v20, %v3895_v30  ;;  %v3902_v41 = vrot.slane %v3901_v14, 4  ;;  %v3915_v50 = vsel %vm3431_vm6, %v3343_v10, -inf  ;;  %v8288_v30 = vpop.f32.mrb[107].mxu0 }
 0x3f3   : > { %v3910_v56 = vmax.f32 %v3908_v52, %v3909_v57  ;;  %v3922_v48 = vsel %vm3431_vm6, %v3222_v61, -inf  ;;  %v3929_v45 = vsel %vm3431_vm6, %v3344_v9, -inf  ;;  %v3882_v12 = vmax.f32 %v3880_v49, %v3881_v27 }
 0x3f4   : > { %v3889_v17 = vmax.f32 %v3887_v46, %v3888_v6  ;;  %v3897_v5 = vrot.slane %v3896_v60, 2  ;;  %v3903_v29 = vmax.f32 %v3901_v14, %v3902_v41  ;;  %v3916_v22 = vrot.slane %v3915_v50, 4 }
 0x3f5   : > { %v3911_v43 = vrot.slane %v3910_v56, 2  ;;  %v3923_v51 = vrot.slane %v3922_v48, 4  ;;  %v3930_v20 = vrot.slane %v3929_v45, 4  ;;  %v3162_v10 = vadd.f32 %v11172_v32, %v3097_v0 }
 0x3f6   : > { %v3890_v53 = vrot.slane %v3889_v17, 2  ;;  %v3898_v16 = vmax.f32 %v3896_v60, %v3897_v5  ;;  %v3904_v52 = vrot.slane %v3903_v29, 2  ;;  %v3917_v61 = vmax.f32 %v3915_v50, %v3916_v22 }
 0x3f7   : > { %v3912_v57 = vmax.f32 %v3910_v56, %v3911_v43  ;;  %v3924_v40 = vmax.f32 %v3922_v48, %v3923_v51  ;;  %v3931_v9 = vmax.f32 %v3929_v45, %v3930_v20  ;;  %v3883_v49 = vrot.slane %v3882_v12, 2 }
 0x3f8   : > { %v3891_v27 = vmax.f32 %v3889_v17, %v3890_v53  ;;  %v3905_v46 = vmax.f32 %v3903_v29, %v3904_v52  ;;  %v3098_v14 = vmul.f32 %v11144_v2, %v11514_v44  ;;  %v3899_v41 = vrot.slane %v3898_v16, 1  ;;  %v11581_v17 = vpop.f32.mrb[108].mxu0 }
 0x3f9   : > { %v3913_v63 = vrot.slane %v3912_v57, 1  ;;  %v3918_v30 = vrot.slane %v3917_v61, 2  ;;  %v4348_v5 = vpack.c.bf16 %v11550_v26, %v11550_v26  ;;  %v3925_v60 = vrot.slane %v3924_v40, 2 }
 0x3fa   : > { %v3932_v0 = vrot.slane %v3931_v9, 2  ;;  %v3223_v56 = vmax.f32 %v3162_v10, 0.0  ;;  %v3892_v22 = vrot.slane %v3891_v27, 1  ;;  %v3906_v51 = vrot.slane %v3905_v46, 1 }
 0x3fb   : > { %v3099_v53 = vmul.f32 %v11144_v2, %v11522_v1  ;;  %v3100_v50 = vmul.f32 %v11144_v2, %v11526_v11  ;;  %v11576_v44 = vsel %vm4697_vm7, %v11310_v4, %v11464_v36  ;;  %v11578_v45 = vmax.f32 %v3882_v12, %v3883_v49  ;;  %v8291_v11 = vpop.f32.mrb[109].mxu0 }
 0x3fc   : > { %13681 = vst [vmem:[#allocation21_spill] sm:$0xff] %v11576_v44  ;;  %v3345_v48 = vcombine.high %v3223_v56, %v3223_v56  ;;  %v3163_v26 = vadd.f32 %v11172_v32, %v3098_v14  ;;  %v13682_v29 = vpack.c.bf16 %v11488_v55, %v11488_v55  ;;  %v3900_v1 = vmax.f32 %v3898_v16, %v3899_v41  ;;  %v11597_v14 = vpop.f32.mrb[110].mxu0 }
 0x3fd   : > { %v3914_v20 = vmax.f32 %v3912_v57, %v3913_v63  ;;  %v3919_v2 = vmax.f32 %v3917_v61, %v3918_v30  ;;  %v11588_v52 = vunpack.c.l.b16 %v4348_v5  ;;  %v11593_v12 = vsel %vm4697_vm7, %v11383_v19, %v11466_v23  ;;  %v8292_v57 = vpop.f32.mrb[111].mxu0 }
 0x3fe   : > { %v11586_v43 = vunpack.c.l.b16 %v13682_v29  ;;  %13685 = vst [vmem:[#allocation24_spill] sm:$0xff] %v11593_v12  ;;  %v3926_v10 = vmax.f32 %v3924_v40, %v3925_v60  ;;  %v11595_v49 = vmax.f32 %v3931_v9, %v3932_v0  ;;  %v11599_v6 = vmax.f32 %v3891_v27, %v3892_v22 }
 0x3ff   : > { %13684 = vst [vmem:[#allocation23_spill] sm:$0xff] %v11588_v52  ;;  %v11601_v55 = vmax.f32 %v3905_v46, %v3906_v51  ;;  %v3164_v63 = vadd.f32 %v11172_v32, %v3099_v53  ;;  %v3165_v16 = vadd.f32 %v11172_v32, %v3100_v50  ;;  %v3936_v41 = vsel %vm3431_vm6, %v3223_v56, -inf }
 0x400   : > { %13683 = vst [vmem:[#allocation22_spill] sm:$0xff] %v11586_v43  ;;  %v3943_v30 = vsel %vm3431_vm6, %v3345_v48, -inf  ;;  %v3224_v40 = vmax.f32 %v3163_v26, 0.0  ;;  %v4352_v9 = vpack.c.bf16 %v3900_v1, %v3900_v1  ;;  %v3920_v5 = vrot.slane %v3919_v2, 1 }
 0x401   : > { %v4354_v60 = vpack.c.bf16 %v3914_v20, %v3914_v20  ;;  %v3944_v0 = vrot.slane %v3943_v30, 4  ;;  %v3927_v27 = vrot.slane %v3926_v10, 1  ;;  %v4351_v32 = vpack.c.bf16 %v11599_v6, %v11599_v6  ;;  %v11615_v20 = vpop.f32.mrb[112].mxu0 }
 0x402   : > { %v3346_v22 = vcombine.high %v3224_v40, %v3224_v40  ;;  %v3950_v51 = vsel %vm3431_vm6, %v3224_v40, -inf  ;;  %v4353_v53 = vpack.c.bf16 %v11601_v55, %v11601_v55  ;;  %v3937_v56 = vrot.slane %v3936_v41, 4  ;;  %13686 = vst [vmem:[#allocation25_spill] sm:$0xff] %v11615_v20  ;;  %v8295_v61 = vpop.f32.mrb[113].mxu0 }
 0x403   : > { %v3945_v50 = vmax.f32 %v3943_v30, %v3944_v0  ;;  %v3951_v48 = vrot.slane %v3950_v51, 4  ;;  %v3225_v29 = vmax.f32 %v3164_v63, 0.0  ;;  %v3226_v1 = vmax.f32 %v3165_v16, 0.0 }
 0x404   : > { %v3957_v26 = vsel %vm3431_vm6, %v3346_v22, -inf  ;;  %v11617_v11 = vunpack.c.l.b16 %v4352_v9  ;;  %v3921_v57 = vmax.f32 %v3919_v2, %v3920_v5  ;;  %v3938_v36 = vmax.f32 %v3936_v41, %v3937_v56 }
 0x405   : > { %v3946_v46 = vrot.slane %v3945_v50, 2  ;;  %v3958_v40 = vrot.slane %v3957_v26, 4  ;;  %v3952_v4 = vmax.f32 %v3950_v51, %v3951_v48  ;;  %v3347_v6 = vcombine.high %v3225_v29, %v3225_v29 }
 0x406   : > { %13687 = vst [vmem:[#allocation102_spill] sm:$0xff] %v11617_v11  ;;  %v3964_v19 = vsel %vm3431_vm6, %v3225_v29, -inf  ;;  %v3348_v55 = vcombine.high %v3226_v1, %v3226_v1  ;;  %v3978_v16 = vsel %vm3431_vm6, %v3226_v1, -inf  ;;  %v11623_v51 = vunpack.c.l.b16 %v4354_v60 }
 0x407   : > { %v3947_v30 = vmax.f32 %v3945_v50, %v3946_v46  ;;  %v3959_v0 = vmax.f32 %v3957_v26, %v3958_v40  ;;  %v3965_v23 = vrot.slane %v3964_v19, 4  ;;  %v3953_v22 = vrot.slane %v3952_v4, 2 }
 0x408   : > { %v3971_v63 = vsel %vm3431_vm6, %v3347_v6, -inf  ;;  %v3985_v9 = vsel %vm3431_vm6, %v3348_v55, -inf  ;;  %13688 = vst [vmem:[#allocation103_spill] sm:$0xff] %v11623_v51  ;;  %v3979_v29 = vrot.slane %v3978_v16, 4  ;;  %v3928_v41 = vmax.f32 %v3926_v10, %v3927_v27 }
 0x409   : > { %v3948_v2 = vrot.slane %v3947_v30, 1  ;;  %v3960_v5 = vrot.slane %v3959_v0, 2  ;;  %v3966_v12 = vmax.f32 %v3964_v19, %v3965_v23  ;;  %v3972_v61 = vrot.slane %v3971_v63, 4 }
 0x40a   : > { %v3954_v48 = vmax.f32 %v3952_v4, %v3953_v22  ;;  %v3986_v42 = vrot.slane %v3985_v9, 4  ;;  %v3939_v26 = vrot.slane %v3938_v36, 2  ;;  %v3980_v33 = vmax.f32 %v3978_v16, %v3979_v29 }
 0x40b   : > { %v3961_v46 = vmax.f32 %v3959_v0, %v3960_v5  ;;  %v3967_v56 = vrot.slane %v3966_v12, 2  ;;  %v3973_v50 = vmax.f32 %v3971_v63, %v3972_v61  ;;  %v3949_v40 = vmax.f32 %v3947_v30, %v3948_v2 }
 0x40c   : > { %v3955_v6 = vrot.slane %v3954_v48, 1  ;;  %v3987_v44 = vmax.f32 %v3985_v9, %v3986_v42  ;;  %v11625_v20 = vunpack.c.l.b16 %v4351_v32  ;;  %v13690_v23 = vrot.slane %v11391_v38, 1 }
 0x40d   : > { %v3962_v1 = vrot.slane %v3961_v46, 1  ;;  %v3968_v3 = vmax.f32 %v3966_v12, %v3967_v56  ;;  %v3974_v55 = vrot.slane %v3973_v50, 2  ;;  %v13691_v10 = vrot.slane %v11537_v39, 1 }
 0x40e   : > { %13689 = vst [vmem:[#allocation104_spill] sm:$0xff] %v11625_v20  ;;  %v3956_v19 = vmax.f32 %v3954_v48, %v3955_v6  ;;  %v3823_v4 = vmax.f32 %v11391_v38, %v13690_v23  ;;  %v4355_v27 = vpack.c.bf16 %v3921_v57, %v3921_v57  ;;  %v4356_v0 = vpack.c.bf16 %v3928_v41, %v3928_v41 }
 0x40f   : > { %v3879_v60 = vmax.f32 %v11537_v39, %v13691_v10  ;;  %v13692_v30 = vrot.slane %v11478_v47, 1  ;;  %v13693_v12 = vrot.slane %v11578_v45, 1  ;;  %v11639_v32 = vmax.f32 %v3938_v36, %v3939_v26 }
 0x410   : > { %v4359_v63 = vpack.c.bf16 %v3949_v40, %v3949_v40  ;;  %v3975_v16 = vmax.f32 %v3973_v50, %v3974_v55  ;;  %v3981_v9 = vrot.slane %v3980_v33, 2  ;;  %v11641_v38 = vmax.f32 %v3961_v46, %v3962_v1 }
 0x411   : > { %v3830_v22 = vmax.f32 %v11478_v47, %v13692_v30  ;;  %v3886_v42 = vmax.f32 %v11578_v45, %v13693_v12  ;;  %v4360_v2 = vpack.c.bf16 %v3956_v19, %v3956_v19  ;;  %v3969_v5 = vrot.slane %v3968_v3, 1 }
 0x412   : > { %v3988_v39 = vrot.slane %v3987_v44, 2  ;;  %v11643_v57 = vunpack.c.l.b16 %v4353_v53  ;;  %v11648_v47 = vsel %vm4697_vm7, %v11617_v11, %v11625_v20  ;;  %v4341_v61 = vpack.c.bf16 %v3823_v4, %v3823_v4 }
 0x413   : > { %v4349_v48 = vpack.c.bf16 %v3879_v60, %v3879_v60  ;;  %v11650_v45 = vunpack.c.l.b16 %v4355_v27  ;;  %v11652_v36 = vunpack.c.l.b16 %v4356_v0  ;;  %v4342_v29 = vpack.c.bf16 %v3830_v22, %v3830_v22  ;;  %v11683_v60 = vpop.f32.mrb[114].mxu0 }
 0x414   : > { %13694 = vst [vmem:[#allocation105_spill] sm:$0xff] %v11643_v57  ;;  %v4350_v41 = vpack.c.bf16 %v3886_v42, %v3886_v42  ;;  %v11655_v56 = vunpack.c.l.b16 %v4359_v63  ;;  %v3976_v50 = vrot.slane %v3975_v16, 1  ;;  %v3982_v53 = vmax.f32 %v3980_v33, %v3981_v9  ;;  %v8296_v30 = vpop.f32.mrb[115].mxu0  ;;  %v13703_v42 = vld [vmem:[#allocation26_spill] sm:$0xff]  ;;  %v13704_v9 = vld [vmem:[#allocation27_spill] sm:$0xff] }
 0x415   : > { %13695 = vst [vmem:[#allocation106_spill] sm:$0xff] %v11650_v45  ;;  %13696 = vst [vmem:[#allocation107_spill] sm:$0xff] %v11652_v36  ;;  %v4361_v26 = vpack.c.bf16 %v11641_v38, %v11641_v38  ;;  %v11659_v40 = vunpack.c.l.b16 %v4360_v2  ;;  %v11661_v6 = vmax.f32 %v3968_v3, %v3969_v5  ;;  %v11663_v1 = vmax.f32 %v3987_v44, %v3988_v39  ;;  %v13705_v5 = vld [vmem:[#allocation28_spill] sm:$0xff]  ;;  %v13709_v30 = vld [vmem:[#allocation15_spill] sm:$0xff] }
 0x416   : > { %13697 = vst [vmem:[#allocation108_spill] sm:$0xff] %v11655_v56  ;;  %v11665_v55 = vunpack.c.l.b16 %v4341_v61  ;;  %v11667_v19 = vunpack.c.l.b16 %v4349_v48  ;;  %v4747_v23 = vsel %vm4699_vm8, %v11407_v58, %v11412_v18  ;;  %v4754_v33 = vsel %vm4699_vm8, %v11535_v7, %v11544_v8  ;;  %v13706_v61 = vld [vmem:[#allocation29_spill] sm:$0xff] }
 0x417   : > { %13698 = vst [vmem:[#allocation109_spill] sm:$0xff] %v11659_v40  ;;  %v11675_v4 = vunpack.c.l.b16 %v4342_v29  ;;  %v11677_v10 = vunpack.c.l.b16 %v4350_v41  ;;  %v4748_v3 = vsel %vm4701_vm9, %v11428_v62, %v4747_v23  ;;  %v4755_v44 = vsel %vm4701_vm9, %v11548_v59, %v4754_v33  ;;  %v13707_v48 = vld [vmem:[#allocation13_spill] sm:$0xff]  ;;  %v11707_v41 = vpop.f32.mrb[116].mxu0 }
 0x418   : > { %13699 = vst [vmem:[#allocation110_spill] sm:$0xff] %v11665_v55  ;;  %13700 = vst [vmem:[#allocation111_spill] sm:$0xff] %v11667_v19  ;;  %v11685_v27 = vmax.f32 %v3975_v16, %v3976_v50  ;;  %v3983_v0 = vrot.slane %v3982_v53, 1  ;;  %v4749_v18 = vsel %vm4703_vm10, %v11475_v24, %v4748_v3  ;;  %v4756_v8 = vsel %vm4703_vm10, %v11586_v43, %v4755_v44  ;;  %v11716_v50 = vld [vmem:[%s13301_s2] ss:$0 sm:$0xff]  ;;  %v8299_v33 = vpop.f32.mrb[117].mxu0 }
 0x419   : > { %13701 = vst [vmem:[#allocation112_spill] sm:$0xff] %v11675_v4  ;;  %13702 = vst [vmem:[#allocation113_spill] sm:$0xff] %v11677_v10  ;;  %v4750_v22 = vsel %vm4705_vm11, %v11528_v34, %v4749_v18  ;;  %v4757_v12 = vsel %vm4705_vm11, %v11588_v52, %v4756_v8  ;;  %v8583_v63 = vadd.f32 %v11320_v54, %v13703_v42  ;;  %v13708_v8 = vld [vmem:[#allocation30_spill] sm:$0xff]  ;;  %v9124_v42 = vld [vmem:[%s13300_s1 + $0xc0] sm:$0xff]  }
 0x41a   : > { %v8584_v16 = vadd.f32 %v11329_v37, %v13704_v9  ;;  %v4751_v38 = vsel %vm4707_vm12, %v11665_v55, %v4750_v22  ;;  %v4758_v2 = vsel %vm4707_vm12, %v11667_v19, %v4757_v12  ;;  %v8585_v39 = vadd.f32 %v11344_v28, %v13705_v5  ;;  %v11724_v12 = vpop.f32.mrb[118].mxu0  ;;  %v13714_v33 = vld [vmem:[#allocation33_spill] sm:$0xff]  ;;  %8337 = vmatprep.subr.bf16.mxu1 %v9124_v42 }
 0x41b   : > { %v8586_v29 = vadd.f32 %v13707_v48, %v13706_v61  ;;  %v4752_v54 = vsel %vm4709_vm13, %v11675_v4, %v4751_v38  ;;  %v4759_v37 = vsel %vm4709_vm13, %v11677_v10, %v4758_v2  ;;  %v3101_v23 = vmul.f32 %v11716_v50, %v8583_v63  ;;  %v11732_v63 = vld [vmem:[%s13302_s3] ss:$0 sm:$0xff]  ;;  %v13711_v2 = vld [vmem:[#allocation86_spill] sm:$0xff]  ;;  %v13713_v61 = vld [vmem:[#allocation17_spill] sm:$0xff]  ;;  %8338 = vmatpush3.bf16.msra.mxu1 %v9124_v42 }
 0x41c   : > { %v3102_v28 = vmul.f32 %v11716_v50, %v8584_v16  ;;  %v4812_v3 = vpack.c.b16 %v4759_v37, %v4752_v54  ;;  %v3103_v44 = vmul.f32 %v11716_v50, %v8585_v39  ;;  %v8587_v22 = vadd.f32 %v13709_v30, %v13708_v8  ;;  %v13710_v38 = vld [vmem:[#allocation31_spill] sm:$0xff]  ;;  %v13712_v39 = vld [vmem:[#allocation32_spill] sm:$0xff] }
 0x41d   : > { %v3104_v18 = vmul.f32 %v11716_v50, %v8586_v29  ;;  %v3166_v9 = vadd.f32 %v11732_v63, %v3101_v23  ;;  %v11738_v5 = vadd.f32 %v13711_v2, %v13710_v38  ;;  %v11742_v48 = vadd.f32 %v13713_v61, %v13712_v39  ;;  %v8300_v29 = vpop.f32.mrb[119].mxu0  ;;  %v9125_v54 = vld [vmem:[%s13300_s1 + $0xc8] sm:$0xff]  }
 0x41e   : > { %v3167_v16 = vadd.f32 %v11732_v63, %v3102_v28  ;;  %8326 = vmatmul.mubr.bf16.gmra.mrb[128].mxu1 %v4812_v3  ;;  %v3168_v23 = vadd.f32 %v11732_v63, %v3103_v44  ;;  %v13715_v8 = vld [vmem:[#allocation92_spill] sm:$0xff]  ;;  %v11754_v38 = vpop.f32.mrb[120].mxu0  ;;  %v11756_v2 = vunpack.c.l.b16 %v4361_v26  ;;  %v11762_v44 = vmax.f32 %v3982_v53, %v3983_v0  ;;  %8339 = vmatprep.subr.bf16.mxu1 %v9125_v54 }
 0x41f   : > { %v3169_v28 = vadd.f32 %v11732_v63, %v3104_v18  ;;  %v11752_v30 = vadd.f32 %v13715_v8, %v13714_v33  ;;  %13716 = vst [vmem:[#allocation26_spill] sm:$0xff] %v11754_v38  ;;  %v3227_v61 = vmax.f32 %v3166_v9, 0.0  ;;  %v8303_v46 = vpop.f32.mrb[121].mxu0  ;;  %8340 = vmatpush3.bf16.msra.mxu1 %v9125_v54 }
 0x420   : > { %v3228_v29 = vmax.f32 %v3167_v16, 0.0  ;;  %v3229_v18 = vmax.f32 %v3168_v23, 0.0  ;;  %v2991_v33 = vpop.f32.mrb[122].mxu0 }
 0x421   : > { %v3230_v37 = vmax.f32 %v3169_v28, 0.0  ;;  %v3349_v8 = vcombine.high %v3227_v61, %v3227_v61  ;;  %v3992_v26 = vsel %vm3431_vm6, %v3227_v61, -inf  ;;  %v8304_v39 = vpop.f32.mrb[123].mxu0  ;;  %v3105_v61 = vmul.f32 %v11716_v50, %v8587_v22 }
 0x422   : > { %v3350_v55 = vcombine.high %v3228_v29, %v3228_v29  ;;  %v4006_v19 = vsel %vm3431_vm6, %v3228_v29, -inf  ;;  %v3993_v9 = vrot.slane %v3992_v26, 4  ;;  %v3351_v16 = vcombine.high %v3229_v18, %v3229_v18 }
 0x423   : > { %v4007_v46 = vrot.slane %v4006_v19, 4  ;;  %v4020_v34 = vsel %vm3431_vm6, %v3229_v18, -inf  ;;  %v3999_v53 = vsel %vm3431_vm6, %v3349_v8, -inf  ;;  %v3352_v28 = vcombine.high %v3230_v37, %v3230_v37  ;;  %v9126_v18 = vld [vmem:[%s13300_s1 + $0xd0] sm:$0xff]  }
 0x424   : > { %v4013_v0 = vsel %vm3431_vm6, %v3350_v55, -inf  ;;  %v4021_v23 = vrot.slane %v4020_v34, 4  ;;  %v4000_v42 = vrot.slane %v3999_v53, 4  ;;  %v4027_v39 = vsel %vm3431_vm6, %v3351_v16, -inf  ;;  %v9127_v55 = vld [vmem:[%s13300_s1 + $0xd8] sm:$0xff]   ;;  %8341 = vmatprep.subr.bf16.mxu1 %v9126_v18 }
 0x425   : > { %v4008_v33 = vmax.f32 %v4006_v19, %v4007_v46  ;;  %v4014_v3 = vrot.slane %v4013_v0, 4  ;;  %v4034_v52 = vsel %vm3431_vm6, %v3230_v37, -inf  ;;  %v4041_v11 = vsel %vm3431_vm6, %v3352_v28, -inf  ;;  %8342 = vmatpush3.bf16.msra.mxu1 %v9126_v18 }
 0x426   : > { %v4022_v29 = vmax.f32 %v4020_v34, %v4021_v23  ;;  %v3994_v19 = vmax.f32 %v3992_v26, %v3993_v9  ;;  %v4001_v8 = vmax.f32 %v3999_v53, %v4000_v42  ;;  %v4028_v34 = vrot.slane %v4027_v39, 4  ;;  %8343 = vmatprep.subr.bf16.mxu1 %v9127_v55 }
 0x427   : > { %v4009_v46 = vrot.slane %v4008_v33, 2  ;;  %v4015_v22 = vmax.f32 %v4013_v0, %v4014_v3  ;;  %v4035_v23 = vrot.slane %v4034_v52, 4  ;;  %v4042_v16 = vrot.slane %v4041_v11, 4  ;;  %v9128_v3 = vld [vmem:[%s13300_s1 + $0xe0] sm:$0xff]  }
 0x428   : > { %v4023_v54 = vrot.slane %v4022_v29, 2  ;;  %v4002_v37 = vrot.slane %v4001_v8, 2  ;;  %v3170_v59 = vadd.f32 %v11732_v63, %v3105_v61  ;;  %v4029_v7 = vmax.f32 %v4027_v39, %v4028_v34 }
 0x429   : > { %v4010_v43 = vmax.f32 %v4008_v33, %v4009_v46  ;;  %v4016_v28 = vrot.slane %v4015_v22, 2  ;;  %v4036_v62 = vmax.f32 %v4034_v52, %v4035_v23  ;;  %v4043_v58 = vmax.f32 %v4041_v11, %v4042_v16  ;;  %8344 = vmatpush3.bf16.msra.mxu1 %v9127_v55 }
 0x42a   : > { %v4024_v24 = vmax.f32 %v4022_v29, %v4023_v54  ;;  %v3995_v26 = vrot.slane %v3994_v19, 2  ;;  %v4003_v9 = vmax.f32 %v4001_v8, %v4002_v37  ;;  %v4030_v38 = vrot.slane %v4029_v7, 2  ;;  %8345 = vmatprep.subr.bf16.mxu1 %v9128_v3 }
 0x42b   : > { %v4011_v53 = vrot.slane %v4010_v43, 1  ;;  %v4017_v0 = vmax.f32 %v4015_v22, %v4016_v28  ;;  %v4037_v33 = vrot.slane %v4036_v62, 2  ;;  %v4044_v46 = vrot.slane %v4043_v58, 2 }
 0x42c   : > { %v4025_v42 = vrot.slane %v4024_v24, 1  ;;  %v4364_v61 = vpack.c.bf16 %v11762_v44, %v11762_v44  ;;  %v4004_v29 = vrot.slane %v4003_v9, 1  ;;  %v3231_v52 = vmax.f32 %v3170_v59, 0.0  ;;  %v9129_v44 = vld [vmem:[%s13300_s1 + $0xe8] sm:$0xff]  }
 0x42d   : > { %v4018_v39 = vrot.slane %v4017_v0, 1  ;;  %v11788_v11 = vsel %vm4697_vm7, %v11659_v40, %v11655_v56  ;;  %v13717_v18 = vpack.c.bf16 %v11661_v6, %v11661_v6  ;;  %v4012_v22 = vmax.f32 %v4010_v43, %v4011_v53  ;;  %8346 = vmatpush3.bf16.msra.mxu1 %v9128_v3 }
 0x42e   : > { %v4031_v54 = vmax.f32 %v4029_v7, %v4030_v38  ;;  %v13719_v59 = vpack.c.bf16 %v11685_v27, %v11685_v27  ;;  %v11803_v34 = vmax.f32 %v3994_v19, %v3995_v26  ;;  %v3353_v23 = vcombine.high %v3231_v52, %v3231_v52  ;;  %8347 = vmatprep.subr.bf16.mxu1 %v9129_v44 }
 0x42f   : > { %v11793_v8 = vunpack.c.l.b16 %v13717_v18  ;;  %v3106_v6 = vmul.f32 %v11716_v50, %v11738_v5  ;;  %v11810_v7 = vsel %vm4697_vm7, %v11480_v25, %v11675_v4  ;;  %v4026_v43 = vmax.f32 %v4024_v24, %v4025_v42 }
 0x430   : > { %v11801_v55 = vunpack.c.l.b16 %v13719_v59  ;;  %v4038_v38 = vmax.f32 %v4036_v62, %v4037_v33  ;;  %v11812_v16 = vmax.f32 %v4043_v58, %v4044_v46  ;;  %v11814_v37 = vunpack.c.l.b16 %v4364_v61  ;;  %v9130_v62 = vld [vmem:[%s13300_s1 + $0xf0] sm:$0xff]  }
 0x431   : > { %13718 = vst [vmem:[#allocation27_spill] sm:$0xff] %v11793_v8  ;;  %v4005_v27 = vmax.f32 %v4003_v9, %v4004_v29  ;;  %v11816_v28 = vmax.f32 %v4017_v0, %v4018_v39  ;;  %v3107_v19 = vmul.f32 %v11716_v50, %v11742_v48  ;;  %v11823_v5 = vsel %vm4697_vm7, %v11625_v20, %v11677_v10 }
 0x432   : > { %13720 = vst [vmem:[#allocation28_spill] sm:$0xff] %v11801_v55  ;;  %13721 = vst [vmem:[#allocation29_spill] sm:$0xff] %v11814_v37  ;;  %v4368_v26 = vpack.c.bf16 %v4012_v22, %v4012_v22  ;;  %v4032_v53 = vrot.slane %v4031_v54, 1  ;;  %v3108_v58 = vmul.f32 %v11716_v50, %v11752_v30  ;;  %v4048_v48 = vsel %vm3431_vm6, %v3231_v52, -inf  ;;  %8348 = vmatpush3.bf16.msra.mxu1 %v9129_v44 }
 0x433   : > { %13722 = vst [vmem:[#allocation13_spill] sm:$0xff] %v11823_v5  ;;  %v4055_v3 = vsel %vm3431_vm6, %v3353_v23, -inf  ;;  %v3171_v9 = vadd.f32 %v11732_v63, %v3106_v6  ;;  %v4370_v0 = vpack.c.bf16 %v4026_v43, %v4026_v43  ;;  %v4039_v42 = vrot.slane %v4038_v38, 1  ;;  %8349 = vmatprep.subr.bf16.mxu1 %v9130_v62  ;;  %v9131_v23 = vld [vmem:[%s13300_s1 + $0xf8] sm:$0xff]  }
 0x434   : > { %v4056_v46 = vrot.slane %v4055_v3, 4  ;;  %v4367_v61 = vpack.c.bf16 %v4005_v27, %v4005_v27  ;;  %v3172_v39 = vadd.f32 %v11732_v63, %v3107_v19  ;;  %v11838_v18 = vunpack.c.l.b16 %v4368_v26 }
 0x435   : > { %v3232_v29 = vmax.f32 %v3171_v9, 0.0  ;;  %v11840_v52 = vmax.f32 %v4031_v54, %v4032_v53  ;;  %v4049_v22 = vrot.slane %v4048_v48, 4  ;;  %v3173_v9 = vadd.f32 %v11732_v63, %v3108_v58  ;;  %v11856_v58 = vld [vmem:[%s13300_s1 + $0x140] sm:$0xff]  }
 0x436   : > { %v4057_v59 = vmax.f32 %v4055_v3, %v4056_v46  ;;  %v3233_v27 = vmax.f32 %v3172_v39, 0.0  ;;  %v11847_v33 = vunpack.c.l.b16 %v4370_v0  ;;  %v11849_v44 = vmax.f32 %v4038_v38, %v4039_v42  ;;  %8350 = vmatpush3.bf16.msra.mxu1 %v9130_v62  ;;  %13723 = vst [vmem:[#allocation30_spill] sm:$0xff] %v11856_v58 }
 0x437   : > { %v3354_v6 = vcombine.high %v3232_v29, %v3232_v29  ;;  %v4062_v43 = vsel %vm3431_vm6, %v3232_v29, -inf  ;;  %v3234_v46 = vmax.f32 %v3173_v9, 0.0  ;;  %v4050_v30 = vmax.f32 %v4048_v48, %v4049_v22  ;;  %8351 = vmatprep.subr.bf16.mxu1 %v9131_v23 }
 0x438   : > { %v4058_v19 = vrot.slane %v4057_v59, 2  ;;  %v4063_v54 = vrot.slane %v4062_v43, 4  ;;  %v3355_v53 = vcombine.high %v3233_v27, %v3233_v27  ;;  %v4076_v3 = vsel %vm3431_vm6, %v3233_v27, -inf }
 0x439   : > { %v4069_v26 = vsel %vm3431_vm6, %v3354_v6, -inf  ;;  %v4077_v38 = vrot.slane %v4076_v3, 4  ;;  %v3356_v42 = vcombine.high %v3234_v46, %v3234_v46  ;;  %v4090_v39 = vsel %vm3431_vm6, %v3234_v46, -inf }
 0x43a   : > { %v4059_v24 = vmax.f32 %v4057_v59, %v4058_v19  ;;  %v4064_v25 = vmax.f32 %v4062_v43, %v4063_v54  ;;  %v4070_v29 = vrot.slane %v4069_v26, 4  ;;  %v4083_v0 = vsel %vm3431_vm6, %v3355_v53, -inf  ;;  %8352 = vmatpush3.bf16.msra.mxu1 %v9131_v23 }
 0x43b   : > { %v4084_v62 = vrot.slane %v4083_v0, 4  ;;  %v11860_v48 = vunpack.c.l.b16 %v4367_v61  ;;  %v4078_v22 = vmax.f32 %v4076_v3, %v4077_v38  ;;  %v4091_v59 = vrot.slane %v4090_v39, 4  ;;  %8369 = vmatprep.subr.bf16.mxu1 %v11856_v58 }
 0x43c   : > { %v4060_v6 = vrot.slane %v4059_v24, 1  ;;  %v4065_v27 = vrot.slane %v4064_v25, 2  ;;  %v4071_v9 = vmax.f32 %v4069_v26, %v4070_v29  ;;  %v4097_v43 = vsel %vm3431_vm6, %v3356_v42, -inf }
 0x43d   : > { %13724 = vst [vmem:[#allocation15_spill] sm:$0xff] %v11860_v48  ;;  %v4371_v19 = vpack.c.bf16 %v11840_v52, %v11840_v52  ;;  %v4085_v53 = vmax.f32 %v4083_v0, %v4084_v62  ;;  %v4051_v46 = vrot.slane %v4050_v30, 2  ;;  %v4079_v10 = vrot.slane %v4078_v22, 2 }
 0x43e   : > { %v4066_v54 = vmax.f32 %v4064_v25, %v4065_v27  ;;  %v4072_v20 = vrot.slane %v4071_v9, 2  ;;  %v4092_v4 = vmax.f32 %v4090_v39, %v4091_v59  ;;  %v4098_v26 = vrot.slane %v4097_v43, 4 }
 0x43f   : > { %v4061_v29 = vmax.f32 %v4059_v24, %v4060_v6  ;;  %v4086_v3 = vrot.slane %v4085_v53, 2  ;;  %v4080_v38 = vmax.f32 %v4078_v22, %v4079_v10  ;;  %v13725_v23 = vrot.slane %v11595_v49, 1 }
 0x440   : > { %v4067_v61 = vrot.slane %v4066_v54, 1  ;;  %v4073_v40 = vmax.f32 %v4071_v9, %v4072_v20  ;;  %v4093_v5 = vrot.slane %v4092_v4, 2  ;;  %v4099_v42 = vmax.f32 %v4097_v43, %v4098_v26 }
 0x441   : > { %v3935_v52 = vmax.f32 %v11595_v49, %v13725_v23  ;;  %v4087_v0 = vmax.f32 %v4085_v53, %v4086_v3  ;;  %v13726_v62 = vrot.slane %v11663_v1, 1  ;;  %v4372_v24 = vpack.c.bf16 %v11849_v44, %v11849_v44 }
 0x442   : > { %v4068_v25 = vmax.f32 %v4066_v54, %v4067_v61  ;;  %v4074_v27 = vrot.slane %v4073_v40, 1  ;;  %v4081_v39 = vrot.slane %v4080_v38, 1  ;;  %v13727_v20 = vrot.slane %v11639_v32, 1 }
 0x443   : > { %v3991_v58 = vmax.f32 %v11663_v1, %v13726_v62  ;;  %v13728_v6 = vrot.slane %v11803_v34, 1  ;;  %v11880_v49 = vmax.f32 %v4050_v30, %v4051_v46  ;;  %v4375_v22 = vpack.c.bf16 %v4061_v29, %v4061_v29 }
 0x444   : > { %v3942_v10 = vmax.f32 %v11639_v32, %v13727_v20  ;;  %v4094_v59 = vmax.f32 %v4092_v4, %v4093_v5  ;;  %v4100_v43 = vrot.slane %v4099_v42, 2  ;;  %v4075_v54 = vmax.f32 %v4073_v40, %v4074_v27 }
 0x445   : > { %v3998_v9 = vmax.f32 %v11803_v34, %v13728_v6  ;;  %v4376_v53 = vpack.c.bf16 %v4068_v25, %v4068_v25  ;;  %v11882_v1 = vmax.f32 %v4080_v38, %v4081_v39  ;;  %v4088_v26 = vrot.slane %v4087_v0, 1 }
 0x446   : > { %v13729_v44 = vpack.c.bf16 %v11816_v28, %v11816_v28  ;;  %v11892_v32 = vsel %vm4697_vm7, %v11838_v18, %v11860_v48  ;;  %v4357_v34 = vpack.c.bf16 %v3935_v52, %v3935_v52  ;;  %v4365_v30 = vpack.c.bf16 %v3991_v58, %v3991_v58 }
 0x447   : > { %v11894_v46 = vunpack.c.l.b16 %v4371_v19  ;;  %v11896_v4 = vunpack.c.l.b16 %v4372_v24  ;;  %v4358_v40 = vpack.c.bf16 %v3942_v10, %v3942_v10  ;;  %v4366_v5 = vpack.c.bf16 %v3998_v9, %v3998_v9  ;;  %v13737_v9 = vld [vmem:[#allocation34_spill] sm:$0xff] }
 0x448   : > { %v11887_v61 = vunpack.c.l.b16 %v13729_v44  ;;  %v11899_v3 = vunpack.c.l.b16 %v4375_v22  ;;  %v4095_v28 = vrot.slane %v4094_v59, 1  ;;  %v11901_v38 = vmax.f32 %v4099_v42, %v4100_v43 }
 0x449   : > { %13730 = vst [vmem:[#allocation31_spill] sm:$0xff] %v11894_v46  ;;  %13731 = vst [vmem:[#allocation86_spill] sm:$0xff] %v11896_v4  ;;  %v4377_v23 = vpack.c.bf16 %v4075_v54, %v4075_v54  ;;  %v11903_v25 = vunpack.c.l.b16 %v4376_v53  ;;  %v11905_v27 = vmax.f32 %v4087_v0, %v4088_v26  ;;  %v11909_v19 = vunpack.c.l.b16 %v4357_v34  ;;  %v13739_v53 = vld [vmem:[#allocation35_spill] sm:$0xff] }
 0x44a   : > { %13732 = vst [vmem:[#allocation32_spill] sm:$0xff] %v11899_v3  ;;  %v11911_v52 = vunpack.c.l.b16 %v4365_v30  ;;  %v4761_v62 = vsel %vm4699_vm8, %v11643_v57, %v11648_v47  ;;  %v4768_v42 = vsel %vm4699_vm8, %v11756_v2, %v11788_v11  ;;  %v11919_v24 = vunpack.c.l.b16 %v4358_v40  ;;  %v13738_v11 = vld [vmem:[#allocation94_spill] sm:$0xff] }
 0x44b   : > { %13733 = vst [vmem:[#allocation17_spill] sm:$0xff] %v11909_v19  ;;  %v11921_v39 = vunpack.c.l.b16 %v4366_v5  ;;  %v4762_v0 = vsel %vm4701_vm9, %v11623_v51, %v4761_v62  ;;  %v4769_v20 = vsel %vm4701_vm9, %v11793_v8, %v4768_v42  ;;  %v11927_v10 = vmax.f32 %v4094_v59, %v4095_v28  ;;  %v13740_v59 = vld [vmem:[#allocation36_spill] sm:$0xff]  ;;  %v13741_v5 = vld [vmem:[#allocation37_spill] sm:$0xff] }
 0x44c   : > { %13734 = vst [vmem:[#allocation33_spill] sm:$0xff] %v11911_v52  ;;  %13735 = vst [vmem:[#allocation92_spill] sm:$0xff] %v11919_v24  ;;  %v4763_v6 = vsel %vm4703_vm10, %v11650_v45, %v4762_v0  ;;  %v4770_v47 = vsel %vm4703_vm10, %v11801_v55, %v4769_v20  ;;  %v8591_v22 = vadd.f32 %v13738_v11, %v13737_v9 }
 0x44d   : > { %13736 = vst [vmem:[#allocation114_spill] sm:$0xff] %v11921_v39  ;;  %v4764_v43 = vsel %vm4705_vm11, %v11652_v36, %v4763_v6  ;;  %v4771_v54 = vsel %vm4705_vm11, %v11814_v37, %v4770_v47  ;;  %v8592_v26 = vadd.f32 %v11482_v31, %v13739_v53  ;;  %v8593_v44 = vadd.f32 %v11502_v15, %v13740_v59  ;;  %v13742_v47 = vld [vmem:[#allocation38_spill] sm:$0xff] }
 0x44e   : > { %v4765_v34 = vsel %vm4707_vm12, %v11909_v19, %v4764_v43  ;;  %v4772_v30 = vsel %vm4707_vm12, %v11911_v52, %v4771_v54  ;;  %v3109_v40 = vmul.f32 %v11716_v50, %v8591_v22  ;;  %v8594_v28 = vadd.f32 %v11516_v21, %v13741_v5  ;;  %v13743_v22 = vld [vmem:[#allocation39_spill] sm:$0xff]  ;;  %v13744_v54 = vld [vmem:[#allocation40_spill] sm:$0xff] }
 0x44f   : > { %v4766_v62 = vsel %vm4709_vm13, %v11919_v24, %v4765_v34  ;;  %v4773_v31 = vsel %vm4709_vm13, %v11921_v39, %v4772_v30  ;;  %v3110_v42 = vmul.f32 %v11716_v50, %v8592_v26  ;;  %v3111_v15 = vmul.f32 %v11716_v50, %v8593_v44  ;;  %v13745_v34 = vld [vmem:[#allocation41_spill] sm:$0xff] }
 0x450   : > { %v4813_v0 = vpack.c.b16 %v4773_v31, %v4766_v62  ;;  %v3174_v20 = vadd.f32 %v11732_v63, %v3109_v40  ;;  %v3112_v6 = vmul.f32 %v11716_v50, %v8594_v28  ;;  %v8595_v9 = vadd.f32 %v11533_v13, %v13742_v47 }
 0x451   : > { %v3175_v21 = vadd.f32 %v11732_v63, %v3110_v42  ;;  %v3176_v11 = vadd.f32 %v11732_v63, %v3111_v15  ;;  %v11964_v43 = vadd.f32 %v11561_v35, %v13743_v22  ;;  %v11968_v53 = vadd.f32 %v11581_v17, %v13744_v54 }
 0x452   : > { %8329 = vmatprep.mubr.bf16.mxu1 %v4813_v0  ;;  %v3235_v59 = vmax.f32 %v3174_v20, 0.0  ;;  %v3177_v44 = vadd.f32 %v11732_v63, %v3112_v6  ;;  %v11974_v13 = vadd.f32 %v11597_v14, %v13745_v34  ;;  %v11976_v30 = vunpack.c.l.b16 %v4377_v23 }
 0x453   : > { %v4379_v35 = vpack.c.bf16 %v11905_v27, %v11905_v27  ;;  %v3236_v40 = vmax.f32 %v3175_v21, 0.0  ;;  %v3237_v5 = vmax.f32 %v3176_v11, 0.0  ;;  %v3113_v22 = vmul.f32 %v11716_v50, %v8595_v9 }
 0x454   : > { %v3357_v28 = vcombine.high %v3235_v59, %v3235_v59  ;;  %v4104_v62 = vsel %vm3431_vm6, %v3235_v59, -inf  ;;  %v3238_v31 = vmax.f32 %v3177_v44, 0.0 }
 0x455   : > { %v4105_v42 = vrot.slane %v4104_v62, 4  ;;  %v3358_v15 = vcombine.high %v3236_v40, %v3236_v40  ;;  %v4118_v0 = vsel %vm3431_vm6, %v3236_v40, -inf  ;;  %v3359_v14 = vcombine.high %v3237_v5, %v3237_v5 }
 0x456   : > { %v4111_v23 = vsel %vm3431_vm6, %v3357_v28, -inf  ;;  %v4119_v20 = vrot.slane %v4118_v0, 4  ;;  %v4132_v6 = vsel %vm3431_vm6, %v3237_v5, -inf  ;;  %v3360_v27 = vcombine.high %v3238_v31, %v3238_v31 }
 0x457   : > { %v4112_v47 = vrot.slane %v4111_v23, 4  ;;  %v4125_v21 = vsel %vm3431_vm6, %v3358_v15, -inf  ;;  %v4133_v11 = vrot.slane %v4132_v6, 4  ;;  %v4139_v44 = vsel %vm3431_vm6, %v3359_v14, -inf }
 0x458   : > { %v4120_v54 = vmax.f32 %v4118_v0, %v4119_v20  ;;  %v4126_v59 = vrot.slane %v4125_v21, 4  ;;  %v4146_v34 = vsel %vm3431_vm6, %v3238_v31, -inf  ;;  %v4106_v40 = vmax.f32 %v4104_v62, %v4105_v42 }
 0x459   : > { %v4113_v26 = vmax.f32 %v4111_v23, %v4112_v47  ;;  %v4134_v29 = vmax.f32 %v4132_v6, %v4133_v11  ;;  %v4140_v28 = vrot.slane %v4139_v44, 4  ;;  %v4147_v5 = vrot.slane %v4146_v34, 4 }
 0x45a   : > { %v4121_v17 = vrot.slane %v4120_v54, 2  ;;  %v4127_v58 = vmax.f32 %v4125_v21, %v4126_v59  ;;  %v4153_v52 = vsel %vm3431_vm6, %v3360_v27, -inf  ;;  %v3178_v9 = vadd.f32 %v11732_v63, %v3113_v22 }
 0x45b   : > { %v4114_v19 = vrot.slane %v4113_v26, 2  ;;  %v4135_v15 = vrot.slane %v4134_v29, 2  ;;  %v4141_v37 = vmax.f32 %v4139_v44, %v4140_v28  ;;  %v4148_v55 = vmax.f32 %v4146_v34, %v4147_v5 }
 0x45c   : > { %v4122_v0 = vmax.f32 %v4120_v54, %v4121_v17  ;;  %v4128_v20 = vrot.slane %v4127_v58, 2  ;;  %v4154_v14 = vrot.slane %v4153_v52, 4  ;;  %v4107_v36 = vrot.slane %v4106_v40, 2 }
 0x45d   : > { %v4115_v31 = vmax.f32 %v4113_v26, %v4114_v19  ;;  %v4136_v62 = vmax.f32 %v4134_v29, %v4135_v15  ;;  %v4142_v42 = vrot.slane %v4141_v37, 2  ;;  %v4149_v47 = vrot.slane %v4148_v55, 2 }
 0x45e   : > { %v4123_v23 = vrot.slane %v4122_v0, 1  ;;  %v4129_v6 = vmax.f32 %v4127_v58, %v4128_v20  ;;  %v4155_v21 = vmax.f32 %v4153_v52, %v4154_v14  ;;  %v3239_v8 = vmax.f32 %v3178_v9, 0.0 }
 0x45f   : > { %v4116_v11 = vrot.slane %v4115_v31, 1  ;;  %v4137_v59 = vrot.slane %v4136_v62, 1  ;;  %v4143_v27 = vmax.f32 %v4141_v37, %v4142_v42  ;;  %v4150_v28 = vmax.f32 %v4148_v55, %v4149_v47 }
 0x460   : > { %v4124_v45 = vmax.f32 %v4122_v0, %v4123_v23  ;;  %v4130_v44 = vrot.slane %v4129_v6, 1  ;;  %v4156_v22 = vrot.slane %v4155_v21, 2  ;;  %v11995_v17 = vsel %vm4697_vm7, %v11903_v25, %v11899_v3 }
 0x461   : > { %v13746_v29 = vpack.c.bf16 %v11882_v1, %v11882_v1  ;;  %v4117_v58 = vmax.f32 %v4115_v31, %v4116_v11  ;;  %v4144_v52 = vrot.slane %v4143_v27, 1  ;;  %v12002_v26 = vunpack.c.l.b16 %v4379_v35 }
 0x462   : > { %v12004_v37 = vmax.f32 %v4106_v40, %v4107_v36  ;;  %v3361_v54 = vcombine.high %v3239_v8, %v3239_v8  ;;  %v3114_v55 = vmul.f32 %v11716_v50, %v11964_v43  ;;  %v4131_v34 = vmax.f32 %v4129_v6, %v4130_v44 }
 0x463   : > { %v12000_v19 = vunpack.c.l.b16 %v13746_v29  ;;  %13747 = vst [vmem:[#allocation34_spill] sm:$0xff] %v12002_v26  ;;  %v4384_v5 = vpack.c.bf16 %v4124_v45, %v4124_v45  ;;  %v4138_v15 = vmax.f32 %v4136_v62, %v4137_v59  ;;  %v4160_v9 = vsel %vm3431_vm6, %v3239_v8, -inf }
 0x464   : > { %v13748_v1 = vpack.c.bf16 %v11927_v10, %v11927_v10  ;;  %v4151_v20 = vrot.slane %v4150_v28, 1  ;;  %v12014_v14 = vmax.f32 %v4155_v21, %v4156_v22  ;;  %v3115_v36 = vmul.f32 %v11716_v50, %v11968_v53 }
 0x465   : > { %v12021_v43 = vsel %vm4697_vm7, %v11655_v56, %v11919_v24  ;;  %v12026_v45 = vsel %vm4697_vm7, %v11860_v48, %v11921_v39  ;;  %v4383_v8 = vpack.c.bf16 %v4117_v58, %v4117_v58  ;;  %v12028_v10 = vmax.f32 %v4143_v27, %v4144_v52 }
 0x466   : > { %v12012_v0 = vunpack.c.l.b16 %v13748_v1  ;;  %v4161_v40 = vrot.slane %v4160_v9, 4  ;;  %v4167_v31 = vsel %vm3431_vm6, %v3361_v54, -inf  ;;  %v3179_v53 = vadd.f32 %v11732_v63, %v3114_v55 }
 0x467   : > { %v4385_v62 = vpack.c.bf16 %v4131_v34, %v4131_v34  ;;  %v12033_v42 = vunpack.c.l.b16 %v4384_v5  ;;  %v4386_v23 = vpack.c.bf16 %v4138_v15, %v4138_v15  ;;  %v4168_v6 = vrot.slane %v4167_v31, 4 }
 0x468   : > { %13749 = vst [vmem:[#allocation94_spill] sm:$0xff] %v12012_v0  ;;  %v12035_v47 = vmax.f32 %v4150_v28, %v4151_v20  ;;  %v3240_v11 = vmax.f32 %v3179_v53, 0.0  ;;  %v3180_v59 = vadd.f32 %v11732_v63, %v3115_v36  ;;  %v12039_v27 = vunpack.c.l.b16 %v4383_v8 }
 0x469   : > { %v4169_v22 = vmax.f32 %v4167_v31, %v4168_v6  ;;  %v3116_v29 = vmul.f32 %v11716_v50, %v11974_v13  ;;  %v4162_v58 = vmax.f32 %v4160_v9, %v4161_v40  ;;  %v12046_v55 = vunpack.c.l.b16 %v4386_v23 }
 0x46a   : > { %13750 = vst [vmem:[#allocation35_spill] sm:$0xff] %v12039_v27  ;;  %v3362_v52 = vcombine.high %v3240_v11, %v3240_v11  ;;  %v4174_v54 = vsel %vm3431_vm6, %v3240_v11, -inf  ;;  %v3241_v28 = vmax.f32 %v3180_v59, 0.0  ;;  %v12049_v1 = vunpack.c.l.b16 %v4385_v62 }
 0x46b   : > { %v4170_v34 = vrot.slane %v4169_v22, 2  ;;  %v4175_v5 = vrot.slane %v4174_v54, 4  ;;  %v3181_v15 = vadd.f32 %v11732_v63, %v3116_v29  ;;  %v4388_v13 = vpack.c.bf16 %v12035_v47, %v12035_v47 }
 0x46c   : > { %v4181_v20 = vsel %vm3431_vm6, %v3362_v52, -inf  ;;  %v3363_v36 = vcombine.high %v3241_v28, %v3241_v28  ;;  %v4188_v8 = vsel %vm3431_vm6, %v3241_v28, -inf  ;;  %v4163_v53 = vrot.slane %v4162_v58, 2 }
 0x46d   : > { %v4171_v9 = vmax.f32 %v4169_v22, %v4170_v34  ;;  %v4176_v40 = vmax.f32 %v4174_v54, %v4175_v5  ;;  %v4182_v31 = vrot.slane %v4181_v20, 4  ;;  %v4189_v23 = vrot.slane %v4188_v8, 4 }
 0x46e   : > { %v4195_v6 = vsel %vm3431_vm6, %v3363_v36, -inf  ;;  %v3242_v11 = vmax.f32 %v3181_v15, 0.0  ;;  %v13751_v28 = vrot.slane %v11812_v16, 1  ;;  %v13752_v5 = vrot.slane %v11880_v49, 1 }
 0x46f   : > { %v4172_v59 = vrot.slane %v4171_v9, 1  ;;  %v4177_v29 = vrot.slane %v4176_v40, 2  ;;  %v4183_v62 = vmax.f32 %v4181_v20, %v4182_v31  ;;  %v4196_v21 = vrot.slane %v4195_v6, 4 }
 0x470   : > { %v4190_v44 = vmax.f32 %v4188_v8, %v4189_v23  ;;  %v3364_v52 = vcombine.high %v3242_v11, %v3242_v11  ;;  %v4202_v35 = vsel %vm3431_vm6, %v3242_v11, -inf  ;;  %v4047_v47 = vmax.f32 %v11812_v16, %v13751_v28 }
 0x471   : > { %v4178_v22 = vmax.f32 %v4176_v40, %v4177_v29  ;;  %v4184_v54 = vrot.slane %v4183_v62, 2  ;;  %v4197_v34 = vmax.f32 %v4195_v6, %v4196_v21  ;;  %v4054_v36 = vmax.f32 %v11880_v49, %v13752_v5 }
 0x472   : > { %v4173_v15 = vmax.f32 %v4171_v9, %v4172_v59  ;;  %v4191_v56 = vrot.slane %v4190_v44, 2  ;;  %v4203_v48 = vrot.slane %v4202_v35, 4  ;;  %v4209_v20 = vsel %vm3431_vm6, %v3364_v52, -inf }
 0x473   : > { %v12064_v8 = vmax.f32 %v4162_v58, %v4163_v53  ;;  %v4179_v31 = vrot.slane %v4178_v22, 1  ;;  %v4185_v23 = vmax.f32 %v4183_v62, %v4184_v54  ;;  %v4198_v11 = vrot.slane %v4197_v34, 2 }
 0x474   : > { %v4192_v24 = vmax.f32 %v4190_v44, %v4191_v56  ;;  %v4204_v39 = vmax.f32 %v4202_v35, %v4203_v48  ;;  %v4210_v16 = vrot.slane %v4209_v20, 4  ;;  %v13753_v40 = vrot.slane %v11901_v38, 1 }
 0x475   : > { %v4180_v6 = vmax.f32 %v4178_v22, %v4179_v31  ;;  %v4186_v29 = vrot.slane %v4185_v23, 1  ;;  %v4199_v49 = vmax.f32 %v4197_v34, %v4198_v11  ;;  %v13754_v9 = vrot.slane %v12004_v37, 1 }
 0x476   : > { %v4103_v21 = vmax.f32 %v11901_v38, %v13753_v40  ;;  %v4391_v52 = vpack.c.bf16 %v4173_v15, %v4173_v15  ;;  %v4193_v58 = vrot.slane %v4192_v24, 1  ;;  %v4205_v53 = vrot.slane %v4204_v39, 2 }
 0x477   : > { %v4110_v59 = vmax.f32 %v12004_v37, %v13754_v9  ;;  %v4211_v28 = vmax.f32 %v4209_v20, %v4210_v16  ;;  %v4187_v62 = vmax.f32 %v4185_v23, %v4186_v29  ;;  %v4392_v54 = vpack.c.bf16 %v4180_v6, %v4180_v6 }
 0x478   : > { %v4200_v56 = vrot.slane %v4199_v49, 1  ;;  %v4373_v48 = vpack.c.bf16 %v4047_v47, %v4047_v47  ;;  %v12075_v35 = vsel %vm4697_vm7, %v12033_v42, %v12039_v27  ;;  %v4206_v38 = vmax.f32 %v4204_v39, %v4205_v53 }
 0x479   : > { %v4374_v44 = vpack.c.bf16 %v4054_v36, %v4054_v36  ;;  %v4381_v22 = vpack.c.bf16 %v4103_v21, %v4103_v21  ;;  %v13755_v34 = vpack.c.bf16 %v12028_v10, %v12028_v10  ;;  %v12082_v5 = vunpack.c.l.b16 %v4388_v13 }
 0x47a   : > { %v4194_v15 = vmax.f32 %v4192_v24, %v4193_v58  ;;  %v4212_v20 = vrot.slane %v4211_v28, 2  ;;  %v4165_v31 = vrot.slane %v12064_v8, 1  ;;  %v12085_v47 = vunpack.c.l.b16 %v4391_v52 }
 0x47b   : > { %v12080_v37 = vunpack.c.l.b16 %v13755_v34  ;;  %v4393_v23 = vpack.c.bf16 %v4187_v62, %v4187_v62  ;;  %v4382_v11 = vpack.c.bf16 %v4110_v59, %v4110_v59  ;;  %v12087_v16 = vunpack.c.l.b16 %v4392_v54  ;;  %v13763_v54 = vld [vmem:[#allocation25_spill] sm:$0xff]  ;;  %v13764_v34 = vld [vmem:[#allocation43_spill] sm:$0xff] }
 0x47c   : > { %13756 = vst [vmem:[#allocation36_spill] sm:$0xff] %v12085_v47  ;;  %v4201_v39 = vmax.f32 %v4199_v49, %v4200_v56  ;;  %v12089_v36 = vunpack.c.l.b16 %v4373_v48  ;;  %v4775_v10 = vsel %vm4699_vm8, %v11887_v61, %v11892_v32  ;;  %v4207_v40 = vrot.slane %v4206_v38, 1 }
 0x47d   : > { %13757 = vst [vmem:[#allocation37_spill] sm:$0xff] %v12087_v16  ;;  %v12094_v13 = vunpack.c.l.b16 %v4374_v44  ;;  %v12096_v24 = vunpack.c.l.b16 %v4381_v22  ;;  %v4776_v21 = vsel %vm4701_vm9, %v11847_v33, %v4775_v10  ;;  %v4394_v6 = vpack.c.bf16 %v4194_v15, %v4194_v15  ;;  %v13766_v10 = vld [vmem:[#allocation45_spill] sm:$0xff] }
 0x47e   : > { %13758 = vst [vmem:[#allocation38_spill] sm:$0xff] %v12089_v36  ;;  %v12100_v29 = vmax.f32 %v4211_v28, %v4212_v20  ;;  %v4777_v49 = vsel %vm4703_vm10, %v11894_v46, %v4776_v21  ;;  %v4782_v9 = vsel %vm4699_vm8, %v11976_v30, %v11995_v17  ;;  %v12107_v59 = vunpack.c.l.b16 %v4393_v23  ;;  %v13762_v17 = vld [vmem:[#allocation42_spill] sm:$0xff] }
 0x47f   : > { %13759 = vst [vmem:[#allocation39_spill] sm:$0xff] %v12094_v13  ;;  %13760 = vst [vmem:[#allocation40_spill] sm:$0xff] %v12096_v24  ;;  %v12109_v32 = vunpack.c.l.b16 %v4382_v11  ;;  %v4778_v52 = vsel %vm4705_vm11, %v11896_v4, %v4777_v49  ;;  %v4783_v58 = vsel %vm4701_vm9, %v12000_v19, %v4782_v9  ;;  %v12118_v53 = vsel %vm4697_vm7, %v12087_v16, %v12085_v47  ;;  %v13765_v11 = vld [vmem:[#allocation44_spill] sm:$0xff]  ;;  %v13768_v9 = vld [vmem:[#allocation26_spill] sm:$0xff] }
 0x480   : > { %v4395_v28 = vpack.c.bf16 %v4201_v39, %v4201_v39  ;;  %v4784_v62 = vsel %vm4703_vm10, %v12002_v26, %v4783_v58  ;;  %v8599_v56 = vadd.f32 %v13763_v54, %v13762_v17  ;;  %v12124_v48 = vmax.f32 %v4206_v38, %v4207_v40 }
 0x481   : > { %13761 = vst [vmem:[#allocation41_spill] sm:$0xff] %v12109_v32  ;;  %v4779_v44 = vsel %vm4707_vm12, %v12089_v36, %v4778_v52  ;;  %v4785_v22 = vsel %vm4705_vm11, %v12012_v0, %v4784_v62  ;;  %v8600_v15 = vadd.f32 %v11683_v60, %v13764_v34  ;;  %v8601_v39 = vadd.f32 %v11707_v41, %v13765_v11  ;;  %v13767_v60 = vld [vmem:[#allocation46_spill] sm:$0xff] }
 0x482   : > { %v4786_v20 = vsel %vm4707_vm12, %v12096_v24, %v4785_v22  ;;  %v3117_v23 = vmul.f32 %v11716_v50, %v8599_v56  ;;  %v8602_v38 = vadd.f32 %v11724_v12, %v13766_v10  ;;  %v4780_v40 = vsel %vm4709_vm13, %v12094_v13, %v4779_v44 }
 0x483   : > { %v4787_v21 = vsel %vm4709_vm13, %v12109_v32, %v4786_v20  ;;  %v3118_v49 = vmul.f32 %v11716_v50, %v8600_v15  ;;  %v8603_v52 = vadd.f32 %v13768_v9, %v13767_v60  ;;  %v3119_v17 = vmul.f32 %v11716_v50, %v8601_v39 }
 0x484   : > { %v4814_v58 = vpack.c.b16 %v4787_v21, %v4780_v40  ;;  %v3182_v62 = vadd.f32 %v11732_v63, %v3117_v23  ;;  %v3120_v41 = vmul.f32 %v11716_v50, %v8602_v38  ;;  %v12149_v54 = vunpack.c.l.b16 %v4394_v6 }
 0x485   : > { %v4214_v12 = vrot.slane %v12100_v29, 1  ;;  %v3183_v56 = vadd.f32 %v11732_v63, %v3118_v49  ;;  %v3121_v44 = vmul.f32 %v11716_v50, %v8603_v52  ;;  %v12154_v22 = vunpack.c.l.b16 %v4395_v28 }
 0x486   : > { %8330 = vmatmul.mubr.bf16.gmra.mrb[132].mxu1 %v4814_v58  ;;  %v3243_v34 = vmax.f32 %v3182_v62, 0.0  ;;  %v3184_v15 = vadd.f32 %v11732_v63, %v3119_v17  ;;  %v3185_v20 = vadd.f32 %v11732_v63, %v3120_v41  ;;  %v13769_v6 = vrot.slane %v12014_v14, 1 }
 0x487   : > { %v3244_v11 = vmax.f32 %v3183_v56, 0.0  ;;  %v12166_v10 = vmax.f32 %v12064_v8, %v4165_v31  ;;  %v3186_v9 = vadd.f32 %v11732_v63, %v3121_v44 }
 0x488   : > { %v12163_v39 = vmax.f32 %v12014_v14, %v13769_v6  ;;  %v3365_v50 = vcombine.high %v3243_v34, %v3243_v34  ;;  %v4216_v28 = vsel %vm3431_vm6, %v3243_v34, -inf  ;;  %v3245_v38 = vmax.f32 %v3184_v15, 0.0 }
 0x489   : > { %v3246_v40 = vmax.f32 %v3185_v20, 0.0  ;;  %v4217_v21 = vrot.slane %v4216_v28, 4  ;;  %v3366_v49 = vcombine.high %v3244_v11, %v3244_v11  ;;  %v4230_v60 = vsel %vm3431_vm6, %v3244_v11, -inf }
 0x48a   : > { %v4223_v52 = vsel %vm3431_vm6, %v3365_v50, -inf  ;;  %v4231_v58 = vrot.slane %v4230_v60, 4  ;;  %v3367_v62 = vcombine.high %v3245_v38, %v3245_v38  ;;  %v4244_v14 = vsel %vm3431_vm6, %v3245_v38, -inf }
 0x48b   : > { %v4218_v17 = vmax.f32 %v4216_v28, %v4217_v21  ;;  %v4224_v8 = vrot.slane %v4223_v52, 4  ;;  %v4237_v31 = vsel %vm3431_vm6, %v3366_v49, -inf  ;;  %v4245_v41 = vrot.slane %v4244_v14, 4 }
 0x48c   : > { %v4232_v56 = vmax.f32 %v4230_v60, %v4231_v58  ;;  %v4238_v34 = vrot.slane %v4237_v31, 4  ;;  %v4251_v15 = vsel %vm3431_vm6, %v3367_v62, -inf  ;;  %v3368_v20 = vcombine.high %v3246_v40, %v3246_v40 }
 0x48d   : > { %v4219_v6 = vrot.slane %v4218_v17, 2  ;;  %v4225_v11 = vmax.f32 %v4223_v52, %v4224_v8  ;;  %v4246_v23 = vmax.f32 %v4244_v14, %v4245_v41  ;;  %v4252_v63 = vrot.slane %v4251_v15, 4 }
 0x48e   : > { %v4233_v44 = vrot.slane %v4232_v56, 2  ;;  %v4239_v50 = vmax.f32 %v4237_v31, %v4238_v34  ;;  %v4258_v36 = vsel %vm3431_vm6, %v3246_v40, -inf  ;;  %v4265_v38 = vsel %vm3431_vm6, %v3368_v20, -inf }
 0x48f   : > { %v4226_v28 = vrot.slane %v4225_v11, 2  ;;  %v4247_v21 = vrot.slane %v4246_v23, 2  ;;  %v4253_v24 = vmax.f32 %v4251_v15, %v4252_v63  ;;  %v4215_v49 = vmax.f32 %v12100_v29, %v4214_v12 }
 0x490   : > { %v4234_v60 = vmax.f32 %v4232_v56, %v4233_v44  ;;  %v4240_v58 = vrot.slane %v4239_v50, 2  ;;  %v4259_v4 = vrot.slane %v4258_v36, 4  ;;  %v4266_v62 = vrot.slane %v4265_v38, 4 }
 0x491   : > { %v4227_v0 = vmax.f32 %v4225_v11, %v4226_v28  ;;  %v4248_v46 = vmax.f32 %v4246_v23, %v4247_v21  ;;  %v4254_v52 = vrot.slane %v4253_v24, 2  ;;  %v12178_v14 = vmax.f32 %v3186_v9, 0.0 }
 0x492   : > { %v4220_v8 = vmax.f32 %v4218_v17, %v4219_v6  ;;  %v4235_v31 = vrot.slane %v4234_v60, 1  ;;  %v4241_v41 = vmax.f32 %v4239_v50, %v4240_v58  ;;  %v4260_v40 = vmax.f32 %v4258_v36, %v4259_v4 }
 0x493   : > { %v4228_v34 = vrot.slane %v4227_v0, 1  ;;  %v4249_v20 = vrot.slane %v4248_v46, 1  ;;  %v4255_v16 = vmax.f32 %v4253_v24, %v4254_v52  ;;  %v4267_v26 = vmax.f32 %v4265_v38, %v4266_v62 }
 0x494   : > { %v4236_v15 = vmax.f32 %v4234_v60, %v4235_v31  ;;  %v4242_v63 = vrot.slane %v4241_v41, 1  ;;  %v4261_v29 = vrot.slane %v4260_v40, 2  ;;  %v4389_v12 = vpack.c.bf16 %v12163_v39, %v12163_v39 }
 0x495   : > { %v4229_v56 = vmax.f32 %v4227_v0, %v4228_v34  ;;  %v4250_v11 = vmax.f32 %v4248_v46, %v4249_v20  ;;  %v4256_v23 = vrot.slane %v4255_v16, 1  ;;  %v4272_v9 = vsel %vm3431_vm6, %v12178_v14, -inf }
 0x496   : > { %v4221_v17 = vrot.slane %v4220_v8, 1  ;;  %v4243_v6 = vmax.f32 %v4241_v41, %v4242_v63  ;;  %v4400_v44 = vpack.c.bf16 %v4236_v15, %v4236_v15  ;;  %v4262_v4 = vmax.f32 %v4260_v40, %v4261_v29 }
 0x497   : > { %v4399_v36 = vpack.c.bf16 %v4229_v56, %v4229_v56  ;;  %v4257_v50 = vmax.f32 %v4255_v16, %v4256_v23  ;;  %v4268_v24 = vrot.slane %v4267_v26, 2  ;;  %v4273_v38 = vrot.slane %v4272_v9, 4 }
 0x498   : > { %v4401_v28 = vpack.c.bf16 %v4243_v6, %v4243_v6  ;;  %v12184_v21 = vunpack.c.l.b16 %v4400_v44  ;;  %v4263_v60 = vrot.slane %v4262_v4, 1  ;;  %v4390_v0 = vpack.c.bf16 %v12166_v10, %v12166_v10 }
 0x499   : > { %v12188_v46 = vunpack.c.l.b16 %v4399_v36  ;;  %v4402_v39 = vpack.c.bf16 %v4250_v11, %v4250_v11  ;;  %v4274_v58 = vmax.f32 %v4272_v9, %v4273_v38  ;;  %v4397_v62 = vpack.c.bf16 %v4215_v49, %v4215_v49 }
 0x49a   : > { %v12190_v52 = vunpack.c.l.b16 %v4401_v28  ;;  %v4403_v31 = vpack.c.bf16 %v4257_v50, %v4257_v50  ;;  %v4264_v41 = vmax.f32 %v4262_v4, %v4263_v60  ;;  %v4222_v40 = vmax.f32 %v4220_v8, %v4221_v17 }
 0x49b   : > { %13770 = vst [vmem:[#allocation42_spill] sm:$0xff] %v12188_v46  ;;  %v12195_v16 = vsel %vm4697_vm7, %v11899_v3, %v12094_v13  ;;  %v4802_v34 = vsel %vm4697_vm7, %v12184_v21, %v12188_v46  ;;  %v4269_v10 = vmax.f32 %v4267_v26, %v4268_v24  ;;  %v4275_v20 = vrot.slane %v4274_v58, 2  ;;  %v13797_v3 = vld [vmem:[#allocation77_spill] sm:$0xff]  ;;  %v13798_v13 = vld [vmem:[#allocation83_spill] sm:$0xff] }
 0x49c   : > { %v13771_v15 = vpack.c.bf16 %v12124_v48, %v12124_v48  ;;  %v12208_v8 = vsel %vm4697_vm7, %v12190_v52, %v12184_v21  ;;  %v4404_v63 = vpack.c.bf16 %v4264_v41, %v4264_v41  ;;  %v4398_v29 = vpack.c.bf16 %v4222_v40, %v4222_v40 }
 0x49d   : > { %13772 = vst [vmem:[#allocation25_spill] sm:$0xff] %v12208_v8  ;;  %v12210_v56 = vunpack.c.l.b16 %v4402_v39  ;;  %v4276_v11 = vmax.f32 %v4274_v58, %v4275_v20  ;;  %v12212_v23 = vunpack.c.l.b16 %v4389_v12  ;;  %v4789_v26 = vsel %vm4699_vm8, %v12049_v1, %v12075_v35  ;;  %v13775_v20 = vld [vmem:[#allocation47_spill] sm:$0xff]  ;;  %v13802_v8 = vld [vmem:[#allocation81_spill] sm:$0xff] }
 0x49e   : > { %v12203_v49 = vunpack.c.l.b16 %v13771_v15  ;;  %v12217_v9 = vunpack.c.l.b16 %v4403_v31  ;;  %v12219_v48 = vunpack.c.l.b16 %v4390_v0  ;;  %v12221_v17 = vunpack.c.l.b16 %v4397_v62  ;;  %v13776_v15 = vld [vmem:[#allocation48_spill] sm:$0xff] }
 0x49f   : > { %v4790_v6 = vsel %vm4701_vm9, %v12046_v55, %v4789_v26  ;;  %v12225_v44 = vunpack.c.l.b16 %v4404_v63  ;;  %v4796_v12 = vsel %vm4699_vm8, %v12107_v59, %v12118_v53  ;;  %v4270_v36 = vrot.slane %v4269_v10, 1  ;;  %v13777_v26 = vld [vmem:[#allocation49_spill] sm:$0xff] }
 0x4a0   : > { %13773 = vst [vmem:[#allocation43_spill] sm:$0xff] %v12219_v48  ;;  %v4791_v4 = vsel %vm4703_vm10, %v12080_v37, %v4790_v6  ;;  %v12232_v35 = vunpack.c.l.b16 %v4398_v29  ;;  %v4797_v24 = vsel %vm4701_vm9, %v12149_v54, %v4796_v12  ;;  %v4277_v38 = vrot.slane %v4276_v11, 1 }
 0x4a1   : > { %v4792_v50 = vsel %vm4705_vm11, %v12082_v5, %v4791_v4  ;;  %v4798_v60 = vsel %vm4703_vm10, %v12154_v22, %v4797_v24  ;;  %v4271_v0 = vmax.f32 %v4269_v10, %v4270_v36  ;;  %v4803_v53 = vsel %vm4699_vm8, %v12190_v52, %v4802_v34  ;;  %v13778_v36 = vld [vmem:[#allocation51_spill] sm:$0xff] }
 0x4a2   : > { %13774 = vst [vmem:[#allocation44_spill] sm:$0xff] %v12232_v35  ;;  %v4793_v28 = vsel %vm4707_vm12, %v12212_v23, %v4792_v50  ;;  %v4799_v58 = vsel %vm4705_vm11, %v12203_v49, %v4798_v60  ;;  %v4278_v62 = vmax.f32 %v4276_v11, %v4277_v38  ;;  %v4804_v31 = vsel %vm4701_vm9, %v12210_v56, %v4803_v53  ;;  %v13779_v24 = vld [vmem:[#allocation79_spill] sm:$0xff] }
 0x4a3   : > { %v4794_v39 = vsel %vm4709_vm13, %v12219_v48, %v4793_v28  ;;  %v4800_v41 = vsel %vm4707_vm12, %v12221_v17, %v4799_v58  ;;  %v4405_v40 = vpack.c.bf16 %v4271_v0, %v4271_v0  ;;  %v4805_v10 = vsel %vm4703_vm10, %v12217_v9, %v4804_v31  ;;  %v13780_v38 = vld [vmem:[#allocation55_spill] sm:$0xff]  ;;  %v13782_v0 = vld [vmem:[#allocation52_spill] sm:$0xff] }
 0x4a4   : > { %v4972_v34 = vsel %vm4699_vm8, %v13776_v15, %v13775_v20  ;;  %v4801_v63 = vsel %vm4709_vm13, %v12232_v35, %v4800_v41  ;;  %v4406_v29 = vpack.c.bf16 %v4278_v62, %v4278_v62  ;;  %v4806_v11 = vsel %vm4705_vm11, %v12225_v44, %v4805_v10  ;;  %v13783_v58 = vld [vmem:[#allocation56_spill] sm:$0xff]  ;;  %v13785_v41 = vld [vmem:[#allocation71_spill] sm:$0xff]  ;;  %v13786_v10 = vld [vmem:[#allocation53_spill] sm:$0xff] }
 0x4a5   : > { %v4973_v6 = vsel %vm4701_vm9, %v13777_v26, %v4972_v34  ;;  %v4815_v4 = vpack.c.b16 %v4801_v63, %v4794_v39  ;;  %v12263_v12 = vunpack.c.l.b16 %v4405_v40  ;;  %v4979_v28 = vsel %vm4699_vm8, %v13780_v38, %v13779_v24  ;;  %v13784_v31 = vld [vmem:[#allocation72_spill] sm:$0xff]  ;;  %v13787_v15 = vld [vmem:[#allocation59_spill] sm:$0xff]  ;;  %v13788_v63 = vld [vmem:[#allocation73_spill] sm:$0xff] }
 0x4a6   : > { %v4974_v50 = vsel %vm4703_vm10, %v13778_v36, %v4973_v6  ;;  %v12270_v60 = vunpack.c.l.b16 %v4406_v29  ;;  %v4980_v62 = vsel %vm4701_vm9, %v13783_v58, %v4979_v28  ;;  %v4988_v39 = vsel %vm4703_vm10, %v13785_v41, %v13784_v31  ;;  %v13789_v6 = vld [vmem:[#allocation67_spill] sm:$0xff]  ;;  %v13790_v24 = vld [vmem:[#allocation60_spill] sm:$0xff]  ;;  %v13791_v38 = vld [vmem:[#allocation74_spill] sm:$0xff] }
 0x4a7   : > { %v4975_v53 = vsel %vm4705_vm11, %v13782_v0, %v4974_v50  ;;  %8333 = vmatprep.mubr.bf16.mxu1 %v4815_v4  ;;  %v4807_v40 = vsel %vm4707_vm12, %v12263_v12, %v4806_v11  ;;  %v4981_v34 = vsel %vm4703_vm10, %v13787_v15, %v4980_v62  ;;  %v4989_v29 = vsel %vm4705_vm11, %v13788_v63, %v4988_v39  ;;  %v13793_v62 = vld [vmem:[#allocation76_spill] sm:$0xff]  ;;  %v13794_v41 = vld [vmem:[#allocation70_spill] sm:$0xff]  ;;  %v13795_v39 = vld [vmem:[#allocation75_spill] sm:$0xff] }
 0x4a8   : > { %13781 = vst [vmem:[#allocation45_spill] sm:$0xff] %v12270_v60  ;;  %v4976_v20 = vsel %vm4707_vm12, %v13786_v10, %v4975_v53  ;;  %v4808_v26 = vsel %vm4709_vm13, %v12270_v60, %v4807_v40  ;;  %v4982_v4 = vsel %vm4705_vm11, %v13790_v24, %v4981_v34  ;;  %v4990_v11 = vsel %vm4707_vm12, %v13791_v38, %v4989_v29  ;;  %v13792_v53 = vld [vmem:[#allocation61_spill] sm:$0xff]  ;;  %v13799_v60 = vld [vmem:[#allocation62_spill] sm:$0xff] }
 0x4a9   : > { %v4977_v50 = vsel %vm4709_vm13, %v13789_v6, %v4976_v20  ;;  %v4816_v28 = vpack.c.b16 %v4808_v26, %v4808_v26  ;;  %v4983_v58 = vsel %vm4707_vm12, %v13792_v53, %v4982_v4  ;;  %v4991_v31 = vsel %vm4709_vm13, %v13793_v62, %v4990_v11  ;;  %v13796_v63 = vld [vmem:[#allocation69_spill] sm:$0xff]  ;;  %v13801_v38 = vld [vmem:[#allocation14_spill] sm:$0xff]  ;;  %v13807_v53 = vld [vmem:[#allocation24_spill] sm:$0xff] }
 0x4aa   : > { %v4996_v40 = vsel %vm4705_vm11, %v13795_v39, %v13794_v41  ;;  %v4984_v20 = vsel %vm4709_vm13, %v13796_v63, %v4983_v58  ;;  %v5000_v29 = vsel %vm4699_vm8, %v13799_v60, %v13798_v13  ;;  %v13800_v26 = vld [vmem:[#allocation21_spill] sm:$0xff]  ;;  %v13803_v41 = vld [vmem:[#allocation64_spill] sm:$0xff]  ;;  %v13806_v13 = vld [vmem:[#allocation87_spill] sm:$0xff] }
 0x4ab   : > { %v4997_v34 = vsel %vm4707_vm12, %v13797_v3, %v4996_v40  ;;  %v5007_v4 = vsel %vm4699_vm8, %v13801_v38, %v13800_v26  ;;  %8334 = vmatmul.mubr.bf16.gmra.mrb[136].mxu1 %v4816_v28  ;;  %v5076_v11 = vpack.c.b16 %v4984_v20, %v4977_v50  ;;  %v5001_v39 = vsel %vm4701_vm9, %v13803_v41, %v5000_v29  ;;  %v13804_v58 = vld [vmem:[#allocation85_spill] sm:$0xff]  ;;  %v13805_v40 = vld [vmem:[#allocation82_spill] sm:$0xff]  ;;  %v13809_v28 = vld [vmem:[#allocation11_spill] sm:$0xff] }
 0x4ac   : > { %v4998_v6 = vsel %vm4709_vm13, %v13802_v8, %v4997_v34  ;;  %v5008_v63 = vsel %vm4701_vm9, %v13804_v58, %v5007_v4  ;;  %v5002_v10 = vsel %vm4703_vm10, %v13805_v40, %v5001_v39  ;;  %v13808_v26 = vld [vmem:[#allocation90_spill] sm:$0xff]  ;;  %v13810_v34 = vld [vmem:[#allocation88_spill] sm:$0xff]  ;;  %v13811_v41 = vld [vmem:[#allocation91_spill] sm:$0xff] }
 0x4ad   : > { %v5077_v3 = vpack.c.b16 %v4998_v6, %v4991_v31  ;;  %v5009_v60 = vsel %vm4703_vm10, %v13806_v13, %v5008_v63  ;;  %v5014_v50 = vsel %vm4699_vm8, %v13808_v26, %v13807_v53  ;;  %8353 = vmatprep.mubr.bf16.mxu1 %v5076_v11  ;;  %v5003_v20 = vsel %vm4705_vm11, %v13809_v28, %v5002_v10  ;;  %v13812_v31 = vld [vmem:[#allocation101_spill] sm:$0xff]  ;;  %v13813_v39 = vld [vmem:[#allocation84_spill] sm:$0xff]  ;;  %v13816_v10 = vld [vmem:[#allocation19_spill] sm:$0xff] }
 0x4ae   : > { %v5010_v29 = vsel %vm4705_vm11, %v13810_v34, %v5009_v60  ;;  %v5015_v6 = vsel %vm4701_vm9, %v13811_v41, %v5014_v50  ;;  %v5021_v4 = vsel %vm4699_vm8, %v13812_v31, %v11810_v7  ;;  %v5004_v63 = vsel %vm4707_vm12, %v13813_v39, %v5003_v20  ;;  %v13814_v13 = vld [vmem:[#allocation16_spill] sm:$0xff]  ;;  %v13815_v11 = vld [vmem:[#allocation93_spill] sm:$0xff]  ;;  %v13818_v7 = vld [vmem:[#allocation99_spill] sm:$0xff] }
 0x4af   : > { %v5011_v53 = vsel %vm4707_vm12, %v13814_v13, %v5010_v29  ;;  %v5016_v40 = vsel %vm4703_vm10, %v13815_v11, %v5015_v6  ;;  %v5022_v28 = vsel %vm4701_vm9, %v13816_v10, %v5021_v4  ;;  %v5055_v60 = vsel %vm4697_vm7, %v12039_v27, %v12109_v32  ;;  %v13817_v50 = vld [vmem:[#allocation96_spill] sm:$0xff]  ;;  %v13820_v6 = vld [vmem:[#allocation95_spill] sm:$0xff]  ;;  %v13821_v4 = vld [vmem:[#allocation22_spill] sm:$0xff] }
 0x4b0   : > { %v5012_v34 = vsel %vm4709_vm13, %v13817_v50, %v5011_v53  ;;  %v5017_v31 = vsel %vm4705_vm11, %v13818_v7, %v5016_v40  ;;  %v13819_v20 = vld [vmem:[#allocation20_spill] sm:$0xff]  ;;  %v5005_v13 = vsel %vm4709_vm13, %v13820_v6, %v5004_v63  ;;  %v13822_v11 = vld [vmem:[#allocation13_spill] sm:$0xff]  ;;  %v13823_v27 = vld [vmem:[#allocation102_spill] sm:$0xff] }
 0x4b1   : > { %v5023_v39 = vsel %vm4703_vm10, %v13819_v20, %v5022_v28  ;;  %v5028_v32 = vsel %vm4699_vm8, %v13823_v27, %v13822_v11  ;;  %v5078_v53 = vpack.c.b16 %v5012_v34, %v5005_v13  ;;  %v9133_v40 = vld [vmem:[%s13300_s1 + $0x148] sm:$0xff]   ;;  %v13824_v50 = vld [vmem:[#allocation23_spill] sm:$0xff]  ;;  %v5042_v11 = vsel %vm4699_vm8, %v11838_v18, %v12026_v45  ;;  %v13830_v45 = vld [vmem:[#allocation30_spill] sm:$0xff] }
 0x4b2   : > { %v5024_v10 = vsel %vm4705_vm11, %v13821_v4, %v5023_v39  ;;  %v5029_v29 = vsel %vm4701_vm9, %v11643_v57, %v5028_v32  ;;  %v13825_v63 = vld [vmem:[#allocation109_spill] sm:$0xff]  ;;  %v13826_v39 = vld [vmem:[#allocation18_spill] sm:$0xff]  ;;  %v5062_v32 = vsel %vm4697_vm7, %v12085_v47, %v12219_v48  ;;  %v13829_v57 = vld [vmem:[#allocation27_spill] sm:$0xff] }
 0x4b3   : > { %v5025_v28 = vsel %vm4707_vm12, %v13824_v50, %v5024_v10  ;;  %v5035_v6 = vsel %vm4699_vm8, %v13825_v63, %v12021_v43  ;;  %v5018_v4 = vsel %vm4707_vm12, %v13826_v39, %v5017_v31  ;;  %v5030_v13 = vsel %vm4703_vm10, %v11623_v51, %v5029_v29  ;;  %8354 = vmatmul.mubr.bf16.vlgmr.msra.gmra.mrb[124].mxu1 %v5077_v3  ;;  %v13827_v10 = vld [vmem:[#allocation111_spill] sm:$0xff]  ;;  %v13828_v50 = vld [vmem:[#allocation106_spill] sm:$0xff]  ;;  %v13832_v3 = vld [vmem:[#allocation28_spill] sm:$0xff] }
 0x4b4   : > { %v5036_v34 = vsel %vm4701_vm9, %v11756_v2, %v5035_v6  ;;  %v5026_v43 = vsel %vm4709_vm13, %v13827_v10, %v5025_v28  ;;  %v5031_v31 = vsel %vm4705_vm11, %v13828_v50, %v5030_v13  ;;  %v5069_v6 = vsel %vm4697_vm7, %v12188_v46, %v12232_v35  ;;  %8357 = vmatprep.mubr.bf16.mxu1 %v5078_v53  ;;  %v13831_v51 = vld [vmem:[#allocation107_spill] sm:$0xff]  ;;  %v13833_v28 = vld [vmem:[#allocation110_spill] sm:$0xff]  ;;  %v13834_v50 = vld [vmem:[#allocation29_spill] sm:$0xff] }
 0x4b5   : > { %v5037_v29 = vsel %vm4703_vm10, %v13829_v57, %v5036_v34  ;;  %8370 = vmatpush3.bf16.msra.mxu1 %v13830_v45  ;;  %v5032_v47 = vsel %vm4707_vm12, %v13831_v51, %v5031_v31  ;;  %v5019_v13 = vsel %vm4709_vm13, %v13833_v28, %v5018_v4  ;;  %v9134_v34 = vld [vmem:[%s13300_s1 + $0x150] sm:$0xff]   ;;  %v5043_v53 = vsel %vm4701_vm9, %v11887_v61, %v5042_v11 }
 0x4b6   : > { %v5038_v48 = vsel %vm4705_vm11, %v13832_v3, %v5037_v29  ;;  %8371 = vmatprep.subr.bf16.mxu1 %v9133_v40  ;;  %v5049_v31 = vsel %vm4699_vm8, %v11903_v25, %v12195_v16  ;;  %v5079_v45 = vpack.c.b16 %v5026_v43, %v5019_v13  ;;  %v5044_v29 = vsel %vm4703_vm10, %v11847_v33, %v5043_v53  ;;  %v13835_v51 = vld [vmem:[#allocation17_spill] sm:$0xff]  ;;  %v13837_v43 = vld [vmem:[#allocation34_spill] sm:$0xff] }
 0x4b7   : > { %v5039_v46 = vsel %vm4707_vm12, %v13834_v50, %v5038_v48  ;;  %v5050_v4 = vsel %vm4701_vm9, %v11976_v30, %v5049_v31  ;;  %v5056_v35 = vsel %vm4699_vm8, %v12033_v42, %v5055_v60  ;;  %v5033_v48 = vsel %vm4709_vm13, %v13835_v51, %v5032_v47  ;;  %v13836_v50 = vld [vmem:[#allocation33_spill] sm:$0xff] }
 0x4b8   : > { %v5040_v11 = vsel %vm4709_vm13, %v13836_v50, %v5039_v46  ;;  %v5051_v10 = vsel %vm4703_vm10, %v12000_v19, %v5050_v4  ;;  %v5057_v16 = vsel %vm4701_vm9, %v12049_v1, %v5056_v35  ;;  %v13838_v60 = vld [vmem:[#allocation37_spill] sm:$0xff]  ;;  %v5070_v47 = vsel %vm4699_vm8, %v12184_v21, %v5069_v6  ;;  %v9135_v46 = vld [vmem:[%s13300_s1 + $0x158] sm:$0xff]  }
 0x4b9   : > { %8372 = vmatpush3.bf16.msra.mxu1 %v9133_v40  ;;  %v5052_v13 = vsel %vm4705_vm11, %v13837_v43, %v5051_v10  ;;  %v5058_v53 = vsel %vm4703_vm10, %v12046_v55, %v5057_v16  ;;  %v5063_v31 = vsel %vm4699_vm8, %v13838_v60, %v5062_v32  ;;  %v13839_v4 = vld [vmem:[#allocation31_spill] sm:$0xff]  ;;  %v5071_v32 = vsel %vm4701_vm9, %v12190_v52, %v5070_v47  ;;  %v13841_v47 = vld [vmem:[#allocation50_spill] sm:$0xff] }
 0x4ba   : > { %8373 = vmatprep.subr.bf16.mxu1 %v9134_v34  ;;  %v5045_v35 = vsel %vm4705_vm11, %v13839_v4, %v5044_v29  ;;  %v5059_v40 = vsel %vm4705_vm11, %v12080_v37, %v5058_v53  ;;  %v5064_v10 = vsel %vm4701_vm9, %v12107_v59, %v5063_v31  ;;  %v5080_v16 = vpack.c.b16 %v5040_v11, %v5033_v48  ;;  %v13840_v29 = vld [vmem:[#allocation94_spill] sm:$0xff] }
 0x4bb   : > { %v5060_v21 = vsel %vm4707_vm12, %v12082_v5, %v5059_v40  ;;  %v5065_v6 = vsel %vm4703_vm10, %v12149_v54, %v5064_v10  ;;  %v5072_v51 = vsel %vm4703_vm10, %v12210_v56, %v5071_v32  ;;  %8358 = vmatmul.mubr.bf16.gmra.mrb[128].mxu1 %v5079_v45  ;;  %v5053_v53 = vsel %vm4707_vm12, %v13840_v29, %v5052_v13  ;;  %v13842_v40 = vld [vmem:[#allocation86_spill] sm:$0xff] }
 0x4bc   : > { %v5061_v31 = vsel %vm4709_vm13, %v12212_v23, %v5060_v21  ;;  %v5066_v52 = vsel %vm4705_vm11, %v12154_v22, %v5065_v6  ;;  %v5073_v48 = vsel %vm4705_vm11, %v12217_v9, %v5072_v51  ;;  %8361 = vmatprep.mubr.bf16.mxu1 %v5080_v16  ;;  %v5239_v13 = vsel %vm4699_vm8, %v13778_v36, %v13841_v47  ;;  %v9136_v51 = vld [vmem:[%s13300_s1 + $0x160] sm:$0xff]   ;;  %v13843_v16 = vld [vmem:[#allocation58_spill] sm:$0xff] }
 0x4bd   : > { %8374 = vmatpush3.bf16.msra.mxu1 %v9134_v34  ;;  %v5067_v11 = vsel %vm4707_vm12, %v12203_v49, %v5066_v52  ;;  %v5074_v45 = vsel %vm4707_vm12, %v12225_v44, %v5073_v48  ;;  %v5046_v10 = vsel %vm4707_vm12, %v13842_v40, %v5045_v35  ;;  %v5246_v21 = vsel %vm4699_vm8, %v13787_v15, %v13843_v16  ;;  %v13844_v35 = vld [vmem:[#allocation40_spill] sm:$0xff]  ;;  %v13845_v47 = vld [vmem:[#allocation78_spill] sm:$0xff] }
 0x4be   : > { %8375 = vmatprep.subr.bf16.mxu1 %v9135_v46  ;;  %v5068_v34 = vsel %vm4709_vm13, %v12221_v17, %v5067_v11  ;;  %v12471_v32 = vsel %vm4709_vm13, %v12263_v12, %v5074_v45  ;;  %v5273_v36 = vsel %vm4697_vm7, %v13804_v58, %v13801_v38  ;;  %v5054_v6 = vsel %vm4709_vm13, %v13844_v35, %v5053_v53  ;;  %v13846_v16 = vld [vmem:[#allocation80_spill] sm:$0xff]  ;;  %v13847_v58 = vld [vmem:[#allocation38_spill] sm:$0xff] }
 0x4bf   : > { %v5082_v52 = vpack.c.b16 %v5068_v34, %v5061_v31  ;;  %v5247_v48 = vsel %vm4701_vm9, %v13790_v24, %v5246_v21  ;;  %v5280_v11 = vsel %vm4697_vm7, %v13811_v41, %v13808_v26  ;;  %v5240_v45 = vsel %vm4701_vm9, %v13782_v0, %v5239_v13  ;;  %v13848_v24 = vld [vmem:[#allocation61_spill] sm:$0xff]  ;;  %v13850_v41 = vld [vmem:[#allocation8_spill] sm:$0xff] }
 0x4c0   : > { %v5256_v15 = vsel %vm4705_vm11, %v13793_v62, %v13845_v47  ;;  %v5263_v38 = vsel %vm4705_vm11, %v13802_v8, %v13846_v16  ;;  %v5047_v53 = vsel %vm4709_vm13, %v13847_v58, %v5046_v10  ;;  %v5248_v31 = vsel %vm4703_vm10, %v13848_v24, %v5247_v48  ;;  %v13849_v34 = vld [vmem:[#allocation65_spill] sm:$0xff]  ;;  %v13857_v24 = vld [vmem:[#allocation87_spill] sm:$0xff] }
 0x4c1   : > { %8376 = vmatpush3.bf16.msra.mxu1 %v9135_v46  ;;  %v5257_v26 = vsel %vm4707_vm12, %v13849_v34, %v5256_v15  ;;  %v5264_v0 = vsel %vm4707_vm12, %v13850_v41, %v5263_v38  ;;  %v13851_v62 = vcombine.high %v12178_v14, %v12178_v14  ;;  %v5081_v21 = vpack.c.b16 %v5054_v6, %v5047_v53  ;;  %v9137_v8 = vld [vmem:[%s13300_s1 + $0x168] sm:$0xff]   ;;  %v13852_v46 = vld [vmem:[#allocation63_spill] sm:$0xff]  ;;  %v13855_v6 = vld [vmem:[#allocation10_spill] sm:$0xff] }
 0x4c2   : > { %8377 = vmatprep.subr.bf16.mxu1 %v9136_v51  ;;  %v12511_v10 = vsel %vm4709_vm13, %v13852_v46, %v5257_v26  ;;  %v13853_v48 = vld [vmem:[#allocation9_spill] sm:$0xff]  ;;  %v13856_v38 = vld [vmem:[#allocation82_spill] sm:$0xff]  ;;  %v5274_v34 = vsel %vm4699_vm8, %v13857_v24, %v5273_v36  ;;  %v13860_v46 = vld [vmem:[#allocation88_spill] sm:$0xff] }
 0x4c3   : > { %v4279_v13 = vsel %vm3431_vm6, %v13851_v62, -inf  ;;  %v12515_v47 = vsel %vm4709_vm13, %v13853_v48, %v5264_v0  ;;  %v13854_v15 = vld [vmem:[#allocation53_spill] sm:$0xff]  ;;  %v5267_v53 = vsel %vm4699_vm8, %v13856_v38, %v13855_v6  ;;  %8362 = vmatmul.mubr.bf16.gmra.mrb[132].mxu1 %v5081_v21  ;;  %v13859_v62 = vld [vmem:[#allocation11_spill] sm:$0xff]  ;;  %v13864_v36 = vld [vmem:[#allocation66_spill] sm:$0xff] }
 0x4c4   : > { %v5241_v16 = vsel %vm4703_vm10, %v13854_v15, %v5240_v45  ;;  %v13858_v26 = vld [vmem:[#allocation69_spill] sm:$0xff]  ;;  %v5268_v0 = vsel %vm4701_vm9, %v13859_v62, %v5267_v53  ;;  %v5275_v45 = vsel %vm4701_vm9, %v13860_v46, %v5274_v34  ;;  %v13863_v58 = vld [vmem:[#allocation19_spill] sm:$0xff]  ;;  %v4280_v38 = vrot.slane %v4279_v13, 4  ;;  %8365 = vmatprep.mubr.bf16.mxu1 %v5082_v52  ;;  %v13868_v52 = vld [vmem:[#allocation84_spill] sm:$0xff] }
 0x4c5   : > { %v5249_v41 = vsel %vm4705_vm11, %v13858_v26, %v5248_v31  ;;  %v13861_v48 = vld [vmem:[#allocation93_spill] sm:$0xff]  ;;  %8378 = vmatpush3.bf16.msra.mxu1 %v9136_v51  ;;  %v13865_v31 = vld [vmem:[#allocation16_spill] sm:$0xff]  ;;  %v13866_v34 = vld [vmem:[#allocation67_spill] sm:$0xff]  ;;  %v5269_v26 = vsel %vm4703_vm10, %v13868_v52, %v5268_v0  ;;  %v5083_v0 = vpack.c.b16 %v12471_v32, %v12471_v32  ;;  %v5308_v52 = vsel %vm4697_vm7, %v11887_v61, %v11838_v18 }
 0x4c6   : > { %v5281_v15 = vsel %vm4699_vm8, %v13861_v48, %v5280_v11  ;;  %v13862_v14 = vld [vmem:[#allocation101_spill] sm:$0xff]  ;;  %v5250_v21 = vsel %vm4707_vm12, %v13864_v36, %v5249_v41  ;;  %v5276_v24 = vsel %vm4703_vm10, %v13865_v31, %v5275_v45  ;;  %8379 = vmatprep.subr.bf16.mxu1 %v9137_v8  ;;  %v5242_v11 = vsel %vm4705_vm11, %v13866_v34, %v5241_v16  ;;  %v13870_v45 = vld [vmem:[#allocation96_spill] sm:$0xff]  ;;  %v13871_v36 = vld [vmem:[#allocation22_spill] sm:$0xff] }
 0x4c7   : > { %v5287_v6 = vsel %vm4697_vm7, %v13863_v58, %v13862_v14  ;;  %v9138_v53 = vld [vmem:[%s13300_s1 + $0x170] sm:$0xff]   ;;  %v13867_v14 = vld [vmem:[#allocation68_spill] sm:$0xff]  ;;  %v5282_v41 = vsel %vm4701_vm9, %v13818_v7, %v5281_v15  ;;  %v5277_v48 = vsel %vm4705_vm11, %v13870_v45, %v5276_v24  ;;  %v9139_v24 = vld [vmem:[%s13300_s1 + $0x178] sm:$0xff]  }
 0x4c8   : > { %v5288_v58 = vsel %vm4699_vm8, %v13819_v20, %v5287_v6  ;;  %v5243_v51 = vsel %vm4707_vm12, %v13867_v14, %v5242_v11  ;;  %v13869_v62 = vld [vmem:[#allocation57_spill] sm:$0xff]  ;;  %v5301_v20 = vsel %vm4697_vm7, %v11756_v2, %v13825_v63  ;;  %v4281_v6 = vmax.f32 %v4279_v13, %v4280_v38  ;;  %v13872_v31 = vld [vmem:[#allocation98_spill] sm:$0xff]  ;;  %v13874_v34 = vld [vmem:[#allocation95_spill] sm:$0xff] }
 0x4c9   : > { %v5251_v46 = vsel %vm4709_vm13, %v13869_v62, %v5250_v21  ;;  %v5289_v16 = vsel %vm4701_vm9, %v13871_v36, %v5288_v58  ;;  %8380 = vmatpush3.bf16.msra.mxu1 %v9137_v8  ;;  %v5278_v7 = vsel %vm4707_vm12, %v13872_v31, %v5277_v48  ;;  %v13873_v15 = vld [vmem:[#allocation54_spill] sm:$0xff]  ;;  %v5270_v11 = vsel %vm4705_vm11, %v13874_v34, %v5269_v26  ;;  %v13875_v32 = vld [vmem:[#allocation105_spill] sm:$0xff]  ;;  %v13877_v14 = vld [vmem:[#allocation23_spill] sm:$0xff] }
 0x4ca   : > { %8381 = vmatprep.subr.bf16.mxu1 %v9138_v53  ;;  %v5244_v21 = vsel %vm4709_vm13, %v13873_v15, %v5243_v51  ;;  %v5283_v2 = vsel %vm4703_vm10, %v13826_v39, %v5282_v41  ;;  %v5302_v63 = vsel %vm4699_vm8, %v13829_v57, %v5301_v20  ;;  %v5294_v13 = vsel %vm4697_vm7, %v13875_v32, %v13823_v27  ;;  %v13876_v38 = vld [vmem:[#allocation97_spill] sm:$0xff]  ;;  %v13879_v27 = vld [vmem:[#allocation103_spill] sm:$0xff]  ;;  %v13881_v48 = vld [vmem:[#allocation112_spill] sm:$0xff] }
 0x4cb   : > { %v5343_v8 = vpack.c.b16 %v5251_v46, %v5244_v21  ;;  %v5271_v58 = vsel %vm4707_vm12, %v13876_v38, %v5270_v11  ;;  %v5290_v51 = vsel %vm4703_vm10, %v13877_v14, %v5289_v16  ;;  %v5315_v39 = vsel %vm4697_vm7, %v11976_v30, %v11903_v25  ;;  %8366 = vmatmul.mubr.bf16.gmra.mrb[136].mxu1 %v5083_v0  ;;  %v13878_v57 = vld [vmem:[#allocation89_spill] sm:$0xff]  ;;  %v13880_v30 = vld [vmem:[#allocation12_spill] sm:$0xff]  ;;  %v13884_v20 = vld [vmem:[#allocation106_spill] sm:$0xff] }
 0x4cc   : > { %v5279_v26 = vsel %vm4709_vm13, %v13878_v57, %v5278_v7  ;;  %v5295_v41 = vsel %vm4699_vm8, %v13879_v27, %v5294_v13  ;;  %v5322_v62 = vsel %vm4697_vm7, %v12049_v1, %v12033_v42  ;;  %v4282_v46 = vrot.slane %v4281_v6, 2  ;;  %v13882_v1 = vld [vmem:[#allocation111_spill] sm:$0xff]  ;;  %v13883_v16 = vld [vmem:[#allocation113_spill] sm:$0xff]  ;;  %v13890_v13 = vld [vmem:[#allocation114_spill] sm:$0xff] }
 0x4cd   : > { %8382 = vmatpush3.bf16.msra.mxu1 %v9138_v53  ;;  %8385 = vmatprep.mubr.bf16.mxu1 %v5343_v8  ;;  %v5284_v18 = vsel %vm4705_vm11, %v13833_v28, %v5283_v2  ;;  %v5303_v61 = vsel %vm4701_vm9, %v13832_v3, %v5302_v63  ;;  %v5329_v25 = vsel %vm4697_vm7, %v12107_v59, %v13838_v60  ;;  %v13885_v60 = vld [vmem:[#allocation29_spill] sm:$0xff]  ;;  %v13886_v2 = vld [vmem:[#allocation107_spill] sm:$0xff]  ;;  %v13891_v8 = vld [vmem:[#allocation44_spill] sm:$0xff] }
 0x4ce   : > { %8383 = vmatprep.subr.bf16.mxu1 %v9139_v24  ;;  %v5272_v45 = vsel %vm4709_vm13, %v13880_v30, %v5271_v58  ;;  %v5285_v42 = vsel %vm4707_vm12, %v13881_v48, %v5284_v18  ;;  %v5291_v53 = vsel %vm4705_vm11, %v13882_v1, %v5290_v51  ;;  %v5296_v3 = vsel %vm4701_vm9, %v13884_v20, %v5295_v41  ;;  %v13888_v63 = vld [vmem:[#allocation43_spill] sm:$0xff]  ;;  %v13892_v58 = vld [vmem:[#allocation36_spill] sm:$0xff]  ;;  %v13893_v14 = vld [vmem:[#allocation42_spill] sm:$0xff] }
 0x4cf   : > { %v5345_v36 = vpack.c.b16 %v5279_v26, %v5272_v45  ;;  %v5292_v28 = vsel %vm4707_vm12, %v13883_v16, %v5291_v53  ;;  %v5323_v59 = vsel %vm4699_vm8, %v12046_v55, %v5322_v62  ;;  %v5304_v0 = vsel %vm4703_vm10, %v13885_v60, %v5303_v61  ;;  %v13896_v27 = vld [vmem:[#allocation92_spill] sm:$0xff]  ;;  %v13897_v18 = vld [vmem:[#allocation45_spill] sm:$0xff]  ;;  %v13898_v61 = vld [vmem:[#allocation15_spill] sm:$0xff] }
 0x4d0   : > { %v5309_v31 = vsel %vm4699_vm8, %v11847_v33, %v5308_v52  ;;  %v5324_v7 = vsel %vm4701_vm9, %v12080_v37, %v5323_v59  ;;  %v5330_v15 = vsel %vm4699_vm8, %v12149_v54, %v5329_v25  ;;  %v5316_v21 = vsel %vm4699_vm8, %v12000_v19, %v5315_v39  ;;  %v13894_v52 = vld [vmem:[#allocation104_spill] sm:$0xff]  ;;  %v13895_v39 = vld [vmem:[#allocation17_spill] sm:$0xff]  ;;  %v13903_v60 = vld [vmem:[#allocation39_spill] sm:$0xff] }
 0x4d1   : > { %8384 = vmatpush3.bf16.msra.mxu1 %v9139_v24  ;;  %v5325_v34 = vsel %vm4703_vm10, %v12082_v5, %v5324_v7  ;;  %v5331_v55 = vsel %vm4701_vm9, %v12154_v22, %v5330_v15  ;;  %v4283_v11 = vmax.f32 %v4281_v6, %v4282_v46  ;;  %v5297_v33 = vsel %vm4703_vm10, %v13886_v2, %v5296_v3  ;;  %v13887_v24 = vld [vmem:[#allocation25_spill] sm:$0xff]  ;;  %v13899_v45 = vld [vmem:[#allocation100_spill] sm:$0xff]  ;;  %v9143_v2 = vld [vmem:[%s13300_s1 + $0x1d8] sm:$0xff]  }
 0x4d2   : > { %v5326_v37 = vsel %vm4705_vm11, %v12212_v23, %v5325_v34  ;;  %v5332_v54 = vsel %vm4703_vm10, %v12203_v49, %v5331_v55  ;;  %v5337_v19 = vsel %vm4699_vm8, %v12210_v56, %v13887_v24  ;;  %v5305_v5 = vsel %vm4705_vm11, %v13836_v50, %v5304_v0  ;;  %v13900_v53 = vld [vmem:[#allocation108_spill] sm:$0xff]  ;;  %v13901_v3 = vld [vmem:[#allocation41_spill] sm:$0xff]  ;;  %v9147_v24 = vld [vmem:[%s13300_s1 + $0x1f8] sm:$0xff]  }
 0x4d3   : > { %v5327_v22 = vsel %vm4707_vm12, %v13888_v63, %v5326_v37  ;;  %v5333_v6 = vsel %vm4705_vm11, %v12221_v17, %v5332_v54  ;;  %v4284_v32 = vrot.slane %v4283_v11, 1  ;;  %v13889_v23 = vpack.c.b16 %v12515_v47, %v12511_v10  ;;  %v13905_v7 = vld [vmem:[#allocation32_spill] sm:$0xff]  ;;  %v9146_v54 = vld [vmem:[%s13300_s1 + $0x1f0] sm:$0xff]  }
 0x4d4   : > { %v5306_v49 = vsel %vm4707_vm12, %v13890_v13, %v5305_v5  ;;  %v5317_v56 = vsel %vm4701_vm9, %v13837_v43, %v5316_v21  ;;  %v5334_v50 = vsel %vm4707_vm12, %v13891_v8, %v5333_v6  ;;  %v5338_v38 = vsel %vm4701_vm9, %v12217_v9, %v5337_v19  ;;  %v9140_v34 = vld [vmem:[%s13300_s1 + $0x1c0] sm:$0xff]   ;;  %v9141_v55 = vld [vmem:[%s13300_s1 + $0x1c8] sm:$0xff]  }
 0x4d5   : > { %8386 = vmatmul.mubr.bf16.vlgmr.msra.gmra.mrb[124].mxu1 %v13889_v23  ;;  %v5328_v17 = vsel %vm4709_vm13, %v13892_v58, %v5327_v22  ;;  %v5335_v10 = vsel %vm4709_vm13, %v13893_v14, %v5334_v50  ;;  %v4285_v47 = vmax.f32 %v4283_v11, %v4284_v32  ;;  %v5339_v51 = vsel %vm4703_vm10, %v12225_v44, %v5338_v38  ;;  %v9142_v11 = vld [vmem:[%s13300_s1 + $0x1d0] sm:$0xff]   ;;  %v9145_v37 = vld [vmem:[%s13300_s1 + $0x1e8] sm:$0xff]   ;;  %v12725_v19 = vld [vmem:[%s13300_s1 + $0x180] sm:$0xff]  }
 0x4d6   : > { %8389 = vmatprep.mubr.bf16.mxu1 %v5345_v36  ;;  %v5293_v43 = vsel %vm4709_vm13, %v13894_v52, %v5292_v28  ;;  %v5298_v57 = vsel %vm4705_vm11, %v13895_v39, %v5297_v33  ;;  %v5349_v26 = vpack.c.b16 %v5335_v10, %v5328_v17  ;;  %v5340_v9 = vsel %vm4705_vm11, %v12263_v12, %v5339_v51  ;;  %v9144_v33 = vld [vmem:[%s13300_s1 + $0x1e0] sm:$0xff]  }
 0x4d7   : > { %v5299_v41 = vsel %vm4707_vm12, %v13896_v27, %v5298_v57  ;;  %v5310_v62 = vsel %vm4701_vm9, %v13839_v4, %v5309_v31  ;;  %v4407_v46 = vpack.c.bf16 %v4285_v47, %v4285_v47  ;;  %v5341_v44 = vsel %vm4707_vm12, %v13897_v18, %v5340_v9  ;;  %v13904_v31 = vld [vmem:[#allocation35_spill] sm:$0xff]  ;;  %8401 = vmatprep.subr.bf16.mxu1 %v9140_v34 }
 0x4d8   : > { %v5307_v25 = vsel %vm4709_vm13, %v13898_v61, %v5306_v49  ;;  %v5318_v30 = vsel %vm4703_vm10, %v13840_v29, %v5317_v56  ;;  %v5286_v48 = vsel %vm4709_vm13, %v13899_v45, %v5285_v42  ;;  %v5300_v36 = vsel %vm4709_vm13, %v13900_v53, %v5299_v41  ;;  %v13902_v42 = vld [vmem:[#allocation38_spill] sm:$0xff]  ;;  %8402 = vmatpush3.bf16.msra.mxu1 %v9140_v34  ;;  %v12731_v5 = vld [vmem:[%s13301_s2 + $0x1] ss:$0 sm:$0xff] }
 0x4d9   : > { %v5237_v12 = vunpack.c.l.b16 %v4407_v46  ;;  %v5346_v1 = vpack.c.b16 %v5293_v43, %v5286_v48  ;;  %v5311_v4 = vsel %vm4703_vm10, %v13842_v40, %v5310_v62  ;;  %v5347_v16 = vpack.c.b16 %v5307_v25, %v5300_v36  ;;  %8403 = vmatprep.subr.bf16.mxu1 %v9141_v55  ;;  %v12736_v22 = vld [vmem:[%s13302_s3 + $0x1] ss:$0 sm:$0xff] }
 0x4da   : > { %v5319_v28 = vsel %vm4705_vm11, %v13844_v35, %v5318_v30  ;;  %v5312_v59 = vsel %vm4705_vm11, %v13902_v42, %v5311_v4 }
 0x4db   : > { %v5342_v20 = vsel %vm4709_vm13, %v5237_v12, %v5341_v44  ;;  %v5320_v29 = vsel %vm4707_vm12, %v13901_v3, %v5319_v28  ;;  %v5313_v0 = vsel %vm4707_vm12, %v13903_v60, %v5312_v59 }
 0x4dc   : > { %v5321_v40 = vsel %vm4709_vm13, %v13904_v31, %v5320_v29  ;;  %v5314_v15 = vsel %vm4709_vm13, %v13905_v7, %v5313_v0  ;;  %v5350_v21 = vpack.c.b16 %v5342_v20, %v5342_v20  ;;  %8404 = vmatpush3.bf16.msra.mxu1 %v9141_v55 }
 0x4dd   : > { %8390 = vmatmul.mubr.bf16.gmra.mrb[128].mxu1 %v5346_v1  ;;  %v5348_v35 = vpack.c.b16 %v5321_v40, %v5314_v15  ;;  %8405 = vmatprep.subr.bf16.mxu1 %v9142_v11 }
 0x4de   : > { %8393 = vmatprep.mubr.bf16.mxu1 %v5347_v16 }
 0x4e0   : > { %8406 = vmatpush3.bf16.msra.mxu1 %v9142_v11 }
 0x4e1   : > { %8407 = vmatprep.subr.bf16.mxu1 %v9143_v2 }
 0x4e4   : > { %8408 = vmatpush3.bf16.msra.mxu1 %v9143_v2 }
 0x4e5   : > { %8394 = vmatmul.mubr.bf16.gmra.mrb[132].mxu1 %v5348_v35  ;;  %8409 = vmatprep.subr.bf16.mxu1 %v9144_v33 }
 0x4e6   : > { %8397 = vmatprep.mubr.bf16.mxu1 %v5349_v26 }
 0x4e8   : > { %8410 = vmatpush3.bf16.msra.mxu1 %v9144_v33 }
 0x4e9   : > { %8411 = vmatprep.subr.bf16.mxu1 %v9145_v37 }
 0x4ec   : > { %8412 = vmatpush3.bf16.msra.mxu1 %v9145_v37 }
 0x4ed   : > { %8398 = vmatmul.mubr.bf16.gmra.mrb[136].mxu1 %v5350_v21  ;;  %8413 = vmatprep.subr.bf16.mxu1 %v9146_v54 }
 0x4f0   : > { %8414 = vmatpush3.bf16.msra.mxu1 %v9146_v54 }
 0x4f1   : > { %8415 = vmatprep.subr.bf16.mxu1 %v9147_v24 }
 0x4f4   : > { %8416 = vmatpush3.bf16.msra.mxu1 %v9147_v24 }
 0x4f5   : > { %8421 = vmatprep.subr.bf16.mxu1 %v12725_v19 }
 0x5a8   : > { %v8387_v63 = vpop.f32.mrb[124].mxu1 }
 0x5a9   : > { %v5526_v6 = vmul.f32 %v8387_v63, %v12731_v5  ;;  %v5441_v32 = vpop.f32.mrb[125].mxu1 }
 0x5aa   : > { %v5524_v23 = vmul.f32 %v12731_v5, %v5441_v32  ;;  %v8388_v13 = vpop.f32.mrb[126].mxu1 }
 0x5ab   : > { %v5545_v49 = vadd.f32 %v12736_v22, %v5526_v6  ;;  %v5527_v56 = vmul.f32 %v8388_v13, %v12731_v5  ;;  %v5444_v8 = vpop.f32.mrb[127].mxu1 }
 0x5ac   : > { %v5543_v50 = vadd.f32 %v12736_v22, %v5524_v23  ;;  %v5525_v38 = vmul.f32 %v12731_v5, %v5444_v8 }
 0x5ad   : > { %v5560_v58 = vmax.f32 %v5545_v49, 0.0  ;;  %v5546_v17 = vadd.f32 %v12736_v22, %v5527_v56 }
 0x5ae   : > { %v5558_v14 = vmax.f32 %v5543_v50, 0.0  ;;  %v5544_v10 = vadd.f32 %v12736_v22, %v5525_v38 }
 0x5af   : > { %v5590_v47 = vcombine.high %v5560_v58, %v5560_v58  ;;  %v5646_v51 = vsel %vm3431_vm6, %v5560_v58, -inf  ;;  %v5561_v52 = vmax.f32 %v5546_v17, 0.0 }
 0x5b0   : > { %v5647_v43 = vrot.slane %v5646_v51, 4  ;;  %v5588_v39 = vcombine.high %v5558_v14, %v5558_v14  ;;  %v5618_v57 = vsel %vm3431_vm6, %v5558_v14, -inf  ;;  %v5559_v26 = vmax.f32 %v5544_v10, 0.0  ;;  %v12748_v9 = vpop.f32.mrb[128].mxu1 }
 0x5b1   : > { %v5653_v27 = vsel %vm3431_vm6, %v5590_v47, -inf  ;;  %v5619_v41 = vrot.slane %v5618_v57, 4  ;;  %v5591_v62 = vcombine.high %v5561_v52, %v5561_v52  ;;  %v5660_v46 = vsel %vm3431_vm6, %v5561_v52, -inf  ;;  %v12752_v18 = vpop.f32.mrb[129].mxu1 }
 0x5b2   : > { %v5648_v44 = vmax.f32 %v5646_v51, %v5647_v43  ;;  %v5654_v61 = vrot.slane %v5653_v27, 4  ;;  %v5625_v25 = vsel %vm3431_vm6, %v5588_v39, -inf  ;;  %v5661_v30 = vrot.slane %v5660_v46, 4  ;;  %v12755_v45 = vpop.f32.mrb[130].mxu1 }
 0x5b3   : > { %v5620_v48 = vmax.f32 %v5618_v57, %v5619_v41  ;;  %v5626_v12 = vrot.slane %v5625_v25, 4  ;;  %v5667_v1 = vsel %vm3431_vm6, %v5591_v62, -inf  ;;  %v5589_v53 = vcombine.high %v5559_v26, %v5559_v26  ;;  %v12758_v36 = vpop.f32.mrb[131].mxu1 }
 0x5b4   : > { %v5649_v4 = vrot.slane %v5648_v44, 2  ;;  %v5655_v16 = vmax.f32 %v5653_v27, %v5654_v61  ;;  %v5662_v28 = vmax.f32 %v5660_v46, %v5661_v30  ;;  %v5668_v20 = vrot.slane %v5667_v1, 4 }
 0x5b5   : > { %v5621_v3 = vrot.slane %v5620_v48, 2  ;;  %v5627_v29 = vmax.f32 %v5625_v25, %v5626_v12  ;;  %v5632_v42 = vsel %vm3431_vm6, %v5559_v26, -inf  ;;  %v5639_v59 = vsel %vm3431_vm6, %v5589_v53, -inf }
 0x5b6   : > { %v5650_v60 = vmax.f32 %v5648_v44, %v5649_v4  ;;  %v5656_v0 = vrot.slane %v5655_v16, 2  ;;  %v5663_v31 = vrot.slane %v5662_v28, 2  ;;  %v5669_v40 = vmax.f32 %v5667_v1, %v5668_v20 }
 0x5b7   : > { %v5622_v7 = vmax.f32 %v5620_v48, %v5621_v3  ;;  %v5628_v15 = vrot.slane %v5627_v29, 2  ;;  %v5633_v35 = vrot.slane %v5632_v42, 4  ;;  %v5640_v21 = vrot.slane %v5639_v59, 4 }
 0x5b8   : > { %v5651_v34 = vrot.slane %v5650_v60, 1  ;;  %v5657_v55 = vmax.f32 %v5655_v16, %v5656_v0  ;;  %v5664_v11 = vmax.f32 %v5662_v28, %v5663_v31  ;;  %v5670_v2 = vrot.slane %v5669_v40, 2  ;;  %v8395_v33 = vpop.f32.mrb[132].mxu1 }
 0x5b9   : > { %v5623_v37 = vrot.slane %v5622_v7, 1  ;;  %v5629_v54 = vmax.f32 %v5627_v29, %v5628_v15  ;;  %v5634_v24 = vmax.f32 %v5632_v42, %v5633_v35  ;;  %v5641_v63 = vmax.f32 %v5639_v59, %v5640_v21  ;;  %v5473_v6 = vpop.f32.mrb[133].mxu1 }
 0x5ba   : > { %v5652_v32 = vmax.f32 %v5650_v60, %v5651_v34  ;;  %v5658_v23 = vrot.slane %v5657_v55, 1  ;;  %v5665_v13 = vrot.slane %v5664_v11, 1  ;;  %v5671_v49 = vmax.f32 %v5669_v40, %v5670_v2  ;;  %v12762_v56 = vpop.f32.mrb[134].mxu1 }
 0x5bb   : > { %v5624_v8 = vmax.f32 %v5622_v7, %v5623_v37  ;;  %v5630_v50 = vrot.slane %v5629_v54, 1  ;;  %v5635_v38 = vrot.slane %v5634_v24, 2  ;;  %v5642_v58 = vrot.slane %v5641_v63, 2  ;;  %v12764_v17 = vpop.f32.mrb[135].mxu1 }
 0x5bc   : > { %v5659_v14 = vmax.f32 %v5657_v55, %v5658_v23  ;;  %v5832_v10 = vpack.c.bf16 %v5652_v32, %v5652_v32  ;;  %v5666_v47 = vmax.f32 %v5664_v11, %v5665_v13  ;;  %v5672_v51 = vrot.slane %v5671_v49, 1 }
 0x5bd   : > { %v5631_v52 = vmax.f32 %v5629_v54, %v5630_v50  ;;  %v5828_v43 = vpack.c.bf16 %v5624_v8, %v5624_v8  ;;  %v5636_v39 = vmax.f32 %v5634_v24, %v5635_v38  ;;  %v5643_v57 = vmax.f32 %v5641_v63, %v5642_v58 }
 0x5be   : > { %v5833_v26 = vpack.c.bf16 %v5659_v14, %v5659_v14  ;;  %v12766_v27 = vunpack.c.l.b16 %v5832_v10  ;;  %v12768_v41 = vmax.f32 %v5671_v49, %v5672_v51  ;;  %v5834_v62 = vpack.c.bf16 %v5666_v47, %v5666_v47 }
 0x5bf   : > { %v5829_v46 = vpack.c.bf16 %v5631_v52, %v5631_v52  ;;  %v6088_v44 = vunpack.c.l.b16 %v5828_v43  ;;  %v5637_v61 = vrot.slane %v5636_v39, 1  ;;  %v5644_v25 = vrot.slane %v5643_v57, 1 }
 0x5c0   : > { %v12770_v30 = vunpack.c.l.b16 %v5833_v26  ;;  %v12772_v48 = vunpack.c.l.b16 %v5834_v62  ;;  %v5530_v12 = vmul.f32 %v12748_v9, %v12731_v5  ;;  %v5528_v1 = vmul.f32 %v12731_v5, %v12752_v18  ;;  %v12778_v53 = vpop.f32.mrb[136].mxu1 }
 0x5c1   : > { %v5935_v4 = vunpack.c.l.b16 %v5829_v46  ;;  %v5638_v16 = vmax.f32 %v5636_v39, %v5637_v61  ;;  %v5645_v28 = vmax.f32 %v5643_v57, %v5644_v25  ;;  %v5531_v20 = vmul.f32 %v12755_v45, %v12731_v5  ;;  %v12782_v3 = vpop.f32.mrb[137].mxu1 }
 0x5c2   : > { %v5549_v29 = vadd.f32 %v12736_v22, %v5530_v12  ;;  %v5547_v42 = vadd.f32 %v12736_v22, %v5528_v1  ;;  %v5529_v9 = vmul.f32 %v12731_v5, %v12758_v36  ;;  %v5534_v59 = vmul.f32 %v8395_v33, %v12731_v5  ;;  %v8400_v18 = vpop.f32.mrb[138].mxu1 }
 0x5c3   : > { %v6089_v60 = vsel %vm4697_vm7, %v5935_v4, %v6088_v44  ;;  %v5830_v0 = vpack.c.bf16 %v5638_v16, %v5638_v16  ;;  %v5831_v31 = vpack.c.bf16 %v5645_v28, %v5645_v28  ;;  %v5550_v40 = vadd.f32 %v12736_v22, %v5531_v20  ;;  %v12791_v7 = vpop.f32.mrb[139].mxu1 }
 0x5c4   : > { %v5564_v45 = vmax.f32 %v5549_v29, 0.0  ;;  %v5562_v15 = vmax.f32 %v5547_v42, 0.0  ;;  %v5548_v35 = vadd.f32 %v12736_v22, %v5529_v9  ;;  %v12795_v21 = vadd.f32 %v12736_v22, %v5534_v59 }
 0x5c5   : > { %v5936_v34 = vunpack.c.l.b16 %v5830_v0  ;;  %v12797_v36 = vunpack.c.l.b16 %v5831_v31  ;;  %v5565_v55 = vmax.f32 %v5550_v40, 0.0  ;;  %v12800_v11 = vmul.f32 %v12731_v5, %v5473_v6 }
 0x5c6   : > { %v5594_v2 = vcombine.high %v5564_v45, %v5564_v45  ;;  %v5702_v33 = vsel %vm3431_vm6, %v5564_v45, -inf  ;;  %v5592_v37 = vcombine.high %v5562_v15, %v5562_v15  ;;  %v5674_v54 = vsel %vm3431_vm6, %v5562_v15, -inf }
 0x5c7   : > { %v12805_v24 = vsel %vm4697_vm7, %v5936_v34, %v5935_v4  ;;  %v12808_v63 = vsel %vm4699_vm8, %v5936_v34, %v6089_v60  ;;  %v12812_v32 = vsel %vm4697_vm7, %v12797_v36, %v5936_v34  ;;  %v5703_v23 = vrot.slane %v5702_v33, 4 }
 0x5c8   : > { %v5709_v6 = vsel %vm3431_vm6, %v5594_v2, -inf  ;;  %v5675_v13 = vrot.slane %v5674_v54, 4  ;;  %v5681_v49 = vsel %vm3431_vm6, %v5592_v37, -inf  ;;  %v5595_v8 = vcombine.high %v5565_v55, %v5565_v55 }
 0x5c9   : > { %v5704_v50 = vmax.f32 %v5702_v33, %v5703_v23  ;;  %v5710_v38 = vrot.slane %v5709_v6, 4  ;;  %v5682_v58 = vrot.slane %v5681_v49, 4  ;;  %v5716_v14 = vsel %vm3431_vm6, %v5565_v55, -inf }
 0x5ca   : > { %v5676_v10 = vmax.f32 %v5674_v54, %v5675_v13  ;;  %v5717_v47 = vrot.slane %v5716_v14, 4  ;;  %v5723_v51 = vsel %vm3431_vm6, %v5595_v8, -inf  ;;  %v5563_v52 = vmax.f32 %v5548_v35, 0.0 }
 0x5cb   : > { %v5705_v43 = vrot.slane %v5704_v50, 2  ;;  %v5711_v39 = vmax.f32 %v5709_v6, %v5710_v38  ;;  %v5683_v57 = vmax.f32 %v5681_v49, %v5682_v58  ;;  %v5724_v26 = vrot.slane %v5723_v51, 4 }
 0x5cc   : > { %v5677_v62 = vrot.slane %v5676_v10, 2  ;;  %v5718_v46 = vmax.f32 %v5716_v14, %v5717_v47  ;;  %v5593_v44 = vcombine.high %v5563_v52, %v5563_v52  ;;  %v5688_v61 = vsel %vm3431_vm6, %v5563_v52, -inf }
 0x5cd   : > { %v5706_v25 = vmax.f32 %v5704_v50, %v5705_v43  ;;  %v5712_v12 = vrot.slane %v5711_v39, 2  ;;  %v5684_v1 = vrot.slane %v5683_v57, 2  ;;  %v5725_v4 = vmax.f32 %v5723_v51, %v5724_v26 }
 0x5ce   : > { %v5678_v16 = vmax.f32 %v5676_v10, %v5677_v62  ;;  %v5719_v28 = vrot.slane %v5718_v46, 2  ;;  %v5689_v20 = vrot.slane %v5688_v61, 4  ;;  %v5695_v29 = vsel %vm3431_vm6, %v5593_v44, -inf }
 0x5cf   : > { %v5707_v42 = vrot.slane %v5706_v25, 1  ;;  %v5713_v9 = vmax.f32 %v5711_v39, %v5712_v12  ;;  %v5685_v59 = vmax.f32 %v5683_v57, %v5684_v1  ;;  %v5726_v18 = vrot.slane %v5725_v4, 2 }
 0x5d0   : > { %v5679_v60 = vrot.slane %v5678_v16, 1  ;;  %v5720_v0 = vmax.f32 %v5718_v46, %v5719_v28  ;;  %v5690_v31 = vmax.f32 %v5688_v61, %v5689_v20  ;;  %v5696_v40 = vrot.slane %v5695_v29, 4 }
 0x5d1   : > { %v5708_v45 = vmax.f32 %v5706_v25, %v5707_v42  ;;  %v5714_v15 = vrot.slane %v5713_v9, 1  ;;  %v5686_v35 = vrot.slane %v5685_v59, 1  ;;  %v5727_v34 = vmax.f32 %v5725_v4, %v5726_v18 }
 0x5d2   : > { %v12820_v55 = vmax.f32 %v5678_v16, %v5679_v60  ;;  %v5721_v2 = vrot.slane %v5720_v0, 1  ;;  %v5691_v33 = vrot.slane %v5690_v31, 2  ;;  %v5697_v37 = vmax.f32 %v5695_v29, %v5696_v40 }
 0x5d3   : > { %v5715_v54 = vmax.f32 %v5713_v9, %v5714_v15  ;;  %v5840_v23 = vpack.c.bf16 %v5708_v45, %v5708_v45  ;;  %v5687_v6 = vmax.f32 %v5685_v59, %v5686_v35  ;;  %v5728_v13 = vrot.slane %v5727_v34, 1 }
 0x5d4   : > { %v5722_v49 = vmax.f32 %v5720_v0, %v5721_v2  ;;  %v5692_v8 = vmax.f32 %v5690_v31, %v5691_v33  ;;  %v5698_v50 = vrot.slane %v5697_v37, 2  ;;  %v5568_v38 = vmax.f32 %v12795_v21, 0.0 }
 0x5d5   : > { %v5841_v58 = vpack.c.bf16 %v5715_v54, %v5715_v54  ;;  %v12823_v14 = vunpack.c.l.b16 %v5840_v23  ;;  %v5837_v10 = vpack.c.bf16 %v5687_v6, %v5687_v6  ;;  %v12825_v47 = vmax.f32 %v5727_v34, %v5728_v13 }
 0x5d6   : > { %v5842_v51 = vpack.c.bf16 %v5722_v49, %v5722_v49  ;;  %v5693_v52 = vrot.slane %v5692_v8, 1  ;;  %v5699_v43 = vmax.f32 %v5697_v37, %v5698_v50  ;;  %v5598_v39 = vcombine.high %v5568_v38, %v5568_v38 }
 0x5d7   : > { %v12827_v57 = vunpack.c.l.b16 %v5841_v58  ;;  %v12829_v26 = vunpack.c.l.b16 %v5837_v10  ;;  %v5758_v62 = vsel %vm3431_vm6, %v5568_v38, -inf  ;;  %v5551_v46 = vadd.f32 %v12736_v22, %v12800_v11 }
 0x5d8   : > { %v12834_v21 = vunpack.c.l.b16 %v5842_v51  ;;  %v5694_v44 = vmax.f32 %v5692_v8, %v5693_v52  ;;  %v5700_v61 = vrot.slane %v5699_v43, 1  ;;  %v5759_v25 = vrot.slane %v5758_v62, 4 }
 0x5d9   : > { %v5765_v12 = vsel %vm3431_vm6, %v5598_v39, -inf  ;;  %v5566_v1 = vmax.f32 %v5551_v46, 0.0  ;;  %v5535_v4 = vmul.f32 %v12762_v56, %v12731_v5  ;;  %v5533_v16 = vmul.f32 %v12731_v5, %v12764_v17 }
 0x5da   : > { %v5701_v28 = vmax.f32 %v5699_v43, %v5700_v61  ;;  %v5838_v20 = vpack.c.bf16 %v5694_v44, %v5694_v44  ;;  %v5760_v29 = vmax.f32 %v5758_v62, %v5759_v25  ;;  %v5766_v42 = vrot.slane %v5765_v12, 4 }
 0x5db   : > { %v5596_v9 = vcombine.high %v5566_v1, %v5566_v1  ;;  %v5730_v11 = vsel %vm3431_vm6, %v5566_v1, -inf  ;;  %v5554_v59 = vadd.f32 %v12736_v22, %v5535_v4  ;;  %v5552_v18 = vadd.f32 %v12736_v22, %v5533_v16 }
 0x5dc   : > { %v5839_v60 = vpack.c.bf16 %v5701_v28, %v5701_v28  ;;  %v12844_v0 = vunpack.c.l.b16 %v5838_v20  ;;  %v5761_v31 = vrot.slane %v5760_v29, 2  ;;  %v5767_v40 = vmax.f32 %v5765_v12, %v5766_v42 }
 0x5dd   : > { %v5731_v56 = vrot.slane %v5730_v11, 4  ;;  %v5737_v45 = vsel %vm3431_vm6, %v5596_v9, -inf  ;;  %v5569_v17 = vmax.f32 %v5554_v59, 0.0  ;;  %v5567_v15 = vmax.f32 %v5552_v18, 0.0 }
 0x5de   : > { %v12847_v35 = vunpack.c.l.b16 %v5839_v60  ;;  %v12852_v34 = vsel %vm4697_vm7, %v12844_v0, %v12829_v26  ;;  %v5762_v2 = vmax.f32 %v5760_v29, %v5761_v31  ;;  %v5768_v33 = vrot.slane %v5767_v40, 2 }
 0x5df   : > { %v5732_v37 = vmax.f32 %v5730_v11, %v5731_v56  ;;  %v5738_v54 = vrot.slane %v5737_v45, 4  ;;  %v5599_v23 = vcombine.high %v5569_v17, %v5569_v17  ;;  %v5772_v6 = vsel %vm3431_vm6, %v5569_v17, -inf }
 0x5e0   : > { %v12858_v13 = vsel %vm4697_vm7, %v12847_v35, %v12844_v0  ;;  %v5763_v49 = vrot.slane %v5762_v2, 1  ;;  %v5769_v8 = vmax.f32 %v5767_v40, %v5768_v33  ;;  %v5773_v50 = vrot.slane %v5772_v6, 4 }
 0x5e1   : > { %v5733_v38 = vrot.slane %v5732_v37, 2  ;;  %v5739_v58 = vmax.f32 %v5737_v45, %v5738_v54  ;;  %v5779_v10 = vsel %vm3431_vm6, %v5599_v23, -inf  ;;  %v5597_v51 = vcombine.high %v5567_v15, %v5567_v15 }
 0x5e2   : > { %v5764_v52 = vmax.f32 %v5762_v2, %v5763_v49  ;;  %v5770_v43 = vrot.slane %v5769_v8, 1  ;;  %v5774_v39 = vmax.f32 %v5772_v6, %v5773_v50  ;;  %v5780_v62 = vrot.slane %v5779_v10, 4 }
 0x5e3   : > { %v5734_v46 = vmax.f32 %v5732_v37, %v5733_v38  ;;  %v5740_v44 = vrot.slane %v5739_v58, 2  ;;  %v5744_v61 = vsel %vm3431_vm6, %v5567_v15, -inf  ;;  %v5751_v25 = vsel %vm3431_vm6, %v5597_v51, -inf }
 0x5e4   : > { %v5771_v12 = vmax.f32 %v5769_v8, %v5770_v43  ;;  %v5848_v1 = vpack.c.bf16 %v5764_v52, %v5764_v52  ;;  %v5775_v4 = vrot.slane %v5774_v39, 2  ;;  %v5781_v16 = vmax.f32 %v5779_v10, %v5780_v62 }
 0x5e5   : > { %v5735_v28 = vrot.slane %v5734_v46, 1  ;;  %v5741_v20 = vmax.f32 %v5739_v58, %v5740_v44  ;;  %v5745_v29 = vrot.slane %v5744_v61, 4  ;;  %v5752_v42 = vrot.slane %v5751_v25, 4 }
 0x5e6   : > { %v5849_v9 = vpack.c.bf16 %v5771_v12, %v5771_v12  ;;  %v12863_v11 = vunpack.c.l.b16 %v5848_v1  ;;  %v5776_v59 = vmax.f32 %v5774_v39, %v5775_v4  ;;  %v5782_v18 = vrot.slane %v5781_v16, 2 }
 0x5e7   : > { %v12865_v60 = vmax.f32 %v5734_v46, %v5735_v28  ;;  %v5742_v31 = vrot.slane %v5741_v20, 1  ;;  %v5746_v40 = vmax.f32 %v5744_v61, %v5745_v29  ;;  %v5753_v56 = vmax.f32 %v5751_v25, %v5752_v42 }
 0x5e8   : > { %v12867_v45 = vunpack.c.l.b16 %v5849_v9  ;;  %v5777_v17 = vrot.slane %v5776_v59, 1  ;;  %v5783_v15 = vmax.f32 %v5781_v16, %v5782_v18  ;;  %v5538_v2 = vmul.f32 %v12778_v53, %v12731_v5 }
 0x5e9   : > { %v5743_v33 = vmax.f32 %v5741_v20, %v5742_v31  ;;  %v5747_v37 = vrot.slane %v5746_v40, 2  ;;  %v5754_v54 = vrot.slane %v5753_v56, 2  ;;  %v5536_v23 = vmul.f32 %v12731_v5, %v12782_v3 }
 0x5ea   : > { %v5778_v6 = vmax.f32 %v5776_v59, %v5777_v17  ;;  %v5784_v49 = vrot.slane %v5783_v15, 1  ;;  %v5557_v8 = vadd.f32 %v12736_v22, %v5538_v2  ;;  %v5537_v50 = vmul.f32 %v12731_v5, %v12791_v7 }
 0x5eb   : > { %v5845_v38 = vpack.c.bf16 %v5743_v33, %v5743_v33  ;;  %v5748_v58 = vmax.f32 %v5746_v40, %v5747_v37  ;;  %v5755_v10 = vmax.f32 %v5753_v56, %v5754_v54  ;;  %v5555_v51 = vadd.f32 %v12736_v22, %v5536_v23 }
 0x5ec   : > { %v5785_v52 = vmax.f32 %v5783_v15, %v5784_v49  ;;  %v5850_v53 = vpack.c.bf16 %v5778_v6, %v5778_v6  ;;  %v5572_v43 = vmax.f32 %v5557_v8, 0.0  ;;  %v5556_v39 = vadd.f32 %v12736_v22, %v5537_v50 }
 0x5ed   : > { %v12878_v62 = vunpack.c.l.b16 %v5845_v38  ;;  %v5749_v3 = vrot.slane %v5748_v58, 1  ;;  %v5756_v46 = vrot.slane %v5755_v10, 1  ;;  %v5570_v44 = vmax.f32 %v5555_v51, 0.0 }
 0x5ee   : > { %v5851_v61 = vpack.c.bf16 %v5785_v52, %v5785_v52  ;;  %v12880_v25 = vunpack.c.l.b16 %v5850_v53  ;;  %v5602_v12 = vcombine.high %v5572_v43, %v5572_v43  ;;  %v5814_v5 = vsel %vm3431_vm6, %v5572_v43, -inf }
 0x5ef   : > { %v5750_v7 = vmax.f32 %v5748_v58, %v5749_v3  ;;  %v5757_v1 = vmax.f32 %v5755_v10, %v5756_v46  ;;  %v5815_v4 = vrot.slane %v5814_v5, 4  ;;  %v5600_v16 = vcombine.high %v5570_v44, %v5570_v44 }
 0x5f0   : > { %v12883_v28 = vunpack.c.l.b16 %v5851_v61  ;;  %v5821_v20 = vsel %vm3431_vm6, %v5602_v12, -inf  ;;  %v5786_v22 = vsel %vm3431_vm6, %v5570_v44, -inf  ;;  %v5571_v29 = vmax.f32 %v5556_v39, 0.0 }
 0x5f1   : > { %v5846_v42 = vpack.c.bf16 %v5750_v7, %v5750_v7  ;;  %v5847_v9 = vpack.c.bf16 %v5757_v1, %v5757_v1  ;;  %v5816_v59 = vmax.f32 %v5814_v5, %v5815_v4  ;;  %v5822_v18 = vrot.slane %v5821_v20, 4 }
 0x5f2   : > { %v5787_v31 = vrot.slane %v5786_v22, 4  ;;  %v5793_v40 = vsel %vm3431_vm6, %v5600_v16, -inf  ;;  %v5601_v56 = vcombine.high %v5571_v29, %v5571_v29  ;;  %v5800_v17 = vsel %vm3431_vm6, %v5571_v29, -inf }
 0x5f3   : > { %v12889_v15 = vunpack.c.l.b16 %v5846_v42  ;;  %v12891_v2 = vunpack.c.l.b16 %v5847_v9  ;;  %v5817_v33 = vrot.slane %v5816_v59, 2  ;;  %v5823_v37 = vmax.f32 %v5821_v20, %v5822_v18 }
 0x5f4   : > { %v5788_v54 = vmax.f32 %v5786_v22, %v5787_v31  ;;  %v5794_v23 = vrot.slane %v5793_v40, 4  ;;  %v5801_v6 = vrot.slane %v5800_v17, 4  ;;  %v5807_v49 = vsel %vm3431_vm6, %v5601_v56, -inf }
 0x5f5   : > { %v5977_v8 = vsel %vm4697_vm7, %v12889_v15, %v12878_v62  ;;  %v6229_v50 = vsel %vm4697_vm7, %v12891_v2, %v12889_v15  ;;  %v5818_v38 = vmax.f32 %v5816_v59, %v5817_v33  ;;  %v5824_v58 = vrot.slane %v5823_v37, 2 }
 0x5f6   : > { %v5978_v10 = vsel %vm4699_vm8, %v12891_v2, %v5977_v8  ;;  %v12904_v51 = vsel %vm4699_vm8, %v12863_v11, %v6229_v50  ;;  %v5789_v52 = vrot.slane %v5788_v54, 2  ;;  %v5795_v53 = vmax.f32 %v5793_v40, %v5794_v23 }
 0x5f7   : > { %v5979_v43 = vsel %vm4701_vm9, %v12863_v11, %v5978_v10  ;;  %v5819_v39 = vrot.slane %v5818_v38, 1  ;;  %v5825_v3 = vmax.f32 %v5823_v37, %v5824_v58  ;;  %v5802_v46 = vmax.f32 %v5800_v17, %v5801_v6 }
 0x5f8   : > { %v5790_v44 = vmax.f32 %v5788_v54, %v5789_v52  ;;  %v5796_v61 = vrot.slane %v5795_v53, 2  ;;  %v5808_v12 = vrot.slane %v5807_v49, 4  ;;  %v5835_v5 = vpack.c.bf16 %v12768_v41, %v12768_v41 }
 0x5f9   : > { %v5820_v7 = vmax.f32 %v5818_v38, %v5819_v39  ;;  %v5826_v1 = vrot.slane %v5825_v3, 1  ;;  %v5803_v4 = vrot.slane %v5802_v46, 2  ;;  %v5836_v16 = vpack.c.bf16 %v12820_v55, %v12820_v55 }
 0x5fa   : > { %v5791_v20 = vrot.slane %v5790_v44, 1  ;;  %v5797_v22 = vmax.f32 %v5795_v53, %v5796_v61  ;;  %v5809_v29 = vmax.f32 %v5807_v49, %v5808_v12  ;;  %v5843_v42 = vpack.c.bf16 %v12825_v47, %v12825_v47 }
 0x5fb   : > { %v12914_v9 = vmax.f32 %v5825_v3, %v5826_v1  ;;  %v5856_v59 = vpack.c.bf16 %v5820_v7, %v5820_v7  ;;  %v5804_v18 = vmax.f32 %v5802_v46, %v5803_v4  ;;  %v5844_v31 = vpack.c.bf16 %v12865_v60, %v12865_v60 }
 0x5fc   : > { %v5792_v41 = vmax.f32 %v5790_v44, %v5791_v20  ;;  %v5798_v40 = vrot.slane %v5797_v22, 1  ;;  %v5810_v56 = vrot.slane %v5809_v29, 2  ;;  %v12918_v17 = vunpack.c.l.b16 %v5835_v5 }
 0x5fd   : > { %v5857_v55 = vpack.c.bf16 %v12914_v9, %v12914_v9  ;;  %v12922_v33 = vunpack.c.l.b16 %v5856_v59  ;;  %v5805_v37 = vrot.slane %v5804_v18, 1  ;;  %v12924_v54 = vunpack.c.l.b16 %v5836_v16 }
 0x5fe   : > { %v5799_v47 = vmax.f32 %v5797_v22, %v5798_v40  ;;  %v5852_v23 = vpack.c.bf16 %v5792_v41, %v5792_v41  ;;  %v5811_v6 = vmax.f32 %v5809_v29, %v5810_v56  ;;  %v12926_v49 = vunpack.c.l.b16 %v5843_v42 }
 0x5ff   : > { %v5806_v8 = vmax.f32 %v5804_v18, %v5805_v37  ;;  %v12928_v60 = vunpack.c.l.b16 %v5844_v31  ;;  %v5964_v50 = vsel %vm4699_vm8, %v12797_v36, %v12805_v24  ;;  %v5971_v38 = vsel %vm4699_vm8, %v12847_v35, %v12852_v34 }
 0x600   : > { %v5853_v58 = vpack.c.bf16 %v5799_v47, %v5799_v47  ;;  %v12936_v10 = vunpack.c.l.b16 %v5852_v23  ;;  %v5812_v52 = vrot.slane %v5811_v6, 1  ;;  %v5965_v53 = vsel %vm4701_vm9, %v12766_v27, %v5964_v50 }
 0x601   : > { %v5854_v39 = vpack.c.bf16 %v5806_v8, %v5806_v8  ;;  %v5966_v3 = vsel %vm4703_vm10, %v12770_v30, %v5965_v53  ;;  %v5972_v46 = vsel %vm4701_vm9, %v12823_v14, %v5971_v38  ;;  %v6096_v24 = vsel %vm4697_vm7, %v12829_v26, %v12924_v54 }
 0x602   : > { %v12947_v44 = vunpack.c.l.b16 %v5853_v58  ;;  %v5813_v34 = vmax.f32 %v5811_v6, %v5812_v52  ;;  %v5967_v61 = vsel %vm4705_vm11, %v12772_v48, %v5966_v3  ;;  %v5973_v12 = vsel %vm4703_vm10, %v12827_v57, %v5972_v46 }
 0x603   : > { %v5960_v5 = vunpack.c.l.b16 %v5854_v39  ;;  %v5968_v7 = vsel %vm4707_vm12, %v12918_v17, %v5967_v61  ;;  %v5974_v1 = vsel %vm4705_vm11, %v12834_v21, %v5973_v12  ;;  %v6103_v4 = vsel %vm4697_vm7, %v12878_v62, %v12928_v60 }
 0x604   : > { %v5855_v16 = vpack.c.bf16 %v5813_v34, %v5813_v34  ;;  %v5969_v20 = vsel %vm4709_vm13, %v12924_v54, %v5968_v7  ;;  %v5975_v22 = vsel %vm4707_vm12, %v12926_v49, %v5974_v1  ;;  %v6104_v29 = vsel %vm4699_vm8, %v12889_v15, %v6103_v4 }
 0x605   : > { %v5984_v42 = vsel %vm4697_vm7, %v5960_v5, %v12947_v44  ;;  %v5976_v59 = vsel %vm4709_vm13, %v12928_v60, %v5975_v22  ;;  %v5980_v18 = vsel %vm4703_vm10, %v12867_v45, %v5979_v43  ;;  %v6091_v31 = vsel %vm4701_vm9, %v12797_v36, %v12808_v63  ;;  %v9156_v22 = vld [vmem:[%s13300_s1 + $0x200] sm:$0xff]  }
 0x606   : > { %v5961_v41 = vunpack.c.l.b16 %v5855_v16  ;;  %v5987_v40 = vpack.c.b16 %v5976_v59, %v5969_v20  ;;  %v5981_v56 = vsel %vm4705_vm11, %v12880_v25, %v5980_v18  ;;  %v6092_v15 = vsel %vm4703_vm10, %v12766_v27, %v6091_v31  ;;  %v9159_v59 = vld [vmem:[%s13300_s1 + $0x218] sm:$0xff]   ;;  %v9160_v18 = vld [vmem:[%s13300_s1 + $0x220] sm:$0xff]   ;;  %v9161_v31 = vld [vmem:[%s13300_s1 + $0x228] sm:$0xff]  }
 0x607   : > { %v5982_v37 = vsel %vm4707_vm12, %v12883_v28, %v5981_v56  ;;  %v6093_v47 = vsel %vm4705_vm11, %v12770_v30, %v6092_v15  ;;  %v6097_v43 = vsel %vm4699_vm8, %v12844_v0, %v6096_v24  ;;  %v6105_v36 = vsel %vm4701_vm9, %v12891_v2, %v6104_v29  ;;  %v9157_v29 = vld [vmem:[%s13300_s1 + $0x208] sm:$0xff]   ;;  %v9164_v15 = vld [vmem:[%s13300_s1 + $0x280] sm:$0xff]  }
 0x608   : > { %8417 = vmatprep.mubr.bf16.mxu1 %v5987_v40  ;;  %v5983_v63 = vsel %vm4709_vm13, %v12936_v10, %v5982_v37  ;;  %v5985_v23 = vsel %vm4699_vm8, %v5961_v41, %v5984_v42  ;;  %v6094_v6 = vsel %vm4707_vm12, %v12772_v48, %v6093_v47  ;;  %v6098_v8 = vsel %vm4701_vm9, %v12847_v35, %v6097_v43  ;;  %v9149_v35 = vld [vmem:[%s13300_s1 + $0x188] sm:$0xff]   ;;  %v9158_v42 = vld [vmem:[%s13300_s1 + $0x210] sm:$0xff]   ;;  %v9163_v40 = vld [vmem:[%s13300_s1 + $0x238] sm:$0xff]  }
 0x609   : > { %v5986_v50 = vsel %vm4701_vm9, %v12922_v33, %v5985_v23  ;;  %v6095_v0 = vsel %vm4709_vm13, %v12918_v17, %v6094_v6  ;;  %v6099_v2 = vsel %vm4703_vm10, %v12823_v14, %v6098_v8  ;;  %v6106_v38 = vsel %vm4703_vm10, %v12863_v11, %v6105_v36  ;;  %v9165_v37 = vld [vmem:[%s13300_s1 + $0x288] sm:$0xff]   ;;  %v9166_v47 = vld [vmem:[%s13300_s1 + $0x290] sm:$0xff]   ;;  %v9167_v43 = vld [vmem:[%s13300_s1 + $0x298] sm:$0xff]  }
 0x60a   : > { %v5988_v58 = vpack.c.b16 %v5986_v50, %v5983_v63  ;;  %v6100_v52 = vsel %vm4705_vm11, %v12827_v57, %v6099_v2  ;;  %v6107_v53 = vsel %vm4705_vm11, %v12867_v45, %v6106_v38  ;;  %v6110_v39 = vsel %vm4697_vm7, %v12947_v44, %v12936_v10  ;;  %v9168_v36 = vld [vmem:[%s13300_s1 + $0x2a0] sm:$0xff]   ;;  %v9169_v63 = vld [vmem:[%s13300_s1 + $0x2a8] sm:$0xff]   ;;  %v9170_v23 = vld [vmem:[%s13300_s1 + $0x2b0] sm:$0xff]  }
 0x60b   : > { %v6101_v3 = vsel %vm4707_vm12, %v12834_v21, %v6100_v52  ;;  %v6108_v11 = vsel %vm4707_vm12, %v12880_v25, %v6107_v53  ;;  %v6111_v46 = vsel %vm4699_vm8, %v5960_v5, %v6110_v39  ;;  %v6216_v24 = vsel %vm4699_vm8, %v12766_v27, %v12812_v32  ;;  %v9150_v32 = vld [vmem:[%s13300_s1 + $0x190] sm:$0xff]   ;;  %v9171_v6 = vld [vmem:[%s13300_s1 + $0x2b8] sm:$0xff]   ;;  %v7314_v8 = vld [vmem:[%s13301_s2 + $0x2] ss:$0 sm:$0xff] }
 0x60c   : > { %8418 = vmatmul.mubr.bf16.vlgmr.msra.gmra.mrb[140].mxu1 %v5988_v58  ;;  %v6102_v34 = vsel %vm4709_vm13, %v12926_v49, %v6101_v3  ;;  %v6109_v61 = vsel %vm4709_vm13, %v12883_v28, %v6108_v11  ;;  %v6112_v12 = vsel %vm4701_vm9, %v5961_v41, %v6111_v46  ;;  %v6217_v7 = vsel %vm4701_vm9, %v12770_v30, %v6216_v24 }
 0x60d   : > { %8422 = vmatpush3.bf16.msra.mxu1 %v12725_v19  ;;  %v6113_v1 = vpack.c.b16 %v6102_v34, %v6095_v0  ;;  %v6114_v4 = vpack.c.b16 %v6112_v12, %v6109_v61  ;;  %v6218_v16 = vsel %vm4703_vm10, %v12772_v48, %v6217_v7  ;;  %v6223_v27 = vsel %vm4699_vm8, %v12823_v14, %v12858_v13  ;;  %v7315_v0 = vld [vmem:[%s13302_s3 + $0x2] ss:$0 sm:$0xff] }
 0x60e   : > { %8423 = vmatprep.subr.bf16.mxu1 %v9149_v35  ;;  %v6219_v20 = vsel %vm4705_vm11, %v12918_v17, %v6218_v16  ;;  %v6224_v19 = vsel %vm4701_vm9, %v12827_v57, %v6223_v27  ;;  %v6214_v30 = vunpack.c.l.b16 %v5857_v55  ;;  %v6231_v48 = vsel %vm4701_vm9, %v12867_v45, %v12904_v51 }
 0x60f   : > { %8437 = vmatprep.mubr.bf16.mxu1 %v6113_v1  ;;  %v6220_v14 = vsel %vm4707_vm12, %v12924_v54, %v6219_v20  ;;  %v6225_v13 = vsel %vm4703_vm10, %v12834_v21, %v6224_v19  ;;  %v6232_v17 = vsel %vm4703_vm10, %v12880_v25, %v6231_v48  ;;  %v6236_v57 = vsel %vm4697_vm7, %v5961_v41, %v5960_v5  ;;  %v9162_v41 = vld [vmem:[%s13300_s1 + $0x230] sm:$0xff]  }
 0x610   : > { %v6221_v9 = vsel %vm4709_vm13, %v12829_v26, %v6220_v14  ;;  %v6226_v55 = vsel %vm4705_vm11, %v12926_v49, %v6225_v13  ;;  %v6233_v45 = vsel %vm4705_vm11, %v12883_v28, %v6232_v17  ;;  %v6237_v51 = vsel %vm4699_vm8, %v12922_v33, %v6236_v57  ;;  %v9151_v26 = vld [vmem:[%s13300_s1 + $0x198] sm:$0xff]  }
 0x611   : > { %8424 = vmatpush3.bf16.msra.mxu1 %v9149_v35  ;;  %v6227_v21 = vsel %vm4707_vm12, %v12928_v60, %v6226_v55  ;;  %v6234_v25 = vsel %vm4707_vm12, %v12936_v10, %v6233_v45  ;;  %v6238_v54 = vsel %vm4701_vm9, %v6214_v30, %v6237_v51  ;;  %v9152_v60 = vld [vmem:[%s13300_s1 + $0x1a0] sm:$0xff]   ;;  %v9153_v10 = vld [vmem:[%s13300_s1 + $0x1a8] sm:$0xff]   ;;  %v13906_v56 = vmov 0.0  }
 0x612   : > { %8425 = vmatprep.subr.bf16.mxu1 %v9150_v32  ;;  %v6228_v28 = vsel %vm4709_vm13, %v12878_v62, %v6227_v21  ;;  %v6235_v33 = vsel %vm4709_vm13, %v12947_v44, %v6234_v25  ;;  %v9154_v62 = vld [vmem:[%s13300_s1 + $0x1b0] sm:$0xff]   ;;  %v9155_v44 = vld [vmem:[%s13300_s1 + $0x1b8] sm:$0xff]  }
 0x613   : > { %v6239_v49 = vpack.c.b16 %v6228_v28, %v6221_v9  ;;  %v6240_v5 = vpack.c.b16 %v6238_v54, %v6235_v33 }
 0x615   : > { %8426 = vmatpush3.bf16.msra.mxu1 %v9150_v32 }
 0x616   : > { %8427 = vmatprep.subr.bf16.mxu1 %v9151_v26 }
 0x619   : > { %8428 = vmatpush3.bf16.msra.mxu1 %v9151_v26 }
 0x61a   : > { %8429 = vmatprep.subr.bf16.mxu1 %v9152_v60 }
 0x61d   : > { %8430 = vmatpush3.bf16.msra.mxu1 %v9152_v60 }
 0x61e   : > { %8431 = vmatprep.subr.bf16.mxu1 %v9153_v10 }
 0x621   : > { %8432 = vmatpush3.bf16.msra.mxu1 %v9153_v10 }
 0x622   : > { %8433 = vmatprep.subr.bf16.mxu1 %v9154_v62 }
 0x625   : > { %8434 = vmatpush3.bf16.msra.mxu1 %v9154_v62 }
 0x626   : > { %8435 = vmatprep.subr.bf16.mxu1 %v9155_v44 }
 0x629   : > { %8436 = vmatpush3.bf16.msra.mxu1 %v9155_v44 }
 0x62a   : > { %8441 = vmatprep.subr.bf16.mxu1 %v9156_v22 }
 0x62c   : > { %8438 = vmatmul.mubr.bf16.vlgmr.msra.gmra.mrb[140].mxu1 %v6114_v4 }
 0x62d   : > { %8442 = vmatpush3.bf16.msra.mxu1 %v9156_v22  ;;  %8457 = vmatprep.mubr.bf16.mxu1 %v6239_v49 }
 0x62e   : > { %8443 = vmatprep.subr.bf16.mxu1 %v9157_v29 }
 0x631   : > { %8444 = vmatpush3.bf16.msra.mxu1 %v9157_v29 }
 0x632   : > { %8445 = vmatprep.subr.bf16.mxu1 %v9158_v42 }
 0x635   : > { %8446 = vmatpush3.bf16.msra.mxu1 %v9158_v42 }
 0x636   : > { %8447 = vmatprep.subr.bf16.mxu1 %v9159_v59 }
 0x639   : > { %8448 = vmatpush3.bf16.msra.mxu1 %v9159_v59 }
 0x63a   : > { %8449 = vmatprep.subr.bf16.mxu1 %v9160_v18 }
 0x63d   : > { %8450 = vmatpush3.bf16.msra.mxu1 %v9160_v18 }
 0x63e   : > { %8451 = vmatprep.subr.bf16.mxu1 %v9161_v31 }
 0x641   : > { %8452 = vmatpush3.bf16.msra.mxu1 %v9161_v31 }
 0x642   : > { %8453 = vmatprep.subr.bf16.mxu1 %v9162_v41 }
 0x645   : > { %8454 = vmatpush3.bf16.msra.mxu1 %v9162_v41 }
 0x646   : > { %8455 = vmatprep.subr.bf16.mxu1 %v9163_v40 }
 0x649   : > { %8456 = vmatpush3.bf16.msra.mxu1 %v9163_v40 }
 0x64a   : > { %8461 = vmatprep.subr.bf16.mxu1 %v13906_v56 }
 0x64c   : > { %8458 = vmatmul.mubr.bf16.vlgmr.msra.gmra.mrb[140].mxu1 %v6240_v5 }
 0x64d   : > { %8477 = vmatprep.mubr.msk.bf16.mxu1 %vm9332_vm0, %v13906_v56  ;;  %8462 = vmatpush3.bf16.msra.mxu1 %v9164_v15 }
 0x64e   : > { %8463 = vmatprep.subr.bf16.mxu1 %v13906_v56 }
 0x651   : > { %8464 = vmatpush3.bf16.msra.mxu1 %v9165_v37 }
 0x652   : > { %8465 = vmatprep.subr.bf16.mxu1 %v13906_v56 }
 0x655   : > { %8466 = vmatpush3.bf16.msra.mxu1 %v9166_v47 }
 0x656   : > { %8467 = vmatprep.subr.bf16.mxu1 %v13906_v56 }
 0x659   : > { %8468 = vmatpush3.bf16.msra.mxu1 %v9167_v43 }
 0x65a   : > { %8469 = vmatprep.subr.bf16.mxu1 %v13906_v56 }
 0x65d   : > { %8470 = vmatpush3.bf16.msra.mxu1 %v9168_v36 }
 0x65e   : > { %8471 = vmatprep.subr.bf16.mxu1 %v13906_v56 }
 0x661   : > { %8472 = vmatpush3.bf16.msra.mxu1 %v9169_v63 }
 0x662   : > { %8473 = vmatprep.subr.bf16.mxu1 %v13906_v56 }
 0x665   : > { %8474 = vmatpush3.bf16.msra.mxu1 %v9170_v23 }
 0x666   : > { %8475 = vmatprep.subr.bf16.mxu1 %v13906_v56 }
 0x669   : > { %8476 = vmatpush3.bf16.msra.mxu1 %v9171_v6 }
 0x66a   : > { %8481 = vmatprep.subr.bf16.mxu1 %v13906_v56 }
 0x71f   : > { %v8459_v50 = vpop.f32.mrb[140].mxu1 }
 0x720   : > { %v6350_v2 = vmul.f32 %v8459_v50, %v7314_v8  ;;  %v6325_v38 = vpop.f32.mrb[141].mxu1 }
 0x721   : > { %v6348_v58 = vmul.f32 %v7314_v8, %v6325_v38  ;;  %v8460_v52 = vpop.f32.mrb[142].mxu1 }
 0x722   : > { %v6357_v35 = vadd.f32 %v7315_v0, %v6350_v2  ;;  %v6328_v53 = vpop.f32.mrb[143].mxu1 }
 0x723   : > { %v6355_v39 = vadd.f32 %v7315_v0, %v6348_v58  ;;  %v6349_v3 = vmul.f32 %v7314_v8, %v6328_v53 }
 0x724   : > { %v6360_v11 = vmax.f32 %v6357_v35, 0.0 }
 0x725   : > { %v6358_v46 = vmax.f32 %v6355_v39, 0.0  ;;  %v6356_v24 = vadd.f32 %v7315_v0, %v6349_v3 }
 0x726   : > { %v6366_v34 = vcombine.high %v6360_v11, %v6360_v11  ;;  %v6398_v61 = vsel %vm3431_vm6, %v6360_v11, -inf }
 0x727   : > { %v6399_v12 = vrot.slane %v6398_v61, 4  ;;  %v6364_v7 = vcombine.high %v6358_v46, %v6358_v46  ;;  %v6370_v1 = vsel %vm3431_vm6, %v6358_v46, -inf  ;;  %v6359_v4 = vmax.f32 %v6356_v24, 0.0 }
 0x728   : > { %v6405_v16 = vsel %vm3431_vm6, %v6366_v34, -inf  ;;  %v6371_v27 = vrot.slane %v6370_v1, 4 }
 0x729   : > { %v6400_v32 = vmax.f32 %v6398_v61, %v6399_v12  ;;  %v6406_v20 = vrot.slane %v6405_v16, 4  ;;  %v6377_v19 = vsel %vm3431_vm6, %v6364_v7, -inf  ;;  %v6365_v30 = vcombine.high %v6359_v4, %v6359_v4  ;;  %v9172_v12 = vld [vmem:[%s13300_s1 + $0x240] sm:$0xff]  }
 0x72a   : > { %v6372_v48 = vmax.f32 %v6370_v1, %v6371_v27  ;;  %v6378_v14 = vrot.slane %v6377_v19, 4  ;;  %v6384_v13 = vsel %vm3431_vm6, %v6359_v4, -inf  ;;  %v9174_v27 = vld [vmem:[%s13300_s1 + $0x250] sm:$0xff]  }
 0x72b   : > { %v6401_v17 = vrot.slane %v6400_v32, 2  ;;  %v6407_v57 = vmax.f32 %v6405_v16, %v6406_v20  ;;  %v6385_v9 = vrot.slane %v6384_v13, 4  ;;  %v6391_v55 = vsel %vm3431_vm6, %v6365_v30, -inf  ;;  %v9173_v16 = vld [vmem:[%s13300_s1 + $0x248] sm:$0xff]   ;;  %v9176_v20 = vld [vmem:[%s13300_s1 + $0x260] sm:$0xff]   ;;  %v9178_v30 = vld [vmem:[%s13300_s1 + $0x270] sm:$0xff]  }
 0x72c   : > { %v6373_v45 = vrot.slane %v6372_v48, 2  ;;  %v6379_v51 = vmax.f32 %v6377_v19, %v6378_v14  ;;  %v6392_v21 = vrot.slane %v6391_v55, 4  ;;  %v9177_v19 = vld [vmem:[%s13300_s1 + $0x268] sm:$0xff]   ;;  %v9180_v14 = vld [vmem:[%s13300_s1 + $0x2c0] sm:$0xff]  }
 0x72d   : > { %v6402_v25 = vmax.f32 %v6400_v32, %v6401_v17  ;;  %v6408_v54 = vrot.slane %v6407_v57, 2  ;;  %v6386_v26 = vmax.f32 %v6384_v13, %v6385_v9  ;;  %v9175_v32 = vld [vmem:[%s13300_s1 + $0x258] sm:$0xff]   ;;  %v9181_v17 = vld [vmem:[%s13300_s1 + $0x2c8] sm:$0xff]  }
 0x72e   : > { %v6374_v28 = vmax.f32 %v6372_v48, %v6373_v45  ;;  %v6380_v33 = vrot.slane %v6379_v51, 2  ;;  %v6393_v49 = vmax.f32 %v6391_v55, %v6392_v21  ;;  %v9179_v48 = vld [vmem:[%s13300_s1 + $0x278] sm:$0xff]   ;;  %v9184_v55 = vld [vmem:[%s13300_s1 + $0x2e0] sm:$0xff]   ;;  %v9185_v45 = vld [vmem:[%s13300_s1 + $0x2e8] sm:$0xff]  }
 0x72f   : > { %v6403_v5 = vrot.slane %v6402_v25, 1  ;;  %v6409_v60 = vmax.f32 %v6407_v57, %v6408_v54  ;;  %v6387_v10 = vrot.slane %v6386_v26, 2  ;;  %v9182_v57 = vld [vmem:[%s13300_s1 + $0x2d0] sm:$0xff]   ;;  %v9183_v9 = vld [vmem:[%s13300_s1 + $0x2d8] sm:$0xff]  }
 0x730   : > { %v6375_v62 = vrot.slane %v6374_v28, 1  ;;  %v6381_v44 = vmax.f32 %v6379_v51, %v6380_v33  ;;  %v6394_v22 = vrot.slane %v6393_v49, 2  ;;  %v9186_v51 = vld [vmem:[%s13300_s1 + $0x2f0] sm:$0xff]   ;;  %v9187_v21 = vld [vmem:[%s13300_s1 + $0x2f8] sm:$0xff]  }
 0x731   : > { %v6410_v29 = vrot.slane %v6409_v60, 1  ;;  %v6388_v42 = vmax.f32 %v6386_v26, %v6387_v10  ;;  %v6404_v41 = vmax.f32 %v6402_v25, %v6403_v5  ;;  %v9188_v25 = vld [vmem:[#allocation2] sm:$0xff]   ;;  %v9189_v26 = vld [vmem:[#allocation2 + $0x8] sm:$0xff]   ;;  %v9191_v33 = vld [vmem:[#allocation2 + $0x18] sm:$0xff]  }
 0x732   : > { %v6376_v59 = vmax.f32 %v6374_v28, %v6375_v62  ;;  %v6382_v18 = vrot.slane %v6381_v44, 1  ;;  %v6395_v31 = vmax.f32 %v6393_v49, %v6394_v22  ;;  %v9190_v28 = vld [vmem:[#allocation2 + $0x10] sm:$0xff]   ;;  %v9192_v49 = vld [vmem:[#allocation2 + $0x20] sm:$0xff]   ;;  %v9193_v5 = vld [vmem:[#allocation2 + $0x28] sm:$0xff]  }
 0x733   : > { %v6389_v40 = vrot.slane %v6388_v42, 1  ;;  %v6411_v15 = vmax.f32 %v6409_v60, %v6410_v29  ;;  %v6416_v6 = vpack.c.bf16 %v6404_v41, %v6404_v41  ;;  %v9194_v60 = vld [vmem:[#allocation2 + $0x30] sm:$0xff]   ;;  %v9195_v10 = vld [vmem:[#allocation2 + $0x38] sm:$0xff]   ;;  %v7388_v62 = vld [vmem:[%s13301_s2 + $0x3] ss:$0 sm:$0xff] }
 0x734   : > { %v6383_v37 = vmax.f32 %v6381_v44, %v6382_v18  ;;  %v6412_v47 = vpack.c.bf16 %v6376_v59, %v6376_v59  ;;  %v6396_v43 = vrot.slane %v6395_v31, 1  ;;  %v7389_v22 = vld [vmem:[%s13302_s3 + $0x3] ss:$0 sm:$0xff] }
 0x735   : > { %v6390_v36 = vmax.f32 %v6388_v42, %v6389_v40  ;;  %v6417_v50 = vpack.c.bf16 %v6411_v15, %v6411_v15  ;;  %v6474_v53 = vunpack.c.l.b16 %v6416_v6 }
 0x736   : > { %v6413_v63 = vpack.c.bf16 %v6383_v37, %v6383_v37  ;;  %v6397_v23 = vmax.f32 %v6395_v31, %v6396_v43  ;;  %v6569_v2 = vunpack.c.l.b16 %v6412_v47 }
 0x737   : > { %v6414_v8 = vpack.c.bf16 %v6390_v36, %v6390_v36  ;;  %v6664_v24 = vunpack.c.l.b16 %v6417_v50 }
 0x738   : > { %v6471_v0 = vunpack.c.l.b16 %v6413_v63  ;;  %v6415_v38 = vpack.c.bf16 %v6397_v23, %v6397_v23  ;;  %v6797_v23 = vld [vmem:[%s13304_s5] sm:$0x1] }
 0x739   : > { %v6472_v58 = vunpack.c.l.b16 %v6414_v8 }
 0x73a   : > { %v6473_v52 = vunpack.c.l.b16 %v6415_v38  ;;  %v6570_v35 = vsel %vm4697_vm7, %v6471_v0, %v6569_v2 }
 0x73b   : > { %v6475_v39 = vsel %vm4697_vm7, %v6472_v58, %v6471_v0  ;;  %v6571_v3 = vsel %vm4699_vm8, %v6472_v58, %v6570_v35 }
 0x73c   : > { %v6476_v11 = vsel %vm4699_vm8, %v6473_v52, %v6475_v39  ;;  %v6572_v46 = vsel %vm4701_vm9, %v6473_v52, %v6571_v3  ;;  %v6665_v34 = vsel %vm4697_vm7, %v6473_v52, %v6472_v58 }
 0x73d   : > { %v6477_v61 = vsel %vm4701_vm9, %v6474_v53, %v6476_v11  ;;  %v6666_v7 = vsel %vm4699_vm8, %v6474_v53, %v6665_v34  ;;  %v6573_v13 = vpack.c.b16 %v6572_v46, %v6572_v46 }
 0x73e   : > { %v6478_v1 = vpack.c.b16 %v6477_v61, %v6477_v61  ;;  %v6667_v4 = vsel %vm4701_vm9, %v6664_v24, %v6666_v7 }
 0x73f   : > { %v6668_v54 = vpack.c.b16 %v6667_v4, %v6667_v4 }
 0x740   : > { %8478 = vmatmul.mubr.bf16.vlgmr.msra.gmra.mrb[144].mxu1 %v6478_v1 }
 0x741   : > { %8482 = vmatpush3.bf16.msra.mxu1 %v9172_v12  ;;  %8497 = vmatprep.mubr.msk.bf16.mxu1 %vm9332_vm0, %v13906_v56 }
 0x742   : > { %8483 = vmatprep.subr.bf16.mxu1 %v13906_v56 }
 0x745   : > { %8484 = vmatpush3.bf16.msra.mxu1 %v9173_v16 }
 0x746   : > { %8485 = vmatprep.subr.bf16.mxu1 %v13906_v56 }
 0x749   : > { %8486 = vmatpush3.bf16.msra.mxu1 %v9174_v27 }
 0x74a   : > { %8487 = vmatprep.subr.bf16.mxu1 %v13906_v56 }
 0x74d   : > { %8488 = vmatpush3.bf16.msra.mxu1 %v9175_v32 }
 0x74e   : > { %8489 = vmatprep.subr.bf16.mxu1 %v13906_v56 }
 0x751   : > { %8490 = vmatpush3.bf16.msra.mxu1 %v9176_v20 }
 0x752   : > { %8491 = vmatprep.subr.bf16.mxu1 %v13906_v56 }
 0x755   : > { %8492 = vmatpush3.bf16.msra.mxu1 %v9177_v19 }
 0x756   : > { %8493 = vmatprep.subr.bf16.mxu1 %v13906_v56 }
 0x759   : > { %8494 = vmatpush3.bf16.msra.mxu1 %v9178_v30 }
 0x75a   : > { %8495 = vmatprep.subr.bf16.mxu1 %v13906_v56 }
 0x75d   : > { %8496 = vmatpush3.bf16.msra.mxu1 %v9179_v48 }
 0x75e   : > { %8501 = vmatprep.subr.bf16.mxu1 %v13906_v56 }
 0x760   : > { %8498 = vmatmul.mubr.bf16.vlgmr.msra.gmra.mrb[144].mxu1 %v6573_v13 }
 0x761   : > { %8502 = vmatpush3.bf16.msra.mxu1 %v9180_v14  ;;  %8517 = vmatprep.mubr.msk.bf16.mxu1 %vm9332_vm0, %v13906_v56 }
 0x762   : > { %8503 = vmatprep.subr.bf16.mxu1 %v13906_v56 }
 0x765   : > { %8504 = vmatpush3.bf16.msra.mxu1 %v9181_v17 }
 0x766   : > { %8505 = vmatprep.subr.bf16.mxu1 %v13906_v56 }
 0x769   : > { %8506 = vmatpush3.bf16.msra.mxu1 %v9182_v57 }
 0x76a   : > { %8507 = vmatprep.subr.bf16.mxu1 %v13906_v56 }
 0x76d   : > { %8508 = vmatpush3.bf16.msra.mxu1 %v9183_v9 }
 0x76e   : > { %8509 = vmatprep.subr.bf16.mxu1 %v13906_v56 }
 0x771   : > { %8510 = vmatpush3.bf16.msra.mxu1 %v9184_v55 }
 0x772   : > { %8511 = vmatprep.subr.bf16.mxu1 %v13906_v56 }
 0x775   : > { %8512 = vmatpush3.bf16.msra.mxu1 %v9185_v45 }
 0x776   : > { %8513 = vmatprep.subr.bf16.mxu1 %v13906_v56 }
 0x779   : > { %8514 = vmatpush3.bf16.msra.mxu1 %v9186_v51 }
 0x77a   : > { %8515 = vmatprep.subr.bf16.mxu1 %v13906_v56 }
 0x77d   : > { %8516 = vmatpush3.bf16.msra.mxu1 %v9187_v21 }
 0x77e   : > { %8521 = vmatprep.subr.bf16.mxu1 %v13906_v56 }
 0x780   : > { %8518 = vmatmul.mubr.bf16.vlgmr.msra.gmra.mrb[144].mxu1 %v6668_v54 }
 0x781   : > { %8522 = vmatpush3.bf16.msra.mxu1 %v9188_v25  ;;  %8537 = vmatprep.mubr.msk.bf16.mxu1 %vm9332_vm0, %v13906_v56 }
 0x782   : > { %8523 = vmatprep.subr.bf16.mxu1 %v13906_v56 }
 0x785   : > { %8524 = vmatpush3.bf16.msra.mxu1 %v9189_v26 }
 0x786   : > { %8525 = vmatprep.subr.bf16.mxu1 %v13906_v56 }
 0x789   : > { %8526 = vmatpush3.bf16.msra.mxu1 %v9190_v28 }
 0x78a   : > { %8527 = vmatprep.subr.bf16.mxu1 %v13906_v56 }
 0x78d   : > { %8528 = vmatpush3.bf16.msra.mxu1 %v9191_v33 }
 0x78e   : > { %8529 = vmatprep.subr.bf16.mxu1 %v13906_v56 }
 0x791   : > { %8530 = vmatpush3.bf16.msra.mxu1 %v9192_v49 }
 0x792   : > { %8531 = vmatprep.subr.bf16.mxu1 %v13906_v56 }
 0x795   : > { %8532 = vmatpush3.bf16.msra.mxu1 %v9193_v5 }
 0x796   : > { %8533 = vmatprep.subr.bf16.mxu1 %v13906_v56 }
 0x799   : > { %8534 = vmatpush3.bf16.msra.mxu1 %v9194_v60 }
 0x79a   : > { %8535 = vmatprep.subr.bf16.mxu1 %v13906_v56 }
 0x79d   : > { %8536 = vmatpush3.bf16.msra.mxu1 %v9195_v10 }
 0x853   : > { %v6752_v44 = vpop.f32.mrb[144].mxu1 }
 0x854   : > { %v6765_v29 = vmul.f32 %v7388_v62, %v6752_v44  ;;  %v8519_v42 = vpop.f32.mrb[145].mxu1 }
 0x855   : > { %v6755_v59 = vpop.f32.mrb[146].mxu1 }
 0x856   : > { %v6770_v18 = vadd.f32 %v7389_v22, %v6765_v29  ;;  %v8520_v31 = vpop.f32.mrb[147].mxu1 }
 0x858   : > { %v6771_v41 = vmax.f32 %v6770_v18, 0.0 }
 0x85a   : > { %v6772_v56 = vsel %vm3431_vm6, %v6771_v41, -inf }
 0x85b   : > { %v6773_v40 = vrot.slane %v6772_v56, 4 }
 0x85d   : > { %v6774_v15 = vmax.f32 %v6772_v56, %v6773_v40 }
 0x85f   : > { %v6775_v37 = vrot.slane %v6774_v15, 2 }
 0x861   : > { %v6776_v47 = vmax.f32 %v6774_v15, %v6775_v37 }
 0x863   : > { %v6777_v43 = vrot.slane %v6776_v47, 1 }
 0x865   : > { %v6778_v36 = vmax.f32 %v6776_v47, %v6777_v43 }
 0x867   : > { %v6780_v63 = vpack.c.bf16 %v6778_v36, %v6778_v36 }
 0x869   : > { %8538 = vmatmul.mubr.bf16.vlgmr.msra.gmra.mrb[148].mxu1 %v6780_v63 }
 0x93c   : > { %v6880_v6 = vpop.f32.mrb[148].mxu1 }
 0x93d   : > { %v6881_v8 = vadd.f32 %v6880_v6, %v6797_v23  ;;  %v8539_v50 = vpop.f32.mrb[149].mxu1 }
 0x93e   : > { %v6883_v0 = vpop.f32.mrb[150].mxu1 }
 0x93f   : > { %6886 = vst [vmem:[%s258_s18] sm:$0x1] %v6881_v8  ;;  %v8540_v2 = vpop.f32.mrb[151].mxu1 }
 0x940   : > { %9273 = shalt.err (!%p9270_p7)
}
 0x941   : > { %s9274_s14 = scalar_lea.hbm %s13257_s28, 16  ;;  %s9278_s15 = scalar_lea.hbm %s13305_s6, 32 }
 0x942   : > { %p9275_p8 = scmp.ne.s32.totalorder %s13257_s28, %s9274_s14  ;;  %p9279_p1 = scmp.lt.u32.totalorder %s13257_s28, %s13305_s6 }
 0x943   : > { %p9280_p0 = scmp.lt.u32.totalorder %s9278_s15, %s9274_s14  ;;  %p9282_p6 = scmp.lt.u32.totalorder %s9274_s14, %s13257_s28 }
 0x944   : > { %p9276_p11 = pnand %p9275_p8, %p13907_p9 }
 0x945   : > { %p9281_p5 = por %p9280_p0, %p9279_p1 }
 0x946   : > { %p9277_p13 = pneg %p9276_p11 }
 0x947   : > { %p9283_p10 = por %p9282_p6, %p9281_p5 }
 0x949   : > { %p9284_p12 = pnand %p9283_p10, %p9277_p13 }
 0x94b   : > { %9287 = shalt.err (!%p9284_p12)
}
 0x94c   : > { %9029 = dma.vmem_to_hbm [thread:$0]  (%p13907_p9), %s13259_s19, 16, %s13257_s28, %s6888_s29  }
 0x94d PF: > { %p9041_p2 = scmp.ge.s32.totalorder %s9326_s24, 2  ;;  %s6912_s18 = sand.u32 1, %s9314_s21  }
 0x94e   : > { %p13908_p3 = scmp.ne.s32.totalorder %s13490_s8, 0  ;;  %s6913_s20 = scalar_lea.sflag [#allocation4], %s6912_s18 }
 0x950   : > { %p9036_p4 = pnand %p9041_p2, %p13908_p3 }
 0x952   : > { %9309 = dma.done.wait (!%p9036_p4), %s6913_s20, 16  }
 0x953   : > { %9311 = vsyncadd (!%p9036_p4), %s6913_s20, 4294967280  ;;  %p17_p7 = scmp.ge.s32.totalorder %s9394_s27, 4   ;;  %s13909_s21 = smov %s9318_s22 }
 0x954   : > { %s13910_s22 = smov %s9322_s23  ;;  %s13911_s23 = smov %s9405_s30 }
 0x955   : > { %s13912_s24 = smov %s9394_s27  ;;  %19 = sbr.rel (!%p17_p7) target bundleno = 4 (0x4), region = 87 }
 0x95c   :  { %6917 = vsyncpa [#allocation3], 1 }
 0x95d   :  { %6919 = vsyncpa [#allocation3 + $0x1], 1 }
 0x95e   :  { %6920 = vsyncpa [#allocation4], 1 }
 0x95f   :  { %6922 = vsyncpa [#allocation4 + $0x1], 1 }

</bundles_post_ra>
